<compile_context>
chip_gen: v5e
topology: v5e:2x2
jax: 0.10.0
libtpu: 0.0.40
codegen_flags: <defaults>
</compile_context>

<pallas_src>
import functools

import jax
import jax.numpy as jnp
from jax.experimental import pallas as pl
from jax.experimental.pallas import tpu as pltpu

CPAD = 128                       # channel padding target (TPU lane width)
TM = 1024                        # row tile for the pointwise (1x1) kernels
ACT_DTYPE = jnp.bfloat16         # inter-kernel activation dtype (HBM traffic)
VMEM_LIMIT = 32 * 1024 * 1024    # safe on v5e/v6e/v7x; actual usage is ~2 MiB


# ---------------------------------------------------------------------------
# In-kernel helpers
# ---------------------------------------------------------------------------
def _silu(y):
    # y * sigmoid(y); the reciprocal goes to the EUP slot (free-ish on VPU).
    return y * pl.reciprocal(1.0 + jnp.exp(-y), approx=True)


# ---------------------------------------------------------------------------
# Pallas kernels
# ---------------------------------------------------------------------------
def _cv12_kernel(x_ref, w1_ref, s1_ref, b1_ref, w2_ref, s2_ref, b2_ref,
                 o1_ref, o2_ref):
    # Fused cv1 & cv2: two 1x1 convs + folded BN + SiLU sharing one x tile.
    x = x_ref[...]
    a1 = jnp.dot(x, w1_ref[...], preferred_element_type=jnp.float32)
    o1_ref[...] = _silu(a1 * s1_ref[...] + b1_ref[...]).astype(o1_ref.dtype)
    a2 = jnp.dot(x, w2_ref[...], preferred_element_type=jnp.float32)
    o2_ref[...] = _silu(a2 * s2_ref[...] + b2_ref[...]).astype(o2_ref.dtype)


def _cv3_kernel(a_ref, c_ref, w_ref, s_ref, b_ref, o_ref):
    # cv3 on the (never-materialized) channel concat of the two CSP branches.
    ka = a_ref.shape[1]
    kc = c_ref.shape[1]
    acc = jnp.dot(a_ref[...].astype(jnp.float32), w_ref[0:ka, :],
                  preferred_element_type=jnp.float32)
    acc = acc + jnp.dot(c_ref[...].astype(jnp.float32), w_ref[ka:ka + kc, :],
                        preferred_element_type=jnp.float32)
    o_ref[...] = _silu(acc * s_ref[...] + b_ref[...]).astype(o_ref.dtype)


def _bottleneck_kernel(y_ref, w1_ref, s1_ref, b1_ref, w2_ref, s2_ref, b2_ref,
                       o_ref, tpad_ref, acc_ref, *, add):
    # Fused Bottleneck: t = SiLU(BN(y @ W1)) computed into a zero-padded VMEM
    # scratch (with a 1-row halo), then the 3x3 conv is accumulated from the
    # scratch, BN + SiLU applied, and the residual added from the resident y.
    th = o_ref.shape[1]
    wdim = o_ref.shape[2]
    cch = o_ref.shape[3]
    hdim = y_ref.shape[1]
    c2off = tpad_ref.shape[1] - wdim       # aligned start of the shifted copy
    h0 = pl.multiple_of(pl.program_id(1) * th, th)

    w1 = w1_ref[...]
    s1 = s1_ref[...]
    b1 = b1_ref[...]

    def pw1(rows):                          # (r, wdim, C) bf16 -> (r, wdim, C) f32
        r = rows.shape[0]
        z = jnp.dot(rows.astype(jnp.float32).reshape(r * wdim, cch), w1,
                    preferred_element_type=jnp.float32)
        return _silu(z * s1 + b1).reshape(r, wdim, cch)

    def put(row, t_rows):                   # store both sublane-aligned copies
        r = t_rows.shape[0]
        tpad_ref[row:row + r, 0:wdim, :] = t_rows
        tpad_ref[row:row + r, c2off:c2off + wdim, :] = t_rows

    # Zero the scratch so halo rows / gap columns read as zero padding.
    tpad_ref[...] = jnp.zeros_like(tpad_ref)

    y_main = y_ref[0, pl.ds(h0, th), :, :]          # reused for the residual
    put(1, pw1(y_main))

    @pl.when(h0 > 0)
    def _():                                         # top halo row
        put(0, pw1(y_ref[0, pl.ds(h0 - 1, 1), :, :]))

    @pl.when(h0 + th < hdim)
    def _():                                         # bottom halo row
        put(th + 1, pw1(y_ref[0, pl.ds(h0 + th, 1), :, :]))

    # 9-tap accumulation of the 3x3 conv from the padded VMEM scratch.
    col0 = (c2off - 1, 0, 1)                # window start column for dj=0,1,2
    acc_ref[...] = jnp.zeros_like(acc_ref)
    for tap in range(9):
        di, dj = divmod(tap, 3)
        win = tpad_ref[di:di + th, col0[dj]:col0[dj] + wdim, :]
        acc_ref[...] += jnp.dot(win.reshape(th * wdim, cch),
                                w2_ref[tap * cch:(tap + 1) * cch, :],
                                preferred_element_type=jnp.float32)

    out = _silu(acc_ref[...] * s2_ref[...] + b2_ref[...])
    if add:
        out = out + y_main.astype(jnp.float32).reshape(th * wdim, cch)
    o_ref[0] = out.reshape(th, wdim, cch).astype(o_ref.dtype)


# ---------------------------------------------------------------------------
# pallas_call wrappers
# ---------------------------------------------------------------------------
def cv12_conv(x, p1, p2, tm=TM):
    """Fused cv1 & cv2: (SiLU(BN(x@W1)), SiLU(BN(x@W2))) as bf16, x:(M,K)."""
    M, K = x.shape
    w1, s1, b1 = p1
    w2, s2, b2 = p2
    C = w1.shape[1]
    tm = min(tm, M)
    row = lambda shp: pl.BlockSpec(shp, lambda i: (i, 0))
    rep = lambda shp: pl.BlockSpec(shp, lambda i: (0, 0))
    return pl.pallas_call(
        _cv12_kernel,
        out_shape=(jax.ShapeDtypeStruct((M, C), ACT_DTYPE),
                   jax.ShapeDtypeStruct((M, C), ACT_DTYPE)),
        grid=(pl.cdiv(M, tm),),
        in_specs=[row((tm, K)),
                  rep((K, C)), rep((1, C)), rep((1, C)),
                  rep((K, C)), rep((1, C)), rep((1, C))],
        out_specs=(row((tm, C)), row((tm, C))),
        compiler_params=pltpu.CompilerParams(
            dimension_semantics=("parallel",),
            vmem_limit_bytes=VMEM_LIMIT),
    )(x, w1, s1, b1, w2, s2, b2)


def cv3_conv(a, c, w, scale, bias, tm=TM):
    """SiLU(BN(concat([a, c], -1) @ w)) without materializing the concat."""
    M, Ka = a.shape
    Kc = c.shape[1]
    Cout = w.shape[1]
    tm = min(tm, M)
    row = lambda shp: pl.BlockSpec(shp, lambda i: (i, 0))
    rep = lambda shp: pl.BlockSpec(shp, lambda i: (0, 0))
    return pl.pallas_call(
        _cv3_kernel,
        out_shape=jax.ShapeDtypeStruct((M, Cout), jnp.float32),
        grid=(pl.cdiv(M, tm),),
        in_specs=[row((tm, Ka)), row((tm, Kc)),
                  rep((Ka + Kc, Cout)), rep((1, Cout)), rep((1, Cout))],
        out_specs=row((tm, Cout)),
        compiler_params=pltpu.CompilerParams(
            dimension_semantics=("parallel",),
            vmem_limit_bytes=VMEM_LIMIT),
    )(a, c, w, scale, bias)


def bottleneck_call(y, w1, s1, b1, w2, s2, b2, *, add, th):
    """Fused Bottleneck: SiLU(BN(conv3x3(SiLU(BN(y@W1))))) [+ y]. y:(N,H,W,C)."""
    N, H, W, C = y.shape
    c2off = ((W + 1 + 7) // 8) * 8          # sublane-aligned shifted-copy start
    sw = c2off + W
    kern = functools.partial(_bottleneck_kernel, add=add)
    # TODO(synk): for very large feature maps on v7x, halo-tile y via manual
    # DMA (memory_space=pl.ANY) instead of keeping the full image resident.
    return pl.pallas_call(
        kern,
        out_shape=jax.ShapeDtypeStruct((N, H, W, C), y.dtype),
        grid=(N, H // th),
        in_specs=[
            pl.BlockSpec((1, H, W, C), lambda b, h: (b, 0, 0, 0)),
            pl.BlockSpec((C, C), lambda b, h: (0, 0)),
            pl.BlockSpec((1, C), lambda b, h: (0, 0)),
            pl.BlockSpec((1, C), lambda b, h: (0, 0)),
            pl.BlockSpec((9 * C, C), lambda b, h: (0, 0)),
            pl.BlockSpec((1, C), lambda b, h: (0, 0)),
            pl.BlockSpec((1, C), lambda b, h: (0, 0)),
        ],
        out_specs=pl.BlockSpec((1, th, W, C), lambda b, h: (b, h, 0, 0)),
        scratch_shapes=[pltpu.VMEM((th + 2, sw, C), jnp.float32),
                        pltpu.VMEM((th * W, C), jnp.float32)],
        compiler_params=pltpu.CompilerParams(
            dimension_semantics=("parallel", "arbitrary"),
            vmem_limit_bytes=VMEM_LIMIT),
    )(y, w1, s1, b1, w2, s2, b2)


def _pick_th(H, W):
    """Largest divisor of H whose slab keeps the scratch modest (>=256 rows/tap)."""
    best = 1
    for cand in range(1, H + 1):
        if H % cand == 0 and cand * W <= 4096:
            best = cand
    return best


# ---------------------------------------------------------------------------
# C3 forward (matches: cv3(cat(m(cv1(x)), cv2(x), dim=1)))
# ---------------------------------------------------------------------------
def c3_forward(x_nchw, params):
    N, C1, H, W = x_nchw.shape
    c2 = params["c2"]
    kin = params["cv1"][0].shape[0]

    # TODO(synk): fold this NCHW->NHWC transpose + channel pad into the fused
    # cv1/cv2 kernel (and the final slice/transpose into cv3) to drop the
    # boundary XLA relayout passes; they act on the small unpadded tensors.
    x = jnp.transpose(x_nchw, (0, 2, 3, 1)).reshape(N * H * W, C1)
    if kin != C1:
        x = jnp.pad(x, ((0, 0), (0, kin - C1)))

    y1, y2 = cv12_conv(x, params["cv1"], params["cv2"])   # bf16 (M, CPAD) each

    y = y1.reshape(N, H, W, CPAD)
    th = _pick_th(H, W)
    for bp in params["m"]:                                 # fused Bottlenecks
        y = bottleneck_call(y, *bp["cv1"], *bp["cv2"], add=bp["add"], th=th)

    out = cv3_conv(y.reshape(N * H * W, CPAD), y2, *params["cv3"])  # f32
    out = out[:, :c2].reshape(N, H, W, c2)
    return jnp.transpose(out, (0, 3, 1, 2))                # NHWC -> NCHW


# ---------------------------------------------------------------------------
# Deterministic parameter construction (conv weights + BN folded, zero-padded
# to lane-dense widths; padded lanes stay exactly zero through the whole net).
# Note: CPAD=128 is sized for realistic YOLO channel widths; at tiny demo
# channel counts it over-pads but keeps every store lane-dense.
# ---------------------------------------------------------------------------
def _bn_fold(key, cout, eps=1e-5):
    kg, kb, km, kv = jax.random.split(key, 4)
    gamma = 1.0 + 0.1 * jax.random.normal(kg, (cout,), jnp.float32)
    beta = 0.1 * jax.random.normal(kb, (cout,), jnp.float32)
    mean = 0.1 * jax.random.normal(km, (cout,), jnp.float32)
    var = 1.0 + 0.5 * jax.random.uniform(kv, (cout,), jnp.float32)
    scale = gamma / jnp.sqrt(var + eps)
    bias = beta - mean * scale
    return scale, bias


def _pad_sb(scale, bias, width):
    cout = scale.shape[0]
    s = jnp.zeros((1, width), jnp.float32).at[0, :cout].set(scale)
    b = jnp.zeros((1, width), jnp.float32).at[0, :cout].set(bias)
    return s, b


def make_pw_params(key, cin, cout, in_width, in_offsets=(0,), out_width=CPAD):
    kw, kbn = jax.random.split(key)
    w_dense = 0.1 * jax.random.normal(kw, (len(in_offsets) * cin, cout),
                                      jnp.float32)
    w = jnp.zeros((in_width, out_width), jnp.float32)
    for i, off in enumerate(in_offsets):
        w = w.at[off:off + cin, :cout].set(w_dense[i * cin:(i + 1) * cin])
    scale, bias = _bn_fold(kbn, cout)
    s, b = _pad_sb(scale, bias, out_width)
    return w, s, b


def make_conv3x3_params(key, cin, cout, in_width=CPAD, out_width=CPAD):
    kw, kbn = jax.random.split(key)
    w_dense = 0.1 * jax.random.normal(kw, (9, cin, cout), jnp.float32)
    w = jnp.zeros((9 * in_width, out_width), jnp.float32)
    for t in range(9):
        w = w.at[t * in_width:t * in_width + cin, :cout].set(w_dense[t])
    scale, bias = _bn_fold(kbn, cout)
    s, b = _pad_sb(scale, bias, out_width)
    return w, s, b


def make_c3_params(key, c1, c2, n=1, shortcut=True, e=0.5):
    c_ = int(c2 * e)
    kin = max(8, ((c1 + 7) // 8) * 8)
    keys = jax.random.split(key, 3 + 2 * n)
    params = {
        "c2": c2,
        "cv1": make_pw_params(keys[0], c1, c_, in_width=kin),
        "cv2": make_pw_params(keys[1], c1, c_, in_width=kin),
        "cv3": make_pw_params(keys[2], c_, c2, in_width=2 * CPAD,
                              in_offsets=(0, CPAD)),
        "m": [],
    }
    for i in range(n):
        params["m"].append({
            "cv1": make_pw_params(keys[3 + 2 * i], c_, c_, in_width=CPAD),
            "cv2": make_conv3x3_params(keys[4 + 2 * i], c_, c_),
            "add": bool(shortcut),      # inside C3's Bottleneck, c_in == c_out
        })
    return params


if __name__ == "__main__":
    N, c1, c2, H, W = 2, 4, 16, 16, 16     # small shapes; C3(c1=4, c2=16, n=1)

    key = jax.random.PRNGKey(0)
    kp, kx = jax.random.split(key)
    params = make_c3_params(kp, c1, c2, n=1, shortcut=True)
    x = jax.random.normal(kx, (N, c1, H, W), jnp.float32)   # NCHW like torch

    fwd = jax.jit(functools.partial(c3_forward, params=params))
    out = fwd(x)
    jax.block_until_ready(out)

    assert out.shape == (N, c2, H, W), out.shape
    assert bool(jnp.all(jnp.isfinite(out)))
    print("KERNEL_OK")
</pallas_src>

<mosaic_0001>
module attributes {stable_mosaic.version = 11 : i64} {
  func.func @_bottleneck_kernel(%arg0: i32, %arg1: i32, %arg2: memref<1x16x16x128xbf16, #tpu.memory_space<vmem>>, %arg3: memref<128x128xf32, #tpu.memory_space<vmem>>, %arg4: memref<1x128xf32, #tpu.memory_space<vmem>>, %arg5: memref<1x128xf32, #tpu.memory_space<vmem>>, %arg6: memref<1152x128xf32, #tpu.memory_space<vmem>>, %arg7: memref<1x128xf32, #tpu.memory_space<vmem>>, %arg8: memref<1x128xf32, #tpu.memory_space<vmem>>, %arg9: memref<1x16x16x128xbf16, #tpu.memory_space<vmem>>, %arg10: memref<18x40x128xf32, #tpu.memory_space<vmem>>, %arg11: memref<256x128xf32, #tpu.memory_space<vmem>>) attributes {dimension_semantics = [#tpu.dimension_semantics<parallel>, #tpu.dimension_semantics<arbitrary>], iteration_bounds = array<i64: 2, 1>, scalar_prefetch = 0 : i64, scratch_operands = 2 : i64, tpu.core_type = #tpu.core_type<tc>, window_params = [{transform_indices = @transform_0, window_bounds = array<i64: 1, 16, 16, 128>}, {pipeline_mode = #tpu.pipeline_mode<synchronous>, transform_indices = @transform_1, window_bounds = array<i64: 128, 128>}, {pipeline_mode = #tpu.pipeline_mode<synchronous>, transform_indices = @transform_2, window_bounds = array<i64: 1, 128>}, {pipeline_mode = #tpu.pipeline_mode<synchronous>, transform_indices = @transform_3, window_bounds = array<i64: 1, 128>}, {pipeline_mode = #tpu.pipeline_mode<synchronous>, transform_indices = @transform_4, window_bounds = array<i64: 1152, 128>}, {pipeline_mode = #tpu.pipeline_mode<synchronous>, transform_indices = @transform_5, window_bounds = array<i64: 1, 128>}, {pipeline_mode = #tpu.pipeline_mode<synchronous>, transform_indices = @transform_6, window_bounds = array<i64: 1, 128>}, {transform_indices = @transform_7, window_bounds = array<i64: 1, 16, 16, 128>}]} {
    %c16_i32 = arith.constant 16 : i32
    %0 = arith.muli %arg1, %c16_i32 : i32
    %1 = tpu.assume_multiple %0, 16 : i32
    %c0 = arith.constant 0 : index
    %c0_0 = arith.constant 0 : index
    %2 = vector.load %arg3[%c0, %c0_0] : memref<128x128xf32, #tpu.memory_space<vmem>>, vector<128x128xf32>
    %c0_1 = arith.constant 0 : index
    %c0_2 = arith.constant 0 : index
    %3 = vector.load %arg4[%c0_1, %c0_2] : memref<1x128xf32, #tpu.memory_space<vmem>>, vector<1x128xf32>
    %c0_3 = arith.constant 0 : index
    %c0_4 = arith.constant 0 : index
    %4 = vector.load %arg5[%c0_3, %c0_4] : memref<1x128xf32, #tpu.memory_space<vmem>>, vector<1x128xf32>
    %cst = arith.constant 0.000000e+00 : f32
    %5 = vector.broadcast %cst : f32 to vector<18x40x128xf32>
    %c0_5 = arith.constant 0 : index
    %c0_6 = arith.constant 0 : index
    %c0_7 = arith.constant 0 : index
    %6 = vector.load %arg10[%c0_5, %c0_6, %c0_7] : memref<18x40x128xf32, #tpu.memory_space<vmem>>, vector<18x40x128xf32>
    tpu.vector_store %arg10[%c0_5, %c0_6, %c0_7], %5 {strides = array<i32>} : memref<18x40x128xf32, #tpu.memory_space<vmem>>, vector<18x40x128xf32>,
    %c0_8 = arith.constant 0 : index
    %7 = arith.index_cast %1 : i32 to index
    %c0_9 = arith.constant 0 : index
    %c0_10 = arith.constant 0 : index
    %8 = vector.load %arg2[%c0_8, %7, %c0_9, %c0_10] : memref<1x16x16x128xbf16, #tpu.memory_space<vmem>>, vector<1x16x16x128xbf16>
    %9 = vector.shape_cast %8 : vector<1x16x16x128xbf16> to vector<16x16x128xbf16>
    %10 = arith.extf %9 : vector<16x16x128xbf16> to vector<16x16x128xf32>
    %11 = vector.shape_cast %10 : vector<16x16x128xf32> to vector<256x128xf32>
    %cst_11 = arith.constant dense<0.000000e+00> : vector<256x128xf32>
    %12 = tpu.matmul %11, %2, %cst_11 {dimension_numbers = #tpu.dot_dimension_numbers<[1], [0], [0], [1], [0, 0, 1, 1], [], []>} : vector<256x128xf32>, vector<128x128xf32>, vector<256x128xf32> -> vector<256x128xf32>
    %13 = vector.broadcast %3 : vector<1x128xf32> to vector<256x128xf32>
    %14 = arith.mulf %12, %13 : vector<256x128xf32>
    %15 = vector.broadcast %4 : vector<1x128xf32> to vector<256x128xf32>
    %16 = arith.addf %14, %15 : vector<256x128xf32>
    %cst_12 = arith.constant 0.000000e+00 : f32
    %17 = vector.broadcast %cst_12 : f32 to vector<256x128xf32>
    %18 = arith.subf %17, %16 : vector<256x128xf32>
    %19 = math.exp %18 : vector<256x128xf32>
    %cst_13 = arith.constant 1.000000e+00 : f32
    %20 = vector.broadcast %cst_13 : f32 to vector<256x128xf32>
    %21 = arith.addf %20, %19 : vector<256x128xf32>
    %22 = tpu.reciprocal %21 {approx = true} : vector<256x128xf32> -> vector<256x128xf32>
    %23 = arith.mulf %16, %22 : vector<256x128xf32>
    %24 = vector.shape_cast %23 : vector<256x128xf32> to vector<16x16x128xf32>
    %c1 = arith.constant 1 : index
    %c0_14 = arith.constant 0 : index
    %c0_15 = arith.constant 0 : index
    %25 = vector.load %arg10[%c1, %c0_14, %c0_15] : memref<18x40x128xf32, #tpu.memory_space<vmem>>, vector<16x16x128xf32>
    tpu.vector_store %arg10[%c1, %c0_14, %c0_15], %24 {strides = array<i32>} : memref<18x40x128xf32, #tpu.memory_space<vmem>>, vector<16x16x128xf32>,
    %c1_16 = arith.constant 1 : index
    %c24 = arith.constant 24 : index
    %c0_17 = arith.constant 0 : index
    %26 = vector.load %arg10[%c1_16, %c24, %c0_17] : memref<18x40x128xf32, #tpu.memory_space<vmem>>, vector<16x16x128xf32>
    tpu.vector_store %arg10[%c1_16, %c24, %c0_17], %24 {strides = array<i32>} : memref<18x40x128xf32, #tpu.memory_space<vmem>>, vector<16x16x128xf32>,
    %c0_i32 = arith.constant 0 : i32
    %27 = arith.cmpi sgt, %1, %c0_i32 : i32
    %28 = arith.extui %27 : i1 to i32
    %c0_i32_18 = arith.constant 0 : i32
    %29 = arith.cmpi ne, %28, %c0_i32_18 : i32
    scf.if %29 {
      %c1_i32 = arith.constant 1 : i32
      %121 = arith.subi %1, %c1_i32 : i32
      %c0_117 = arith.constant 0 : index
      %122 = arith.index_cast %121 : i32 to index
      %c0_118 = arith.constant 0 : index
      %c0_119 = arith.constant 0 : index
      %123 = vector.load %arg2[%c0_117, %122, %c0_118, %c0_119] : memref<1x16x16x128xbf16, #tpu.memory_space<vmem>>, vector<1x1x16x128xbf16>
      %124 = vector.shape_cast %123 : vector<1x1x16x128xbf16> to vector<1x16x128xbf16>
      %125 = arith.extf %124 : vector<1x16x128xbf16> to vector<1x16x128xf32>
      %126 = vector.shape_cast %125 : vector<1x16x128xf32> to vector<16x128xf32>
      %cst_120 = arith.constant dense<0.000000e+00> : vector<16x128xf32>
      %127 = tpu.matmul %126, %2, %cst_120 {dimension_numbers = #tpu.dot_dimension_numbers<[1], [0], [0], [1], [0, 0, 1, 1], [], []>} : vector<16x128xf32>, vector<128x128xf32>, vector<16x128xf32> -> vector<16x128xf32>
      %128 = vector.broadcast %3 : vector<1x128xf32> to vector<16x128xf32>
      %129 = arith.mulf %127, %128 : vector<16x128xf32>
      %130 = vector.broadcast %4 : vector<1x128xf32> to vector<16x128xf32>
      %131 = arith.addf %129, %130 : vector<16x128xf32>
      %cst_121 = arith.constant 0.000000e+00 : f32
      %132 = vector.broadcast %cst_121 : f32 to vector<16x128xf32>
      %133 = arith.subf %132, %131 : vector<16x128xf32>
      %134 = math.exp %133 : vector<16x128xf32>
      %cst_122 = arith.constant 1.000000e+00 : f32
      %135 = vector.broadcast %cst_122 : f32 to vector<16x128xf32>
      %136 = arith.addf %135, %134 : vector<16x128xf32>
      %137 = tpu.reciprocal %136 {approx = true} : vector<16x128xf32> -> vector<16x128xf32>
      %138 = arith.mulf %131, %137 : vector<16x128xf32>
      %139 = vector.shape_cast %138 : vector<16x128xf32> to vector<1x16x128xf32>
      %c0_123 = arith.constant 0 : index
      %c0_124 = arith.constant 0 : index
      %c0_125 = arith.constant 0 : index
      %140 = vector.load %arg10[%c0_123, %c0_124, %c0_125] : memref<18x40x128xf32, #tpu.memory_space<vmem>>, vector<1x16x128xf32>
      tpu.vector_store %arg10[%c0_123, %c0_124, %c0_125], %139 {strides = array<i32>} : memref<18x40x128xf32, #tpu.memory_space<vmem>>, vector<1x16x128xf32>,
      %c0_126 = arith.constant 0 : index
      %c24_127 = arith.constant 24 : index
      %c0_128 = arith.constant 0 : index
      %141 = vector.load %arg10[%c0_126, %c24_127, %c0_128] : memref<18x40x128xf32, #tpu.memory_space<vmem>>, vector<1x16x128xf32>
      tpu.vector_store %arg10[%c0_126, %c24_127, %c0_128], %139 {strides = array<i32>} : memref<18x40x128xf32, #tpu.memory_space<vmem>>, vector<1x16x128xf32>,
    } else {
    }
    %c16_i32_19 = arith.constant 16 : i32
    %30 = arith.addi %1, %c16_i32_19 : i32
    %c16_i32_20 = arith.constant 16 : i32
    %31 = arith.cmpi slt, %30, %c16_i32_20 : i32
    %32 = arith.extui %31 : i1 to i32
    %c0_i32_21 = arith.constant 0 : i32
    %33 = arith.cmpi ne, %32, %c0_i32_21 : i32
    scf.if %33 {
      %c16_i32_117 = arith.constant 16 : i32
      %121 = arith.addi %1, %c16_i32_117 : i32
      %c0_118 = arith.constant 0 : index
      %122 = arith.index_cast %121 : i32 to index
      %c0_119 = arith.constant 0 : index
      %c0_120 = arith.constant 0 : index
      %123 = vector.load %arg2[%c0_118, %122, %c0_119, %c0_120] : memref<1x16x16x128xbf16, #tpu.memory_space<vmem>>, vector<1x1x16x128xbf16>
      %124 = vector.shape_cast %123 : vector<1x1x16x128xbf16> to vector<1x16x128xbf16>
      %125 = arith.extf %124 : vector<1x16x128xbf16> to vector<1x16x128xf32>
      %126 = vector.shape_cast %125 : vector<1x16x128xf32> to vector<16x128xf32>
      %cst_121 = arith.constant dense<0.000000e+00> : vector<16x128xf32>
      %127 = tpu.matmul %126, %2, %cst_121 {dimension_numbers = #tpu.dot_dimension_numbers<[1], [0], [0], [1], [0, 0, 1, 1], [], []>} : vector<16x128xf32>, vector<128x128xf32>, vector<16x128xf32> -> vector<16x128xf32>
      %128 = vector.broadcast %3 : vector<1x128xf32> to vector<16x128xf32>
      %129 = arith.mulf %127, %128 : vector<16x128xf32>
      %130 = vector.broadcast %4 : vector<1x128xf32> to vector<16x128xf32>
      %131 = arith.addf %129, %130 : vector<16x128xf32>
      %cst_122 = arith.constant 0.000000e+00 : f32
      %132 = vector.broadcast %cst_122 : f32 to vector<16x128xf32>
      %133 = arith.subf %132, %131 : vector<16x128xf32>
      %134 = math.exp %133 : vector<16x128xf32>
      %cst_123 = arith.constant 1.000000e+00 : f32
      %135 = vector.broadcast %cst_123 : f32 to vector<16x128xf32>
      %136 = arith.addf %135, %134 : vector<16x128xf32>
      %137 = tpu.reciprocal %136 {approx = true} : vector<16x128xf32> -> vector<16x128xf32>
      %138 = arith.mulf %131, %137 : vector<16x128xf32>
      %139 = vector.shape_cast %138 : vector<16x128xf32> to vector<1x16x128xf32>
      %c17 = arith.constant 17 : index
      %c0_124 = arith.constant 0 : index
      %c0_125 = arith.constant 0 : index
      %140 = vector.load %arg10[%c17, %c0_124, %c0_125] : memref<18x40x128xf32, #tpu.memory_space<vmem>>, vector<1x16x128xf32>
      tpu.vector_store %arg10[%c17, %c0_124, %c0_125], %139 {strides = array<i32>} : memref<18x40x128xf32, #tpu.memory_space<vmem>>, vector<1x16x128xf32>,
      %c17_126 = arith.constant 17 : index
      %c24_127 = arith.constant 24 : index
      %c0_128 = arith.constant 0 : index
      %141 = vector.load %arg10[%c17_126, %c24_127, %c0_128] : memref<18x40x128xf32, #tpu.memory_space<vmem>>, vector<1x16x128xf32>
      tpu.vector_store %arg10[%c17_126, %c24_127, %c0_128], %139 {strides = array<i32>} : memref<18x40x128xf32, #tpu.memory_space<vmem>>, vector<1x16x128xf32>,
    } else {
    }
    %cst_22 = arith.constant 0.000000e+00 : f32
    %34 = vector.broadcast %cst_22 : f32 to vector<256x128xf32>
    %c0_23 = arith.constant 0 : index
    %c0_24 = arith.constant 0 : index
    %35 = vector.load %arg11[%c0_23, %c0_24] : memref<256x128xf32, #tpu.memory_space<vmem>>, vector<256x128xf32>
    tpu.vector_store %arg11[%c0_23, %c0_24], %34 {strides = array<i32>} : memref<256x128xf32, #tpu.memory_space<vmem>>, vector<256x128xf32>,
    %c0_25 = arith.constant 0 : index
    %c23 = arith.constant 23 : index
    %c0_26 = arith.constant 0 : index
    %36 = vector.load %arg10[%c0_25, %c23, %c0_26] : memref<18x40x128xf32, #tpu.memory_space<vmem>>, vector<16x16x128xf32>
    %c0_27 = arith.constant 0 : index
    %c0_28 = arith.constant 0 : index
    %37 = vector.load %arg11[%c0_27, %c0_28] : memref<256x128xf32, #tpu.memory_space<vmem>>, vector<256x128xf32>
    %38 = vector.shape_cast %36 : vector<16x16x128xf32> to vector<256x128xf32>
    %c0_29 = arith.constant 0 : index
    %c0_30 = arith.constant 0 : index
    %39 = vector.load %arg6[%c0_29, %c0_30] : memref<1152x128xf32, #tpu.memory_space<vmem>>, vector<128x128xf32>
    %cst_31 = arith.constant dense<0.000000e+00> : vector<256x128xf32>
    %40 = tpu.matmul %38, %39, %cst_31 {dimension_numbers = #tpu.dot_dimension_numbers<[1], [0], [0], [1], [0, 0, 1, 1], [], []>} : vector<256x128xf32>, vector<128x128xf32>, vector<256x128xf32> -> vector<256x128xf32>
    %41 = arith.addf %37, %40 : vector<256x128xf32>
    %c0_32 = arith.constant 0 : index
    %c0_33 = arith.constant 0 : index
    %42 = vector.load %arg11[%c0_32, %c0_33] : memref<256x128xf32, #tpu.memory_space<vmem>>, vector<256x128xf32>
    tpu.vector_store %arg11[%c0_32, %c0_33], %41 {strides = array<i32>} : memref<256x128xf32, #tpu.memory_space<vmem>>, vector<256x128xf32>,
    %c0_34 = arith.constant 0 : index
    %c0_35 = arith.constant 0 : index
    %c0_36 = arith.constant 0 : index
    %43 = vector.load %arg10[%c0_34, %c0_35, %c0_36] : memref<18x40x128xf32, #tpu.memory_space<vmem>>, vector<16x16x128xf32>
    %c0_37 = arith.constant 0 : index
    %c0_38 = arith.constant 0 : index
    %44 = vector.load %arg11[%c0_37, %c0_38] : memref<256x128xf32, #tpu.memory_space<vmem>>, vector<256x128xf32>
    %45 = vector.shape_cast %43 : vector<16x16x128xf32> to vector<256x128xf32>
    %c128 = arith.constant 128 : index
    %c0_39 = arith.constant 0 : index
    %46 = vector.load %arg6[%c128, %c0_39] : memref<1152x128xf32, #tpu.memory_space<vmem>>, vector<128x128xf32>
    %cst_40 = arith.constant dense<0.000000e+00> : vector<256x128xf32>
    %47 = tpu.matmul %45, %46, %cst_40 {dimension_numbers = #tpu.dot_dimension_numbers<[1], [0], [0], [1], [0, 0, 1, 1], [], []>} : vector<256x128xf32>, vector<128x128xf32>, vector<256x128xf32> -> vector<256x128xf32>
    %48 = arith.addf %44, %47 : vector<256x128xf32>
    %c0_41 = arith.constant 0 : index
    %c0_42 = arith.constant 0 : index
    %49 = vector.load %arg11[%c0_41, %c0_42] : memref<256x128xf32, #tpu.memory_space<vmem>>, vector<256x128xf32>
    tpu.vector_store %arg11[%c0_41, %c0_42], %48 {strides = array<i32>} : memref<256x128xf32, #tpu.memory_space<vmem>>, vector<256x128xf32>,
    %c0_43 = arith.constant 0 : index
    %c1_44 = arith.constant 1 : index
    %c0_45 = arith.constant 0 : index
    %50 = vector.load %arg10[%c0_43, %c1_44, %c0_45] : memref<18x40x128xf32, #tpu.memory_space<vmem>>, vector<16x16x128xf32>
    %c0_46 = arith.constant 0 : index
    %c0_47 = arith.constant 0 : index
    %51 = vector.load %arg11[%c0_46, %c0_47] : memref<256x128xf32, #tpu.memory_space<vmem>>, vector<256x128xf32>
    %52 = vector.shape_cast %50 : vector<16x16x128xf32> to vector<256x128xf32>
    %c256 = arith.constant 256 : index
    %c0_48 = arith.constant 0 : index
    %53 = vector.load %arg6[%c256, %c0_48] : memref<1152x128xf32, #tpu.memory_space<vmem>>, vector<128x128xf32>
    %cst_49 = arith.constant dense<0.000000e+00> : vector<256x128xf32>
    %54 = tpu.matmul %52, %53, %cst_49 {dimension_numbers = #tpu.dot_dimension_numbers<[1], [0], [0], [1], [0, 0, 1, 1], [], []>} : vector<256x128xf32>, vector<128x128xf32>, vector<256x128xf32> -> vector<256x128xf32>
    %55 = arith.addf %51, %54 : vector<256x128xf32>
    %c0_50 = arith.constant 0 : index
    %c0_51 = arith.constant 0 : index
    %56 = vector.load %arg11[%c0_50, %c0_51] : memref<256x128xf32, #tpu.memory_space<vmem>>, vector<256x128xf32>
    tpu.vector_store %arg11[%c0_50, %c0_51], %55 {strides = array<i32>} : memref<256x128xf32, #tpu.memory_space<vmem>>, vector<256x128xf32>,
    %c1_52 = arith.constant 1 : index
    %c23_53 = arith.constant 23 : index
    %c0_54 = arith.constant 0 : index
    %57 = vector.load %arg10[%c1_52, %c23_53, %c0_54] : memref<18x40x128xf32, #tpu.memory_space<vmem>>, vector<16x16x128xf32>
    %c0_55 = arith.constant 0 : index
    %c0_56 = arith.constant 0 : index
    %58 = vector.load %arg11[%c0_55, %c0_56] : memref<256x128xf32, #tpu.memory_space<vmem>>, vector<256x128xf32>
    %59 = vector.shape_cast %57 : vector<16x16x128xf32> to vector<256x128xf32>
    %c384 = arith.constant 384 : index
    %c0_57 = arith.constant 0 : index
    %60 = vector.load %arg6[%c384, %c0_57] : memref<1152x128xf32, #tpu.memory_space<vmem>>, vector<128x128xf32>
    %cst_58 = arith.constant dense<0.000000e+00> : vector<256x128xf32>
    %61 = tpu.matmul %59, %60, %cst_58 {dimension_numbers = #tpu.dot_dimension_numbers<[1], [0], [0], [1], [0, 0, 1, 1], [], []>} : vector<256x128xf32>, vector<128x128xf32>, vector<256x128xf32> -> vector<256x128xf32>
    %62 = arith.addf %58, %61 : vector<256x128xf32>
    %c0_59 = arith.constant 0 : index
    %c0_60 = arith.constant 0 : index
    %63 = vector.load %arg11[%c0_59, %c0_60] : memref<256x128xf32, #tpu.memory_space<vmem>>, vector<256x128xf32>
    tpu.vector_store %arg11[%c0_59, %c0_60], %62 {strides = array<i32>} : memref<256x128xf32, #tpu.memory_space<vmem>>, vector<256x128xf32>,
    %c1_61 = arith.constant 1 : index
    %c0_62 = arith.constant 0 : index
    %c0_63 = arith.constant 0 : index
    %64 = vector.load %arg10[%c1_61, %c0_62, %c0_63] : memref<18x40x128xf32, #tpu.memory_space<vmem>>, vector<16x16x128xf32>
    %c0_64 = arith.constant 0 : index
    %c0_65 = arith.constant 0 : index
    %65 = vector.load %arg11[%c0_64, %c0_65] : memref<256x128xf32, #tpu.memory_space<vmem>>, vector<256x128xf32>
    %66 = vector.shape_cast %64 : vector<16x16x128xf32> to vector<256x128xf32>
    %c512 = arith.constant 512 : index
    %c0_66 = arith.constant 0 : index
    %67 = vector.load %arg6[%c512, %c0_66] : memref<1152x128xf32, #tpu.memory_space<vmem>>, vector<128x128xf32>
    %cst_67 = arith.constant dense<0.000000e+00> : vector<256x128xf32>
    %68 = tpu.matmul %66, %67, %cst_67 {dimension_numbers = #tpu.dot_dimension_numbers<[1], [0], [0], [1], [0, 0, 1, 1], [], []>} : vector<256x128xf32>, vector<128x128xf32>, vector<256x128xf32> -> vector<256x128xf32>
    %69 = arith.addf %65, %68 : vector<256x128xf32>
    %c0_68 = arith.constant 0 : index
    %c0_69 = arith.constant 0 : index
    %70 = vector.load %arg11[%c0_68, %c0_69] : memref<256x128xf32, #tpu.memory_space<vmem>>, vector<256x128xf32>
    tpu.vector_store %arg11[%c0_68, %c0_69], %69 {strides = array<i32>} : memref<256x128xf32, #tpu.memory_space<vmem>>, vector<256x128xf32>,
    %c1_70 = arith.constant 1 : index
    %c1_71 = arith.constant 1 : index
    %c0_72 = arith.constant 0 : index
    %71 = vector.load %arg10[%c1_70, %c1_71, %c0_72] : memref<18x40x128xf32, #tpu.memory_space<vmem>>, vector<16x16x128xf32>
    %c0_73 = arith.constant 0 : index
    %c0_74 = arith.constant 0 : index
    %72 = vector.load %arg11[%c0_73, %c0_74] : memref<256x128xf32, #tpu.memory_space<vmem>>, vector<256x128xf32>
    %73 = vector.shape_cast %71 : vector<16x16x128xf32> to vector<256x128xf32>
    %c640 = arith.constant 640 : index
    %c0_75 = arith.constant 0 : index
    %74 = vector.load %arg6[%c640, %c0_75] : memref<1152x128xf32, #tpu.memory_space<vmem>>, vector<128x128xf32>
    %cst_76 = arith.constant dense<0.000000e+00> : vector<256x128xf32>
    %75 = tpu.matmul %73, %74, %cst_76 {dimension_numbers = #tpu.dot_dimension_numbers<[1], [0], [0], [1], [0, 0, 1, 1], [], []>} : vector<256x128xf32>, vector<128x128xf32>, vector<256x128xf32> -> vector<256x128xf32>
    %76 = arith.addf %72, %75 : vector<256x128xf32>
    %c0_77 = arith.constant 0 : index
    %c0_78 = arith.constant 0 : index
    %77 = vector.load %arg11[%c0_77, %c0_78] : memref<256x128xf32, #tpu.memory_space<vmem>>, vector<256x128xf32>
    tpu.vector_store %arg11[%c0_77, %c0_78], %76 {strides = array<i32>} : memref<256x128xf32, #tpu.memory_space<vmem>>, vector<256x128xf32>,
    %c2 = arith.constant 2 : index
    %c23_79 = arith.constant 23 : index
    %c0_80 = arith.constant 0 : index
    %78 = vector.load %arg10[%c2, %c23_79, %c0_80] : memref<18x40x128xf32, #tpu.memory_space<vmem>>, vector<16x16x128xf32>
    %c0_81 = arith.constant 0 : index
    %c0_82 = arith.constant 0 : index
    %79 = vector.load %arg11[%c0_81, %c0_82] : memref<256x128xf32, #tpu.memory_space<vmem>>, vector<256x128xf32>
    %80 = vector.shape_cast %78 : vector<16x16x128xf32> to vector<256x128xf32>
    %c768 = arith.constant 768 : index
    %c0_83 = arith.constant 0 : index
    %81 = vector.load %arg6[%c768, %c0_83] : memref<1152x128xf32, #tpu.memory_space<vmem>>, vector<128x128xf32>
    %cst_84 = arith.constant dense<0.000000e+00> : vector<256x128xf32>
    %82 = tpu.matmul %80, %81, %cst_84 {dimension_numbers = #tpu.dot_dimension_numbers<[1], [0], [0], [1], [0, 0, 1, 1], [], []>} : vector<256x128xf32>, vector<128x128xf32>, vector<256x128xf32> -> vector<256x128xf32>
    %83 = arith.addf %79, %82 : vector<256x128xf32>
    %c0_85 = arith.constant 0 : index
    %c0_86 = arith.constant 0 : index
    %84 = vector.load %arg11[%c0_85, %c0_86] : memref<256x128xf32, #tpu.memory_space<vmem>>, vector<256x128xf32>
    tpu.vector_store %arg11[%c0_85, %c0_86], %83 {strides = array<i32>} : memref<256x128xf32, #tpu.memory_space<vmem>>, vector<256x128xf32>,
    %c2_87 = arith.constant 2 : index
    %c0_88 = arith.constant 0 : index
    %c0_89 = arith.constant 0 : index
    %85 = vector.load %arg10[%c2_87, %c0_88, %c0_89] : memref<18x40x128xf32, #tpu.memory_space<vmem>>, vector<16x16x128xf32>
    %c0_90 = arith.constant 0 : index
    %c0_91 = arith.constant 0 : index
    %86 = vector.load %arg11[%c0_90, %c0_91] : memref<256x128xf32, #tpu.memory_space<vmem>>, vector<256x128xf32>
    %87 = vector.shape_cast %85 : vector<16x16x128xf32> to vector<256x128xf32>
    %c896 = arith.constant 896 : index
    %c0_92 = arith.constant 0 : index
    %88 = vector.load %arg6[%c896, %c0_92] : memref<1152x128xf32, #tpu.memory_space<vmem>>, vector<128x128xf32>
    %cst_93 = arith.constant dense<0.000000e+00> : vector<256x128xf32>
    %89 = tpu.matmul %87, %88, %cst_93 {dimension_numbers = #tpu.dot_dimension_numbers<[1], [0], [0], [1], [0, 0, 1, 1], [], []>} : vector<256x128xf32>, vector<128x128xf32>, vector<256x128xf32> -> vector<256x128xf32>
    %90 = arith.addf %86, %89 : vector<256x128xf32>
    %c0_94 = arith.constant 0 : index
    %c0_95 = arith.constant 0 : index
    %91 = vector.load %arg11[%c0_94, %c0_95] : memref<256x128xf32, #tpu.memory_space<vmem>>, vector<256x128xf32>
    tpu.vector_store %arg11[%c0_94, %c0_95], %90 {strides = array<i32>} : memref<256x128xf32, #tpu.memory_space<vmem>>, vector<256x128xf32>,
    %c2_96 = arith.constant 2 : index
    %c1_97 = arith.constant 1 : index
    %c0_98 = arith.constant 0 : index
    %92 = vector.load %arg10[%c2_96, %c1_97, %c0_98] : memref<18x40x128xf32, #tpu.memory_space<vmem>>, vector<16x16x128xf32>
    %c0_99 = arith.constant 0 : index
    %c0_100 = arith.constant 0 : index
    %93 = vector.load %arg11[%c0_99, %c0_100] : memref<256x128xf32, #tpu.memory_space<vmem>>, vector<256x128xf32>
    %94 = vector.shape_cast %92 : vector<16x16x128xf32> to vector<256x128xf32>
    %c1024 = arith.constant 1024 : index
    %c0_101 = arith.constant 0 : index
    %95 = vector.load %arg6[%c1024, %c0_101] : memref<1152x128xf32, #tpu.memory_space<vmem>>, vector<128x128xf32>
    %cst_102 = arith.constant dense<0.000000e+00> : vector<256x128xf32>
    %96 = tpu.matmul %94, %95, %cst_102 {dimension_numbers = #tpu.dot_dimension_numbers<[1], [0], [0], [1], [0, 0, 1, 1], [], []>} : vector<256x128xf32>, vector<128x128xf32>, vector<256x128xf32> -> vector<256x128xf32>
    %97 = arith.addf %93, %96 : vector<256x128xf32>
    %c0_103 = arith.constant 0 : index
    %c0_104 = arith.constant 0 : index
    %98 = vector.load %arg11[%c0_103, %c0_104] : memref<256x128xf32, #tpu.memory_space<vmem>>, vector<256x128xf32>
    tpu.vector_store %arg11[%c0_103, %c0_104], %97 {strides = array<i32>} : memref<256x128xf32, #tpu.memory_space<vmem>>, vector<256x128xf32>,
    %c0_105 = arith.constant 0 : index
    %c0_106 = arith.constant 0 : index
    %99 = vector.load %arg11[%c0_105, %c0_106] : memref<256x128xf32, #tpu.memory_space<vmem>>, vector<256x128xf32>
    %c0_107 = arith.constant 0 : index
    %c0_108 = arith.constant 0 : index
    %100 = vector.load %arg7[%c0_107, %c0_108] : memref<1x128xf32, #tpu.memory_space<vmem>>, vector<1x128xf32>
    %101 = vector.broadcast %100 : vector<1x128xf32> to vector<256x128xf32>
    %102 = arith.mulf %99, %101 : vector<256x128xf32>
    %c0_109 = arith.constant 0 : index
    %c0_110 = arith.constant 0 : index
    %103 = vector.load %arg8[%c0_109, %c0_110] : memref<1x128xf32, #tpu.memory_space<vmem>>, vector<1x128xf32>
    %104 = vector.broadcast %103 : vector<1x128xf32> to vector<256x128xf32>
    %105 = arith.addf %102, %104 : vector<256x128xf32>
    %cst_111 = arith.constant 0.000000e+00 : f32
    %106 = vector.broadcast %cst_111 : f32 to vector<256x128xf32>
    %107 = arith.subf %106, %105 : vector<256x128xf32>
    %108 = math.exp %107 : vector<256x128xf32>
    %cst_112 = arith.constant 1.000000e+00 : f32
    %109 = vector.broadcast %cst_112 : f32 to vector<256x128xf32>
    %110 = arith.addf %109, %108 : vector<256x128xf32>
    %111 = tpu.reciprocal %110 {approx = true} : vector<256x128xf32> -> vector<256x128xf32>
    %112 = arith.mulf %105, %111 : vector<256x128xf32>
    %113 = arith.extf %9 : vector<16x16x128xbf16> to vector<16x16x128xf32>
    %114 = vector.shape_cast %113 : vector<16x16x128xf32> to vector<256x128xf32>
    %115 = arith.addf %112, %114 : vector<256x128xf32>
    %116 = vector.shape_cast %115 : vector<256x128xf32> to vector<16x16x128xf32>
    %117 = arith.truncf %116 : vector<16x16x128xf32> to vector<16x16x128xbf16>
    %c0_113 = arith.constant 0 : index
    %c0_114 = arith.constant 0 : index
    %c0_115 = arith.constant 0 : index
    %c0_116 = arith.constant 0 : index
    %118 = vector.load %arg9[%c0_113, %c0_114, %c0_115, %c0_116] : memref<1x16x16x128xbf16, #tpu.memory_space<vmem>>, vector<1x16x16x128xbf16>
    %119 = vector.shape_cast %118 : vector<1x16x16x128xbf16> to vector<16x16x128xbf16>
    %120 = vector.shape_cast %117 : vector<16x16x128xbf16> to vector<1x16x16x128xbf16>
    tpu.vector_store %arg9[%c0_113, %c0_114, %c0_115, %c0_116], %120 {strides = array<i32>} : memref<1x16x16x128xbf16, #tpu.memory_space<vmem>>, vector<1x16x16x128xbf16>,
    return
  }
  func.func @transform_0(%arg0: i32, %arg1: i32) -> (i32, i32, i32, i32) {
    %c0_i32 = arith.constant 0 : i32
    %c0_i32_0 = arith.constant 0 : i32
    %c0_i32_1 = arith.constant 0 : i32
    %c0_i32_2 = arith.constant 0 : i32
    return %arg0, %c0_i32, %c0_i32_0, %c0_i32_1 : i32, i32, i32, i32
  }
  func.func @transform_1(%arg0: i32, %arg1: i32) -> (i32, i32) {
    %c0_i32 = arith.constant 0 : i32
    %c0_i32_0 = arith.constant 0 : i32
    %c0_i32_1 = arith.constant 0 : i32
    return %c0_i32, %c0_i32_0 : i32, i32
  }
  func.func @transform_2(%arg0: i32, %arg1: i32) -> (i32, i32) {
    %c0_i32 = arith.constant 0 : i32
    %c0_i32_0 = arith.constant 0 : i32
    %c0_i32_1 = arith.constant 0 : i32
    return %c0_i32, %c0_i32_0 : i32, i32
  }
  func.func @transform_3(%arg0: i32, %arg1: i32) -> (i32, i32) {
    %c0_i32 = arith.constant 0 : i32
    %c0_i32_0 = arith.constant 0 : i32
    %c0_i32_1 = arith.constant 0 : i32
    return %c0_i32, %c0_i32_0 : i32, i32
  }
  func.func @transform_4(%arg0: i32, %arg1: i32) -> (i32, i32) {
    %c0_i32 = arith.constant 0 : i32
    %c0_i32_0 = arith.constant 0 : i32
    %c0_i32_1 = arith.constant 0 : i32
    return %c0_i32, %c0_i32_0 : i32, i32
  }
  func.func @transform_5(%arg0: i32, %arg1: i32) -> (i32, i32) {
    %c0_i32 = arith.constant 0 : i32
    %c0_i32_0 = arith.constant 0 : i32
    %c0_i32_1 = arith.constant 0 : i32
    return %c0_i32, %c0_i32_0 : i32, i32
  }
  func.func @transform_6(%arg0: i32, %arg1: i32) -> (i32, i32) {
    %c0_i32 = arith.constant 0 : i32
    %c0_i32_0 = arith.constant 0 : i32
    %c0_i32_1 = arith.constant 0 : i32
    return %c0_i32, %c0_i32_0 : i32, i32
  }
  func.func @transform_7(%arg0: i32, %arg1: i32) -> (i32, i32, i32, i32) {
    %c0_i32 = arith.constant 0 : i32
    %c0_i32_0 = arith.constant 0 : i32
    %c0_i32_1 = arith.constant 0 : i32
    return %arg0, %arg1, %c0_i32, %c0_i32_0 : i32, i32, i32, i32
  }
}

module attributes {stable_mosaic.version = 11 : i64} {
  func.func @_cv12_kernel(%arg0: i32, %arg1: memref<512x8xf32, #tpu.memory_space<vmem>>, %arg2: memref<8x128xf32, #tpu.memory_space<vmem>>, %arg3: memref<1x128xf32, #tpu.memory_space<vmem>>, %arg4: memref<1x128xf32, #tpu.memory_space<vmem>>, %arg5: memref<8x128xf32, #tpu.memory_space<vmem>>, %arg6: memref<1x128xf32, #tpu.memory_space<vmem>>, %arg7: memref<1x128xf32, #tpu.memory_space<vmem>>, %arg8: memref<512x128xbf16, #tpu.memory_space<vmem>>, %arg9: memref<512x128xbf16, #tpu.memory_space<vmem>>) attributes {dimension_semantics = [#tpu.dimension_semantics<parallel>], iteration_bounds = array<i64: 1>, scalar_prefetch = 0 : i64, scratch_operands = 0 : i64, tpu.core_type = #tpu.core_type<tc>, window_params = [{transform_indices = @transform_0, window_bounds = array<i64: 512, 8>}, {pipeline_mode = #tpu.pipeline_mode<synchronous>, transform_indices = @transform_1, window_bounds = array<i64: 8, 128>}, {pipeline_mode = #tpu.pipeline_mode<synchronous>, transform_indices = @transform_2, window_bounds = array<i64: 1, 128>}, {pipeline_mode = #tpu.pipeline_mode<synchronous>, transform_indices = @transform_3, window_bounds = array<i64: 1, 128>}, {pipeline_mode = #tpu.pipeline_mode<synchronous>, transform_indices = @transform_4, window_bounds = array<i64: 8, 128>}, {pipeline_mode = #tpu.pipeline_mode<synchronous>, transform_indices = @transform_5, window_bounds = array<i64: 1, 128>}, {pipeline_mode = #tpu.pipeline_mode<synchronous>, transform_indices = @transform_6, window_bounds = array<i64: 1, 128>}, {transform_indices = @transform_7, window_bounds = array<i64: 512, 128>}, {transform_indices = @transform_8, window_bounds = array<i64: 512, 128>}]} {
    %c0 = arith.constant 0 : index
    %c0_0 = arith.constant 0 : index
    %0 = vector.load %arg1[%c0, %c0_0] : memref<512x8xf32, #tpu.memory_space<vmem>>, vector<512x8xf32>
    %c0_1 = arith.constant 0 : index
    %c0_2 = arith.constant 0 : index
    %1 = vector.load %arg2[%c0_1, %c0_2] : memref<8x128xf32, #tpu.memory_space<vmem>>, vector<8x128xf32>
    %cst = arith.constant dense<0.000000e+00> : vector<512x128xf32>
    %2 = tpu.matmul %0, %1, %cst {dimension_numbers = #tpu.dot_dimension_numbers<[1], [0], [0], [1], [0, 0, 1, 1], [], []>} : vector<512x8xf32>, vector<8x128xf32>, vector<512x128xf32> -> vector<512x128xf32>
    %c0_3 = arith.constant 0 : index
    %c0_4 = arith.constant 0 : index
    %3 = vector.load %arg3[%c0_3, %c0_4] : memref<1x128xf32, #tpu.memory_space<vmem>>, vector<1x128xf32>
    %4 = vector.broadcast %3 : vector<1x128xf32> to vector<512x128xf32>
    %5 = arith.mulf %2, %4 : vector<512x128xf32>
    %c0_5 = arith.constant 0 : index
    %c0_6 = arith.constant 0 : index
    %6 = vector.load %arg4[%c0_5, %c0_6] : memref<1x128xf32, #tpu.memory_space<vmem>>, vector<1x128xf32>
    %7 = vector.broadcast %6 : vector<1x128xf32> to vector<512x128xf32>
    %8 = arith.addf %5, %7 : vector<512x128xf32>
    %cst_7 = arith.constant 0.000000e+00 : f32
    %9 = vector.broadcast %cst_7 : f32 to vector<512x128xf32>
    %10 = arith.subf %9, %8 : vector<512x128xf32>
    %11 = math.exp %10 : vector<512x128xf32>
    %cst_8 = arith.constant 1.000000e+00 : f32
    %12 = vector.broadcast %cst_8 : f32 to vector<512x128xf32>
    %13 = arith.addf %12, %11 : vector<512x128xf32>
    %14 = tpu.reciprocal %13 {approx = true} : vector<512x128xf32> -> vector<512x128xf32>
    %15 = arith.mulf %8, %14 : vector<512x128xf32>
    %16 = arith.truncf %15 : vector<512x128xf32> to vector<512x128xbf16>
    %c0_9 = arith.constant 0 : index
    %c0_10 = arith.constant 0 : index
    %17 = vector.load %arg8[%c0_9, %c0_10] : memref<512x128xbf16, #tpu.memory_space<vmem>>, vector<512x128xbf16>
    tpu.vector_store %arg8[%c0_9, %c0_10], %16 {strides = array<i32>} : memref<512x128xbf16, #tpu.memory_space<vmem>>, vector<512x128xbf16>,
    %c0_11 = arith.constant 0 : index
    %c0_12 = arith.constant 0 : index
    %18 = vector.load %arg5[%c0_11, %c0_12] : memref<8x128xf32, #tpu.memory_space<vmem>>, vector<8x128xf32>
    %cst_13 = arith.constant dense<0.000000e+00> : vector<512x128xf32>
    %19 = tpu.matmul %0, %18, %cst_13 {dimension_numbers = #tpu.dot_dimension_numbers<[1], [0], [0], [1], [0, 0, 1, 1], [], []>} : vector<512x8xf32>, vector<8x128xf32>, vector<512x128xf32> -> vector<512x128xf32>
    %c0_14 = arith.constant 0 : index
    %c0_15 = arith.constant 0 : index
    %20 = vector.load %arg6[%c0_14, %c0_15] : memref<1x128xf32, #tpu.memory_space<vmem>>, vector<1x128xf32>
    %21 = vector.broadcast %20 : vector<1x128xf32> to vector<512x128xf32>
    %22 = arith.mulf %19, %21 : vector<512x128xf32>
    %c0_16 = arith.constant 0 : index
    %c0_17 = arith.constant 0 : index
    %23 = vector.load %arg7[%c0_16, %c0_17] : memref<1x128xf32, #tpu.memory_space<vmem>>, vector<1x128xf32>
    %24 = vector.broadcast %23 : vector<1x128xf32> to vector<512x128xf32>
    %25 = arith.addf %22, %24 : vector<512x128xf32>
    %cst_18 = arith.constant 0.000000e+00 : f32
    %26 = vector.broadcast %cst_18 : f32 to vector<512x128xf32>
    %27 = arith.subf %26, %25 : vector<512x128xf32>
    %28 = math.exp %27 : vector<512x128xf32>
    %cst_19 = arith.constant 1.000000e+00 : f32
    %29 = vector.broadcast %cst_19 : f32 to vector<512x128xf32>
    %30 = arith.addf %29, %28 : vector<512x128xf32>
    %31 = tpu.reciprocal %30 {approx = true} : vector<512x128xf32> -> vector<512x128xf32>
    %32 = arith.mulf %25, %31 : vector<512x128xf32>
    %33 = arith.truncf %32 : vector<512x128xf32> to vector<512x128xbf16>
    %c0_20 = arith.constant 0 : index
    %c0_21 = arith.constant 0 : index
    %34 = vector.load %arg9[%c0_20, %c0_21] : memref<512x128xbf16, #tpu.memory_space<vmem>>, vector<512x128xbf16>
    tpu.vector_store %arg9[%c0_20, %c0_21], %33 {strides = array<i32>} : memref<512x128xbf16, #tpu.memory_space<vmem>>, vector<512x128xbf16>,
    return
  }
  func.func @transform_0(%arg0: i32) -> (i32, i32) {
    %c0_i32 = arith.constant 0 : i32
    %c0_i32_0 = arith.constant 0 : i32
    return %arg0, %c0_i32 : i32, i32
  }
  func.func @transform_1(%arg0: i32) -> (i32, i32) {
    %c0_i32 = arith.constant 0 : i32
    %c0_i32_0 = arith.constant 0 : i32
    %c0_i32_1 = arith.constant 0 : i32
    return %c0_i32, %c0_i32_0 : i32, i32
  }
  func.func @transform_2(%arg0: i32) -> (i32, i32) {
    %c0_i32 = arith.constant 0 : i32
    %c0_i32_0 = arith.constant 0 : i32
    %c0_i32_1 = arith.constant 0 : i32
    return %c0_i32, %c0_i32_0 : i32, i32
  }
  func.func @transform_3(%arg0: i32) -> (i32, i32) {
    %c0_i32 = arith.constant 0 : i32
    %c0_i32_0 = arith.constant 0 : i32
    %c0_i32_1 = arith.constant 0 : i32
    return %c0_i32, %c0_i32_0 : i32, i32
  }
  func.func @transform_4(%arg0: i32) -> (i32, i32) {
    %c0_i32 = arith.constant 0 : i32
    %c0_i32_0 = arith.constant 0 : i32
    %c0_i32_1 = arith.constant 0 : i32
    return %c0_i32, %c0_i32_0 : i32, i32
  }
  func.func @transform_5(%arg0: i32) -> (i32, i32) {
    %c0_i32 = arith.constant 0 : i32
    %c0_i32_0 = arith.constant 0 : i32
    %c0_i32_1 = arith.constant 0 : i32
    return %c0_i32, %c0_i32_0 : i32, i32
  }
  func.func @transform_6(%arg0: i32) -> (i32, i32) {
    %c0_i32 = arith.constant 0 : i32
    %c0_i32_0 = arith.constant 0 : i32
    %c0_i32_1 = arith.constant 0 : i32
    return %c0_i32, %c0_i32_0 : i32, i32
  }
  func.func @transform_7(%arg0: i32) -> (i32, i32) {
    %c0_i32 = arith.constant 0 : i32
    %c0_i32_0 = arith.constant 0 : i32
    return %arg0, %c0_i32 : i32, i32
  }
  func.func @transform_8(%arg0: i32) -> (i32, i32) {
    %c0_i32 = arith.constant 0 : i32
    %c0_i32_0 = arith.constant 0 : i32
    return %arg0, %c0_i32 : i32, i32
  }
}

module attributes {stable_mosaic.version = 11 : i64} {
  func.func @_cv3_kernel(%arg0: i32, %arg1: memref<512x128xbf16, #tpu.memory_space<vmem>>, %arg2: memref<512x128xbf16, #tpu.memory_space<vmem>>, %arg3: memref<256x128xf32, #tpu.memory_space<vmem>>, %arg4: memref<1x128xf32, #tpu.memory_space<vmem>>, %arg5: memref<1x128xf32, #tpu.memory_space<vmem>>, %arg6: memref<512x128xf32, #tpu.memory_space<vmem>>) attributes {dimension_semantics = [#tpu.dimension_semantics<parallel>], iteration_bounds = array<i64: 1>, scalar_prefetch = 0 : i64, scratch_operands = 0 : i64, tpu.core_type = #tpu.core_type<tc>, window_params = [{transform_indices = @transform_0, window_bounds = array<i64: 512, 128>}, {transform_indices = @transform_1, window_bounds = array<i64: 512, 128>}, {pipeline_mode = #tpu.pipeline_mode<synchronous>, transform_indices = @transform_2, window_bounds = array<i64: 256, 128>}, {pipeline_mode = #tpu.pipeline_mode<synchronous>, transform_indices = @transform_3, window_bounds = array<i64: 1, 128>}, {pipeline_mode = #tpu.pipeline_mode<synchronous>, transform_indices = @transform_4, window_bounds = array<i64: 1, 128>}, {transform_indices = @transform_5, window_bounds = array<i64: 512, 128>}]} {
    %c0 = arith.constant 0 : index
    %c0_0 = arith.constant 0 : index
    %0 = vector.load %arg1[%c0, %c0_0] : memref<512x128xbf16, #tpu.memory_space<vmem>>, vector<512x128xbf16>
    %1 = arith.extf %0 : vector<512x128xbf16> to vector<512x128xf32>
    %c0_1 = arith.constant 0 : index
    %c0_2 = arith.constant 0 : index
    %2 = vector.load %arg3[%c0_1, %c0_2] : memref<256x128xf32, #tpu.memory_space<vmem>>, vector<128x128xf32>
    %cst = arith.constant dense<0.000000e+00> : vector<512x128xf32>
    %3 = tpu.matmul %1, %2, %cst {dimension_numbers = #tpu.dot_dimension_numbers<[1], [0], [0], [1], [0, 0, 1, 1], [], []>} : vector<512x128xf32>, vector<128x128xf32>, vector<512x128xf32> -> vector<512x128xf32>
    %c0_3 = arith.constant 0 : index
    %c0_4 = arith.constant 0 : index
    %4 = vector.load %arg2[%c0_3, %c0_4] : memref<512x128xbf16, #tpu.memory_space<vmem>>, vector<512x128xbf16>
    %5 = arith.extf %4 : vector<512x128xbf16> to vector<512x128xf32>
    %c128 = arith.constant 128 : index
    %c0_5 = arith.constant 0 : index
    %6 = vector.load %arg3[%c128, %c0_5] : memref<256x128xf32, #tpu.memory_space<vmem>>, vector<128x128xf32>
    %cst_6 = arith.constant dense<0.000000e+00> : vector<512x128xf32>
    %7 = tpu.matmul %5, %6, %cst_6 {dimension_numbers = #tpu.dot_dimension_numbers<[1], [0], [0], [1], [0, 0, 1, 1], [], []>} : vector<512x128xf32>, vector<128x128xf32>, vector<512x128xf32> -> vector<512x128xf32>
    %8 = arith.addf %3, %7 : vector<512x128xf32>
    %c0_7 = arith.constant 0 : index
    %c0_8 = arith.constant 0 : index
    %9 = vector.load %arg4[%c0_7, %c0_8] : memref<1x128xf32, #tpu.memory_space<vmem>>, vector<1x128xf32>
    %10 = vector.broadcast %9 : vector<1x128xf32> to vector<512x128xf32>
    %11 = arith.mulf %8, %10 : vector<512x128xf32>
    %c0_9 = arith.constant 0 : index
    %c0_10 = arith.constant 0 : index
    %12 = vector.load %arg5[%c0_9, %c0_10] : memref<1x128xf32, #tpu.memory_space<vmem>>, vector<1x128xf32>
    %13 = vector.broadcast %12 : vector<1x128xf32> to vector<512x128xf32>
    %14 = arith.addf %11, %13 : vector<512x128xf32>
    %cst_11 = arith.constant 0.000000e+00 : f32
    %15 = vector.broadcast %cst_11 : f32 to vector<512x128xf32>
    %16 = arith.subf %15, %14 : vector<512x128xf32>
    %17 = math.exp %16 : vector<512x128xf32>
    %cst_12 = arith.constant 1.000000e+00 : f32
    %18 = vector.broadcast %cst_12 : f32 to vector<512x128xf32>
    %19 = arith.addf %18, %17 : vector<512x128xf32>
    %20 = tpu.reciprocal %19 {approx = true} : vector<512x128xf32> -> vector<512x128xf32>
    %21 = arith.mulf %14, %20 : vector<512x128xf32>
    %c0_13 = arith.constant 0 : index
    %c0_14 = arith.constant 0 : index
    %22 = vector.load %arg6[%c0_13, %c0_14] : memref<512x128xf32, #tpu.memory_space<vmem>>, vector<512x128xf32>
    tpu.vector_store %arg6[%c0_13, %c0_14], %21 {strides = array<i32>} : memref<512x128xf32, #tpu.memory_space<vmem>>, vector<512x128xf32>,
    return
  }
  func.func @transform_0(%arg0: i32) -> (i32, i32) {
    %c0_i32 = arith.constant 0 : i32
    %c0_i32_0 = arith.constant 0 : i32
    return %arg0, %c0_i32 : i32, i32
  }
  func.func @transform_1(%arg0: i32) -> (i32, i32) {
    %c0_i32 = arith.constant 0 : i32
    %c0_i32_0 = arith.constant 0 : i32
    return %arg0, %c0_i32 : i32, i32
  }
  func.func @transform_2(%arg0: i32) -> (i32, i32) {
    %c0_i32 = arith.constant 0 : i32
    %c0_i32_0 = arith.constant 0 : i32
    %c0_i32_1 = arith.constant 0 : i32
    return %c0_i32, %c0_i32_0 : i32, i32
  }
  func.func @transform_3(%arg0: i32) -> (i32, i32) {
    %c0_i32 = arith.constant 0 : i32
    %c0_i32_0 = arith.constant 0 : i32
    %c0_i32_1 = arith.constant 0 : i32
    return %c0_i32, %c0_i32_0 : i32, i32
  }
  func.func @transform_4(%arg0: i32) -> (i32, i32) {
    %c0_i32 = arith.constant 0 : i32
    %c0_i32_0 = arith.constant 0 : i32
    %c0_i32_1 = arith.constant 0 : i32
    return %c0_i32, %c0_i32_0 : i32, i32
  }
  func.func @transform_5(%arg0: i32) -> (i32, i32) {
    %c0_i32 = arith.constant 0 : i32
    %c0_i32_0 = arith.constant 0 : i32
    return %arg0, %c0_i32 : i32, i32
  }
}

</mosaic_0001>

<bundles_post_ra>
// kernel: c3_forward.5
= control target key start
LH: loop header
LB: loop body
LE: loop exit
PB: predicated region body
PF: predicated region fallthrough
CT: control target
= control target key end

     0   :  { %s2922_s2 = inlined_call_operand.vmem [shape: f32[256,128], index: 2, kind: input, shape index: {}]   ;;  %s2923_s1 = inlined_call_operand.vmem [shape: bf16[512,128], index: 1, kind: input, shape index: {}]   ;;  %s2924_s0 = inlined_call_operand.vmem [shape: bf16[512,128], index: 0, kind: input, shape index: {}]   ;;  %s2925_s3 = inlined_call_operand.vmem [shape: f32[1,128], index: 3, kind: input, shape index: {}]   ;;  %s2926_s4 = inlined_call_operand.vmem [shape: f32[1,128], index: 4, kind: input, shape index: {}]   ;;  %s2927_s5 = inlined_call_operand.vmem [shape: f32[512,128], index: 5, kind: output, shape index: {}]  }
   0x1   :  { %v307_v0 = vld [vmem:[%s2922_s2 + $0xf8] sm:$0xff]  ;;  %v306_v2 = vld [vmem:[%s2922_s2 + $0xf0] sm:$0xff]  ;;  %v305_v4 = vld [vmem:[%s2922_s2 + $0xe8] sm:$0xff] }
   0x2   :  { %v163_v1 = vld [vmem:[%s2922_s2 + $0x78] sm:$0xff]  ;;  %308 = vmatpush.msra.mxu0 %v307_v0  ;;  %1632 = vmatpush.msra.mxu2 %v307_v0  ;;  %v162_v3 = vld [vmem:[%s2922_s2 + $0x70] sm:$0xff]  ;;  %v161_v5 = vld [vmem:[%s2922_s2 + $0x68] sm:$0xff] }
   0x3   :  { %517 = vmatpush.msra.mxu1 %v163_v1  ;;  %1648 = vmatpush.msra.mxu3 %v163_v1  ;;  %v304_v6 = vld [vmem:[%s2922_s2 + $0xe0] sm:$0xff]  ;;  %v303_v8 = vld [vmem:[%s2922_s2 + $0xd8] sm:$0xff]  ;;  %v302_v10 = vld [vmem:[%s2922_s2 + $0xd0] sm:$0xff] }
   0x4   :  { %309 = vmatpush.msra.mxu0 %v306_v2  ;;  %1633 = vmatpush.msra.mxu2 %v306_v2  ;;  %v160_v7 = vld [vmem:[%s2922_s2 + $0x60] sm:$0xff]  ;;  %v159_v9 = vld [vmem:[%s2922_s2 + $0x58] sm:$0xff]  ;;  %v158_v11 = vld [vmem:[%s2922_s2 + $0x50] sm:$0xff] }
   0x5   :  { %518 = vmatpush.msra.mxu1 %v162_v3  ;;  %1649 = vmatpush.msra.mxu3 %v162_v3  ;;  %v301_v12 = vld [vmem:[%s2922_s2 + $0xc8] sm:$0xff]  ;;  %v300_v14 = vld [vmem:[%s2922_s2 + $0xc0] sm:$0xff]  ;;  %v299_v16 = vld [vmem:[%s2922_s2 + $0xb8] sm:$0xff] }
   0x6   :  { %310 = vmatpush.msra.mxu0 %v305_v4  ;;  %1634 = vmatpush.msra.mxu2 %v305_v4  ;;  %v157_v13 = vld [vmem:[%s2922_s2 + $0x48] sm:$0xff]  ;;  %v156_v15 = vld [vmem:[%s2922_s2 + $0x40] sm:$0xff]  ;;  %v155_v17 = vld [vmem:[%s2922_s2 + $0x38] sm:$0xff] }
   0x7   :  { %519 = vmatpush.msra.mxu1 %v161_v5  ;;  %1650 = vmatpush.msra.mxu3 %v161_v5  ;;  %v298_v18 = vld [vmem:[%s2922_s2 + $0xb0] sm:$0xff]  ;;  %v297_v20 = vld [vmem:[%s2922_s2 + $0xa8] sm:$0xff]  ;;  %v296_v22 = vld [vmem:[%s2922_s2 + $0xa0] sm:$0xff] }
   0x8   :  { %311 = vmatpush.msra.mxu0 %v304_v6  ;;  %1635 = vmatpush.msra.mxu2 %v304_v6  ;;  %v154_v19 = vld [vmem:[%s2922_s2 + $0x30] sm:$0xff]  ;;  %v153_v21 = vld [vmem:[%s2922_s2 + $0x28] sm:$0xff]  ;;  %v152_v23 = vld [vmem:[%s2922_s2 + $0x20] sm:$0xff] }
   0x9   :  { %520 = vmatpush.msra.mxu1 %v160_v7  ;;  %1651 = vmatpush.msra.mxu3 %v160_v7  ;;  %v295_v24 = vld [vmem:[%s2922_s2 + $0x98] sm:$0xff]  ;;  %v294_v26 = vld [vmem:[%s2922_s2 + $0x90] sm:$0xff]  ;;  %v293_v28 = vld [vmem:[%s2922_s2 + $0x88] sm:$0xff] }
   0xa   :  { %312 = vmatpush.msra.mxu0 %v303_v8  ;;  %1636 = vmatpush.msra.mxu2 %v303_v8  ;;  %v151_v25 = vld [vmem:[%s2922_s2 + $0x18] sm:$0xff]  ;;  %v150_v27 = vld [vmem:[%s2922_s2 + $0x10] sm:$0xff]  ;;  %v1443_v29 = vld [vmem:[%s2923_s1] sm:$0xff]  }
   0xb   :  { %521 = vmatpush.msra.mxu1 %v159_v9  ;;  %1652 = vmatpush.msra.mxu3 %v159_v9  ;;  %v1616_v30 = vld [vmem:[%s2923_s1 + $0x80] sm:$0xff]   ;;  %v149_v31 = vld [vmem:[%s2922_s2 + $0x8] sm:$0xff]  ;;  %v1444_v36 = vunpack.c.l.bf16 %v1443_v29  ;;  %v1445_v40 = vunpack.c.h.bf16 %v1443_v29  ;;  %v1602_v56 = vld [vmem:[%s2923_s1 + $0x10] sm:$0xff]  }
   0xc   :  { %313 = vmatpush.msra.mxu0 %v302_v10  ;;  %1637 = vmatpush.msra.mxu2 %v302_v10  ;;  %v1315_v32 = vld [vmem:[%s2924_s0] sm:$0xff]   ;;  %v1508_v37 = vunpack.c.l.bf16 %v1616_v30  ;;  %v1509_v41 = vunpack.c.h.bf16 %v1616_v30  ;;  %v1601_v44 = vld [vmem:[%s2923_s1 + $0x8] sm:$0xff]   ;;  %v1618_v57 = vld [vmem:[%s2923_s1 + $0x90] sm:$0xff]   ;;  %v1452_v60 = vunpack.c.l.bf16 %v1602_v56  ;;  %v1453_v0 = vunpack.c.h.bf16 %v1602_v56 }
   0xd   :  { %522 = vmatpush.msra.mxu1 %v158_v11  ;;  %1653 = vmatpush.msra.mxu3 %v158_v11  ;;  %v1585_v33 = vld [vmem:[%s2924_s0 + $0x80] sm:$0xff]   ;;  %v1316_v38 = vunpack.c.l.bf16 %v1315_v32  ;;  %v1317_v42 = vunpack.c.h.bf16 %v1315_v32  ;;  %v1617_v45 = vld [vmem:[%s2923_s1 + $0x88] sm:$0xff]   ;;  %v1448_v48 = vunpack.c.l.bf16 %v1601_v44  ;;  %v1449_v52 = vunpack.c.h.bf16 %v1601_v44  ;;  %v1571_v58 = vld [vmem:[%s2924_s0 + $0x10] sm:$0xff]  }
   0xe   :  { %314 = vmatpush.msra.mxu0 %v301_v12  ;;  %1638 = vmatpush.msra.mxu2 %v301_v12  ;;  %v292_v34 = vld [vmem:[%s2922_s2 + $0x80] sm:$0xff]  ;;  %v1380_v39 = vunpack.c.l.bf16 %v1585_v33  ;;  %v1381_v43 = vunpack.c.h.bf16 %v1585_v33  ;;  %v1570_v46 = vld [vmem:[%s2924_s0 + $0x8] sm:$0xff]   ;;  %v1512_v49 = vunpack.c.l.bf16 %v1617_v45  ;;  %v1513_v53 = vunpack.c.h.bf16 %v1617_v45  ;;  %v1587_v59 = vld [vmem:[%s2924_s0 + $0x90] sm:$0xff]  }
   0xf   :  { %523 = vmatpush.msra.mxu1 %v157_v13  ;;  %1654 = vmatpush.msra.mxu3 %v157_v13  ;;  %v148_v35 = vld [vmem:[%s2922_s2] sm:$0xff]  ;;  %v1586_v47 = vld [vmem:[%s2924_s0 + $0x88] sm:$0xff]   ;;  %v1320_v50 = vunpack.c.l.bf16 %v1570_v46  ;;  %v1321_v54 = vunpack.c.h.bf16 %v1570_v46  ;;  %v1516_v61 = vunpack.c.l.bf16 %v1618_v57  ;;  %v1324_v62 = vunpack.c.l.bf16 %v1571_v58  ;;  %v1603_v4 = vld [vmem:[%s2923_s1 + $0x18] sm:$0xff]  }
  0x10   :  { %315 = vmatpush.msra.mxu0 %v300_v14  ;;  %1639 = vmatpush.msra.mxu2 %v300_v14  ;;  %v1384_v51 = vunpack.c.l.bf16 %v1586_v47  ;;  %v1385_v55 = vunpack.c.h.bf16 %v1586_v47  ;;  %v1388_v63 = vunpack.c.l.bf16 %v1587_v59  ;;  %v1517_v1 = vunpack.c.h.bf16 %v1618_v57  ;;  %v1619_v5 = vld [vmem:[%s2923_s1 + $0x98] sm:$0xff]   ;;  %v1621_v29 = vld [vmem:[%s2923_s1 + $0xa8] sm:$0xff]  }
  0x11   :  { %524 = vmatpush.msra.mxu1 %v156_v15  ;;  %1655 = vmatpush.msra.mxu3 %v156_v15  ;;  %v1325_v2 = vunpack.c.h.bf16 %v1571_v58  ;;  %v1389_v3 = vunpack.c.h.bf16 %v1587_v59  ;;  %v1572_v6 = vld [vmem:[%s2924_s0 + $0x18] sm:$0xff]   ;;  %v1456_v8 = vunpack.c.l.bf16 %v1603_v4  ;;  %v1520_v9 = vunpack.c.l.bf16 %v1619_v5  ;;  %v1574_v30 = vld [vmem:[%s2924_s0 + $0x28] sm:$0xff]  }
  0x12   :  { %316 = vmatpush.msra.mxu0 %v299_v16  ;;  %1640 = vmatpush.msra.mxu2 %v299_v16  ;;  %v1588_v7 = vld [vmem:[%s2924_s0 + $0x98] sm:$0xff]   ;;  %v1328_v10 = vunpack.c.l.bf16 %v1572_v6  ;;  %v1457_v12 = vunpack.c.h.bf16 %v1603_v4  ;;  %v1521_v13 = vunpack.c.h.bf16 %v1619_v5  ;;  %v1329_v14 = vunpack.c.h.bf16 %v1572_v6  ;;  %v1604_v16 = vld [vmem:[%s2923_s1 + $0x20] sm:$0xff]  }
  0x13   :  { %525 = vmatpush.msra.mxu1 %v155_v17  ;;  %1656 = vmatpush.msra.mxu3 %v155_v17  ;;  %v1392_v11 = vunpack.c.l.bf16 %v1588_v7  ;;  %v1393_v15 = vunpack.c.h.bf16 %v1588_v7  ;;  %v1620_v17 = vld [vmem:[%s2923_s1 + $0xa0] sm:$0xff]   ;;  %v1528_v33 = vunpack.c.l.bf16 %v1621_v29 }
  0x14   :  { %317 = vmatpush.msra.mxu0 %v298_v18  ;;  %1641 = vmatpush.msra.mxu2 %v298_v18  ;;  %v1573_v18 = vld [vmem:[%s2924_s0 + $0x20] sm:$0xff]  }
  0x15   :  { %526 = vmatpush.msra.mxu1 %v154_v19  ;;  %1657 = vmatpush.msra.mxu3 %v154_v19  ;;  %v1589_v19 = vld [vmem:[%s2924_s0 + $0xa0] sm:$0xff]  }
  0x16   :  { %318 = vmatpush.msra.mxu0 %v297_v20  ;;  %1642 = vmatpush.msra.mxu2 %v297_v20  ;;  %v1460_v20 = vunpack.c.l.bf16 %v1604_v16  ;;  %v2161_v7 = vld [vmem:[%s2925_s3] ss:$0 sm:$0xff] }
  0x17   :  { %527 = vmatpush.msra.mxu1 %v153_v21  ;;  %1658 = vmatpush.msra.mxu3 %v153_v21  ;;  %v1524_v21 = vunpack.c.l.bf16 %v1620_v17 }
  0x18   :  { %319 = vmatpush.msra.mxu0 %v296_v22  ;;  %1643 = vmatpush.msra.mxu2 %v296_v22  ;;  %v1332_v22 = vunpack.c.l.bf16 %v1573_v18 }
  0x19   :  { %528 = vmatpush.msra.mxu1 %v152_v23  ;;  %1659 = vmatpush.msra.mxu3 %v152_v23  ;;  %v1396_v23 = vunpack.c.l.bf16 %v1589_v19 }
  0x1a   :  { %320 = vmatpush.msra.mxu0 %v295_v24  ;;  %1644 = vmatpush.msra.mxu2 %v295_v24  ;;  %v1461_v24 = vunpack.c.h.bf16 %v1604_v16 }
  0x1b   :  { %529 = vmatpush.msra.mxu1 %v151_v25  ;;  %1660 = vmatpush.msra.mxu3 %v151_v25  ;;  %v1525_v25 = vunpack.c.h.bf16 %v1620_v17 }
  0x1c   :  { %321 = vmatpush.msra.mxu0 %v294_v26  ;;  %1645 = vmatpush.msra.mxu2 %v294_v26  ;;  %v1333_v26 = vunpack.c.h.bf16 %v1573_v18 }
  0x1d   :  { %530 = vmatpush.msra.mxu1 %v150_v27  ;;  %1661 = vmatpush.msra.mxu3 %v150_v27  ;;  %v1397_v27 = vunpack.c.h.bf16 %v1589_v19 }
  0x1e   :  { %322 = vmatpush.msra.mxu0 %v293_v28  ;;  %1646 = vmatpush.msra.mxu2 %v293_v28  ;;  %v1605_v28 = vld [vmem:[%s2923_s1 + $0x28] sm:$0xff]  }
  0x1f   :  { %531 = vmatpush.msra.mxu1 %v149_v31  ;;  %1662 = vmatpush.msra.mxu3 %v149_v31  ;;  %v1590_v31 = vld [vmem:[%s2924_s0 + $0xa8] sm:$0xff]   ;;  %v1464_v32 = vunpack.c.l.bf16 %v1605_v28 }
  0x20   :  { %323 = vmatpush.msra.mxu0 %v292_v34  ;;  %1647 = vmatpush.msra.mxu2 %v292_v34  ;;  %v1336_v34 = vunpack.c.l.bf16 %v1574_v30 }
  0x21   :  { %532 = vmatpush.msra.mxu1 %v148_v35  ;;  %1663 = vmatpush.msra.mxu3 %v148_v35  ;;  %v1400_v35 = vunpack.c.l.bf16 %v1590_v31 }
  0x22   :  { %324 = vmatmul.f32.vlgmr.msra.gmra.mxu0 %v1444_v36  ;;  %420 = vmatmul.f32.vlgmr.msra.gmra.mxu2 %v1508_v37  ;;  %v1465_v36 = vunpack.c.h.bf16 %v1605_v28  ;;  %v1529_v37 = vunpack.c.h.bf16 %v1621_v29 }
  0x23   :  { %533 = vmatmul.f32.vlgmr.msra.gmra.mxu1 %v1316_v38  ;;  %629 = vmatmul.f32.vlgmr.msra.gmra.mxu3 %v1380_v39  ;;  %v1337_v38 = vunpack.c.h.bf16 %v1574_v30  ;;  %v1401_v39 = vunpack.c.h.bf16 %v1590_v31  ;;  %v1609_v30 = vld [vmem:[%s2923_s1 + $0x48] sm:$0xff]  }
  0x24   :  { %v1625_v31 = vld [vmem:[%s2923_s1 + $0xc8] sm:$0xff]  }
  0x2a   :  { %327 = vmatmul.f32.gmra.mxu0 %v1445_v40  ;;  %423 = vmatmul.f32.gmra.mxu2 %v1509_v41  ;;  %v1606_v40 = vld [vmem:[%s2923_s1 + $0x30] sm:$0xff]  }
  0x2b   :  { %536 = vmatmul.f32.gmra.mxu1 %v1317_v42  ;;  %632 = vmatmul.f32.gmra.mxu3 %v1381_v43  ;;  %v1622_v41 = vld [vmem:[%s2923_s1 + $0xb0] sm:$0xff]   ;;  %v1468_v44 = vunpack.c.l.bf16 %v1606_v40 }
  0x2c   :  { %v1575_v42 = vld [vmem:[%s2924_s0 + $0x30] sm:$0xff]   ;;  %v1532_v45 = vunpack.c.l.bf16 %v1622_v41 }
  0x2d   :  { %v1591_v43 = vld [vmem:[%s2924_s0 + $0xb0] sm:$0xff]   ;;  %v1340_v46 = vunpack.c.l.bf16 %v1575_v42 }
  0x2e   :  { %v1404_v47 = vunpack.c.l.bf16 %v1591_v43 }
  0x32   :  { %330 = vmatmul.f32.gmra.mxu0 %v1448_v48  ;;  %426 = vmatmul.f32.gmra.mxu2 %v1512_v49  ;;  %v1469_v48 = vunpack.c.h.bf16 %v1606_v40  ;;  %v1533_v49 = vunpack.c.h.bf16 %v1622_v41 }
  0x33   :  { %539 = vmatmul.f32.gmra.mxu1 %v1320_v50  ;;  %635 = vmatmul.f32.gmra.mxu3 %v1384_v51  ;;  %v1341_v50 = vunpack.c.h.bf16 %v1575_v42  ;;  %v1405_v51 = vunpack.c.h.bf16 %v1591_v43 }
  0x3a   :  { %333 = vmatmul.f32.gmra.mxu0 %v1449_v52  ;;  %429 = vmatmul.f32.gmra.mxu2 %v1513_v53  ;;  %v1607_v52 = vld [vmem:[%s2923_s1 + $0x38] sm:$0xff]  }
  0x3b   :  { %542 = vmatmul.f32.gmra.mxu1 %v1321_v54  ;;  %638 = vmatmul.f32.gmra.mxu3 %v1385_v55  ;;  %v1623_v53 = vld [vmem:[%s2923_s1 + $0xb8] sm:$0xff]   ;;  %v1472_v56 = vunpack.c.l.bf16 %v1607_v52 }
  0x3c   :  { %v1576_v54 = vld [vmem:[%s2924_s0 + $0x38] sm:$0xff]   ;;  %v1536_v57 = vunpack.c.l.bf16 %v1623_v53 }
  0x3d   :  { %v1592_v55 = vld [vmem:[%s2924_s0 + $0xb8] sm:$0xff]   ;;  %v1344_v58 = vunpack.c.l.bf16 %v1576_v54 }
  0x3e   :  { %v1408_v59 = vunpack.c.l.bf16 %v1592_v55 }
  0x42   :  { %336 = vmatmul.f32.gmra.mxu0 %v1452_v60  ;;  %432 = vmatmul.f32.gmra.mxu2 %v1516_v61  ;;  %v1473_v60 = vunpack.c.h.bf16 %v1607_v52  ;;  %v1537_v61 = vunpack.c.h.bf16 %v1623_v53 }
  0x43   :  { %545 = vmatmul.f32.gmra.mxu1 %v1324_v62  ;;  %641 = vmatmul.f32.gmra.mxu3 %v1388_v63  ;;  %v1345_v62 = vunpack.c.h.bf16 %v1576_v54  ;;  %v1409_v63 = vunpack.c.h.bf16 %v1592_v55 }
  0x4a   :  { %339 = vmatmul.f32.gmra.mxu0 %v1453_v0  ;;  %435 = vmatmul.f32.gmra.mxu2 %v1517_v1  ;;  %v1608_v0 = vld [vmem:[%s2923_s1 + $0x40] sm:$0xff]  }
  0x4b   :  { %548 = vmatmul.f32.gmra.mxu1 %v1325_v2  ;;  %644 = vmatmul.f32.gmra.mxu3 %v1389_v3  ;;  %v1624_v1 = vld [vmem:[%s2923_s1 + $0xc0] sm:$0xff]   ;;  %v1476_v4 = vunpack.c.l.bf16 %v1608_v0  ;;  %v1477_v17 = vunpack.c.h.bf16 %v1608_v0 }
  0x4c   :  { %v1577_v2 = vld [vmem:[%s2924_s0 + $0x40] sm:$0xff]   ;;  %v1540_v5 = vunpack.c.l.bf16 %v1624_v1  ;;  %v1541_v18 = vunpack.c.h.bf16 %v1624_v1 }
  0x4d   :  { %v1593_v3 = vld [vmem:[%s2924_s0 + $0xc0] sm:$0xff]  }
  0x52   :  { %342 = vmatmul.f32.gmra.mxu0 %v1456_v8  ;;  %438 = vmatmul.f32.gmra.mxu2 %v1520_v9  ;;  %v1348_v8 = vunpack.c.l.bf16 %v1577_v2  ;;  %v1412_v9 = vunpack.c.l.bf16 %v1593_v3 }
  0x53   :  { %551 = vmatmul.f32.gmra.mxu1 %v1328_v10  ;;  %647 = vmatmul.f32.gmra.mxu3 %v1392_v11 }
  0x5a   :  { %345 = vmatmul.f32.gmra.mxu0 %v1457_v12  ;;  %441 = vmatmul.f32.gmra.mxu2 %v1521_v13  ;;  %v2166_v12 = vld [vmem:[%s2926_s4] ss:$0 sm:$0xff] }
  0x5b   :  { %554 = vmatmul.f32.gmra.mxu1 %v1329_v14  ;;  %650 = vmatmul.f32.gmra.mxu3 %v1393_v15 }
  0x62   :  { %348 = vmatmul.f32.gmra.mxu0 %v1460_v20  ;;  %444 = vmatmul.f32.gmra.mxu2 %v1524_v21 }
  0x63   :  { %557 = vmatmul.f32.gmra.mxu1 %v1332_v22  ;;  %653 = vmatmul.f32.gmra.mxu3 %v1396_v23  ;;  %v1349_v22 = vunpack.c.h.bf16 %v1577_v2  ;;  %v1413_v23 = vunpack.c.h.bf16 %v1593_v3 }
  0x6a   :  { %351 = vmatmul.f32.gmra.mxu0 %v1461_v24  ;;  %447 = vmatmul.f32.gmra.mxu2 %v1525_v25 }
  0x6b   :  { %560 = vmatmul.f32.gmra.mxu1 %v1333_v26  ;;  %656 = vmatmul.f32.gmra.mxu3 %v1397_v27 }
  0x72   :  { %354 = vmatmul.f32.gmra.mxu0 %v1464_v32  ;;  %450 = vmatmul.f32.gmra.mxu2 %v1528_v33  ;;  %v1578_v32 = vld [vmem:[%s2924_s0 + $0x48] sm:$0xff]  }
  0x73   :  { %563 = vmatmul.f32.gmra.mxu1 %v1336_v34  ;;  %659 = vmatmul.f32.gmra.mxu3 %v1400_v35  ;;  %v1594_v33 = vld [vmem:[%s2924_s0 + $0xc8] sm:$0xff]   ;;  %v1352_v40 = vunpack.c.l.bf16 %v1578_v32 }
  0x74   :  { %v1417_v2 = vunpack.c.h.bf16 %v1594_v33 }
  0x7a   :  { %357 = vmatmul.f32.gmra.mxu0 %v1465_v36  ;;  %453 = vmatmul.f32.gmra.mxu2 %v1529_v37 }
  0x7b   :  { %566 = vmatmul.f32.gmra.mxu1 %v1337_v38  ;;  %662 = vmatmul.f32.gmra.mxu3 %v1401_v39  ;;  %v1480_v38 = vunpack.c.l.bf16 %v1609_v30  ;;  %v1544_v39 = vunpack.c.l.bf16 %v1625_v31 }
  0x82   :  { %360 = vmatmul.f32.gmra.mxu0 %v1468_v44  ;;  %456 = vmatmul.f32.gmra.mxu2 %v1532_v45  ;;  %v1416_v45 = vunpack.c.l.bf16 %v1594_v33 }
  0x83   :  { %569 = vmatmul.f32.gmra.mxu1 %v1340_v46  ;;  %665 = vmatmul.f32.gmra.mxu3 %v1404_v47 }
  0x8a   :  { %363 = vmatmul.f32.gmra.mxu0 %v1469_v48  ;;  %459 = vmatmul.f32.gmra.mxu2 %v1533_v49 }
  0x8b   :  { %572 = vmatmul.f32.gmra.mxu1 %v1341_v50  ;;  %668 = vmatmul.f32.gmra.mxu3 %v1405_v51 }
  0x92   :  { %366 = vmatmul.f32.gmra.mxu0 %v1472_v56  ;;  %462 = vmatmul.f32.gmra.mxu2 %v1536_v57 }
  0x93   :  { %575 = vmatmul.f32.gmra.mxu1 %v1344_v58  ;;  %671 = vmatmul.f32.gmra.mxu3 %v1408_v59  ;;  %v1481_v58 = vunpack.c.h.bf16 %v1609_v30  ;;  %v1545_v59 = vunpack.c.h.bf16 %v1625_v31 }
  0x9a   :  { %369 = vmatmul.f32.gmra.mxu0 %v1473_v60  ;;  %465 = vmatmul.f32.gmra.mxu2 %v1537_v61  ;;  %v1353_v60 = vunpack.c.h.bf16 %v1578_v32 }
  0x9b   :  { %578 = vmatmul.f32.gmra.mxu1 %v1345_v62  ;;  %674 = vmatmul.f32.gmra.mxu3 %v1409_v63 }
  0x9f   :  { %v325_v6 = vpop.f32.mrf.mxu0 }
  0xa0   :  { %v534_v10 = vpop.f32.mrf.mxu1 }
  0xa1   :  { %v535_v11 = vadd.f32 %v534_v10, %v325_v6 }
  0xa2   :  { %372 = vmatmul.f32.gmra.mxu0 %v1476_v4  ;;  %468 = vmatmul.f32.gmra.mxu2 %v1540_v5 }
  0xa3   :  { %v730_v13 = vmul.f32 %v2161_v7, %v535_v11  ;;  %581 = vmatmul.f32.gmra.mxu1 %v1348_v8  ;;  %677 = vmatmul.f32.gmra.mxu3 %v1412_v9 }
  0xa5   :  { %v2170_v14 = vadd.f32 %v2166_v12, %v730_v13  ;;  %v421_v15 = vpop.f32.mrf.mxu2 }
  0xa6   :  { %v630_v16 = vpop.f32.mrf.mxu3 }
  0xa7   :  { %v862_v19 = vsub.f32 0.0, %v2170_v14  ;;  %v631_v20 = vadd.f32 %v630_v16, %v421_v15  ;;  %v328_v21 = vpop.f32.mrf.mxu0 }
  0xa8   :  { %v537_v24 = vpop.f32.mrf.mxu1 }
  0xa9   :  { %v926_v25 = vmul.f32 1.442695, %v862_v19  ;;  %v762_v26 = vmul.f32 %v2161_v7, %v631_v20  ;;  %v538_v27 = vadd.f32 %v537_v24, %v328_v21  ;;  %v2229_v19 = vld [vmem:[%s2924_s0 + $0xd0] sm:$0xff]  }
  0xaa   :  { %375 = vmatmul.f32.gmra.mxu0 %v1477_v17  ;;  %471 = vmatmul.f32.gmra.mxu2 %v1541_v18  ;;  %v2214_v17 = vld [vmem:[%s2923_s1 + $0x50] sm:$0xff]   ;;  %v1420_v33 = vunpack.c.l.bf16 %v2229_v19 }
  0xab   :  { %1666 = vpow2.f32 %v926_v25  ;;  %v2175_v28 = vadd.f32 %v2166_v12, %v762_v26  ;;  %v731_v29 = vmul.f32 %v2161_v7, %v538_v27  ;;  %584 = vmatmul.f32.gmra.mxu1 %v1349_v22  ;;  %680 = vmatmul.f32.gmra.mxu3 %v1413_v23  ;;  %v2219_v18 = vld [vmem:[%s2923_s1 + $0xd0] sm:$0xff]   ;;  %v1484_v24 = vunpack.c.l.bf16 %v2214_v17 }
  0xac   :  { %v1548_v25 = vunpack.c.l.bf16 %v2219_v18 }
  0xad   :  { %v894_v34 = vsub.f32 0.0, %v2175_v28  ;;  %v2192_v35 = vadd.f32 %v2166_v12, %v731_v29  ;;  %v424_v36 = vpop.f32.mrf.mxu2 }
  0xae   :  { %v633_v37 = vpop.f32.mrf.mxu3 }
  0xaf   :  { %v990_v41 = vmul.f32 1.442695, %v894_v34  ;;  %v863_v42 = vsub.f32 0.0, %v2192_v35  ;;  %v634_v43 = vadd.f32 %v633_v37, %v424_v36  ;;  %v331_v44 = vpop.f32.mrf.mxu0 }
  0xb0   :  { %v540_v46 = vpop.f32.mrf.mxu1 }
  0xb1   :  { %v1667_v47 = vpop.eup %1666  ;;  %1668 = vpow2.f32 %v990_v41  ;;  %v928_v48 = vmul.f32 1.442695, %v863_v42  ;;  %v763_v49 = vmul.f32 %v2161_v7, %v634_v43  ;;  %v541_v50 = vadd.f32 %v540_v46, %v331_v44 }
  0xb2   :  { %v1054_v51 = vadd.f32 1.0, %v1667_v47  ;;  %378 = vmatmul.f32.gmra.mxu0 %v1480_v38  ;;  %474 = vmatmul.f32.gmra.mxu2 %v1544_v39 }
  0xb3   :  { %1670 = vpow2.f32 %v928_v48  ;;  %v2197_v52 = vadd.f32 %v2166_v12, %v763_v49  ;;  %v732_v53 = vmul.f32 %v2161_v7, %v541_v50  ;;  %587 = vmatmul.f32.gmra.mxu1 %v1352_v40  ;;  %683 = vmatmul.f32.gmra.mxu3 %v1416_v45  ;;  %v1485_v50 = vunpack.c.h.bf16 %v2214_v17 }
  0xb4   :  { %1672 = vrcp.f32 %v1054_v51  ;;  %v1549_v51 = vunpack.c.h.bf16 %v2219_v18 }
  0xb5   :  { %v895_v54 = vsub.f32 0.0, %v2197_v52  ;;  %v2202_v55 = vadd.f32 %v2166_v12, %v732_v53  ;;  %v427_v56 = vpop.f32.mrf.mxu2 }
  0xb6   :  { %v636_v57 = vpop.f32.mrf.mxu3 }
  0xb7   :  { %v1669_v61 = vpop.eup %1668  ;;  %v992_v62 = vmul.f32 1.442695, %v895_v54  ;;  %v864_v63 = vsub.f32 0.0, %v2202_v55  ;;  %v637_v0 = vadd.f32 %v636_v57, %v427_v56  ;;  %v334_v1 = vpop.f32.mrf.mxu0 }
  0xb8   :  { %v1086_v3 = vadd.f32 1.0, %v1669_v61  ;;  %v543_v4 = vpop.f32.mrf.mxu1 }
  0xb9   :  { %v1671_v5 = vpop.eup %1670  ;;  %1674 = vpow2.f32 %v992_v62  ;;  %v930_v6 = vmul.f32 1.442695, %v864_v63  ;;  %v764_v8 = vmul.f32 %v2161_v7, %v637_v0  ;;  %v544_v9 = vadd.f32 %v543_v4, %v334_v1 }
  0xba   :  { %v1673_v10 = vpop.eup %1672  ;;  %1676 = vrcp.f32 %v1086_v3  ;;  %v1055_v11 = vadd.f32 1.0, %v1671_v5  ;;  %381 = vmatmul.f32.gmra.mxu0 %v1481_v58  ;;  %477 = vmatmul.f32.gmra.mxu2 %v1545_v59  ;;  %v1421_v59 = vunpack.c.h.bf16 %v2229_v19 }
  0xbb   :  { %v1182_v13 = vmul.f32 %v1673_v10, %v2170_v14  ;;  %1678 = vpow2.f32 %v930_v6  ;;  %v2208_v15 = vadd.f32 %v2166_v12, %v764_v8  ;;  %v733_v16 = vmul.f32 %v2161_v7, %v544_v9  ;;  %590 = vmatmul.f32.gmra.mxu1 %v1353_v60  ;;  %686 = vmatmul.f32.gmra.mxu3 %v1417_v2  ;;  %v2224_v14 = vld [vmem:[%s2924_s0 + $0x50] sm:$0xff]   ;;  %v2278_v10 = vld [vmem:[%s2923_s1 + $0x58] sm:$0xff]  }
  0xbc   :  { %1680 = vrcp.f32 %v1055_v11  ;;  %v1356_v26 = vunpack.c.l.bf16 %v2224_v14  ;;  %v1357_v58 = vunpack.c.h.bf16 %v2224_v14  ;;  %v2283_v11 = vld [vmem:[%s2923_s1 + $0xd8] sm:$0xff]   ;;  %v1488_v19 = vunpack.c.l.bf16 %v2278_v10 }
  0xbd   :  { %1246 = vst [vmem:[%s2927_s5] sm:$0xff] %v1182_v13  ;;  %v896_v20 = vsub.f32 0.0, %v2208_v15  ;;  %v2236_v21 = vadd.f32 %v2166_v12, %v733_v16  ;;  %v430_v22 = vpop.f32.mrf.mxu2  ;;  %v2293_v13 = vld [vmem:[%s2924_s0 + $0xd8] sm:$0xff]  }
  0xbe   :  { %v639_v23 = vpop.f32.mrf.mxu3 }
  0xbf   :  { %v1675_v27 = vpop.eup %1674  ;;  %v994_v29 = vmul.f32 1.442695, %v896_v20  ;;  %v865_v30 = vsub.f32 0.0, %v2236_v21  ;;  %v640_v31 = vadd.f32 %v639_v23, %v430_v22  ;;  %v337_v32 = vpop.f32.mrf.mxu0  ;;  %v1552_v20 = vunpack.c.l.bf16 %v2283_v11 }
  0xc0   :  { %v1677_v34 = vpop.eup %1676  ;;  %v1087_v36 = vadd.f32 1.0, %v1675_v27  ;;  %v546_v37 = vpop.f32.mrf.mxu1 }
  0xc1   :  { %v1679_v38 = vpop.eup %1678  ;;  %v1214_v39 = vmul.f32 %v1677_v34, %v2175_v28  ;;  %1682 = vpow2.f32 %v994_v29  ;;  %v932_v40 = vmul.f32 1.442695, %v865_v30  ;;  %v765_v41 = vmul.f32 %v2161_v7, %v640_v31 }
  0xc2   :  { %v1681_v42 = vpop.eup %1680  ;;  %1684 = vrcp.f32 %v1087_v36  ;;  %v1056_v43 = vadd.f32 1.0, %v1679_v38  ;;  %v547_v44 = vadd.f32 %v546_v37, %v337_v32  ;;  %384 = vmatmul.f32.gmra.mxu0 %v1484_v24  ;;  %480 = vmatmul.f32.gmra.mxu2 %v1548_v25  ;;  %v1424_v29 = vunpack.c.l.bf16 %v2293_v13 }
  0xc3   :  { %1278 = vst [vmem:[%s2927_s5 + $0x100] sm:$0xff] %v1214_v39  ;;  %v1183_v45 = vmul.f32 %v1681_v42, %v2192_v35  ;;  %1686 = vpow2.f32 %v932_v40  ;;  %v2250_v46 = vadd.f32 %v2166_v12, %v765_v41  ;;  %593 = vmatmul.f32.gmra.mxu1 %v1356_v26  ;;  %689 = vmatmul.f32.gmra.mxu3 %v1420_v33 }
  0xc4   :  { %1688 = vrcp.f32 %v1056_v43  ;;  %v734_v28 = vmul.f32 %v2161_v7, %v547_v44 }
  0xc5   :  { %1247 = vst [vmem:[%s2927_s5 + $0x8] sm:$0xff] %v1183_v45  ;;  %v897_v47 = vsub.f32 0.0, %v2250_v46  ;;  %v433_v48 = vpop.f32.mrf.mxu2 }
  0xc6   :  { %v2258_v49 = vadd.f32 %v2166_v12, %v734_v28  ;;  %v642_v35 = vpop.f32.mrf.mxu3  ;;  %v1489_v28 = vunpack.c.h.bf16 %v2278_v10 }
  0xc7   :  { %v1683_v53 = vpop.eup %1682  ;;  %v996_v54 = vmul.f32 1.442695, %v897_v47  ;;  %v643_v56 = vadd.f32 %v642_v35, %v433_v48  ;;  %v340_v57 = vpop.f32.mrf.mxu0  ;;  %v1553_v47 = vunpack.c.h.bf16 %v2283_v11 }
  0xc8   :  { %v1685_v60 = vpop.eup %1684  ;;  %v1088_v61 = vadd.f32 1.0, %v1683_v53  ;;  %v866_v62 = vsub.f32 0.0, %v2258_v49  ;;  %v549_v63 = vpop.f32.mrf.mxu1 }
  0xc9   :  { %v1687_v0 = vpop.eup %1686  ;;  %v1215_v1 = vmul.f32 %v1685_v60, %v2197_v52  ;;  %1690 = vpow2.f32 %v996_v54  ;;  %v766_v2 = vmul.f32 %v2161_v7, %v643_v56  ;;  %v550_v3 = vadd.f32 %v549_v63, %v340_v57 }
  0xca   :  { %v1689_v4 = vpop.eup %1688  ;;  %1692 = vrcp.f32 %v1088_v61  ;;  %v1057_v5 = vadd.f32 1.0, %v1687_v0  ;;  %v934_v6 = vmul.f32 1.442695, %v866_v62  ;;  %387 = vmatmul.f32.gmra.mxu0 %v1485_v50  ;;  %483 = vmatmul.f32.gmra.mxu2 %v1549_v51  ;;  %v1425_v54 = vunpack.c.h.bf16 %v2293_v13 }
  0xcb   :  { %1279 = vst [vmem:[%s2927_s5 + $0x108] sm:$0xff] %v1215_v1  ;;  %v1184_v8 = vmul.f32 %v1689_v4, %v2202_v55  ;;  %v2272_v9 = vadd.f32 %v2166_v12, %v766_v2  ;;  %v735_v52 = vmul.f32 %v2161_v7, %v550_v3  ;;  %596 = vmatmul.f32.gmra.mxu1 %v1357_v58  ;;  %v2288_v55 = vld [vmem:[%s2924_s0 + $0x58] sm:$0xff]   ;;  %v2346_v4 = vld [vmem:[%s2923_s1 + $0xe0] sm:$0xff]  }
  0xcc   :  { %692 = vmatmul.f32.gmra.mxu3 %v1421_v59  ;;  %1694 = vrcp.f32 %v1057_v5  ;;  %v1360_v22 = vunpack.c.l.bf16 %v2288_v55  ;;  %v1361_v53 = vunpack.c.h.bf16 %v2288_v55  ;;  %v2351_v5 = vld [vmem:[%s2924_s0 + $0x60] sm:$0xff]  }
  0xcd   :  { %1248 = vst [vmem:[%s2927_s5 + $0x10] sm:$0xff] %v1184_v8  ;;  %1696 = vpow2.f32 %v934_v6  ;;  %v898_v16 = vsub.f32 0.0, %v2272_v9  ;;  %v2300_v17 = vadd.f32 %v2166_v12, %v735_v52  ;;  %v436_v18 = vpop.f32.mrf.mxu2  ;;  %v2356_v8 = vld [vmem:[%s2924_s0 + $0xe0] sm:$0xff]  }
  0xce   :  { %v645_v14 = vpop.f32.mrf.mxu3 }
  0xcf   :  { %v1691_v23 = vpop.eup %1690  ;;  %v998_v24 = vmul.f32 1.442695, %v898_v16  ;;  %v867_v25 = vsub.f32 0.0, %v2300_v17  ;;  %v646_v26 = vadd.f32 %v645_v14, %v436_v18  ;;  %v343_v27 = vpop.f32.mrf.mxu0  ;;  %v1556_v18 = vunpack.c.l.bf16 %v2346_v4 }
  0xd0   :  { %v1693_v30 = vpop.eup %1692  ;;  %v1089_v31 = vadd.f32 1.0, %v1691_v23  ;;  %v552_v32 = vpop.f32.mrf.mxu1  ;;  %v1364_v14 = vunpack.c.l.bf16 %v2351_v5 }
  0xd1   :  { %v1216_v33 = vmul.f32 %v1693_v30, %v2208_v15  ;;  %1698 = vpow2.f32 %v998_v24  ;;  %v936_v34 = vmul.f32 1.442695, %v867_v25  ;;  %v767_v36 = vmul.f32 %v2161_v7, %v646_v26 }
  0xd2   :  { %v1695_v37 = vpop.eup %1694  ;;  %1700 = vrcp.f32 %v1089_v31  ;;  %v553_v38 = vadd.f32 %v552_v32, %v343_v27  ;;  %390 = vmatmul.f32.gmra.mxu0 %v1488_v19  ;;  %486 = vmatmul.f32.gmra.mxu2 %v1552_v20  ;;  %v1428_v24 = vunpack.c.l.bf16 %v2356_v8 }
  0xd3   :  { %v1697_v39 = vpop.eup %1696  ;;  %1280 = vst [vmem:[%s2927_s5 + $0x110] sm:$0xff] %v1216_v33  ;;  %v1185_v40 = vmul.f32 %v1695_v37, %v2236_v21  ;;  %1702 = vpow2.f32 %v936_v34  ;;  %v2314_v41 = vadd.f32 %v2166_v12, %v767_v36  ;;  %599 = vmatmul.f32.gmra.mxu1 %v1360_v22 }
  0xd4   :  { %695 = vmatmul.f32.gmra.mxu3 %v1424_v29  ;;  %v1058_v15 = vadd.f32 1.0, %v1697_v39  ;;  %v736_v42 = vmul.f32 %v2161_v7, %v553_v38 }
  0xd5   :  { %1249 = vst [vmem:[%s2927_s5 + $0x18] sm:$0xff] %v1185_v40  ;;  %v899_v43 = vsub.f32 0.0, %v2314_v41  ;;  %v439_v44 = vpop.f32.mrf.mxu2 }
  0xd6   :  { %1704 = vrcp.f32 %v1058_v15  ;;  %v2322_v45 = vadd.f32 %v2166_v12, %v736_v42  ;;  %v648_v21 = vpop.f32.mrf.mxu3 }
  0xd7   :  { %v1699_v48 = vpop.eup %1698  ;;  %v1000_v35 = vmul.f32 1.442695, %v899_v43  ;;  %v649_v50 = vadd.f32 %v648_v21, %v439_v44  ;;  %v346_v51 = vpop.f32.mrf.mxu0  ;;  %v1557_v43 = vunpack.c.h.bf16 %v2346_v4 }
  0xd8   :  { %v1701_v56 = vpop.eup %1700  ;;  %v1090_v57 = vadd.f32 1.0, %v1699_v48  ;;  %v868_v58 = vsub.f32 0.0, %v2322_v45  ;;  %v555_v59 = vpop.f32.mrf.mxu1  ;;  %v1365_v48 = vunpack.c.h.bf16 %v2351_v5 }
  0xd9   :  { %v1703_v60 = vpop.eup %1702  ;;  %v1217_v61 = vmul.f32 %v1701_v56, %v2250_v46  ;;  %1706 = vpow2.f32 %v1000_v35  ;;  %v768_v62 = vmul.f32 %v2161_v7, %v649_v50  ;;  %v556_v63 = vadd.f32 %v555_v59, %v346_v51  ;;  %v2341_v46 = vld [vmem:[%s2923_s1 + $0x60] sm:$0xff]  }
  0xda   :  { %1708 = vrcp.f32 %v1090_v57  ;;  %v1059_v0 = vadd.f32 1.0, %v1703_v60  ;;  %v938_v1 = vmul.f32 1.442695, %v868_v58  ;;  %393 = vmatmul.f32.gmra.mxu0 %v1489_v28  ;;  %489 = vmatmul.f32.gmra.mxu2 %v1553_v47  ;;  %v1492_v16 = vunpack.c.l.bf16 %v2341_v46 }
  0xdb   :  { %1281 = vst [vmem:[%s2927_s5 + $0x118] sm:$0xff] %v1217_v61  ;;  %v2335_v2 = vadd.f32 %v2166_v12, %v768_v62  ;;  %v737_v3 = vmul.f32 %v2161_v7, %v556_v63  ;;  %602 = vmatmul.f32.gmra.mxu1 %v1361_v53  ;;  %v1493_v42 = vunpack.c.h.bf16 %v2341_v46  ;;  %v1429_v35 = vunpack.c.h.bf16 %v2356_v8  ;;  %v2420_v46 = vld [vmem:[%s2924_s0 + $0xe8] sm:$0xff]  }
  0xdc   :  { %698 = vmatmul.f32.gmra.mxu3 %v1425_v54  ;;  %v1705_v6 = vpop.eup %1704  ;;  %1710 = vrcp.f32 %v1059_v0  ;;  %v2410_v0 = vld [vmem:[%s2923_s1 + $0xe8] sm:$0xff]  }
  0xdd   :  { %v1186_v52 = vmul.f32 %v1705_v6, %v2258_v49  ;;  %1712 = vpow2.f32 %v938_v1  ;;  %v900_v10 = vsub.f32 0.0, %v2335_v2  ;;  %v2361_v11 = vadd.f32 %v2166_v12, %v737_v3  ;;  %v442_v55 = vpop.f32.mrf.mxu2  ;;  %v2415_v1 = vld [vmem:[%s2924_s0 + $0x68] sm:$0xff]  }
  0xde   :  { %v651_v13 = vpop.f32.mrf.mxu3 }
  0xdf   :  { %v1707_v19 = vpop.eup %1706  ;;  %1250 = vst [vmem:[%s2927_s5 + $0x20] sm:$0xff] %v1186_v52  ;;  %v1002_v49 = vmul.f32 1.442695, %v900_v10  ;;  %v869_v20 = vsub.f32 0.0, %v2361_v11  ;;  %v652_v22 = vadd.f32 %v651_v13, %v442_v55  ;;  %v349_v23 = vpop.f32.mrf.mxu0  ;;  %v1560_v55 = vunpack.c.l.bf16 %v2410_v0 }
  0xe0   :  { %v1709_v25 = vpop.eup %1708  ;;  %v1091_v26 = vadd.f32 1.0, %v1707_v19  ;;  %v558_v27 = vpop.f32.mrf.mxu1  ;;  %v1368_v13 = vunpack.c.l.bf16 %v2415_v1 }
  0xe1   :  { %v1218_v29 = vmul.f32 %v1709_v25, %v2272_v9  ;;  %1714 = vpow2.f32 %v1002_v49  ;;  %v940_v30 = vmul.f32 1.442695, %v869_v20  ;;  %v769_v31 = vmul.f32 %v2161_v7, %v652_v22 }
  0xe2   :  { %v1711_v32 = vpop.eup %1710  ;;  %1716 = vrcp.f32 %v1091_v26  ;;  %v559_v33 = vadd.f32 %v558_v27, %v349_v23  ;;  %396 = vmatmul.f32.gmra.mxu0 %v1492_v16  ;;  %492 = vmatmul.f32.gmra.mxu2 %v1556_v18  ;;  %v1432_v49 = vunpack.c.l.bf16 %v2420_v46 }
  0xe3   :  { %v1713_v34 = vpop.eup %1712  ;;  %1282 = vst [vmem:[%s2927_s5 + $0x120] sm:$0xff] %v1218_v29  ;;  %v1187_v36 = vmul.f32 %v1711_v32, %v2300_v17  ;;  %1718 = vpow2.f32 %v940_v30  ;;  %v2378_v37 = vadd.f32 %v2166_v12, %v769_v31  ;;  %605 = vmatmul.f32.gmra.mxu1 %v1364_v14 }
  0xe4   :  { %701 = vmatmul.f32.gmra.mxu3 %v1428_v24  ;;  %v1060_v9 = vadd.f32 1.0, %v1713_v34  ;;  %v738_v38 = vmul.f32 %v2161_v7, %v559_v33 }
  0xe5   :  { %1251 = vst [vmem:[%s2927_s5 + $0x28] sm:$0xff] %v1187_v36  ;;  %v901_v39 = vsub.f32 0.0, %v2378_v37  ;;  %v445_v40 = vpop.f32.mrf.mxu2 }
  0xe6   :  { %1720 = vrcp.f32 %v1060_v9  ;;  %v2386_v15 = vadd.f32 %v2166_v12, %v738_v38  ;;  %v654_v17 = vpop.f32.mrf.mxu3 }
  0xe7   :  { %v1715_v44 = vpop.eup %1714  ;;  %v1004_v21 = vmul.f32 1.442695, %v901_v39  ;;  %v655_v28 = vadd.f32 %v654_v17, %v445_v40  ;;  %v352_v47 = vpop.f32.mrf.mxu0  ;;  %v1561_v39 = vunpack.c.h.bf16 %v2410_v0 }
  0xe8   :  { %v1717_v50 = vpop.eup %1716  ;;  %v1092_v51 = vadd.f32 1.0, %v1715_v44  ;;  %v870_v53 = vsub.f32 0.0, %v2386_v15  ;;  %v561_v54 = vpop.f32.mrf.mxu1  ;;  %v1369_v44 = vunpack.c.h.bf16 %v2415_v1 }
  0xe9   :  { %v1719_v56 = vpop.eup %1718  ;;  %v1219_v57 = vmul.f32 %v1717_v50, %v2314_v41  ;;  %1722 = vpow2.f32 %v1004_v21  ;;  %v770_v58 = vmul.f32 %v2161_v7, %v655_v28  ;;  %v562_v59 = vadd.f32 %v561_v54, %v352_v47  ;;  %v2405_v41 = vld [vmem:[%s2923_s1 + $0x68] sm:$0xff]  }
  0xea   :  { %1724 = vrcp.f32 %v1092_v51  ;;  %v1061_v60 = vadd.f32 1.0, %v1719_v56  ;;  %v942_v61 = vmul.f32 1.442695, %v870_v53  ;;  %399 = vmatmul.f32.gmra.mxu0 %v1493_v42  ;;  %495 = vmatmul.f32.gmra.mxu2 %v1557_v43  ;;  %v1496_v10 = vunpack.c.l.bf16 %v2405_v41 }
  0xeb   :  { %1283 = vst [vmem:[%s2927_s5 + $0x128] sm:$0xff] %v1219_v57  ;;  %v2399_v62 = vadd.f32 %v2166_v12, %v770_v58  ;;  %v739_v63 = vmul.f32 %v2161_v7, %v562_v59  ;;  %608 = vmatmul.f32.gmra.mxu1 %v1365_v48  ;;  %v1497_v38 = vunpack.c.h.bf16 %v2405_v41  ;;  %v1433_v21 = vunpack.c.h.bf16 %v2420_v46  ;;  %v2484_v41 = vld [vmem:[%s2924_s0 + $0xf0] sm:$0xff]  }
  0xec   :  { %704 = vmatmul.f32.gmra.mxu3 %v1429_v35  ;;  %v1721_v3 = vpop.eup %1720  ;;  %1726 = vrcp.f32 %v1061_v60  ;;  %v2474_v60 = vld [vmem:[%s2923_s1 + $0xf0] sm:$0xff]  }
  0xed   :  { %v1188_v4 = vmul.f32 %v1721_v3, %v2322_v45  ;;  %1728 = vpow2.f32 %v942_v61  ;;  %v902_v5 = vsub.f32 0.0, %v2399_v62  ;;  %v2425_v6 = vadd.f32 %v2166_v12, %v739_v63  ;;  %v448_v8 = vpop.f32.mrf.mxu2  ;;  %v2479_v61 = vld [vmem:[%s2924_s0 + $0x70] sm:$0xff]  }
  0xee   :  { %v657_v52 = vpop.f32.mrf.mxu3 }
  0xef   :  { %v1723_v16 = vpop.eup %1722  ;;  %1252 = vst [vmem:[%s2927_s5 + $0x30] sm:$0xff] %v1188_v4  ;;  %v1006_v45 = vmul.f32 1.442695, %v902_v5  ;;  %v871_v18 = vsub.f32 0.0, %v2425_v6  ;;  %v658_v14 = vadd.f32 %v657_v52, %v448_v8  ;;  %v355_v19 = vpop.f32.mrf.mxu0  ;;  %v1564_v8 = vunpack.c.l.bf16 %v2474_v60 }
  0xf0   :  { %v1725_v20 = vpop.eup %1724  ;;  %v1093_v22 = vadd.f32 1.0, %v1723_v16  ;;  %v564_v23 = vpop.f32.mrf.mxu1  ;;  %v1372_v52 = vunpack.c.l.bf16 %v2479_v61 }
  0xf1   :  { %v1220_v24 = vmul.f32 %v1725_v20, %v2335_v2  ;;  %1730 = vpow2.f32 %v1006_v45  ;;  %v944_v25 = vmul.f32 1.442695, %v871_v18  ;;  %v771_v26 = vmul.f32 %v2161_v7, %v658_v14 }
  0xf2   :  { %v1727_v27 = vpop.eup %1726  ;;  %1732 = vrcp.f32 %v1093_v22  ;;  %v565_v29 = vadd.f32 %v564_v23, %v355_v19  ;;  %402 = vmatmul.f32.gmra.mxu0 %v1496_v10  ;;  %498 = vmatmul.f32.gmra.mxu2 %v1560_v55  ;;  %v1436_v45 = vunpack.c.l.bf16 %v2484_v41 }
  0xf3   :  { %v1729_v30 = vpop.eup %1728  ;;  %1284 = vst [vmem:[%s2927_s5 + $0x130] sm:$0xff] %v1220_v24  ;;  %v1189_v31 = vmul.f32 %v1727_v27, %v2361_v11  ;;  %1734 = vpow2.f32 %v944_v25  ;;  %v2442_v32 = vadd.f32 %v2166_v12, %v771_v26  ;;  %611 = vmatmul.f32.gmra.mxu1 %v1368_v13 }
  0xf4   :  { %707 = vmatmul.f32.gmra.mxu3 %v1432_v49  ;;  %v1062_v2 = vadd.f32 1.0, %v1729_v30  ;;  %v740_v33 = vmul.f32 %v2161_v7, %v565_v29 }
  0xf5   :  { %1253 = vst [vmem:[%s2927_s5 + $0x38] sm:$0xff] %v1189_v31  ;;  %v903_v34 = vsub.f32 0.0, %v2442_v32  ;;  %v451_v36 = vpop.f32.mrf.mxu2 }
  0xf6   :  { %1736 = vrcp.f32 %v1062_v2  ;;  %v2450_v9 = vadd.f32 %v2166_v12, %v740_v33  ;;  %v660_v11 = vpop.f32.mrf.mxu3 }
  0xf7   :  { %v1731_v40 = vpop.eup %1730  ;;  %v1008_v17 = vmul.f32 1.442695, %v903_v34  ;;  %v661_v42 = vadd.f32 %v660_v11, %v451_v36  ;;  %v358_v43 = vpop.f32.mrf.mxu0  ;;  %v1565_v34 = vunpack.c.h.bf16 %v2474_v60 }
  0xf8   :  { %v1733_v28 = vpop.eup %1732  ;;  %v1094_v47 = vadd.f32 1.0, %v1731_v40  ;;  %v872_v48 = vsub.f32 0.0, %v2450_v9  ;;  %v567_v35 = vpop.f32.mrf.mxu1  ;;  %v1373_v40 = vunpack.c.h.bf16 %v2479_v61 }
  0xf9   :  { %v1735_v50 = vpop.eup %1734  ;;  %v1221_v51 = vmul.f32 %v1733_v28, %v2378_v37  ;;  %1738 = vpow2.f32 %v1008_v17  ;;  %v772_v53 = vmul.f32 %v2161_v7, %v661_v42  ;;  %v568_v54 = vadd.f32 %v567_v35, %v358_v43  ;;  %v2469_v37 = vld [vmem:[%s2923_s1 + $0x70] sm:$0xff]  }
  0xfa   :  { %1740 = vrcp.f32 %v1094_v47  ;;  %v1063_v56 = vadd.f32 1.0, %v1735_v50  ;;  %v946_v57 = vmul.f32 1.442695, %v872_v48  ;;  %405 = vmatmul.f32.gmra.mxu0 %v1497_v38  ;;  %501 = vmatmul.f32.gmra.mxu2 %v1561_v39  ;;  %v1500_v5 = vunpack.c.l.bf16 %v2469_v37 }
  0xfb   :  { %1285 = vst [vmem:[%s2927_s5 + $0x138] sm:$0xff] %v1221_v51  ;;  %v2463_v58 = vadd.f32 %v2166_v12, %v772_v53  ;;  %v741_v59 = vmul.f32 %v2161_v7, %v568_v54  ;;  %614 = vmatmul.f32.gmra.mxu1 %v1369_v44  ;;  %v1501_v33 = vunpack.c.h.bf16 %v2469_v37  ;;  %v1437_v17 = vunpack.c.h.bf16 %v2484_v41  ;;  %v2548_v37 = vld [vmem:[%s2924_s0 + $0xf8] sm:$0xff]  }
  0xfc   :  { %710 = vmatmul.f32.gmra.mxu3 %v1433_v21  ;;  %v1737_v63 = vpop.eup %1736  ;;  %1742 = vrcp.f32 %v1063_v56  ;;  %v2538_v56 = vld [vmem:[%s2923_s1 + $0xf8] sm:$0xff]  }
  0xfd   :  { %v1190_v0 = vmul.f32 %v1737_v63, %v2386_v15  ;;  %1744 = vpow2.f32 %v946_v57  ;;  %v904_v1 = vsub.f32 0.0, %v2463_v58  ;;  %v2489_v3 = vadd.f32 %v2166_v12, %v741_v59  ;;  %v454_v46 = vpop.f32.mrf.mxu2  ;;  %v2543_v57 = vld [vmem:[%s2924_s0 + $0x78] sm:$0xff]  }
  0xfe   :  { %v663_v4 = vpop.f32.mrf.mxu3 }
  0xff   :  { %v1739_v10 = vpop.eup %1738  ;;  %1254 = vst [vmem:[%s2927_s5 + $0x40] sm:$0xff] %v1190_v0  ;;  %v1010_v15 = vmul.f32 1.442695, %v904_v1  ;;  %v873_v55 = vsub.f32 0.0, %v2489_v3  ;;  %v664_v13 = vadd.f32 %v663_v4, %v454_v46  ;;  %v361_v16 = vpop.f32.mrf.mxu0  ;;  %v1568_v46 = vunpack.c.l.bf16 %v2538_v56 }
 0x100   :  { %v1741_v18 = vpop.eup %1740  ;;  %v1095_v14 = vadd.f32 1.0, %v1739_v10  ;;  %v570_v19 = vpop.f32.mrf.mxu1  ;;  %v1376_v4 = vunpack.c.l.bf16 %v2543_v57 }
 0x101   :  { %v1222_v49 = vmul.f32 %v1741_v18, %v2399_v62  ;;  %1746 = vpow2.f32 %v1010_v15  ;;  %v948_v20 = vmul.f32 1.442695, %v873_v55  ;;  %v773_v22 = vmul.f32 %v2161_v7, %v664_v13 }
 0x102   :  { %v1743_v23 = vpop.eup %1742  ;;  %1748 = vrcp.f32 %v1095_v14  ;;  %v571_v24 = vadd.f32 %v570_v19, %v361_v16  ;;  %408 = vmatmul.f32.gmra.mxu0 %v1500_v5  ;;  %504 = vmatmul.f32.gmra.mxu2 %v1564_v8  ;;  %v1440_v15 = vunpack.c.l.bf16 %v2548_v37 }
 0x103   :  { %v1745_v25 = vpop.eup %1744  ;;  %1286 = vst [vmem:[%s2927_s5 + $0x140] sm:$0xff] %v1222_v49  ;;  %v1191_v26 = vmul.f32 %v1743_v23, %v2425_v6  ;;  %1750 = vpow2.f32 %v948_v20  ;;  %v2506_v27 = vadd.f32 %v2166_v12, %v773_v22  ;;  %617 = vmatmul.f32.gmra.mxu1 %v1372_v52 }
 0x104   :  { %713 = vmatmul.f32.gmra.mxu3 %v1436_v45  ;;  %v1064_v62 = vadd.f32 1.0, %v1745_v25  ;;  %v742_v29 = vmul.f32 %v2161_v7, %v571_v24 }
 0x105   :  { %1255 = vst [vmem:[%s2927_s5 + $0x48] sm:$0xff] %v1191_v26  ;;  %v905_v30 = vsub.f32 0.0, %v2506_v27  ;;  %v457_v31 = vpop.f32.mrf.mxu2 }
 0x106   :  { %1752 = vrcp.f32 %v1064_v62  ;;  %v2514_v2 = vadd.f32 %v2166_v12, %v742_v29  ;;  %v666_v6 = vpop.f32.mrf.mxu3 }
 0x107   :  { %v1747_v36 = vpop.eup %1746  ;;  %v1012_v11 = vmul.f32 1.442695, %v905_v30  ;;  %v667_v38 = vadd.f32 %v666_v6, %v457_v31  ;;  %v364_v39 = vpop.f32.mrf.mxu0  ;;  %v1569_v30 = vunpack.c.h.bf16 %v2538_v56 }
 0x108   :  { %v1749_v42 = vpop.eup %1748  ;;  %v1096_v43 = vadd.f32 1.0, %v1747_v36  ;;  %v874_v44 = vsub.f32 0.0, %v2514_v2  ;;  %v573_v21 = vpop.f32.mrf.mxu1  ;;  %v1377_v36 = vunpack.c.h.bf16 %v2543_v57 }
 0x109   :  { %v1751_v28 = vpop.eup %1750  ;;  %v1223_v47 = vmul.f32 %v1749_v42, %v2442_v32  ;;  %1754 = vpow2.f32 %v1012_v11  ;;  %v774_v48 = vmul.f32 %v2161_v7, %v667_v38  ;;  %v574_v35 = vadd.f32 %v573_v21, %v364_v39  ;;  %v2533_v32 = vld [vmem:[%s2923_s1 + $0x78] sm:$0xff]  }
 0x10a   :  { %1756 = vrcp.f32 %v1096_v43  ;;  %v1065_v50 = vadd.f32 1.0, %v1751_v28  ;;  %v950_v51 = vmul.f32 1.442695, %v874_v44  ;;  %411 = vmatmul.f32.gmra.mxu0 %v1501_v33  ;;  %507 = vmatmul.f32.gmra.mxu2 %v1565_v34  ;;  %v1504_v1 = vunpack.c.l.bf16 %v2533_v32 }
 0x10b   :  { %1287 = vst [vmem:[%s2927_s5 + $0x148] sm:$0xff] %v1223_v47  ;;  %v2527_v53 = vadd.f32 %v2166_v12, %v774_v48  ;;  %v743_v54 = vmul.f32 %v2161_v7, %v574_v35  ;;  %620 = vmatmul.f32.gmra.mxu1 %v1373_v40  ;;  %v1505_v29 = vunpack.c.h.bf16 %v2533_v32  ;;  %v1441_v11 = vunpack.c.h.bf16 %v2548_v37 }
 0x10c   :  { %716 = vmatmul.f32.gmra.mxu3 %v1437_v17  ;;  %v1753_v59 = vpop.eup %1752  ;;  %1758 = vrcp.f32 %v1065_v50 }
 0x10d   :  { %v1192_v60 = vmul.f32 %v1753_v59, %v2450_v9  ;;  %1760 = vpow2.f32 %v950_v51  ;;  %v906_v61 = vsub.f32 0.0, %v2527_v53  ;;  %v2553_v63 = vadd.f32 %v2166_v12, %v743_v54  ;;  %v460_v41 = vpop.f32.mrf.mxu2 }
 0x10e   :  { %v669_v0 = vpop.f32.mrf.mxu3 }
 0x10f   :  { %v1755_v5 = vpop.eup %1754  ;;  %1256 = vst [vmem:[%s2927_s5 + $0x50] sm:$0xff] %v1192_v60  ;;  %v1014_v9 = vmul.f32 1.442695, %v906_v61  ;;  %v875_v8 = vsub.f32 0.0, %v2553_v63  ;;  %v670_v52 = vadd.f32 %v669_v0, %v460_v41  ;;  %v367_v10 = vpop.f32.mrf.mxu0 }
 0x110   :  { %v1757_v55 = vpop.eup %1756  ;;  %v1097_v13 = vadd.f32 1.0, %v1755_v5  ;;  %v576_v16 = vpop.f32.mrf.mxu1 }
 0x111   :  { %v1224_v45 = vmul.f32 %v1757_v55, %v2463_v58  ;;  %1762 = vpow2.f32 %v1014_v9  ;;  %v952_v18 = vmul.f32 1.442695, %v875_v8  ;;  %v775_v14 = vmul.f32 %v2161_v7, %v670_v52  ;;  %v2575_v7 = vld [vmem:[%s2925_s3] ss:$0 sm:$0xff] }
 0x112   :  { %v1759_v19 = vpop.eup %1758  ;;  %1764 = vrcp.f32 %v1097_v13  ;;  %v577_v49 = vadd.f32 %v576_v16, %v367_v10  ;;  %414 = vmatmul.f32.gmra.mxu0 %v1504_v1  ;;  %510 = vmatmul.f32.gmra.mxu2 %v1568_v46 }
 0x113   :  { %v1761_v20 = vpop.eup %1760  ;;  %1288 = vst [vmem:[%s2927_s5 + $0x150] sm:$0xff] %v1224_v45  ;;  %v1193_v22 = vmul.f32 %v1759_v19, %v2489_v3  ;;  %1766 = vpow2.f32 %v952_v18  ;;  %v2570_v23 = vadd.f32 %v2166_v12, %v775_v14  ;;  %623 = vmatmul.f32.gmra.mxu1 %v1376_v4  ;;  %v2585_v12 = vld [vmem:[%s2926_s4] ss:$0 sm:$0xff] }
 0x114   :  { %719 = vmatmul.f32.gmra.mxu3 %v1440_v15  ;;  %v1066_v58 = vadd.f32 1.0, %v1761_v20  ;;  %v744_v24 = vmul.f32 %v2575_v7, %v577_v49 }
 0x115   :  { %1257 = vst [vmem:[%s2927_s5 + $0x58] sm:$0xff] %v1193_v22  ;;  %v907_v3 = vsub.f32 0.0, %v2570_v23  ;;  %v463_v25 = vpop.f32.mrf.mxu2 }
 0x116   :  { %1768 = vrcp.f32 %v1066_v58  ;;  %v2588_v26 = vadd.f32 %v2585_v12, %v744_v24  ;;  %v672_v62 = vpop.f32.mrf.mxu3 }
 0x117   :  { %v1763_v31 = vpop.eup %1762  ;;  %v1016_v6 = vmul.f32 1.442695, %v907_v3  ;;  %v673_v33 = vadd.f32 %v672_v62, %v463_v25  ;;  %v370_v34 = vpop.f32.mrf.mxu0 }
 0x118   :  { %v1765_v38 = vpop.eup %1764  ;;  %v1098_v39 = vadd.f32 1.0, %v1763_v31  ;;  %v876_v40 = vsub.f32 0.0, %v2588_v26  ;;  %v579_v17 = vpop.f32.mrf.mxu1 }
 0x119   :  { %v1767_v42 = vpop.eup %1766  ;;  %v1225_v43 = vmul.f32 %v1765_v38, %v2506_v27  ;;  %1770 = vpow2.f32 %v1016_v6  ;;  %v776_v44 = vmul.f32 %v2575_v7, %v673_v33  ;;  %v580_v21 = vadd.f32 %v579_v17, %v370_v34 }
 0x11a   :  { %1772 = vrcp.f32 %v1098_v39  ;;  %v1067_v28 = vadd.f32 1.0, %v1767_v42  ;;  %v954_v47 = vmul.f32 1.442695, %v876_v40  ;;  %417 = vmatmul.f32.gmra.mxu0 %v1505_v29  ;;  %513 = vmatmul.f32.gmra.mxu2 %v1569_v30 }
 0x11b   :  { %1289 = vst [vmem:[%s2927_s5 + $0x158] sm:$0xff] %v1225_v43  ;;  %v2601_v48 = vadd.f32 %v2585_v12, %v776_v44  ;;  %v745_v35 = vmul.f32 %v2575_v7, %v580_v21  ;;  %626 = vmatmul.f32.gmra.mxu1 %v1377_v36 }
 0x11c   :  { %722 = vmatmul.f32.gmra.mxu3 %v1441_v11  ;;  %v1769_v27 = vpop.eup %1768  ;;  %1774 = vrcp.f32 %v1067_v28 }
 0x11d   :  { %v1194_v50 = vmul.f32 %v1769_v27, %v2514_v2  ;;  %1776 = vpow2.f32 %v954_v47  ;;  %v908_v51 = vsub.f32 0.0, %v2601_v48  ;;  %v2607_v54 = vadd.f32 %v2585_v12, %v745_v35  ;;  %v466_v32 = vpop.f32.mrf.mxu2 }
 0x11e   :  { %v675_v56 = vpop.f32.mrf.mxu3 }
 0x11f   :  { %v1771_v57 = vpop.eup %1770  ;;  %1258 = vst [vmem:[%s2927_s5 + $0x60] sm:$0xff] %v1194_v50  ;;  %v1018_v59 = vmul.f32 1.442695, %v908_v51  ;;  %v877_v37 = vsub.f32 0.0, %v2607_v54  ;;  %v676_v60 = vadd.f32 %v675_v56, %v466_v32  ;;  %v373_v61 = vpop.f32.mrf.mxu0 }
 0x120   :  { %v1773_v41 = vpop.eup %1772  ;;  %v1099_v2 = vadd.f32 1.0, %v1771_v57  ;;  %v582_v0 = vpop.f32.mrf.mxu1 }
 0x121   :  { %v1226_v1 = vmul.f32 %v1773_v41, %v2527_v53  ;;  %1778 = vpow2.f32 %v1018_v59  ;;  %v956_v46 = vmul.f32 1.442695, %v877_v37  ;;  %v777_v4 = vmul.f32 %v2575_v7, %v676_v60 }
 0x122   :  { %v1775_v5 = vpop.eup %1774  ;;  %1780 = vrcp.f32 %v1099_v2  ;;  %v583_v9 = vadd.f32 %v582_v0, %v373_v61 }
 0x123   :  { %v1777_v8 = vpop.eup %1776  ;;  %1290 = vst [vmem:[%s2927_s5 + $0x160] sm:$0xff] %v1226_v1  ;;  %v1195_v52 = vmul.f32 %v1775_v5, %v2553_v63  ;;  %1782 = vpow2.f32 %v956_v46  ;;  %v2620_v10 = vadd.f32 %v2585_v12, %v777_v4 }
 0x124   :  { %v1068_v15 = vadd.f32 1.0, %v1777_v8  ;;  %v746_v53 = vmul.f32 %v2575_v7, %v583_v9 }
 0x125   :  { %1259 = vst [vmem:[%s2927_s5 + $0x68] sm:$0xff] %v1195_v52  ;;  %v909_v55 = vsub.f32 0.0, %v2620_v10  ;;  %v469_v13 = vpop.f32.mrf.mxu2 }
 0x126   :  { %1784 = vrcp.f32 %v1068_v15  ;;  %v2628_v16 = vadd.f32 %v2585_v12, %v746_v53  ;;  %v678_v45 = vpop.f32.mrf.mxu3 }
 0x127   :  { %v1779_v63 = vpop.eup %1778  ;;  %v1020_v18 = vmul.f32 1.442695, %v909_v55  ;;  %v679_v14 = vadd.f32 %v678_v45, %v469_v13  ;;  %v376_v19 = vpop.f32.mrf.mxu0 }
 0x128   :  { %v1781_v49 = vpop.eup %1780  ;;  %v1100_v20 = vadd.f32 1.0, %v1779_v63  ;;  %v878_v22 = vsub.f32 0.0, %v2628_v16  ;;  %v585_v58 = vpop.f32.mrf.mxu1 }
 0x129   :  { %v1783_v24 = vpop.eup %1782  ;;  %v1227_v3 = vmul.f32 %v1781_v49, %v2570_v23  ;;  %1786 = vpow2.f32 %v1020_v18  ;;  %v778_v25 = vmul.f32 %v2575_v7, %v679_v14  ;;  %v586_v62 = vadd.f32 %v585_v58, %v376_v19 }
 0x12a   :  { %1788 = vrcp.f32 %v1100_v20  ;;  %v1069_v29 = vadd.f32 1.0, %v1783_v24  ;;  %v958_v30 = vmul.f32 1.442695, %v878_v22 }
 0x12b   :  { %1291 = vst [vmem:[%s2927_s5 + $0x168] sm:$0xff] %v1227_v3  ;;  %v2637_v31 = vadd.f32 %v2585_v12, %v778_v25  ;;  %v747_v6 = vmul.f32 %v2575_v7, %v586_v62 }
 0x12c   :  { %v1785_v33 = vpop.eup %1784  ;;  %1790 = vrcp.f32 %v1069_v29 }
 0x12d   :  { %v1196_v23 = vmul.f32 %v1785_v33, %v2588_v26  ;;  %1792 = vpow2.f32 %v958_v30  ;;  %v910_v34 = vsub.f32 0.0, %v2637_v31  ;;  %v2643_v36 = vadd.f32 %v2585_v12, %v747_v6  ;;  %v472_v11 = vpop.f32.mrf.mxu2 }
 0x12e   :  { %v681_v38 = vpop.f32.mrf.mxu3 }
 0x12f   :  { %v1787_v39 = vpop.eup %1786  ;;  %1260 = vst [vmem:[%s2927_s5 + $0x70] sm:$0xff] %v1196_v23  ;;  %v1022_v40 = vmul.f32 1.442695, %v910_v34  ;;  %v879_v17 = vsub.f32 0.0, %v2643_v36  ;;  %v682_v42 = vadd.f32 %v681_v38, %v472_v11  ;;  %v379_v43 = vpop.f32.mrf.mxu0 }
 0x130   :  { %v1789_v44 = vpop.eup %1788  ;;  %v1101_v26 = vadd.f32 1.0, %v1787_v39  ;;  %v588_v21 = vpop.f32.mrf.mxu1 }
 0x131   :  { %v1228_v28 = vmul.f32 %v1789_v44, %v2601_v48  ;;  %1794 = vpow2.f32 %v1022_v40  ;;  %v960_v47 = vmul.f32 1.442695, %v879_v17  ;;  %v779_v35 = vmul.f32 %v2575_v7, %v682_v42 }
 0x132   :  { %v1791_v27 = vpop.eup %1790  ;;  %1796 = vrcp.f32 %v1101_v26  ;;  %v589_v50 = vadd.f32 %v588_v21, %v379_v43 }
 0x133   :  { %v1793_v51 = vpop.eup %1792  ;;  %1292 = vst [vmem:[%s2927_s5 + $0x170] sm:$0xff] %v1228_v28  ;;  %v1197_v32 = vmul.f32 %v1791_v27, %v2607_v54  ;;  %1798 = vpow2.f32 %v960_v47  ;;  %v2656_v56 = vadd.f32 %v2585_v12, %v779_v35 }
 0x134   :  { %v1070_v57 = vadd.f32 1.0, %v1793_v51  ;;  %v748_v48 = vmul.f32 %v2575_v7, %v589_v50 }
 0x135   :  { %1261 = vst [vmem:[%s2927_s5 + $0x78] sm:$0xff] %v1197_v32  ;;  %v911_v59 = vsub.f32 0.0, %v2656_v56  ;;  %v475_v37 = vpop.f32.mrf.mxu2 }
 0x136   :  { %1800 = vrcp.f32 %v1070_v57  ;;  %v2664_v60 = vadd.f32 %v2585_v12, %v748_v48  ;;  %v684_v61 = vpop.f32.mrf.mxu3 }
 0x137   :  { %v1795_v54 = vpop.eup %1794  ;;  %v1024_v41 = vmul.f32 1.442695, %v911_v59  ;;  %v685_v2 = vadd.f32 %v684_v61, %v475_v37  ;;  %v382_v0 = vpop.f32.mrf.mxu0 }
 0x138   :  { %v1797_v1 = vpop.eup %1796  ;;  %v1102_v46 = vadd.f32 1.0, %v1795_v54  ;;  %v880_v4 = vsub.f32 0.0, %v2664_v60  ;;  %v591_v5 = vpop.f32.mrf.mxu1 }
 0x139   :  { %v1799_v9 = vpop.eup %1798  ;;  %v1229_v8 = vmul.f32 %v1797_v1, %v2620_v10  ;;  %1802 = vpow2.f32 %v1024_v41  ;;  %v780_v52 = vmul.f32 %v2575_v7, %v685_v2  ;;  %v592_v15 = vadd.f32 %v591_v5, %v382_v0 }
 0x13a   :  { %1804 = vrcp.f32 %v1102_v46  ;;  %v1071_v53 = vadd.f32 1.0, %v1799_v9  ;;  %v962_v55 = vmul.f32 1.442695, %v880_v4 }
 0x13b   :  { %1293 = vst [vmem:[%s2927_s5 + $0x178] sm:$0xff] %v1229_v8  ;;  %v2673_v13 = vadd.f32 %v2585_v12, %v780_v52  ;;  %v749_v45 = vmul.f32 %v2575_v7, %v592_v15 }
 0x13c   :  { %v1801_v63 = vpop.eup %1800  ;;  %1806 = vrcp.f32 %v1071_v53 }
 0x13d   :  { %v1198_v10 = vmul.f32 %v1801_v63, %v2628_v16  ;;  %1808 = vpow2.f32 %v962_v55  ;;  %v912_v18 = vsub.f32 0.0, %v2673_v13  ;;  %v2679_v14 = vadd.f32 %v2585_v12, %v749_v45  ;;  %v478_v19 = vpop.f32.mrf.mxu2 }
 0x13e   :  { %v687_v49 = vpop.f32.mrf.mxu3 }
 0x13f   :  { %v1803_v20 = vpop.eup %1802  ;;  %1262 = vst [vmem:[%s2927_s5 + $0x80] sm:$0xff] %v1198_v10  ;;  %v1026_v22 = vmul.f32 1.442695, %v912_v18  ;;  %v881_v58 = vsub.f32 0.0, %v2679_v14  ;;  %v688_v24 = vadd.f32 %v687_v49, %v478_v19  ;;  %v385_v3 = vpop.f32.mrf.mxu0 }
 0x140   :  { %v1805_v25 = vpop.eup %1804  ;;  %v1103_v16 = vadd.f32 1.0, %v1803_v20  ;;  %v594_v62 = vpop.f32.mrf.mxu1 }
 0x141   :  { %v1230_v29 = vmul.f32 %v1805_v25, %v2637_v31  ;;  %1810 = vpow2.f32 %v1026_v22  ;;  %v964_v30 = vmul.f32 1.442695, %v881_v58  ;;  %v781_v6 = vmul.f32 %v2575_v7, %v688_v24 }
 0x142   :  { %v1807_v33 = vpop.eup %1806  ;;  %1812 = vrcp.f32 %v1103_v16  ;;  %v595_v23 = vadd.f32 %v594_v62, %v385_v3 }
 0x143   :  { %v1809_v34 = vpop.eup %1808  ;;  %1294 = vst [vmem:[%s2927_s5 + $0x180] sm:$0xff] %v1230_v29  ;;  %v1199_v11 = vmul.f32 %v1807_v33, %v2643_v36  ;;  %1814 = vpow2.f32 %v964_v30  ;;  %v2692_v38 = vadd.f32 %v2585_v12, %v781_v6 }
 0x144   :  { %v1072_v39 = vadd.f32 1.0, %v1809_v34  ;;  %v750_v31 = vmul.f32 %v2575_v7, %v595_v23 }
 0x145   :  { %1263 = vst [vmem:[%s2927_s5 + $0x88] sm:$0xff] %v1199_v11  ;;  %v913_v40 = vsub.f32 0.0, %v2692_v38  ;;  %v481_v17 = vpop.f32.mrf.mxu2 }
 0x146   :  { %1816 = vrcp.f32 %v1072_v39  ;;  %v2700_v42 = vadd.f32 %v2585_v12, %v750_v31  ;;  %v690_v43 = vpop.f32.mrf.mxu3 }
 0x147   :  { %v1811_v36 = vpop.eup %1810  ;;  %v1028_v44 = vmul.f32 1.442695, %v913_v40  ;;  %v691_v26 = vadd.f32 %v690_v43, %v481_v17  ;;  %v388_v21 = vpop.f32.mrf.mxu0 }
 0x148   :  { %v1813_v28 = vpop.eup %1812  ;;  %v1104_v47 = vadd.f32 1.0, %v1811_v36  ;;  %v882_v35 = vsub.f32 0.0, %v2700_v42  ;;  %v597_v27 = vpop.f32.mrf.mxu1 }
 0x149   :  { %v1815_v50 = vpop.eup %1814  ;;  %v1231_v51 = vmul.f32 %v1813_v28, %v2656_v56  ;;  %1818 = vpow2.f32 %v1028_v44  ;;  %v782_v32 = vmul.f32 %v2575_v7, %v691_v26  ;;  %v598_v57 = vadd.f32 %v597_v27, %v388_v21 }
 0x14a   :  { %1820 = vrcp.f32 %v1104_v47  ;;  %v1073_v48 = vadd.f32 1.0, %v1815_v50  ;;  %v966_v59 = vmul.f32 1.442695, %v882_v35 }
 0x14b   :  { %1295 = vst [vmem:[%s2927_s5 + $0x188] sm:$0xff] %v1231_v51  ;;  %v2709_v37 = vadd.f32 %v2585_v12, %v782_v32  ;;  %v751_v61 = vmul.f32 %v2575_v7, %v598_v57 }
 0x14c   :  { %v1817_v54 = vpop.eup %1816  ;;  %1822 = vrcp.f32 %v1073_v48 }
 0x14d   :  { %v1200_v56 = vmul.f32 %v1817_v54, %v2664_v60  ;;  %1824 = vpow2.f32 %v966_v59  ;;  %v914_v41 = vsub.f32 0.0, %v2709_v37  ;;  %v2715_v2 = vadd.f32 %v2585_v12, %v751_v61  ;;  %v484_v0 = vpop.f32.mrf.mxu2 }
 0x14f   :  { %v693_v1 = vpop.f32.mrf.mxu3  ;;  %v1819_v46 = vpop.eup %1818  ;;  %1264 = vst [vmem:[%s2927_s5 + $0x90] sm:$0xff] %v1200_v56  ;;  %v1030_v4 = vmul.f32 1.442695, %v914_v41  ;;  %v883_v5 = vsub.f32 0.0, %v2715_v2 }
 0x150   :  { %v694_v9 = vadd.f32 %v693_v1, %v484_v0  ;;  %v391_v8 = vpop.f32.mrf.mxu0  ;;  %v1821_v52 = vpop.eup %1820  ;;  %v1105_v60 = vadd.f32 1.0, %v1819_v46 }
 0x151   :  { %v600_v15 = vpop.f32.mrf.mxu1  ;;  %v1232_v53 = vmul.f32 %v1821_v52, %v2673_v13  ;;  %1826 = vpow2.f32 %v1030_v4  ;;  %v968_v55 = vmul.f32 1.442695, %v883_v5 }
 0x152   :  { %v783_v45 = vmul.f32 %v2575_v7, %v694_v9  ;;  %v1823_v63 = vpop.eup %1822  ;;  %1828 = vrcp.f32 %v1105_v60  ;;  %v601_v10 = vadd.f32 %v600_v15, %v391_v8 }
 0x153   :  { %v1825_v18 = vpop.eup %1824  ;;  %1296 = vst [vmem:[%s2927_s5 + $0x190] sm:$0xff] %v1232_v53  ;;  %v1201_v19 = vmul.f32 %v1823_v63, %v2679_v14  ;;  %1830 = vpow2.f32 %v968_v55 }
 0x154   :  { %v2728_v49 = vadd.f32 %v2585_v12, %v783_v45  ;;  %v1074_v20 = vadd.f32 1.0, %v1825_v18  ;;  %v752_v13 = vmul.f32 %v2575_v7, %v601_v10 }
 0x155   :  { %1265 = vst [vmem:[%s2927_s5 + $0x98] sm:$0xff] %v1201_v19  ;;  %v487_v58 = vpop.f32.mrf.mxu2 }
 0x156   :  { %v915_v22 = vsub.f32 0.0, %v2728_v49  ;;  %1832 = vrcp.f32 %v1074_v20  ;;  %v2736_v24 = vadd.f32 %v2585_v12, %v752_v13 }
 0x157   :  { %v696_v3 = vpop.f32.mrf.mxu3  ;;  %v1827_v14 = vpop.eup %1826 }
 0x158   :  { %v1032_v25 = vmul.f32 1.442695, %v915_v22  ;;  %v697_v16 = vadd.f32 %v696_v3, %v487_v58  ;;  %v394_v62 = vpop.f32.mrf.mxu0  ;;  %v1829_v29 = vpop.eup %1828  ;;  %v1106_v30 = vadd.f32 1.0, %v1827_v14  ;;  %v884_v6 = vsub.f32 0.0, %v2736_v24 }
 0x159   :  { %v603_v33 = vpop.f32.mrf.mxu1  ;;  %v1831_v23 = vpop.eup %1830  ;;  %v1233_v34 = vmul.f32 %v1829_v29, %v2692_v38 }
 0x15a   :  { %1834 = vpow2.f32 %v1032_v25  ;;  %v784_v11 = vmul.f32 %v2575_v7, %v697_v16  ;;  %v604_v39 = vadd.f32 %v603_v33, %v394_v62  ;;  %v1075_v31 = vadd.f32 1.0, %v1831_v23 }
 0x15b   :  { %1836 = vrcp.f32 %v1106_v30  ;;  %v970_v40 = vmul.f32 1.442695, %v884_v6  ;;  %1297 = vst [vmem:[%s2927_s5 + $0x198] sm:$0xff] %v1233_v34 }
 0x15c   :  { %v2745_v17 = vadd.f32 %v2585_v12, %v784_v11  ;;  %v753_v43 = vmul.f32 %v2575_v7, %v604_v39  ;;  %v1833_v36 = vpop.eup %1832  ;;  %1838 = vrcp.f32 %v1075_v31 }
 0x15d   :  { %v1202_v38 = vmul.f32 %v1833_v36, %v2700_v42  ;;  %1840 = vpow2.f32 %v970_v40  ;;  %v490_v21 = vpop.f32.mrf.mxu2 }
 0x15e   :  { %v916_v44 = vsub.f32 0.0, %v2745_v17  ;;  %v2751_v26 = vadd.f32 %v2585_v12, %v753_v43 }
 0x15f   :  { %v699_v28 = vpop.f32.mrf.mxu3  ;;  %1266 = vst [vmem:[%s2927_s5 + $0xa0] sm:$0xff] %v1202_v38 }
 0x160   :  { %v1835_v47 = vpop.eup %1834  ;;  %v1034_v35 = vmul.f32 1.442695, %v916_v44  ;;  %v885_v27 = vsub.f32 0.0, %v2751_v26  ;;  %v700_v50 = vadd.f32 %v699_v28, %v490_v21  ;;  %v397_v51 = vpop.f32.mrf.mxu0 }
 0x161   :  { %v1837_v32 = vpop.eup %1836  ;;  %v1107_v42 = vadd.f32 1.0, %v1835_v47  ;;  %v606_v57 = vpop.f32.mrf.mxu1 }
 0x162   :  { %v1234_v48 = vmul.f32 %v1837_v32, %v2709_v37  ;;  %1842 = vpow2.f32 %v1034_v35  ;;  %v972_v59 = vmul.f32 1.442695, %v885_v27  ;;  %v785_v61 = vmul.f32 %v2575_v7, %v700_v50  ;;  %v1839_v54 = vpop.eup %1838 }
 0x163   :  { %1844 = vrcp.f32 %v1107_v42  ;;  %v607_v56 = vadd.f32 %v606_v57, %v397_v51  ;;  %v1841_v41 = vpop.eup %1840  ;;  %v1203_v0 = vmul.f32 %v1839_v54, %v2715_v2 }
 0x164   :  { %1298 = vst [vmem:[%s2927_s5 + $0x1a0] sm:$0xff] %v1234_v48  ;;  %1846 = vpow2.f32 %v972_v59  ;;  %v2764_v1 = vadd.f32 %v2585_v12, %v785_v61  ;;  %v1076_v46 = vadd.f32 1.0, %v1841_v41 }
 0x165   :  { %v754_v37 = vmul.f32 %v2575_v7, %v607_v56  ;;  %1267 = vst [vmem:[%s2927_s5 + $0xa8] sm:$0xff] %v1203_v0  ;;  %v493_v5 = vpop.f32.mrf.mxu2 }
 0x166   :  { %v917_v4 = vsub.f32 0.0, %v2764_v1  ;;  %1848 = vrcp.f32 %v1076_v46 }
 0x167   :  { %v2772_v9 = vadd.f32 %v2585_v12, %v754_v37  ;;  %v702_v8 = vpop.f32.mrf.mxu3 }
 0x168   :  { %v1843_v2 = vpop.eup %1842  ;;  %v1036_v52 = vmul.f32 1.442695, %v917_v4  ;;  %v703_v60 = vadd.f32 %v702_v8, %v493_v5  ;;  %v400_v15 = vpop.f32.mrf.mxu0 }
 0x169   :  { %v1845_v53 = vpop.eup %1844  ;;  %v1108_v55 = vadd.f32 1.0, %v1843_v2  ;;  %v886_v45 = vsub.f32 0.0, %v2772_v9  ;;  %v609_v63 = vpop.f32.mrf.mxu1 }
 0x16a   :  { %v1847_v10 = vpop.eup %1846  ;;  %v1235_v18 = vmul.f32 %v1845_v53, %v2728_v49  ;;  %1850 = vpow2.f32 %v1036_v52  ;;  %v786_v19 = vmul.f32 %v2575_v7, %v703_v60  ;;  %v610_v20 = vadd.f32 %v609_v63, %v400_v15 }
 0x16b   :  { %1852 = vrcp.f32 %v1108_v55  ;;  %v1077_v13 = vadd.f32 1.0, %v1847_v10  ;;  %v974_v22 = vmul.f32 1.442695, %v886_v45 }
 0x16c   :  { %1299 = vst [vmem:[%s2927_s5 + $0x1a8] sm:$0xff] %v1235_v18  ;;  %v2781_v58 = vadd.f32 %v2585_v12, %v786_v19  ;;  %v755_v3 = vmul.f32 %v2575_v7, %v610_v20  ;;  %v1849_v14 = vpop.eup %1848 }
 0x16d   :  { %1854 = vrcp.f32 %v1077_v13  ;;  %v1204_v49 = vmul.f32 %v1849_v14, %v2736_v24  ;;  %v496_v62 = vpop.f32.mrf.mxu2 }
 0x16e   :  { %1856 = vpow2.f32 %v974_v22  ;;  %v918_v25 = vsub.f32 0.0, %v2781_v58  ;;  %v2787_v16 = vadd.f32 %v2585_v12, %v755_v3 }
 0x16f   :  { %v705_v29 = vpop.f32.mrf.mxu3  ;;  %1268 = vst [vmem:[%s2927_s5 + $0xb0] sm:$0xff] %v1204_v49 }
 0x170   :  { %v1851_v30 = vpop.eup %1850  ;;  %v1038_v6 = vmul.f32 1.442695, %v918_v25  ;;  %v887_v33 = vsub.f32 0.0, %v2787_v16  ;;  %v706_v23 = vadd.f32 %v705_v29, %v496_v62  ;;  %v403_v34 = vpop.f32.mrf.mxu0 }
 0x171   :  { %v1853_v11 = vpop.eup %1852  ;;  %v1109_v24 = vadd.f32 1.0, %v1851_v30  ;;  %v612_v39 = vpop.f32.mrf.mxu1 }
 0x172   :  { %v1236_v31 = vmul.f32 %v1853_v11, %v2745_v17  ;;  %1858 = vpow2.f32 %v1038_v6  ;;  %v976_v40 = vmul.f32 1.442695, %v887_v33  ;;  %v787_v43 = vmul.f32 %v2575_v7, %v706_v23 }
 0x173   :  { %v1855_v36 = vpop.eup %1854  ;;  %1860 = vrcp.f32 %v1109_v24  ;;  %v613_v38 = vadd.f32 %v612_v39, %v403_v34 }
 0x174   :  { %v1857_v44 = vpop.eup %1856  ;;  %1300 = vst [vmem:[%s2927_s5 + $0x1b0] sm:$0xff] %v1236_v31  ;;  %v1205_v21 = vmul.f32 %v1855_v36, %v2751_v26  ;;  %1862 = vpow2.f32 %v976_v40  ;;  %v2800_v28 = vadd.f32 %v2585_v12, %v787_v43 }
 0x175   :  { %v1078_v47 = vadd.f32 1.0, %v1857_v44  ;;  %v756_v17 = vmul.f32 %v2575_v7, %v613_v38  ;;  %v499_v27 = vpop.f32.mrf.mxu2 }
 0x176   :  { %1269 = vst [vmem:[%s2927_s5 + $0xb8] sm:$0xff] %v1205_v21  ;;  %v919_v35 = vsub.f32 0.0, %v2800_v28 }
 0x177   :  { %1864 = vrcp.f32 %v1078_v47  ;;  %v2808_v50 = vadd.f32 %v2585_v12, %v756_v17  ;;  %v708_v51 = vpop.f32.mrf.mxu3 }
 0x178   :  { %v1859_v26 = vpop.eup %1858  ;;  %v1040_v32 = vmul.f32 1.442695, %v919_v35  ;;  %v709_v42 = vadd.f32 %v708_v51, %v499_v27  ;;  %v406_v57 = vpop.f32.mrf.mxu0 }
 0x179   :  { %v1861_v48 = vpop.eup %1860  ;;  %v1110_v59 = vadd.f32 1.0, %v1859_v26  ;;  %v888_v61 = vsub.f32 0.0, %v2808_v50  ;;  %v615_v54 = vpop.f32.mrf.mxu1 }
 0x17a   :  { %v1863_v56 = vpop.eup %1862  ;;  %v1237_v41 = vmul.f32 %v1861_v48, %v2764_v1  ;;  %1866 = vpow2.f32 %v1040_v32  ;;  %v788_v0 = vmul.f32 %v2575_v7, %v709_v42  ;;  %v616_v46 = vadd.f32 %v615_v54, %v406_v57 }
 0x17b   :  { %1868 = vrcp.f32 %v1110_v59  ;;  %v1079_v37 = vadd.f32 1.0, %v1863_v56  ;;  %v978_v4 = vmul.f32 1.442695, %v888_v61 }
 0x17c   :  { %1301 = vst [vmem:[%s2927_s5 + $0x1b8] sm:$0xff] %v1237_v41  ;;  %v2817_v5 = vadd.f32 %v2585_v12, %v788_v0  ;;  %v757_v8 = vmul.f32 %v2575_v7, %v616_v46 }
 0x17d   :  { %v1865_v2 = vpop.eup %1864  ;;  %1870 = vrcp.f32 %v1079_v37  ;;  %v502_v15 = vpop.f32.mrf.mxu2 }
 0x17e   :  { %v1206_v1 = vmul.f32 %v1865_v2, %v2772_v9  ;;  %1872 = vpow2.f32 %v978_v4  ;;  %v920_v52 = vsub.f32 0.0, %v2817_v5  ;;  %v2823_v60 = vadd.f32 %v2585_v12, %v757_v8 }
 0x17f   :  { %v711_v53 = vpop.f32.mrf.mxu3 }
 0x180   :  { %v1867_v55 = vpop.eup %1866  ;;  %1270 = vst [vmem:[%s2927_s5 + $0xc0] sm:$0xff] %v1206_v1  ;;  %v1042_v45 = vmul.f32 1.442695, %v920_v52  ;;  %v889_v63 = vsub.f32 0.0, %v2823_v60  ;;  %v712_v10 = vadd.f32 %v711_v53, %v502_v15  ;;  %v409_v18 = vpop.f32.mrf.mxu0 }
 0x181   :  { %v1869_v19 = vpop.eup %1868  ;;  %v1111_v9 = vadd.f32 1.0, %v1867_v55  ;;  %v618_v20 = vpop.f32.mrf.mxu1 }
 0x182   :  { %v1238_v13 = vmul.f32 %v1869_v19, %v2781_v58  ;;  %1874 = vpow2.f32 %v1042_v45  ;;  %v980_v22 = vmul.f32 1.442695, %v889_v63  ;;  %v789_v3 = vmul.f32 %v2575_v7, %v712_v10 }
 0x183   :  { %v1871_v14 = vpop.eup %1870  ;;  %1876 = vrcp.f32 %v1111_v9  ;;  %v619_v49 = vadd.f32 %v618_v20, %v409_v18 }
 0x184   :  { %v1873_v25 = vpop.eup %1872  ;;  %1302 = vst [vmem:[%s2927_s5 + $0x1c0] sm:$0xff] %v1238_v13  ;;  %v1207_v62 = vmul.f32 %v1871_v14, %v2787_v16  ;;  %1878 = vpow2.f32 %v980_v22  ;;  %v2836_v29 = vadd.f32 %v2585_v12, %v789_v3 }
 0x185   :  { %v1080_v30 = vadd.f32 1.0, %v1873_v25  ;;  %v758_v58 = vmul.f32 %v2575_v7, %v619_v49  ;;  %v505_v33 = vpop.f32.mrf.mxu2 }
 0x186   :  { %1271 = vst [vmem:[%s2927_s5 + $0xc8] sm:$0xff] %v1207_v62  ;;  %v921_v6 = vsub.f32 0.0, %v2836_v29 }
 0x187   :  { %1880 = vrcp.f32 %v1080_v30  ;;  %v2844_v23 = vadd.f32 %v2585_v12, %v758_v58  ;;  %v714_v34 = vpop.f32.mrf.mxu3 }
 0x188   :  { %v1875_v16 = vpop.eup %1874  ;;  %v1044_v11 = vmul.f32 1.442695, %v921_v6  ;;  %v715_v24 = vadd.f32 %v714_v34, %v505_v33  ;;  %v412_v39 = vpop.f32.mrf.mxu0 }
 0x189   :  { %v1877_v31 = vpop.eup %1876  ;;  %v1112_v40 = vadd.f32 1.0, %v1875_v16  ;;  %v890_v43 = vsub.f32 0.0, %v2844_v23  ;;  %v621_v36 = vpop.f32.mrf.mxu1 }
 0x18a   :  { %v1879_v38 = vpop.eup %1878  ;;  %v1239_v44 = vmul.f32 %v1877_v31, %v2800_v28  ;;  %1882 = vpow2.f32 %v1044_v11  ;;  %v790_v21 = vmul.f32 %v2575_v7, %v715_v24  ;;  %v622_v47 = vadd.f32 %v621_v36, %v412_v39 }
 0x18b   :  { %1884 = vrcp.f32 %v1112_v40  ;;  %v1081_v17 = vadd.f32 1.0, %v1879_v38  ;;  %v982_v35 = vmul.f32 1.442695, %v890_v43 }
 0x18c   :  { %1303 = vst [vmem:[%s2927_s5 + $0x1c8] sm:$0xff] %v1239_v44  ;;  %v2853_v27 = vadd.f32 %v2585_v12, %v790_v21  ;;  %v759_v51 = vmul.f32 %v2575_v7, %v622_v47 }
 0x18d   :  { %v1881_v26 = vpop.eup %1880  ;;  %1886 = vrcp.f32 %v1081_v17  ;;  %v508_v57 = vpop.f32.mrf.mxu2 }
 0x18e   :  { %v1208_v28 = vmul.f32 %v1881_v26, %v2808_v50  ;;  %1888 = vpow2.f32 %v982_v35  ;;  %v922_v32 = vsub.f32 0.0, %v2853_v27  ;;  %v2859_v42 = vadd.f32 %v2585_v12, %v759_v51 }
 0x18f   :  { %v717_v48 = vpop.f32.mrf.mxu3 }
 0x190   :  { %v1883_v59 = vpop.eup %1882  ;;  %1272 = vst [vmem:[%s2927_s5 + $0xd0] sm:$0xff] %v1208_v28  ;;  %v1046_v61 = vmul.f32 1.442695, %v922_v32  ;;  %v891_v54 = vsub.f32 0.0, %v2859_v42  ;;  %v718_v56 = vadd.f32 %v717_v48, %v508_v57  ;;  %v415_v41 = vpop.f32.mrf.mxu0 }
 0x191   :  { %v1885_v0 = vpop.eup %1884  ;;  %v1113_v50 = vadd.f32 1.0, %v1883_v59  ;;  %v624_v46 = vpop.f32.mrf.mxu1 }
 0x192   :  { %v1240_v37 = vmul.f32 %v1885_v0, %v2817_v5  ;;  %1890 = vpow2.f32 %v1046_v61  ;;  %v984_v4 = vmul.f32 1.442695, %v891_v54  ;;  %v791_v8 = vmul.f32 %v2575_v7, %v718_v56 }
 0x193   :  { %v1887_v2 = vpop.eup %1886  ;;  %1892 = vrcp.f32 %v1113_v50  ;;  %v625_v1 = vadd.f32 %v624_v46, %v415_v41 }
 0x194   :  { %v1889_v52 = vpop.eup %1888  ;;  %1304 = vst [vmem:[%s2927_s5 + $0x1d0] sm:$0xff] %v1240_v37  ;;  %v1209_v15 = vmul.f32 %v1887_v2, %v2823_v60  ;;  %1894 = vpow2.f32 %v984_v4  ;;  %v2872_v53 = vadd.f32 %v2585_v12, %v791_v8 }
 0x195   :  { %v1082_v55 = vadd.f32 1.0, %v1889_v52  ;;  %v760_v5 = vmul.f32 %v2575_v7, %v625_v1  ;;  %v511_v63 = vpop.f32.mrf.mxu2 }
 0x196   :  { %1273 = vst [vmem:[%s2927_s5 + $0xd8] sm:$0xff] %v1209_v15  ;;  %v923_v45 = vsub.f32 0.0, %v2872_v53 }
 0x197   :  { %1896 = vrcp.f32 %v1082_v55  ;;  %v2880_v10 = vadd.f32 %v2585_v12, %v760_v5  ;;  %v720_v18 = vpop.f32.mrf.mxu3 }
 0x198   :  { %v1891_v60 = vpop.eup %1890  ;;  %v1048_v19 = vmul.f32 1.442695, %v923_v45  ;;  %v721_v9 = vadd.f32 %v720_v18, %v511_v63  ;;  %v418_v20 = vpop.f32.mrf.mxu0 }
 0x199   :  { %v1893_v13 = vpop.eup %1892  ;;  %v1114_v22 = vadd.f32 1.0, %v1891_v60  ;;  %v892_v3 = vsub.f32 0.0, %v2880_v10  ;;  %v627_v14 = vpop.f32.mrf.mxu1 }
 0x19a   :  { %v1895_v49 = vpop.eup %1894  ;;  %v1241_v25 = vmul.f32 %v1893_v13, %v2836_v29  ;;  %1898 = vpow2.f32 %v1048_v19  ;;  %v792_v62 = vmul.f32 %v2575_v7, %v721_v9  ;;  %v628_v30 = vadd.f32 %v627_v14, %v418_v20 }
 0x19b   :  { %1900 = vrcp.f32 %v1114_v22  ;;  %v1083_v58 = vadd.f32 1.0, %v1895_v49  ;;  %v986_v6 = vmul.f32 1.442695, %v892_v3 }
 0x19c   :  { %1305 = vst [vmem:[%s2927_s5 + $0x1d8] sm:$0xff] %v1241_v25  ;;  %v860_v33 = vadd.f32 %v2585_v12, %v792_v62  ;;  %v761_v34 = vmul.f32 %v2575_v7, %v628_v30 }
 0x19d   :  { %v1897_v16 = vpop.eup %1896  ;;  %1902 = vrcp.f32 %v1083_v58  ;;  %v514_v39 = vpop.f32.mrf.mxu2 }
 0x19e   :  { %v1210_v11 = vmul.f32 %v1897_v16, %v2844_v23  ;;  %1904 = vpow2.f32 %v986_v6  ;;  %v924_v29 = vsub.f32 0.0, %v860_v33  ;;  %v829_v24 = vadd.f32 %v2585_v12, %v761_v34 }
 0x19f   :  { %v723_v31 = vpop.f32.mrf.mxu3 }
 0x1a0   :  { %v1899_v40 = vpop.eup %1898  ;;  %1274 = vst [vmem:[%s2927_s5 + $0xe0] sm:$0xff] %v1210_v11  ;;  %v1050_v43 = vmul.f32 1.442695, %v924_v29  ;;  %v893_v36 = vsub.f32 0.0, %v829_v24  ;;  %v724_v38 = vadd.f32 %v723_v31, %v514_v39 }
 0x1a1   :  { %v1901_v44 = vpop.eup %1900  ;;  %v1115_v21 = vadd.f32 1.0, %v1899_v40 }
 0x1a2   :  { %v1242_v47 = vmul.f32 %v1901_v44, %v2853_v27  ;;  %1906 = vpow2.f32 %v1050_v43  ;;  %v988_v23 = vmul.f32 1.442695, %v893_v36  ;;  %v793_v17 = vmul.f32 %v2575_v7, %v724_v38 }
 0x1a3   :  { %v1903_v35 = vpop.eup %1902  ;;  %1908 = vrcp.f32 %v1115_v21 }
 0x1a4   :  { %v1905_v51 = vpop.eup %1904  ;;  %1306 = vst [vmem:[%s2927_s5 + $0x1e0] sm:$0xff] %v1242_v47  ;;  %v1211_v26 = vmul.f32 %v1903_v35, %v2859_v42  ;;  %1910 = vpow2.f32 %v988_v23  ;;  %v861_v28 = vadd.f32 %v2585_v12, %v793_v17 }
 0x1a5   :  { %v1084_v32 = vadd.f32 1.0, %v1905_v51 }
 0x1a6   :  { %1275 = vst [vmem:[%s2927_s5 + $0xe8] sm:$0xff] %v1211_v26  ;;  %v925_v27 = vsub.f32 0.0, %v861_v28 }
 0x1a7   :  { %1912 = vrcp.f32 %v1084_v32 }
 0x1a8   :  { %v1907_v7 = vpop.eup %1906  ;;  %v1052_v57 = vmul.f32 1.442695, %v925_v27 }
 0x1a9   :  { %v1909_v48 = vpop.eup %1908  ;;  %v1116_v59 = vadd.f32 1.0, %v1907_v7 }
 0x1aa   :  { %v1911_v61 = vpop.eup %1910  ;;  %v1243_v54 = vmul.f32 %v1909_v48, %v2872_v53  ;;  %1914 = vpow2.f32 %v1052_v57 }
 0x1ab   :  { %1916 = vrcp.f32 %v1116_v59  ;;  %v1085_v42 = vadd.f32 1.0, %v1911_v61 }
 0x1ac   :  { %1307 = vst [vmem:[%s2927_s5 + $0x1e8] sm:$0xff] %v1243_v54 }
 0x1ad   :  { %v1913_v12 = vpop.eup %1912  ;;  %1918 = vrcp.f32 %v1085_v42 }
 0x1ae   :  { %v1212_v56 = vmul.f32 %v1913_v12, %v2880_v10 }
 0x1b0   :  { %v1915_v41 = vpop.eup %1914  ;;  %1276 = vst [vmem:[%s2927_s5 + $0xf0] sm:$0xff] %v1212_v56 }
 0x1b1   :  { %v1917_v0 = vpop.eup %1916  ;;  %v1117_v50 = vadd.f32 1.0, %v1915_v41 }
 0x1b2   :  { %v1244_v46 = vmul.f32 %v1917_v0, %v860_v33 }
 0x1b3   :  { %v1919_v37 = vpop.eup %1918  ;;  %1920 = vrcp.f32 %v1117_v50 }
 0x1b4   :  { %1308 = vst [vmem:[%s2927_s5 + $0x1f0] sm:$0xff] %v1244_v46  ;;  %v1213_v4 = vmul.f32 %v1919_v37, %v829_v24 }
 0x1b6   :  { %1277 = vst [vmem:[%s2927_s5 + $0xf8] sm:$0xff] %v1213_v4 }
 0x1b9   :  { %v1921_v8 = vpop.eup %1920 }
 0x1ba   :  { %v1245_v2 = vmul.f32 %v1921_v8, %v861_v28 }
 0x1bc   :  { %1309 = vst [vmem:[%s2927_s5 + $0x1f8] sm:$0xff] %v1245_v2 }

// kernel: c3_forward.3
= control target key start
LH: loop header
LB: loop body
LE: loop exit
PB: predicated region body
PF: predicated region fallthrough
CT: control target
= control target key end

     0   :  { %vm93_vm0 = vcmask 64512   ;;  %s4592_s1 = inlined_call_operand.vmem [shape: f32[8,128], index: 1, kind: input, shape index: {}]   ;;  %s4593_s4 = inlined_call_operand.vmem [shape: f32[8,128], index: 4, kind: input, shape index: {}]   ;;  %s4594_s0 = inlined_call_operand.vmem [shape: f32[512,8], index: 0, kind: input, shape index: {}]   ;;  %s4595_s2 = inlined_call_operand.vmem [shape: f32[1,128], index: 2, kind: input, shape index: {}]   ;;  %s4596_s3 = inlined_call_operand.vmem [shape: f32[1,128], index: 3, kind: input, shape index: {}]   ;;  %s4597_s5 = inlined_call_operand.vmem [shape: f32[1,128], index: 5, kind: input, shape index: {}]   ;;  %s4598_s6 = inlined_call_operand.vmem [shape: f32[1,128], index: 6, kind: input, shape index: {}]   ;;  %s4599_s7 = inlined_call_operand.vmem [shape: bf16[512,128], index: 7, kind: output, shape index: {0}]   ;;  %s4600_s8 = inlined_call_operand.vmem [shape: bf16[512,128], index: 8, kind: output, shape index: {1}]  }
   0x1   :  { %v92_v0 = vld [vmem:[%s4592_s1] sm:$0xff]  ;;  %v29_v4 = vld [vmem:[%s4594_s0 + $0x8] sm:$0xff]  ;;  %v30_v6 = vld [vmem:[%s4594_s0 + $0x10] sm:$0xff] }
   0x2   :  { %v1143_v1 = vld [vmem:[%s4593_s4] sm:$0xff]  ;;  %301 = vmatpush.msra.mxu0 %v92_v0  ;;  %2519 = vmatpush.msra.mxu2 %v92_v0  ;;  %v61_v5 = vld [vmem:[%s4594_s0 + $0x108] sm:$0xff]  ;;  %v62_v7 = vld [vmem:[%s4594_s0 + $0x110] sm:$0xff] }
   0x3   :  { %v28_v2 = vld [vmem:[%s4594_s0] sm:$0xff]  ;;  %1159 = vmatpush.msra.mxu1 %v1143_v1  ;;  %2520 = vmatpush.msra.mxu3 %v1143_v1  ;;  %v31_v8 = vld [vmem:[%s4594_s0 + $0x18] sm:$0xff]  ;;  %v33_v12 = vld [vmem:[%s4594_s0 + $0x28] sm:$0xff] }
   0x4   :  { %v60_v3 = vld [vmem:[%s4594_s0 + $0x100] sm:$0xff]  ;;  %2009 = vmatmul.msk.f32.vlgmr.msra.gmra.mxu0 %vm93_vm0, %v28_v2  ;;  %2073 = vmatmul.msk.f32.vlgmr.msra.gmra.mxu1 %vm93_vm0, %v28_v2  ;;  %v63_v9 = vld [vmem:[%s4594_s0 + $0x118] sm:$0xff]  ;;  %v65_v13 = vld [vmem:[%s4594_s0 + $0x128] sm:$0xff] }
   0x5   :  { %2041 = vmatmul.msk.f32.vlgmr.msra.gmra.mxu2 %vm93_vm0, %v60_v3  ;;  %2105 = vmatmul.msk.f32.vlgmr.msra.gmra.mxu3 %vm93_vm0, %v60_v3  ;;  %v32_v10 = vld [vmem:[%s4594_s0 + $0x20] sm:$0xff]  ;;  %v34_v14 = vld [vmem:[%s4594_s0 + $0x30] sm:$0xff]  ;;  %v35_v16 = vld [vmem:[%s4594_s0 + $0x38] sm:$0xff] }
   0x6   :  { %v64_v11 = vld [vmem:[%s4594_s0 + $0x120] sm:$0xff]  ;;  %v66_v15 = vld [vmem:[%s4594_s0 + $0x130] sm:$0xff]  ;;  %v67_v17 = vld [vmem:[%s4594_s0 + $0x138] sm:$0xff] }
   0x7   :  { %v36_v18 = vld [vmem:[%s4594_s0 + $0x40] sm:$0xff]  ;;  %v37_v20 = vld [vmem:[%s4594_s0 + $0x48] sm:$0xff]  ;;  %v38_v22 = vld [vmem:[%s4594_s0 + $0x50] sm:$0xff] }
   0x8   :  { %v68_v19 = vld [vmem:[%s4594_s0 + $0x140] sm:$0xff]  ;;  %v69_v21 = vld [vmem:[%s4594_s0 + $0x148] sm:$0xff]  ;;  %v70_v23 = vld [vmem:[%s4594_s0 + $0x150] sm:$0xff] }
   0x9   :  { %v39_v24 = vld [vmem:[%s4594_s0 + $0x58] sm:$0xff]  ;;  %v40_v26 = vld [vmem:[%s4594_s0 + $0x60] sm:$0xff]  ;;  %v41_v28 = vld [vmem:[%s4594_s0 + $0x68] sm:$0xff] }
   0xa   :  { %v71_v25 = vld [vmem:[%s4594_s0 + $0x158] sm:$0xff]  ;;  %v72_v27 = vld [vmem:[%s4594_s0 + $0x160] sm:$0xff]  ;;  %v73_v29 = vld [vmem:[%s4594_s0 + $0x168] sm:$0xff] }
   0xb   :  { %v42_v30 = vld [vmem:[%s4594_s0 + $0x70] sm:$0xff]  ;;  %v43_v32 = vld [vmem:[%s4594_s0 + $0x78] sm:$0xff]  ;;  %v3260_v34 = vld [vmem:[%s4595_s2] ss:$0 sm:$0xff] }
   0xc   :  { %2010 = vmatmul.msk.f32.gmra.mxu0 %vm93_vm0, %v29_v4  ;;  %2074 = vmatmul.msk.f32.gmra.mxu1 %vm93_vm0, %v29_v4  ;;  %v74_v31 = vld [vmem:[%s4594_s0 + $0x170] sm:$0xff]  ;;  %v75_v33 = vld [vmem:[%s4594_s0 + $0x178] sm:$0xff]  ;;  %v3265_v35 = vld [vmem:[%s4597_s5] ss:$0 sm:$0xff] }
   0xd   :  { %2042 = vmatmul.msk.f32.gmra.mxu2 %vm93_vm0, %v61_v5  ;;  %2106 = vmatmul.msk.f32.gmra.mxu3 %vm93_vm0, %v61_v5  ;;  %v3270_v36 = vld [vmem:[%s4596_s3] ss:$0 sm:$0xff]  ;;  %v45_v55 = vld [vmem:[%s4594_s0 + $0x88] sm:$0xff] }
   0xe   :  { %v3275_v38 = vld [vmem:[%s4598_s6] ss:$0 sm:$0xff]  ;;  %v77_v56 = vld [vmem:[%s4594_s0 + $0x188] sm:$0xff] }
   0xf   :  { %v44_v39 = vld [vmem:[%s4594_s0 + $0x80] sm:$0xff] }
  0x10   :  { %v76_v40 = vld [vmem:[%s4594_s0 + $0x180] sm:$0xff] }
  0x14   :  { %2011 = vmatmul.msk.f32.gmra.mxu0 %vm93_vm0, %v30_v6  ;;  %2075 = vmatmul.msk.f32.gmra.mxu1 %vm93_vm0, %v30_v6 }
  0x15   :  { %2043 = vmatmul.msk.f32.gmra.mxu2 %vm93_vm0, %v62_v7  ;;  %2107 = vmatmul.msk.f32.gmra.mxu3 %vm93_vm0, %v62_v7 }
  0x1c   :  { %2012 = vmatmul.msk.f32.gmra.mxu0 %vm93_vm0, %v31_v8  ;;  %2076 = vmatmul.msk.f32.gmra.mxu1 %vm93_vm0, %v31_v8 }
  0x1d   :  { %2044 = vmatmul.msk.f32.gmra.mxu2 %vm93_vm0, %v63_v9  ;;  %2108 = vmatmul.msk.f32.gmra.mxu3 %vm93_vm0, %v63_v9 }
  0x24   :  { %2013 = vmatmul.msk.f32.gmra.mxu0 %vm93_vm0, %v32_v10  ;;  %2077 = vmatmul.msk.f32.gmra.mxu1 %vm93_vm0, %v32_v10 }
  0x25   :  { %2045 = vmatmul.msk.f32.gmra.mxu2 %vm93_vm0, %v64_v11  ;;  %2109 = vmatmul.msk.f32.gmra.mxu3 %vm93_vm0, %v64_v11 }
  0x2c   :  { %2014 = vmatmul.msk.f32.gmra.mxu0 %vm93_vm0, %v33_v12  ;;  %2078 = vmatmul.msk.f32.gmra.mxu1 %vm93_vm0, %v33_v12 }
  0x2d   :  { %2046 = vmatmul.msk.f32.gmra.mxu2 %vm93_vm0, %v65_v13  ;;  %2110 = vmatmul.msk.f32.gmra.mxu3 %vm93_vm0, %v65_v13 }
  0x34   :  { %2015 = vmatmul.msk.f32.gmra.mxu0 %vm93_vm0, %v34_v14  ;;  %2079 = vmatmul.msk.f32.gmra.mxu1 %vm93_vm0, %v34_v14 }
  0x35   :  { %2047 = vmatmul.msk.f32.gmra.mxu2 %vm93_vm0, %v66_v15  ;;  %2111 = vmatmul.msk.f32.gmra.mxu3 %vm93_vm0, %v66_v15 }
  0x3c   :  { %2016 = vmatmul.msk.f32.gmra.mxu0 %vm93_vm0, %v35_v16  ;;  %2080 = vmatmul.msk.f32.gmra.mxu1 %vm93_vm0, %v35_v16  ;;  %v46_v16 = vld [vmem:[%s4594_s0 + $0x90] sm:$0xff] }
  0x3d   :  { %2048 = vmatmul.msk.f32.gmra.mxu2 %vm93_vm0, %v67_v17  ;;  %2112 = vmatmul.msk.f32.gmra.mxu3 %vm93_vm0, %v67_v17  ;;  %v78_v17 = vld [vmem:[%s4594_s0 + $0x190] sm:$0xff] }
  0x44   :  { %2017 = vmatmul.msk.f32.gmra.mxu0 %vm93_vm0, %v36_v18  ;;  %2081 = vmatmul.msk.f32.gmra.mxu1 %vm93_vm0, %v36_v18 }
  0x45   :  { %2049 = vmatmul.msk.f32.gmra.mxu2 %vm93_vm0, %v68_v19  ;;  %2113 = vmatmul.msk.f32.gmra.mxu3 %vm93_vm0, %v68_v19 }
  0x4c   :  { %2018 = vmatmul.msk.f32.gmra.mxu0 %vm93_vm0, %v37_v20  ;;  %2082 = vmatmul.msk.f32.gmra.mxu1 %vm93_vm0, %v37_v20 }
  0x4d   :  { %2050 = vmatmul.msk.f32.gmra.mxu2 %vm93_vm0, %v69_v21  ;;  %2114 = vmatmul.msk.f32.gmra.mxu3 %vm93_vm0, %v69_v21 }
  0x54   :  { %2019 = vmatmul.msk.f32.gmra.mxu0 %vm93_vm0, %v38_v22  ;;  %2083 = vmatmul.msk.f32.gmra.mxu1 %vm93_vm0, %v38_v22 }
  0x55   :  { %2051 = vmatmul.msk.f32.gmra.mxu2 %vm93_vm0, %v70_v23  ;;  %2115 = vmatmul.msk.f32.gmra.mxu3 %vm93_vm0, %v70_v23 }
  0x5c   :  { %2020 = vmatmul.msk.f32.gmra.mxu0 %vm93_vm0, %v39_v24  ;;  %2084 = vmatmul.msk.f32.gmra.mxu1 %vm93_vm0, %v39_v24 }
  0x5d   :  { %2052 = vmatmul.msk.f32.gmra.mxu2 %vm93_vm0, %v71_v25  ;;  %2116 = vmatmul.msk.f32.gmra.mxu3 %vm93_vm0, %v71_v25 }
  0x64   :  { %2021 = vmatmul.msk.f32.gmra.mxu0 %vm93_vm0, %v40_v26  ;;  %2085 = vmatmul.msk.f32.gmra.mxu1 %vm93_vm0, %v40_v26 }
  0x65   :  { %2053 = vmatmul.msk.f32.gmra.mxu2 %vm93_vm0, %v72_v27  ;;  %2117 = vmatmul.msk.f32.gmra.mxu3 %vm93_vm0, %v72_v27 }
  0x6c   :  { %2022 = vmatmul.msk.f32.gmra.mxu0 %vm93_vm0, %v41_v28  ;;  %2086 = vmatmul.msk.f32.gmra.mxu1 %vm93_vm0, %v41_v28 }
  0x6d   :  { %2054 = vmatmul.msk.f32.gmra.mxu2 %vm93_vm0, %v73_v29  ;;  %2118 = vmatmul.msk.f32.gmra.mxu3 %vm93_vm0, %v73_v29 }
  0x74   :  { %2023 = vmatmul.msk.f32.gmra.mxu0 %vm93_vm0, %v42_v30  ;;  %2087 = vmatmul.msk.f32.gmra.mxu1 %vm93_vm0, %v42_v30 }
  0x75   :  { %2055 = vmatmul.msk.f32.gmra.mxu2 %vm93_vm0, %v74_v31  ;;  %2119 = vmatmul.msk.f32.gmra.mxu3 %vm93_vm0, %v74_v31 }
  0x7c   :  { %2024 = vmatmul.msk.f32.gmra.mxu0 %vm93_vm0, %v43_v32  ;;  %2088 = vmatmul.msk.f32.gmra.mxu1 %vm93_vm0, %v43_v32 }
  0x7d   :  { %2056 = vmatmul.msk.f32.gmra.mxu2 %vm93_vm0, %v75_v33  ;;  %2120 = vmatmul.msk.f32.gmra.mxu3 %vm93_vm0, %v75_v33 }
  0x81   :  { %v303_v37 = vpop.f32.mrf.mxu0  ;;  %v1161_v42 = vpop.f32.mrf.mxu1 }
  0x82   :  { %v499_v41 = vmul.f32 %v3260_v34, %v303_v37  ;;  %v1357_v43 = vmul.f32 %v3265_v35, %v1161_v42 }
  0x84   :  { %v3286_v44 = vadd.f32 %v3270_v36, %v499_v41  ;;  %2025 = vmatmul.msk.f32.gmra.mxu0 %vm93_vm0, %v44_v39  ;;  %v3291_v45 = vadd.f32 %v3275_v38, %v1357_v43  ;;  %2089 = vmatmul.msk.f32.gmra.mxu1 %vm93_vm0, %v44_v39 }
  0x85   :  { %2057 = vmatmul.msk.f32.gmra.mxu2 %vm93_vm0, %v76_v40  ;;  %2121 = vmatmul.msk.f32.gmra.mxu3 %vm93_vm0, %v76_v40 }
  0x86   :  { %v631_v46 = vsub.f32 0.0, %v3286_v44  ;;  %v1489_v47 = vsub.f32 0.0, %v3291_v45 }
  0x88   :  { %v399_v48 = vpop.f32.mrf.mxu2  ;;  %v695_v49 = vmul.f32 1.442695, %v631_v46  ;;  %v1257_v51 = vpop.f32.mrf.mxu3  ;;  %v1553_v52 = vmul.f32 1.442695, %v1489_v47 }
  0x89   :  { %v531_v50 = vmul.f32 %v3260_v34, %v399_v48  ;;  %v1389_v53 = vmul.f32 %v3265_v35, %v1257_v51  ;;  %v306_v54 = vpop.f32.mrf.mxu0  ;;  %v1164_v59 = vpop.f32.mrf.mxu1  ;;  %v47_v51 = vld [vmem:[%s4594_s0 + $0x98] sm:$0xff] }
  0x8a   :  { %2525 = vpow2.f32 %v695_v49  ;;  %v500_v58 = vmul.f32 %v3260_v34, %v306_v54  ;;  %v1358_v61 = vmul.f32 %v3265_v35, %v1164_v59 }
  0x8b   :  { %v3306_v57 = vadd.f32 %v3270_v36, %v531_v50  ;;  %2527 = vpow2.f32 %v1553_v52  ;;  %v3310_v60 = vadd.f32 %v3275_v38, %v1389_v53  ;;  %v79_v52 = vld [vmem:[%s4594_s0 + $0x198] sm:$0xff] }
  0x8c   :  { %v3315_v63 = vadd.f32 %v3270_v36, %v500_v58  ;;  %2026 = vmatmul.msk.f32.gmra.mxu0 %vm93_vm0, %v45_v55  ;;  %v3321_v1 = vadd.f32 %v3275_v38, %v1358_v61  ;;  %2090 = vmatmul.msk.f32.gmra.mxu1 %vm93_vm0, %v45_v55 }
  0x8d   :  { %v663_v62 = vsub.f32 0.0, %v3306_v57  ;;  %2058 = vmatmul.msk.f32.gmra.mxu2 %vm93_vm0, %v77_v56  ;;  %v1521_v0 = vsub.f32 0.0, %v3310_v60  ;;  %2122 = vmatmul.msk.f32.gmra.mxu3 %vm93_vm0, %v77_v56 }
  0x8e   :  { %v632_v3 = vsub.f32 0.0, %v3315_v63  ;;  %v1490_v5 = vsub.f32 0.0, %v3321_v1 }
  0x8f   :  { %v759_v2 = vmul.f32 1.442695, %v663_v62  ;;  %v1617_v4 = vmul.f32 1.442695, %v1521_v0 }
  0x90   :  { %v402_v6 = vpop.f32.mrf.mxu2  ;;  %v2526_v7 = vpop.eup %2525  ;;  %v697_v8 = vmul.f32 1.442695, %v632_v3  ;;  %v1555_v13 = vmul.f32 1.442695, %v1490_v5 }
  0x91   :  { %2529 = vpow2.f32 %v759_v2  ;;  %v532_v9 = vmul.f32 %v3260_v34, %v402_v6  ;;  %v1260_v10 = vpop.f32.mrf.mxu3  ;;  %v2528_v11 = vpop.eup %2527  ;;  %v823_v12 = vadd.f32 1.0, %v2526_v7 }
  0x92   :  { %2531 = vpow2.f32 %v1617_v4  ;;  %v1390_v14 = vmul.f32 %v3265_v35, %v1260_v10  ;;  %v309_v15 = vpop.f32.mrf.mxu0  ;;  %v1681_v18 = vadd.f32 1.0, %v2528_v11  ;;  %v1167_v21 = vpop.f32.mrf.mxu1 }
  0x93   :  { %2533 = vpow2.f32 %v697_v8  ;;  %v3336_v19 = vadd.f32 %v3270_v36, %v532_v9  ;;  %v501_v20 = vmul.f32 %v3260_v34, %v309_v15  ;;  %v1359_v23 = vmul.f32 %v3265_v35, %v1167_v21 }
  0x94   :  { %2535 = vrcp.f32 %v823_v12  ;;  %v3340_v22 = vadd.f32 %v3275_v38, %v1390_v14  ;;  %2027 = vmatmul.msk.f32.gmra.mxu0 %vm93_vm0, %v46_v16  ;;  %2091 = vmatmul.msk.f32.gmra.mxu1 %vm93_vm0, %v46_v16 }
  0x95   :  { %2537 = vrcp.f32 %v1681_v18  ;;  %v664_v24 = vsub.f32 0.0, %v3336_v19  ;;  %v3345_v25 = vadd.f32 %v3270_v36, %v501_v20  ;;  %2059 = vmatmul.msk.f32.gmra.mxu2 %vm93_vm0, %v78_v17  ;;  %v3351_v27 = vadd.f32 %v3275_v38, %v1359_v23  ;;  %2123 = vmatmul.msk.f32.gmra.mxu3 %vm93_vm0, %v78_v17 }
  0x96   :  { %2539 = vpow2.f32 %v1555_v13  ;;  %v1522_v26 = vsub.f32 0.0, %v3340_v22 }
  0x97   :  { %v2530_v28 = vpop.eup %2529  ;;  %v761_v29 = vmul.f32 1.442695, %v664_v24  ;;  %v633_v30 = vsub.f32 0.0, %v3345_v25  ;;  %v1491_v33 = vsub.f32 0.0, %v3351_v27 }
  0x98   :  { %v2532_v31 = vpop.eup %2531  ;;  %v855_v32 = vadd.f32 1.0, %v2530_v28  ;;  %v405_v37 = vpop.f32.mrf.mxu2  ;;  %v1619_v41 = vmul.f32 1.442695, %v1522_v26  ;;  %v48_v28 = vld [vmem:[%s4594_s0 + $0xa0] sm:$0xff] }
  0x99   :  { %v2534_v39 = vpop.eup %2533  ;;  %v1713_v40 = vadd.f32 1.0, %v2532_v31  ;;  %2541 = vpow2.f32 %v761_v29  ;;  %v533_v42 = vmul.f32 %v3260_v34, %v405_v37  ;;  %v1263_v43 = vpop.f32.mrf.mxu3  ;;  %v699_v48 = vmul.f32 1.442695, %v633_v30 }
  0x9a   :  { %v2536_v46 = vpop.eup %2535  ;;  %2543 = vrcp.f32 %v855_v32  ;;  %v824_v47 = vadd.f32 1.0, %v2534_v39  ;;  %v1391_v49 = vmul.f32 %v3265_v35, %v1263_v43  ;;  %v312_v50 = vpop.f32.mrf.mxu0  ;;  %v1557_v59 = vmul.f32 1.442695, %v1491_v33 }
  0x9b   :  { %v2538_v53 = vpop.eup %2537  ;;  %2545 = vrcp.f32 %v1713_v40  ;;  %v3366_v54 = vadd.f32 %v3270_v36, %v533_v42  ;;  %v502_v55 = vmul.f32 %v3260_v34, %v312_v50  ;;  %v1170_v56 = vpop.f32.mrf.mxu1  ;;  %v951_v4 = vmul.f32 %v2536_v46, %v3286_v44 }
  0x9c   :  { %v2540_v58 = vpop.eup %2539  ;;  %2547 = vrcp.f32 %v824_v47  ;;  %v3370_v61 = vadd.f32 %v3275_v38, %v1391_v49  ;;  %v1360_v62 = vmul.f32 %v3265_v35, %v1170_v56  ;;  %2028 = vmatmul.msk.f32.gmra.mxu0 %vm93_vm0, %v47_v51  ;;  %2092 = vmatmul.msk.f32.gmra.mxu1 %vm93_vm0, %v47_v51  ;;  %v3387_v8 = vmul.f32 %v2538_v53, %v3291_v45 }
  0x9d   :  { %v1682_v0 = vadd.f32 1.0, %v2540_v58  ;;  %2549 = vpow2.f32 %v1619_v41  ;;  %v665_v2 = vsub.f32 0.0, %v3366_v54  ;;  %v3375_v3 = vadd.f32 %v3270_v36, %v502_v55  ;;  %2060 = vmatmul.msk.f32.gmra.mxu2 %vm93_vm0, %v79_v52  ;;  %2124 = vmatmul.msk.f32.gmra.mxu3 %vm93_vm0, %v79_v52 }
  0x9e   :  { %2551 = vpow2.f32 %v699_v48  ;;  %v1523_v5 = vsub.f32 0.0, %v3370_v61  ;;  %v3382_v6 = vadd.f32 %v3275_v38, %v1360_v62 }
  0x9f   :  { %v2542_v7 = vpop.eup %2541  ;;  %2553 = vrcp.f32 %v1682_v0  ;;  %v763_v9 = vmul.f32 1.442695, %v665_v2  ;;  %v634_v10 = vsub.f32 0.0, %v3375_v3 }
  0xa0   :  { %v2544_v11 = vpop.eup %2543  ;;  %v856_v44 = vadd.f32 1.0, %v2542_v7  ;;  %2555 = vpow2.f32 %v1557_v59  ;;  %v1621_v12 = vmul.f32 1.442695, %v1523_v5  ;;  %v1492_v13 = vsub.f32 0.0, %v3382_v6  ;;  %v408_v14 = vpop.f32.mrf.mxu2 }
  0xa1   :  { %v2546_v15 = vpop.eup %2545  ;;  %v3392_v16 = vmul.f32 %v2544_v11, %v3306_v57  ;;  %2557 = vpow2.f32 %v763_v9  ;;  %v701_v17 = vmul.f32 1.442695, %v634_v10  ;;  %v534_v45 = vmul.f32 %v3260_v34, %v408_v14  ;;  %v1266_v18 = vpop.f32.mrf.mxu3  ;;  %v80_v57 = vld [vmem:[%s4594_s0 + $0x1a0] sm:$0xff] }
  0xa2   :  { %v2548_v20 = vpop.eup %2547  ;;  %v3396_v21 = vmul.f32 %v2546_v15, %v3310_v60  ;;  %2559 = vrcp.f32 %v856_v44  ;;  %v1559_v23 = vmul.f32 1.442695, %v1492_v13  ;;  %v1392_v24 = vmul.f32 %v3265_v35, %v1266_v18  ;;  %v315_v26 = vpop.f32.mrf.mxu0 }
  0xa3   :  { %v2550_v29 = vpop.eup %2549  ;;  %v952_v30 = vmul.f32 %v2548_v20, %v3315_v63  ;;  %2561 = vpow2.f32 %v1621_v12  ;;  %v3407_v60 = vadd.f32 %v3270_v36, %v534_v45  ;;  %v503_v31 = vmul.f32 %v3260_v34, %v315_v26  ;;  %v1173_v32 = vpop.f32.mrf.mxu1  ;;  %v81_v45 = vld [vmem:[%s4594_s0 + $0x1a8] sm:$0xff] }
  0xa4   :  { %v2552_v33 = vpop.eup %2551  ;;  %v1714_v37 = vadd.f32 1.0, %v2550_v29  ;;  %2563 = vpow2.f32 %v701_v17  ;;  %v3411_v39 = vadd.f32 %v3275_v38, %v1392_v24  ;;  %v1361_v40 = vmul.f32 %v3265_v35, %v1173_v32  ;;  %2029 = vmatmul.msk.f32.gmra.mxu0 %vm93_vm0, %v48_v28  ;;  %2093 = vmatmul.msk.f32.gmra.mxu1 %vm93_vm0, %v48_v28 }
  0xa5   :  { %v2554_v41 = vpop.eup %2553  ;;  %v2140_v42 = vpack.c.bf16 %v952_v30, %v951_v4  ;;  %v825_v43 = vadd.f32 1.0, %v2552_v33  ;;  %2565 = vpow2.f32 %v1559_v23  ;;  %v666_v63 = vsub.f32 0.0, %v3407_v60  ;;  %2061 = vmatmul.msk.f32.gmra.mxu2 %vm93_vm0, %v80_v57  ;;  %2125 = vmatmul.msk.f32.gmra.mxu3 %vm93_vm0, %v80_v57 }
  0xa6   :  { %v2556_v46 = vpop.eup %2555  ;;  %v1810_v47 = vmul.f32 %v2554_v41, %v3321_v1  ;;  %2567 = vrcp.f32 %v1714_v37  ;;  %v1524_v48 = vsub.f32 0.0, %v3411_v39  ;;  %v3420_v49 = vadd.f32 %v3270_v36, %v503_v31 }
  0xa7   :  { %v2558_v50 = vpop.eup %2557  ;;  %2141 = vst [vmem:[%s4599_s7] sm:$0xff] %v2140_v42   ;;  %2569 = vrcp.f32 %v825_v43  ;;  %v1683_v51 = vadd.f32 1.0, %v2556_v46  ;;  %v765_v52 = vmul.f32 1.442695, %v666_v63  ;;  %v3428_v1 = vadd.f32 %v3275_v38, %v1361_v40 }
  0xa8   :  { %v2560_v53 = vpop.eup %2559  ;;  %v2300_v55 = vpack.c.bf16 %v1810_v47, %v3387_v8  ;;  %v857_v56 = vadd.f32 1.0, %v2558_v50  ;;  %v1623_v58 = vmul.f32 1.442695, %v1524_v48  ;;  %v635_v59 = vsub.f32 0.0, %v3420_v49  ;;  %v411_v62 = vpop.f32.mrf.mxu2 }
  0xa9   :  { %v2562_v0 = vpop.eup %2561  ;;  %v984_v2 = vmul.f32 %v2560_v53, %v3336_v19  ;;  %2571 = vrcp.f32 %v1683_v51  ;;  %v1493_v4 = vsub.f32 0.0, %v3428_v1  ;;  %v535_v5 = vmul.f32 %v3260_v34, %v411_v62  ;;  %v1269_v7 = vpop.f32.mrf.mxu3  ;;  %v49_v19 = vld [vmem:[%s4594_s0 + $0xa8] sm:$0xff] }
  0xaa   :  { %v2564_v9 = vpop.eup %2563  ;;  %2301 = vst [vmem:[%s4600_s8] sm:$0xff] %v2300_v55   ;;  %2573 = vrcp.f32 %v857_v56  ;;  %v1715_v8 = vadd.f32 1.0, %v2562_v0  ;;  %v703_v10 = vmul.f32 1.442695, %v635_v59  ;;  %v1393_v11 = vmul.f32 %v3265_v35, %v1269_v7  ;;  %v318_v44 = vpop.f32.mrf.mxu0  ;;  %v50_v55 = vld [vmem:[%s4594_s0 + $0xb0] sm:$0xff] }
  0xab   :  { %v2566_v12 = vpop.eup %2565  ;;  %v2220_v13 = vpack.c.bf16 %v984_v2, %v3392_v16  ;;  %v826_v14 = vadd.f32 1.0, %v2564_v9  ;;  %2575 = vpow2.f32 %v765_v52  ;;  %v1561_v15 = vmul.f32 1.442695, %v1493_v4  ;;  %v1176_v17 = vpop.f32.mrf.mxu1  ;;  %v82_v0 = vld [vmem:[%s4594_s0 + $0x1b0] sm:$0xff] }
  0xac   :  { %v2568_v18 = vpop.eup %2567  ;;  %2577 = vrcp.f32 %v1715_v8  ;;  %v1684_v20 = vadd.f32 1.0, %v2566_v12  ;;  %v3447_v23 = vadd.f32 %v3270_v36, %v535_v5  ;;  %v3450_v24 = vadd.f32 %v3275_v38, %v1393_v11  ;;  %2030 = vmatmul.msk.f32.gmra.mxu0 %vm93_vm0, %v49_v19  ;;  %2094 = vmatmul.msk.f32.gmra.mxu1 %vm93_vm0, %v49_v19 }
  0xad   :  { %v2570_v26 = vpop.eup %2569  ;;  %2472 = vst [vmem:[%s4599_s7 + $0x80] sm:$0xff] %v2220_v13   ;;  %v1842_v16 = vmul.f32 %v2568_v18, %v3340_v22  ;;  %2579 = vrcp.f32 %v826_v14  ;;  %v504_v28 = vmul.f32 %v3260_v34, %v318_v44  ;;  %v1362_v57 = vmul.f32 %v3265_v35, %v1176_v17  ;;  %2062 = vmatmul.msk.f32.gmra.mxu2 %vm93_vm0, %v81_v45 }
  0xae   :  { %2581 = vrcp.f32 %v1684_v20  ;;  %v667_v29 = vsub.f32 0.0, %v3447_v23  ;;  %v1525_v30 = vsub.f32 0.0, %v3450_v24  ;;  %2126 = vmatmul.msk.f32.gmra.mxu3 %vm93_vm0, %v81_v45  ;;  %v953_v40 = vmul.f32 %v2570_v26, %v3345_v25 }
  0xaf   :  { %v2572_v31 = vpop.eup %2571  ;;  %v2380_v32 = vpack.c.bf16 %v1842_v16, %v3396_v21  ;;  %2583 = vpow2.f32 %v1623_v58  ;;  %v3465_v22 = vadd.f32 %v3270_v36, %v504_v28  ;;  %v3468_v33 = vadd.f32 %v3275_v38, %v1362_v57 }
  0xb0   :  { %v2574_v37 = vpop.eup %2573  ;;  %2585 = vpow2.f32 %v703_v10  ;;  %v767_v41 = vmul.f32 1.442695, %v667_v29  ;;  %v1625_v42 = vmul.f32 1.442695, %v1525_v30  ;;  %v414_v43 = vpop.f32.mrf.mxu2  ;;  %v1811_v21 = vmul.f32 %v2572_v31, %v3351_v27 }
  0xb1   :  { %v2576_v63 = vpop.eup %2575  ;;  %2503 = vst [vmem:[%s4600_s8 + $0x80] sm:$0xff] %v2380_v32   ;;  %2587 = vpow2.f32 %v1561_v15  ;;  %v636_v46 = vsub.f32 0.0, %v3465_v22  ;;  %v1494_v47 = vsub.f32 0.0, %v3468_v33  ;;  %v1272_v48 = vpop.f32.mrf.mxu3  ;;  %v536_v51 = vmul.f32 %v3260_v34, %v414_v43 }
  0xb2   :  { %v3478_v50 = vpop.eup %2577  ;;  %v858_v25 = vadd.f32 1.0, %v2576_v63  ;;  %2589 = vpow2.f32 %v767_v41  ;;  %v1394_v52 = vmul.f32 %v3265_v35, %v1272_v48  ;;  %v321_v53 = vpop.f32.mrf.mxu0  ;;  %v3486_v56 = vmul.f32 %v2574_v37, %v3366_v54  ;;  %v83_v48 = vld [vmem:[%s4594_s0 + $0x1b8] sm:$0xff] }
  0xb3   :  { %v2580_v27 = vpop.eup %2579  ;;  %2591 = vpow2.f32 %v1625_v42  ;;  %v705_v58 = vmul.f32 1.442695, %v636_v46  ;;  %v1563_v59 = vmul.f32 1.442695, %v1494_v47  ;;  %v1179_v62 = vpop.f32.mrf.mxu1  ;;  %v3493_v5 = vadd.f32 %v3270_v36, %v536_v51  ;;  %v51_v42 = vld [vmem:[%s4594_s0 + $0xb8] sm:$0xff] }
  0xb4   :  { %v2582_v2 = vpop.eup %2581  ;;  %v954_v4 = vmul.f32 %v2580_v27, %v3375_v3  ;;  %2593 = vrcp.f32 %v858_v25  ;;  %v3496_v7 = vadd.f32 %v3275_v38, %v1394_v52  ;;  %v505_v8 = vmul.f32 %v3260_v34, %v321_v53  ;;  %2031 = vmatmul.msk.f32.gmra.mxu0 %vm93_vm0, %v50_v55  ;;  %2095 = vmatmul.msk.f32.gmra.mxu1 %vm93_vm0, %v50_v55 }
  0xb5   :  { %v2584_v54 = vpop.eup %2583  ;;  %v1812_v9 = vmul.f32 %v2582_v2, %v3382_v6  ;;  %2595 = vpow2.f32 %v705_v58  ;;  %v1363_v10 = vmul.f32 %v3265_v35, %v1179_v62  ;;  %v668_v19 = vsub.f32 0.0, %v3493_v5  ;;  %2063 = vmatmul.msk.f32.gmra.mxu2 %vm93_vm0, %v82_v0 }
  0xb6   :  { %v2586_v11 = vpop.eup %2585  ;;  %v2145_v44 = vpack.c.bf16 %v954_v4, %v953_v40  ;;  %v1716_v3 = vadd.f32 1.0, %v2584_v54  ;;  %2597 = vpow2.f32 %v1563_v59  ;;  %v1526_v14 = vsub.f32 0.0, %v3496_v7  ;;  %2127 = vmatmul.msk.f32.gmra.mxu3 %vm93_vm0, %v82_v0 }
  0xb7   :  { %v2588_v12 = vpop.eup %2587  ;;  %v2305_v13 = vpack.c.bf16 %v1812_v9, %v1811_v21  ;;  %v827_v6 = vadd.f32 1.0, %v2586_v11  ;;  %v3507_v15 = vadd.f32 %v3270_v36, %v505_v8  ;;  %v769_v18 = vmul.f32 1.442695, %v668_v19 }
  0xb8   :  { %v2590_v17 = vpop.eup %2589  ;;  %2457 = vst [vmem:[%s4599_s7 + $0x8] sm:$0xff] %v2145_v44   ;;  %2599 = vrcp.f32 %v1716_v3  ;;  %v1685_v45 = vadd.f32 1.0, %v2588_v12  ;;  %v3514_v20 = vadd.f32 %v3275_v38, %v1363_v10  ;;  %v417_v26 = vpop.f32.mrf.mxu2  ;;  %v1627_v57 = vmul.f32 1.442695, %v1526_v14 }
  0xb9   :  { %v2592_v16 = vpop.eup %2591  ;;  %2488 = vst [vmem:[%s4600_s8 + $0x8] sm:$0xff] %v2305_v13   ;;  %2601 = vrcp.f32 %v827_v6  ;;  %v859_v28 = vadd.f32 1.0, %v2590_v17  ;;  %v637_v29 = vsub.f32 0.0, %v3507_v15  ;;  %v1275_v30 = vpop.f32.mrf.mxu3  ;;  %v537_v40 = vmul.f32 %v3260_v34, %v417_v26  ;;  %v52_v17 = vld [vmem:[%s4594_s0 + $0xc0] sm:$0xff] }
  0xba   :  { %v2594_v31 = vpop.eup %2593  ;;  %2603 = vrcp.f32 %v1685_v45  ;;  %v1717_v32 = vadd.f32 1.0, %v2592_v16  ;;  %v1495_v37 = vsub.f32 0.0, %v3514_v20  ;;  %v324_v41 = vpop.f32.mrf.mxu0  ;;  %v1395_v46 = vmul.f32 %v3265_v35, %v1275_v30  ;;  %v84_v16 = vld [vmem:[%s4594_s0 + $0x1c0] sm:$0xff] }
  0xbb   :  { %v2596_v43 = vpop.eup %2595  ;;  %v986_v63 = vmul.f32 %v2594_v31, %v3407_v60  ;;  %2605 = vrcp.f32 %v859_v28  ;;  %v707_v21 = vmul.f32 1.442695, %v637_v29  ;;  %v1182_v47 = vpop.f32.mrf.mxu1  ;;  %v3531_v53 = vadd.f32 %v3270_v36, %v537_v40 }
  0xbc   :  { %v2598_v25 = vpop.eup %2597  ;;  %2607 = vrcp.f32 %v1717_v32  ;;  %v828_v51 = vadd.f32 1.0, %v2596_v43  ;;  %v1565_v52 = vmul.f32 1.442695, %v1495_v37  ;;  %v3535_v60 = vadd.f32 %v3275_v38, %v1395_v46  ;;  %2032 = vmatmul.msk.f32.gmra.mxu0 %vm93_vm0, %v51_v42  ;;  %2096 = vmatmul.msk.f32.gmra.mxu1 %vm93_vm0, %v51_v42 }
  0xbd   :  { %v2225_v55 = vpack.c.bf16 %v986_v63, %v3486_v56  ;;  %v1686_v27 = vadd.f32 1.0, %v2598_v25  ;;  %2609 = vpow2.f32 %v769_v18  ;;  %v669_v59 = vsub.f32 0.0, %v3531_v53  ;;  %2064 = vmatmul.msk.f32.gmra.mxu2 %vm93_vm0, %v83_v48 }
  0xbe   :  { %v2600_v58 = vpop.eup %2599  ;;  %2611 = vrcp.f32 %v828_v51  ;;  %v506_v62 = vmul.f32 %v3260_v34, %v324_v41  ;;  %v1364_v0 = vmul.f32 %v3265_v35, %v1182_v47  ;;  %v1843_v2 = vmul.f32 %v3478_v50, %v3370_v61  ;;  %2128 = vmatmul.msk.f32.gmra.mxu3 %vm93_vm0, %v83_v48 }
  0xbf   :  { %v2602_v56 = vpop.eup %2601  ;;  %2473 = vst [vmem:[%s4599_s7 + $0x88] sm:$0xff] %v2225_v55   ;;  %v1844_v4 = vmul.f32 %v2600_v58, %v3411_v39  ;;  %2613 = vrcp.f32 %v1686_v27  ;;  %v1527_v54 = vsub.f32 0.0, %v3535_v60  ;;  %v771_v10 = vmul.f32 1.442695, %v669_v59 }
  0xc0   :  { %v2604_v9 = vpop.eup %2603  ;;  %v955_v8 = vmul.f32 %v2602_v56, %v3420_v49  ;;  %2615 = vpow2.f32 %v1627_v57  ;;  %v3553_v11 = vadd.f32 %v3270_v36, %v506_v62  ;;  %v420_v61 = vpop.f32.mrf.mxu2  ;;  %v3561_v6 = vadd.f32 %v3275_v38, %v1364_v0 }
  0xc1   :  { %v2606_v50 = vpop.eup %2605  ;;  %v2385_v44 = vpack.c.bf16 %v1844_v4, %v1843_v2  ;;  %v1813_v3 = vmul.f32 %v2604_v9, %v3428_v1  ;;  %2617 = vpow2.f32 %v707_v21  ;;  %v1629_v39 = vmul.f32 1.442695, %v1527_v54  ;;  %v1278_v19 = vpop.f32.mrf.mxu3  ;;  %v53_v9 = vld [vmem:[%s4594_s0 + $0xc8] sm:$0xff] }
  0xc2   :  { %v2608_v12 = vpop.eup %2607  ;;  %v3557_v13 = vmul.f32 %v2606_v50, %v3447_v23  ;;  %2619 = vpow2.f32 %v1565_v52  ;;  %v638_v49 = vsub.f32 0.0, %v3553_v11  ;;  %v327_v14 = vpop.f32.mrf.mxu0  ;;  %v538_v23 = vmul.f32 %v3260_v34, %v420_v61 }
  0xc3   :  { %v2610_v45 = vpop.eup %2609  ;;  %2504 = vst [vmem:[%s4600_s8 + $0x88] sm:$0xff] %v2385_v44   ;;  %v3570_v1 = vmul.f32 %v2608_v12, %v3450_v24  ;;  %2621 = vpow2.f32 %v771_v10  ;;  %v1396_v18 = vmul.f32 %v3265_v35, %v1278_v19  ;;  %v1185_v26 = vpop.f32.mrf.mxu1  ;;  %v1496_v30 = vsub.f32 0.0, %v3561_v6  ;;  %v85_v44 = vld [vmem:[%s4594_s0 + $0x1c8] sm:$0xff] }
  0xc4   :  { %v2612_v28 = vpop.eup %2611  ;;  %v860_v57 = vadd.f32 1.0, %v2610_v45  ;;  %2623 = vpow2.f32 %v1629_v39  ;;  %v709_v29 = vmul.f32 1.442695, %v638_v49  ;;  %v3580_v32 = vadd.f32 %v3270_v36, %v538_v23  ;;  %2033 = vmatmul.msk.f32.gmra.mxu0 %vm93_vm0, %v52_v17  ;;  %2097 = vmatmul.msk.f32.gmra.mxu1 %vm93_vm0, %v52_v17 }
  0xc5   :  { %v2614_v31 = vpop.eup %2613  ;;  %v956_v24 = vmul.f32 %v2612_v28, %v3465_v22  ;;  %v3583_v37 = vadd.f32 %v3275_v38, %v1396_v18  ;;  %v507_v40 = vmul.f32 %v3260_v34, %v327_v14  ;;  %v1567_v43 = vmul.f32 1.442695, %v1496_v30  ;;  %2065 = vmatmul.msk.f32.gmra.mxu2 %vm93_vm0, %v84_v16 }
  0xc6   :  { %v2616_v41 = vpop.eup %2615  ;;  %v1814_v42 = vmul.f32 %v2614_v31, %v3468_v33  ;;  %2625 = vrcp.f32 %v860_v57  ;;  %v1365_v63 = vmul.f32 %v3265_v35, %v1185_v26  ;;  %v670_v47 = vsub.f32 0.0, %v3580_v32  ;;  %2129 = vmatmul.msk.f32.gmra.mxu3 %vm93_vm0, %v84_v16 }
  0xc7   :  { %v2618_v22 = vpop.eup %2617  ;;  %v2150_v21 = vpack.c.bf16 %v956_v24, %v955_v8  ;;  %v1718_v46 = vadd.f32 1.0, %v2616_v41  ;;  %2627 = vpow2.f32 %v709_v29  ;;  %v1528_v33 = vsub.f32 0.0, %v3583_v37 }
  0xc8   :  { %v2620_v48 = vpop.eup %2619  ;;  %v2310_v25 = vpack.c.bf16 %v1814_v42, %v1813_v3  ;;  %v829_v51 = vadd.f32 1.0, %v2618_v22  ;;  %2629 = vpow2.f32 %v1567_v43  ;;  %v423_v52 = vpop.f32.mrf.mxu2  ;;  %v773_v58 = vmul.f32 1.442695, %v670_v47 }
  0xc9   :  { %v2622_v55 = vpop.eup %2621  ;;  %2458 = vst [vmem:[%s4599_s7 + $0x10] sm:$0xff] %v2150_v21   ;;  %2631 = vrcp.f32 %v1718_v46  ;;  %v1687_v27 = vadd.f32 1.0, %v2620_v48  ;;  %v3598_v59 = vadd.f32 %v3270_v36, %v507_v40  ;;  %v1281_v62 = vpop.f32.mrf.mxu3  ;;  %v1631_v2 = vmul.f32 1.442695, %v1528_v33 }
  0xca   :  { %v2624_v0 = vpop.eup %2623  ;;  %2489 = vst [vmem:[%s4600_s8 + $0x10] sm:$0xff] %v2310_v25   ;;  %2633 = vrcp.f32 %v829_v51  ;;  %v861_v56 = vadd.f32 1.0, %v2622_v55  ;;  %v3604_v4 = vadd.f32 %v3275_v38, %v1365_v63  ;;  %v330_v54 = vpop.f32.mrf.mxu0  ;;  %v539_v61 = vmul.f32 %v3260_v34, %v423_v52  ;;  %v54_v25 = vld [vmem:[%s4594_s0 + $0xd0] sm:$0xff] }
  0xcb   :  { %2635 = vrcp.f32 %v1687_v27  ;;  %v1719_v8 = vadd.f32 1.0, %v2624_v0  ;;  %v639_v10 = vsub.f32 0.0, %v3598_v59  ;;  %v1188_v50 = vpop.f32.mrf.mxu1  ;;  %v1397_v19 = vmul.f32 %v3265_v35, %v1281_v62 }
  0xcc   :  { %v2626_v3 = vpop.eup %2625  ;;  %2637 = vrcp.f32 %v861_v56  ;;  %v1497_v39 = vsub.f32 0.0, %v3604_v4  ;;  %v508_v12 = vmul.f32 %v3260_v34, %v330_v54  ;;  %v3619_v45 = vadd.f32 %v3270_v36, %v539_v61  ;;  %2034 = vmatmul.msk.f32.gmra.mxu0 %vm93_vm0, %v53_v9  ;;  %2098 = vmatmul.msk.f32.gmra.mxu1 %vm93_vm0, %v53_v9 }
  0xcd   :  { %v2628_v49 = vpop.eup %2627  ;;  %v988_v14 = vmul.f32 %v2626_v3, %v3493_v5  ;;  %2639 = vrcp.f32 %v1719_v8  ;;  %v711_v17 = vmul.f32 1.442695, %v639_v10  ;;  %v3623_v16 = vadd.f32 %v3275_v38, %v1397_v19  ;;  %2066 = vmatmul.msk.f32.gmra.mxu2 %vm93_vm0, %v85_v44 }
  0xce   :  { %v2630_v23 = vpop.eup %2629  ;;  %v830_v18 = vadd.f32 1.0, %v2628_v49  ;;  %2641 = vpow2.f32 %v773_v58  ;;  %v1569_v26 = vmul.f32 1.442695, %v1497_v39  ;;  %v671_v29 = vsub.f32 0.0, %v3619_v45  ;;  %2130 = vmatmul.msk.f32.gmra.mxu3 %vm93_vm0, %v85_v44 }
  0xcf   :  { %v2632_v28 = vpop.eup %2631  ;;  %v2230_v5 = vpack.c.bf16 %v988_v14, %v3557_v13  ;;  %v1688_v57 = vadd.f32 1.0, %v2630_v23  ;;  %2643 = vpow2.f32 %v1631_v2  ;;  %v1529_v24 = vsub.f32 0.0, %v3623_v16 }
  0xd0   :  { %v2634_v30 = vpop.eup %2633  ;;  %v1846_v31 = vmul.f32 %v2632_v28, %v3496_v7  ;;  %2645 = vrcp.f32 %v830_v18  ;;  %v3633_v40 = vadd.f32 %v3270_v36, %v508_v12  ;;  %v426_v41 = vpop.f32.mrf.mxu2  ;;  %v775_v43 = vmul.f32 1.442695, %v671_v29 }
  0xd1   :  { %v2636_v42 = vpop.eup %2635  ;;  %2474 = vst [vmem:[%s4599_s7 + $0x90] sm:$0xff] %v2230_v5   ;;  %v3639_v13 = vmul.f32 %v2634_v30, %v3507_v15  ;;  %2647 = vrcp.f32 %v1688_v57  ;;  %v1366_v63 = vmul.f32 %v3265_v35, %v1188_v50  ;;  %v1284_v7 = vpop.f32.mrf.mxu3  ;;  %v1633_v47 = vmul.f32 1.442695, %v1529_v24  ;;  %v55_v5 = vld [vmem:[%s4594_s0 + $0xd8] sm:$0xff] }
  0xd2   :  { %v2638_v22 = vpop.eup %2637  ;;  %v2390_v21 = vpack.c.bf16 %v1846_v31, %v3570_v1  ;;  %v3644_v46 = vmul.f32 %v2636_v42, %v3514_v20  ;;  %2649 = vpow2.f32 %v711_v17  ;;  %v333_v48 = vpop.f32.mrf.mxu0  ;;  %v640_v33 = vsub.f32 0.0, %v3633_v40  ;;  %v86_v20 = vld [vmem:[%s4594_s0 + $0x1d0] sm:$0xff]  ;;  %v87_v24 = vld [vmem:[%s4594_s0 + $0x1d8] sm:$0xff]  ;;  %v3705_v42 = vld [vmem:[%s4598_s6] ss:$0 sm:$0xff] }
  0xd3   :  { %v2640_v15 = vpop.eup %2639  ;;  %v3650_v51 = vmul.f32 %v2638_v22, %v3531_v53  ;;  %2651 = vpow2.f32 %v1569_v26  ;;  %v3654_v52 = vadd.f32 %v3275_v38, %v1366_v63  ;;  %v1191_v1 = vpop.f32.mrf.mxu1  ;;  %v540_v53 = vmul.f32 %v3260_v34, %v426_v41 }
  0xd4   :  { %v2642_v55 = vpop.eup %2641  ;;  %2505 = vst [vmem:[%s4600_s8 + $0x90] sm:$0xff] %v2390_v21   ;;  %v3663_v27 = vmul.f32 %v2640_v15, %v3535_v60  ;;  %2653 = vpow2.f32 %v775_v43  ;;  %v1398_v58 = vmul.f32 %v3265_v35, %v1284_v7  ;;  %v713_v56 = vmul.f32 1.442695, %v640_v33  ;;  %2035 = vmatmul.msk.f32.gmra.mxu0 %vm93_vm0, %v54_v25  ;;  %2099 = vmatmul.msk.f32.gmra.mxu1 %vm93_vm0, %v54_v25  ;;  %v3713_v43 = vld [vmem:[%s4595_s2] ss:$0 sm:$0xff] }
  0xd5   :  { %v2644_v62 = vpop.eup %2643  ;;  %v862_v0 = vadd.f32 1.0, %v2642_v55  ;;  %2655 = vpow2.f32 %v1633_v47  ;;  %v1498_v2 = vsub.f32 0.0, %v3654_v52  ;;  %v3670_v8 = vadd.f32 %v3270_v36, %v540_v53  ;;  %2067 = vmatmul.msk.f32.gmra.mxu2 %vm93_vm0, %v86_v20  ;;  %v3719_v21 = vld [vmem:[%s4597_s5] ss:$0 sm:$0xff] }
  0xd6   :  { %v2646_v54 = vpop.eup %2645  ;;  %v1720_v9 = vadd.f32 1.0, %v2644_v62  ;;  %v3673_v60 = vadd.f32 %v3275_v38, %v1398_v58  ;;  %v509_v10 = vmul.f32 %v3260_v34, %v333_v48  ;;  %v1367_v3 = vmul.f32 %v3265_v35, %v1191_v1  ;;  %2131 = vmatmul.msk.f32.gmra.mxu3 %vm93_vm0, %v86_v20  ;;  %v3729_v33 = vld [vmem:[%s4596_s3] ss:$0 sm:$0xff] }
  0xd7   :  { %v2648_v61 = vpop.eup %2647  ;;  %v958_v50 = vmul.f32 %v2646_v54, %v3553_v11  ;;  %2657 = vrcp.f32 %v862_v0  ;;  %v1571_v44 = vmul.f32 1.442695, %v1498_v2  ;;  %v672_v38 = vsub.f32 0.0, %v3670_v8 }
  0xd8   :  { %v2650_v39 = vpop.eup %2649  ;;  %v1816_v19 = vmul.f32 %v2648_v61, %v3561_v6  ;;  %2659 = vrcp.f32 %v1720_v9  ;;  %v1530_v34 = vsub.f32 0.0, %v3673_v60  ;;  %v429_v12 = vpop.f32.mrf.mxu2  ;;  %v3686_v11 = vadd.f32 %v3270_v36, %v509_v10 }
  0xd9   :  { %v2652_v49 = vpop.eup %2651  ;;  %v2155_v14 = vpack.c.bf16 %v958_v50, %v3639_v13  ;;  %v831_v17 = vadd.f32 1.0, %v2650_v39  ;;  %2661 = vpow2.f32 %v713_v56  ;;  %v1287_v35 = vpop.f32.mrf.mxu3  ;;  %v777_v6 = vmul.f32 1.442695, %v672_v38 }
  0xda   :  { %v2654_v23 = vpop.eup %2653  ;;  %v2315_v18 = vpack.c.bf16 %v1816_v19, %v3644_v46  ;;  %v1689_v26 = vadd.f32 1.0, %v2652_v49  ;;  %2663 = vpow2.f32 %v1571_v44  ;;  %v336_v28 = vpop.f32.mrf.mxu0  ;;  %v1635_v29 = vmul.f32 1.442695, %v1530_v34  ;;  %v88_v49 = vld [vmem:[%s4594_s0 + $0x1e0] sm:$0xff] }
  0xdb   :  { %v2656_v57 = vpop.eup %2655  ;;  %2459 = vst [vmem:[%s4599_s7 + $0x18] sm:$0xff] %v2155_v14   ;;  %2665 = vrcp.f32 %v831_v17  ;;  %v863_v36 = vadd.f32 1.0, %v2654_v23  ;;  %v641_v30 = vsub.f32 0.0, %v3686_v11  ;;  %v1194_v31 = vpop.f32.mrf.mxu1  ;;  %v3708_v13 = vadd.f32 %v3705_v42, %v1367_v3 }
  0xdc   :  { %2490 = vst [vmem:[%s4600_s8 + $0x18] sm:$0xff] %v2315_v18   ;;  %2667 = vrcp.f32 %v1689_v26  ;;  %v1721_v41 = vadd.f32 1.0, %v2656_v57  ;;  %v541_v63 = vmul.f32 %v3713_v43, %v429_v12  ;;  %v1399_v46 = vmul.f32 %v3719_v21, %v1287_v35  ;;  %2036 = vmatmul.msk.f32.gmra.mxu0 %vm93_vm0, %v55_v5  ;;  %2100 = vmatmul.msk.f32.gmra.mxu1 %vm93_vm0, %v55_v5 }
  0xdd   :  { %v2658_v7 = vpop.eup %2657  ;;  %2669 = vrcp.f32 %v863_v36  ;;  %v715_v22 = vmul.f32 1.442695, %v641_v30  ;;  %v510_v47 = vmul.f32 %v3713_v43, %v336_v28  ;;  %v1499_v15 = vsub.f32 0.0, %v3708_v13  ;;  %2068 = vmatmul.msk.f32.gmra.mxu2 %vm93_vm0, %v87_v24 }
  0xde   :  { %v2660_v48 = vpop.eup %2659  ;;  %v990_v25 = vmul.f32 %v2658_v7, %v3580_v32  ;;  %2671 = vrcp.f32 %v1721_v41  ;;  %v3732_v1 = vadd.f32 %v3729_v33, %v541_v63  ;;  %v3738_v32 = vadd.f32 %v3705_v42, %v1399_v46  ;;  %2132 = vmatmul.msk.f32.gmra.mxu3 %vm93_vm0, %v87_v24 }
  0xdf   :  { %v2662_v20 = vpop.eup %2661  ;;  %v1848_v55 = vmul.f32 %v2660_v48, %v3583_v37  ;;  %2673 = vpow2.f32 %v777_v6  ;;  %v3741_v53 = vadd.f32 %v3729_v33, %v510_v47  ;;  %v1573_v56 = vmul.f32 1.442695, %v1499_v15 }
  0xe0   :  { %v2664_v58 = vpop.eup %2663  ;;  %v2235_v62 = vpack.c.bf16 %v990_v25, %v3650_v51  ;;  %v832_v0 = vadd.f32 1.0, %v2662_v20  ;;  %2675 = vpow2.f32 %v1635_v29  ;;  %v432_v2 = vpop.f32.mrf.mxu2  ;;  %v673_v10 = vsub.f32 0.0, %v3732_v1 }
  0xe1   :  { %v2666_v54 = vpop.eup %2665  ;;  %v2395_v9 = vpack.c.bf16 %v1848_v55, %v3663_v27  ;;  %v1690_v37 = vadd.f32 1.0, %v2664_v58  ;;  %2677 = vpow2.f32 %v715_v22  ;;  %v1290_v61 = vpop.f32.mrf.mxu3  ;;  %v1531_v51 = vsub.f32 0.0, %v3738_v32  ;;  %v56_v27 = vld [vmem:[%s4594_s0 + $0xe0] sm:$0xff] }
  0xe2   :  { %v2668_v50 = vpop.eup %2667  ;;  %2475 = vst [vmem:[%s4599_s7 + $0x98] sm:$0xff] %v2235_v62   ;;  %v3751_v44 = vmul.f32 %v2666_v54, %v3598_v59  ;;  %2679 = vrcp.f32 %v832_v0  ;;  %v642_v3 = vsub.f32 0.0, %v3741_v53  ;;  %v339_v39 = vpop.f32.mrf.mxu0  ;;  %v779_v59 = vmul.f32 1.442695, %v673_v10  ;;  %v57_v0 = vld [vmem:[%s4594_s0 + $0xe8] sm:$0xff] }
  0xe3   :  { %v2670_v19 = vpop.eup %2669  ;;  %2506 = vst [vmem:[%s4600_s8 + $0x98] sm:$0xff] %v2395_v9   ;;  %v3762_v38 = vmul.f32 %v2668_v50, %v3604_v4  ;;  %2681 = vrcp.f32 %v1690_v37  ;;  %v1368_v34 = vmul.f32 %v3719_v21, %v1194_v31  ;;  %v1197_v12 = vpop.f32.mrf.mxu1  ;;  %v1637_v35 = vmul.f32 1.442695, %v1531_v51 }
  0xe4   :  { %v2672_v14 = vpop.eup %2671  ;;  %v3769_v17 = vmul.f32 %v2670_v19, %v3619_v45  ;;  %2683 = vpow2.f32 %v1573_v56  ;;  %v717_v23 = vmul.f32 1.442695, %v642_v3  ;;  %v542_v6 = vmul.f32 %v3713_v43, %v432_v2  ;;  %2037 = vmatmul.msk.f32.gmra.mxu0 %vm93_vm0, %v56_v27  ;;  %2101 = vmatmul.msk.f32.gmra.mxu1 %vm93_vm0, %v56_v27 }
  0xe5   :  { %v2674_v18 = vpop.eup %2673  ;;  %v3772_v4 = vmul.f32 %v2672_v14, %v3623_v16  ;;  %2685 = vpow2.f32 %v779_v59  ;;  %v3775_v26 = vadd.f32 %v3705_v42, %v1368_v34  ;;  %v1400_v45 = vmul.f32 %v3719_v21, %v1290_v61  ;;  %2069 = vmatmul.msk.f32.gmra.mxu2 %vm93_vm0, %v88_v49 }
  0xe6   :  { %v2676_v28 = vpop.eup %2675  ;;  %v864_v5 = vadd.f32 1.0, %v2674_v18  ;;  %2687 = vpow2.f32 %v1637_v35  ;;  %v511_v57 = vmul.f32 %v3713_v43, %v339_v39  ;;  %v3785_v30 = vadd.f32 %v3729_v33, %v542_v6  ;;  %2133 = vmatmul.msk.f32.gmra.mxu3 %vm93_vm0, %v88_v49 }
  0xe7   :  { %v2678_v16 = vpop.eup %2677  ;;  %v1722_v36 = vadd.f32 1.0, %v2676_v28  ;;  %2689 = vpow2.f32 %v717_v23  ;;  %v1500_v29 = vsub.f32 0.0, %v3775_v26  ;;  %v3789_v41 = vadd.f32 %v3705_v42, %v1400_v45 }
  0xe8   :  { %v2680_v31 = vpop.eup %2679  ;;  %2691 = vrcp.f32 %v864_v5  ;;  %v833_v24 = vadd.f32 1.0, %v2678_v16  ;;  %v3792_v63 = vadd.f32 %v3729_v33, %v511_v57  ;;  %v435_v7 = vpop.f32.mrf.mxu2  ;;  %v674_v48 = vsub.f32 0.0, %v3785_v30 }
  0xe9   :  { %v2682_v22 = vpop.eup %2681  ;;  %v960_v46 = vmul.f32 %v2680_v31, %v3633_v40  ;;  %2693 = vrcp.f32 %v1722_v36  ;;  %v1575_v47 = vmul.f32 1.442695, %v1500_v29  ;;  %v1293_v25 = vpop.f32.mrf.mxu3  ;;  %v1532_v55 = vsub.f32 0.0, %v3789_v41 }
  0xea   :  { %v2684_v15 = vpop.eup %2683  ;;  %v1818_v20 = vmul.f32 %v2682_v22, %v3654_v52  ;;  %2695 = vrcp.f32 %v833_v24  ;;  %v643_v58 = vsub.f32 0.0, %v3792_v63  ;;  %v342_v62 = vpop.f32.mrf.mxu0  ;;  %v781_v54 = vmul.f32 1.442695, %v674_v48  ;;  %v89_v52 = vld [vmem:[%s4594_s0 + $0x1e8] sm:$0xff] }
  0xeb   :  { %v2686_v56 = vpop.eup %2685  ;;  %v2160_v40 = vpack.c.bf16 %v960_v46, %v3751_v44  ;;  %v1691_v2 = vadd.f32 1.0, %v2684_v15  ;;  %2697 = vpow2.f32 %v1575_v47  ;;  %v1200_v9 = vpop.f32.mrf.mxu1  ;;  %v1639_v50 = vmul.f32 1.442695, %v1532_v55  ;;  %v90_v47 = vld [vmem:[%s4594_s0 + $0x1f0] sm:$0xff] }
  0xec   :  { %v2688_v37 = vpop.eup %2687  ;;  %v2320_v10 = vpack.c.bf16 %v1818_v20, %v3762_v38  ;;  %v865_v61 = vadd.f32 1.0, %v2686_v56  ;;  %v719_v51 = vmul.f32 1.442695, %v643_v58  ;;  %v1369_v39 = vmul.f32 %v3719_v21, %v1197_v12  ;;  %2038 = vmatmul.msk.f32.gmra.mxu0 %vm93_vm0, %v57_v0  ;;  %2102 = vmatmul.msk.f32.gmra.mxu1 %vm93_vm0, %v57_v0 }
  0xed   :  { %v2690_v3 = vpop.eup %2689  ;;  %2460 = vst [vmem:[%s4599_s7 + $0x20] sm:$0xff] %v2160_v40   ;;  %2699 = vrcp.f32 %v1691_v2  ;;  %v1723_v44 = vadd.f32 1.0, %v2688_v37  ;;  %v543_v27 = vmul.f32 %v3713_v43, %v435_v7  ;;  %v1401_v59 = vmul.f32 %v3719_v21, %v1293_v25  ;;  %2070 = vmatmul.msk.f32.gmra.mxu2 %vm93_vm0, %v89_v52  ;;  %v58_v7 = vld [vmem:[%s4594_s0 + $0xf0] sm:$0xff] }
  0xee   :  { %v2692_v19 = vpop.eup %2691  ;;  %2491 = vst [vmem:[%s4600_s8 + $0x20] sm:$0xff] %v2320_v10   ;;  %2701 = vrcp.f32 %v865_v61  ;;  %v834_v38 = vadd.f32 1.0, %v2690_v3  ;;  %v512_v34 = vmul.f32 %v3713_v43, %v342_v62  ;;  %v3822_v14 = vadd.f32 %v3705_v42, %v1369_v39  ;;  %2134 = vmatmul.msk.f32.gmra.mxu3 %vm93_vm0, %v89_v52 }
  0xef   :  { %v2694_v12 = vpop.eup %2693  ;;  %v992_v49 = vmul.f32 %v2692_v19, %v3670_v8  ;;  %2703 = vrcp.f32 %v1723_v44  ;;  %v3825_v35 = vadd.f32 %v3729_v33, %v543_v27  ;;  %v3830_v6 = vadd.f32 %v3705_v42, %v1401_v59 }
  0xf0   :  { %v2696_v23 = vpop.eup %2695  ;;  %v1850_v18 = vmul.f32 %v2694_v12, %v3673_v60  ;;  %2705 = vrcp.f32 %v834_v38  ;;  %v3833_v28 = vadd.f32 %v3729_v33, %v512_v34  ;;  %v438_v8 = vpop.f32.mrf.mxu2  ;;  %v1501_v16 = vsub.f32 0.0, %v3822_v14 }
  0xf1   :  { %v2698_v5 = vpop.eup %2697  ;;  %v2240_v45 = vpack.c.bf16 %v992_v49, %v3769_v17  ;;  %v3837_v57 = vmul.f32 %v2696_v23, %v3686_v11  ;;  %2707 = vpow2.f32 %v781_v54  ;;  %v1296_v36 = vpop.f32.mrf.mxu3  ;;  %v675_v31 = vsub.f32 0.0, %v3825_v35  ;;  %v59_v49 = vld [vmem:[%s4594_s0 + $0xf8] sm:$0xff] }
  0xf2   :  { %v2400_v60 = vpack.c.bf16 %v1850_v18, %v3772_v4  ;;  %v1692_v29 = vadd.f32 1.0, %v2698_v5  ;;  %2709 = vpow2.f32 %v1639_v50  ;;  %v345_v24 = vpop.f32.mrf.mxu0  ;;  %v1577_v11 = vmul.f32 1.442695, %v1501_v16 }
  0xf3   :  { %v2700_v22 = vpop.eup %2699  ;;  %2476 = vst [vmem:[%s4599_s7 + $0xa0] sm:$0xff] %v2240_v45   ;;  %2711 = vpow2.f32 %v719_v51  ;;  %v1533_v17 = vsub.f32 0.0, %v3830_v6  ;;  %v644_v4 = vsub.f32 0.0, %v3833_v28  ;;  %v1203_v46 = vpop.f32.mrf.mxu1  ;;  %v783_v15 = vmul.f32 1.442695, %v675_v31 }
  0xf4   :  { %v2702_v48 = vpop.eup %2701  ;;  %2507 = vst [vmem:[%s4600_s8 + $0xa0] sm:$0xff] %v2400_v60   ;;  %v3857_v25 = vmul.f32 %v2700_v22, %v3708_v13  ;;  %2713 = vrcp.f32 %v1692_v29  ;;  %v1370_v20 = vmul.f32 %v3719_v21, %v1200_v9  ;;  %2039 = vmatmul.msk.f32.gmra.mxu0 %vm93_vm0, %v58_v7  ;;  %v544_v2 = vmul.f32 %v3713_v43, %v438_v8 }
  0xf5   :  { %v2704_v55 = vpop.eup %2703  ;;  %v3861_v58 = vmul.f32 %v2702_v48, %v3732_v1  ;;  %2715 = vpow2.f32 %v1577_v11  ;;  %v1641_v62 = vmul.f32 1.442695, %v1533_v17  ;;  %v721_v0 = vmul.f32 1.442695, %v644_v4  ;;  %2071 = vmatmul.msk.f32.gmra.mxu2 %vm93_vm0, %v90_v47  ;;  %2103 = vmatmul.msk.f32.gmra.mxu1 %vm93_vm0, %v58_v7 }
  0xf6   :  { %v2706_v56 = vpop.eup %2705  ;;  %v3865_v40 = vmul.f32 %v2704_v55, %v3738_v32  ;;  %2717 = vpow2.f32 %v783_v15  ;;  %v3868_v13 = vadd.f32 %v3705_v42, %v1370_v20  ;;  %v1402_v9 = vmul.f32 %v3719_v21, %v1296_v36  ;;  %2135 = vmatmul.msk.f32.gmra.mxu3 %vm93_vm0, %v90_v47 }
  0xf7   :  { %v2708_v1 = vpop.eup %2707  ;;  %v962_v54 = vmul.f32 %v2706_v56, %v3741_v53  ;;  %2719 = vpow2.f32 %v1641_v62  ;;  %v513_v52 = vmul.f32 %v3713_v43, %v345_v24  ;;  %v3879_v61 = vadd.f32 %v3729_v33, %v544_v2 }
  0xf8   :  { %v2710_v32 = vpop.eup %2709  ;;  %v866_v37 = vadd.f32 1.0, %v2708_v1  ;;  %2721 = vpow2.f32 %v721_v0  ;;  %v1502_v10 = vsub.f32 0.0, %v3868_v13  ;;  %v441_v50 = vpop.f32.mrf.mxu2  ;;  %v3883_v44 = vadd.f32 %v3705_v42, %v1402_v9 }
  0xf9   :  { %v2712_v51 = vpop.eup %2711  ;;  %v2165_v3 = vpack.c.bf16 %v962_v54, %v3837_v57  ;;  %v1724_v53 = vadd.f32 1.0, %v2710_v32  ;;  %v3886_v39 = vadd.f32 %v3729_v33, %v513_v52  ;;  %v1299_v27 = vpop.f32.mrf.mxu3  ;;  %v676_v34 = vsub.f32 0.0, %v3879_v61  ;;  %v91_v57 = vld [vmem:[%s4594_s0 + $0x1f8] sm:$0xff] }
  0xfa   :  { %v2714_v19 = vpop.eup %2713  ;;  %2723 = vrcp.f32 %v866_v37  ;;  %v835_v38 = vadd.f32 1.0, %v2712_v51  ;;  %v1579_v59 = vmul.f32 1.442695, %v1502_v10  ;;  %v348_v12 = vpop.f32.mrf.mxu0  ;;  %v1534_v8 = vsub.f32 0.0, %v3883_v44 }
  0xfb   :  { %v2716_v23 = vpop.eup %2715  ;;  %2461 = vst [vmem:[%s4599_s7 + $0x28] sm:$0xff] %v2165_v3   ;;  %v1820_v18 = vmul.f32 %v2714_v19, %v3775_v26  ;;  %2725 = vrcp.f32 %v1724_v53  ;;  %v645_v5 = vsub.f32 0.0, %v3886_v39  ;;  %v1206_v45 = vpop.f32.mrf.mxu1  ;;  %v785_v60 = vmul.f32 1.442695, %v676_v34 }
  0xfc   :  { %v2718_v16 = vpop.eup %2717  ;;  %2727 = vrcp.f32 %v835_v38  ;;  %v1693_v36 = vadd.f32 1.0, %v2716_v23  ;;  %v1371_v29 = vmul.f32 %v3719_v21, %v1203_v46  ;;  %v1643_v7 = vmul.f32 1.442695, %v1534_v8  ;;  %2040 = vmatmul.msk.f32.gmra.mxu0 %vm93_vm0, %v59_v49 }
  0xfd   :  { %v2720_v31 = vpop.eup %2719  ;;  %v2325_v24 = vpack.c.bf16 %v1820_v18, %v3857_v25  ;;  %v867_v26 = vadd.f32 1.0, %v2718_v16  ;;  %2729 = vpow2.f32 %v1579_v59  ;;  %v723_v17 = vmul.f32 1.442695, %v645_v5  ;;  %2072 = vmatmul.msk.f32.gmra.mxu2 %vm93_vm0, %v91_v57  ;;  %2104 = vmatmul.msk.f32.gmra.mxu1 %vm93_vm0, %v59_v49 }
  0xfe   :  { %v2722_v22 = vpop.eup %2721  ;;  %2731 = vrcp.f32 %v1693_v36  ;;  %v1725_v11 = vadd.f32 1.0, %v2720_v31  ;;  %v3905_v4 = vadd.f32 %v3705_v42, %v1371_v29  ;;  %v545_v47 = vmul.f32 %v3713_v43, %v441_v50  ;;  %2136 = vmatmul.msk.f32.gmra.mxu3 %vm93_vm0, %v91_v57 }
  0xff   :  { %2492 = vst [vmem:[%s4600_s8 + $0x28] sm:$0xff] %v2325_v24   ;;  %2733 = vrcp.f32 %v867_v26  ;;  %v836_v46 = vadd.f32 1.0, %v2722_v22  ;;  %v1403_v48 = vmul.f32 %v3719_v21, %v1299_v27  ;;  %v514_v20 = vmul.f32 %v3713_v43, %v348_v12 }
 0x100   :  { %v2724_v25 = vpop.eup %2723  ;;  %2735 = vrcp.f32 %v1725_v11  ;;  %v1503_v15 = vsub.f32 0.0, %v3905_v4  ;;  %v1372_v55 = vmul.f32 %v3719_v21, %v1206_v45  ;;  %v444_v62 = vpop.f32.mrf.mxu2  ;;  %v3920_v2 = vadd.f32 %v3729_v33, %v545_v47 }
 0x101   :  { %v2726_v0 = vpop.eup %2725  ;;  %v994_v56 = vmul.f32 %v2724_v25, %v3785_v30  ;;  %2737 = vrcp.f32 %v836_v46  ;;  %v3923_v1 = vadd.f32 %v3705_v42, %v1403_v48  ;;  %v1302_v54 = vpop.f32.mrf.mxu3  ;;  %v3927_v37 = vadd.f32 %v3729_v33, %v514_v20 }
 0x102   :  { %v2728_v9 = vpop.eup %2727  ;;  %v1852_v52 = vmul.f32 %v2726_v0, %v3789_v41  ;;  %2739 = vpow2.f32 %v785_v60  ;;  %v1581_v32 = vmul.f32 1.442695, %v1503_v15  ;;  %v351_v10 = vpop.f32.mrf.mxu0  ;;  %v677_v3 = vsub.f32 0.0, %v3920_v2 }
 0x103   :  { %v2730_v50 = vpop.eup %2729  ;;  %v2245_v30 = vpack.c.bf16 %v994_v56, %v3861_v58  ;;  %v963_v51 = vmul.f32 %v2728_v9, %v3792_v63  ;;  %2741 = vpow2.f32 %v1643_v7  ;;  %v1209_v53 = vpop.f32.mrf.mxu1  ;;  %v1535_v41 = vsub.f32 0.0, %v3923_v1 }
 0x104   :  { %v2732_v27 = vpop.eup %2731  ;;  %v2405_v19 = vpack.c.bf16 %v1852_v52, %v3865_v40  ;;  %v1694_v38 = vadd.f32 1.0, %v2730_v50  ;;  %2743 = vpow2.f32 %v723_v17  ;;  %v787_v63 = vmul.f32 1.442695, %v677_v3 }
 0x105   :  { %v2734_v59 = vpop.eup %2733  ;;  %2477 = vst [vmem:[%s4599_s7 + $0xa8] sm:$0xff] %v2245_v30   ;;  %v3938_v58 = vmul.f32 %v2732_v27, %v3822_v14  ;;  %2745 = vpow2.f32 %v1581_v32  ;;  %v646_v34 = vsub.f32 0.0, %v3927_v37  ;;  %v1645_v49 = vmul.f32 1.442695, %v1535_v41 }
 0x106   :  { %v2736_v12 = vpop.eup %2735  ;;  %2508 = vst [vmem:[%s4600_s8 + $0xa8] sm:$0xff] %v2405_v19   ;;  %v3945_v40 = vmul.f32 %v2734_v59, %v3825_v35  ;;  %2747 = vrcp.f32 %v1694_v38  ;;  %v3948_v23 = vadd.f32 %v3705_v42, %v1372_v55  ;;  %v546_v5 = vmul.f32 %v3713_v43, %v444_v62 }
 0x107   :  { %v2738_v18 = vpop.eup %2737  ;;  %v3951_v14 = vmul.f32 %v2736_v12, %v3830_v6  ;;  %2749 = vpow2.f32 %v787_v63  ;;  %v725_v8 = vmul.f32 1.442695, %v646_v34  ;;  %v1404_v16 = vmul.f32 %v3719_v21, %v1302_v54 }
 0x108   :  { %v2740_v45 = vpop.eup %2739  ;;  %v964_v57 = vmul.f32 %v2738_v18, %v3833_v28  ;;  %2751 = vpow2.f32 %v1645_v49  ;;  %v1504_v35 = vsub.f32 0.0, %v3948_v23  ;;  %v447_v36 = vpop.f32.mrf.mxu2  ;;  %v3958_v31 = vadd.f32 %v3729_v33, %v546_v5 }
 0x109   :  { %v2742_v60 = vpop.eup %2741  ;;  %v868_v29 = vadd.f32 1.0, %v2740_v45  ;;  %2753 = vpow2.f32 %v725_v8  ;;  %v515_v6 = vmul.f32 %v3713_v43, %v351_v10  ;;  %v1305_v24 = vpop.f32.mrf.mxu3  ;;  %v3962_v28 = vadd.f32 %v3705_v42, %v1404_v16 }
 0x10a   :  { %v2744_v26 = vpop.eup %2743  ;;  %v2170_v7 = vpack.c.bf16 %v964_v57, %v963_v51  ;;  %v1726_v22 = vadd.f32 1.0, %v2742_v60  ;;  %v1583_v11 = vmul.f32 1.442695, %v1504_v35  ;;  %v354_v17 = vpop.f32.mrf.mxu0  ;;  %v678_v48 = vsub.f32 0.0, %v3958_v31 }
 0x10b   :  { %v2746_v46 = vpop.eup %2745  ;;  %2755 = vrcp.f32 %v868_v29  ;;  %v837_v47 = vadd.f32 1.0, %v2744_v26  ;;  %v3966_v25 = vadd.f32 %v3729_v33, %v515_v6  ;;  %v1212_v15 = vpop.f32.mrf.mxu1  ;;  %v1536_v62 = vsub.f32 0.0, %v3962_v28 }
 0x10c   :  { %v2748_v20 = vpop.eup %2747  ;;  %2462 = vst [vmem:[%s4599_s7 + $0x30] sm:$0xff] %v2170_v7   ;;  %2757 = vrcp.f32 %v1726_v22  ;;  %v1695_v55 = vadd.f32 1.0, %v2746_v46  ;;  %v1373_v0 = vmul.f32 %v3719_v21, %v1209_v53  ;;  %v789_v9 = vmul.f32 1.442695, %v678_v48 }
 0x10d   :  { %v2750_v56 = vpop.eup %2749  ;;  %v1822_v54 = vmul.f32 %v2748_v20, %v3868_v13  ;;  %2759 = vrcp.f32 %v837_v47  ;;  %v647_v52 = vsub.f32 0.0, %v3966_v25  ;;  %v1647_v50 = vmul.f32 1.442695, %v1536_v62 }
 0x10e   :  { %v2752_v32 = vpop.eup %2751  ;;  %2761 = vrcp.f32 %v1695_v55  ;;  %v869_v10 = vadd.f32 1.0, %v2750_v56  ;;  %v3976_v30 = vadd.f32 %v3705_v42, %v1373_v0  ;;  %v547_v38 = vmul.f32 %v3713_v43, %v447_v36 }
 0x10f   :  { %v2754_v51 = vpop.eup %2753  ;;  %v2330_v3 = vpack.c.bf16 %v1822_v54, %v3938_v58  ;;  %v1727_v27 = vadd.f32 1.0, %v2752_v32  ;;  %2763 = vpow2.f32 %v1583_v11  ;;  %v727_v53 = vmul.f32 1.442695, %v647_v52 }
 0x110   :  { %2765 = vrcp.f32 %v869_v10  ;;  %v838_v19 = vadd.f32 1.0, %v2754_v51  ;;  %v1505_v13 = vsub.f32 0.0, %v3976_v30  ;;  %v450_v41 = vpop.f32.mrf.mxu2  ;;  %v1405_v63 = vmul.f32 %v3719_v21, %v1305_v24 }
 0x111   :  { %v2756_v59 = vpop.eup %2755  ;;  %2493 = vst [vmem:[%s4600_s8 + $0x30] sm:$0xff] %v2330_v3   ;;  %2767 = vrcp.f32 %v1727_v27  ;;  %v516_v58 = vmul.f32 %v3713_v43, %v354_v17  ;;  %v1374_v34 = vmul.f32 %v3719_v21, %v1212_v15  ;;  %v1308_v12 = vpop.f32.mrf.mxu3  ;;  %v3989_v5 = vadd.f32 %v3729_v33, %v547_v38 }
 0x112   :  { %v2758_v49 = vpop.eup %2757  ;;  %v996_v18 = vmul.f32 %v2756_v59, %v3879_v61  ;;  %2769 = vrcp.f32 %v838_v19  ;;  %v1585_v8 = vmul.f32 1.442695, %v1505_v13  ;;  %v357_v45 = vpop.f32.mrf.mxu0  ;;  %v3993_v16 = vadd.f32 %v3705_v42, %v1405_v63 }
 0x113   :  { %v2760_v57 = vpop.eup %2759  ;;  %v1854_v35 = vmul.f32 %v2758_v49, %v3883_v44  ;;  %2771 = vpow2.f32 %v789_v9  ;;  %v3996_v36 = vadd.f32 %v3729_v33, %v516_v58  ;;  %v1215_v60 = vpop.f32.mrf.mxu1  ;;  %v679_v24 = vsub.f32 0.0, %v3989_v5 }
 0x114   :  { %v2762_v29 = vpop.eup %2761  ;;  %v2250_v61 = vpack.c.bf16 %v996_v18, %v3945_v40  ;;  %v965_v6 = vmul.f32 %v2760_v57, %v3886_v39  ;;  %2773 = vpow2.f32 %v1647_v50  ;;  %v1537_v22 = vsub.f32 0.0, %v3993_v16 }
 0x115   :  { %v2764_v26 = vpop.eup %2763  ;;  %v2410_v7 = vpack.c.bf16 %v1854_v35, %v3951_v14  ;;  %v4003_v44 = vmul.f32 %v2762_v29, %v3905_v4  ;;  %2775 = vpow2.f32 %v727_v53  ;;  %v791_v39 = vmul.f32 1.442695, %v679_v24 }
 0x116   :  { %v2766_v11 = vpop.eup %2765  ;;  %2478 = vst [vmem:[%s4599_s7 + $0xb0] sm:$0xff] %v2250_v61   ;;  %v1696_v40 = vadd.f32 1.0, %v2764_v26  ;;  %2777 = vpow2.f32 %v1585_v8  ;;  %v648_v17 = vsub.f32 0.0, %v3996_v36  ;;  %v1649_v14 = vmul.f32 1.442695, %v1537_v22 }
 0x117   :  { %v2768_v46 = vpop.eup %2767  ;;  %2509 = vst [vmem:[%s4600_s8 + $0xb0] sm:$0xff] %v2410_v7   ;;  %v4014_v4 = vmul.f32 %v2766_v11, %v3920_v2  ;;  %v4017_v47 = vadd.f32 %v3705_v42, %v1374_v34  ;;  %v548_v48 = vmul.f32 %v3713_v43, %v450_v41  ;;  %v1406_v62 = vmul.f32 %v3719_v21, %v1308_v12 }
 0x118   :  { %v2770_v15 = vpop.eup %2769  ;;  %v4021_v20 = vmul.f32 %v2768_v46, %v3923_v1  ;;  %2779 = vrcp.f32 %v1696_v40  ;;  %v729_v55 = vmul.f32 1.442695, %v648_v17  ;;  %v453_v0 = vpop.f32.mrf.mxu2  ;;  %v517_v50 = vmul.f32 %v3713_v43, %v357_v45 }
 0x119   :  { %v2772_v56 = vpop.eup %2771  ;;  %v966_v54 = vmul.f32 %v2770_v15, %v3927_v37  ;;  %2781 = vpow2.f32 %v791_v39  ;;  %v1506_v2 = vsub.f32 0.0, %v4017_v47  ;;  %v4027_v9 = vadd.f32 %v3729_v33, %v548_v48  ;;  %v1311_v52 = vpop.f32.mrf.mxu3 }
 0x11a   :  { %v2774_v32 = vpop.eup %2773  ;;  %v870_v10 = vadd.f32 1.0, %v2772_v56  ;;  %2783 = vpow2.f32 %v1649_v14  ;;  %v4030_v1 = vadd.f32 %v3705_v42, %v1406_v62  ;;  %v360_v51 = vpop.f32.mrf.mxu0  ;;  %v4041_v58 = vadd.f32 %v3729_v33, %v517_v50 }
 0x11b   :  { %v2776_v3 = vpop.eup %2775  ;;  %v2175_v27 = vpack.c.bf16 %v966_v54, %v965_v6  ;;  %v1728_v53 = vadd.f32 1.0, %v2774_v32  ;;  %2785 = vpow2.f32 %v729_v55  ;;  %v1587_v37 = vmul.f32 1.442695, %v1506_v2  ;;  %v4033_v19 = vpop.f32.mrf.mxu1 }
 0x11c   :  { %v2778_v13 = vpop.eup %2777  ;;  %2787 = vrcp.f32 %v870_v10  ;;  %v839_v38 = vadd.f32 1.0, %v2776_v3  ;;  %v680_v41 = vsub.f32 0.0, %v4027_v9  ;;  %v1538_v59 = vsub.f32 0.0, %v4030_v1 }
 0x11d   :  { %2463 = vst [vmem:[%s4599_s7 + $0x38] sm:$0xff] %v2175_v27   ;;  %2789 = vrcp.f32 %v1728_v53  ;;  %v1697_v63 = vadd.f32 1.0, %v2778_v13  ;;  %v1375_v34 = vmul.f32 %v3719_v21, %v1215_v60  ;;  %v549_v8 = vmul.f32 %v3713_v43, %v453_v0 }
 0x11e   :  { %v2780_v12 = vpop.eup %2779  ;;  %2791 = vrcp.f32 %v839_v38  ;;  %v793_v49 = vmul.f32 1.442695, %v680_v41  ;;  %v1651_v18 = vmul.f32 1.442695, %v1538_v59  ;;  %v649_v35 = vsub.f32 0.0, %v4041_v58 }
 0x11f   :  { %v2782_v45 = vpop.eup %2781  ;;  %v1824_v57 = vmul.f32 %v2780_v12, %v3948_v23  ;;  %2793 = vrcp.f32 %v1697_v63  ;;  %v4048_v29 = vadd.f32 %v3705_v42, %v1375_v34  ;;  %v4051_v60 = vadd.f32 %v3729_v33, %v549_v8 }
 0x120   :  { %v2784_v61 = vpop.eup %2783  ;;  %v871_v6 = vadd.f32 1.0, %v2782_v45  ;;  %2795 = vpow2.f32 %v1587_v37  ;;  %v1407_v24 = vmul.f32 %v3719_v21, %v1311_v52  ;;  %v456_v26 = vpop.f32.mrf.mxu2  ;;  %v731_v23 = vmul.f32 1.442695, %v649_v35 }
 0x121   :  { %v2786_v7 = vpop.eup %2785  ;;  %v2335_v22 = vpack.c.bf16 %v1824_v57, %v4003_v44  ;;  %v1729_v11 = vadd.f32 1.0, %v2784_v61  ;;  %2797 = vpow2.f32 %v793_v49  ;;  %v1314_v40 = vpop.f32.mrf.mxu3  ;;  %v1507_v46 = vsub.f32 0.0, %v4048_v29 }
 0x122   :  { %v2788_v39 = vpop.eup %2787  ;;  %2799 = vrcp.f32 %v871_v6  ;;  %v840_v17 = vadd.f32 1.0, %v2786_v7  ;;  %v681_v14 = vsub.f32 0.0, %v4051_v60  ;;  %v363_v48 = vpop.f32.mrf.mxu0  ;;  %v4062_v44 = vadd.f32 %v3705_v42, %v1407_v24 }
 0x123   :  { %v2790_v15 = vpop.eup %2789  ;;  %2494 = vst [vmem:[%s4600_s8 + $0x38] sm:$0xff] %v2335_v22   ;;  %v998_v55 = vmul.f32 %v2788_v39, %v3958_v31  ;;  %2801 = vrcp.f32 %v1729_v11  ;;  %v518_v62 = vmul.f32 %v3713_v43, %v360_v51  ;;  %v4065_v0 = vpop.f32.mrf.mxu1  ;;  %v1589_v2 = vmul.f32 1.442695, %v1507_v46 }
 0x124   :  { %v2792_v56 = vpop.eup %2791  ;;  %v1856_v54 = vmul.f32 %v2790_v15, %v3962_v28  ;;  %2803 = vrcp.f32 %v840_v17  ;;  %v795_v52 = vmul.f32 1.442695, %v681_v14  ;;  %v1539_v31 = vsub.f32 0.0, %v4062_v44 }
 0x125   :  { %v2794_v32 = vpop.eup %2793  ;;  %v2255_v10 = vpack.c.bf16 %v998_v55, %v4014_v4  ;;  %v967_v50 = vmul.f32 %v2792_v56, %v3966_v25  ;;  %2805 = vpow2.f32 %v1651_v18  ;;  %v4076_v28 = vadd.f32 %v3729_v33, %v518_v62 }
 0x126   :  { %v2796_v3 = vpop.eup %2795  ;;  %v2415_v27 = vpack.c.bf16 %v1856_v54, %v4021_v20  ;;  %v4073_v51 = vmul.f32 %v2794_v32, %v3976_v30  ;;  %2807 = vpow2.f32 %v731_v23  ;;  %v1653_v25 = vmul.f32 1.442695, %v1539_v31 }
 0x127   :  { %v2798_v53 = vpop.eup %2797  ;;  %2479 = vst [vmem:[%s4599_s7 + $0xb8] sm:$0xff] %v2255_v10   ;;  %v1698_v4 = vadd.f32 1.0, %v2796_v3  ;;  %2809 = vpow2.f32 %v1589_v2  ;;  %v1376_v37 = vmul.f32 %v3719_v21, %v4033_v19  ;;  %v650_v20 = vsub.f32 0.0, %v4076_v28 }
 0x128   :  { %v2800_v13 = vpop.eup %2799  ;;  %2510 = vst [vmem:[%s4600_s8 + $0xb8] sm:$0xff] %v2415_v27   ;;  %v872_v30 = vadd.f32 1.0, %v2798_v53  ;;  %2811 = vpow2.f32 %v795_v52  ;;  %v550_v38 = vmul.f32 %v3713_v43, %v456_v26  ;;  %v459_v41 = vpop.f32.mrf.mxu2  ;;  %v1408_v19 = vmul.f32 %v3719_v21, %v1314_v40 }
 0x129   :  { %v2802_v59 = vpop.eup %2801  ;;  %v4089_v63 = vmul.f32 %v2800_v13, %v3989_v5  ;;  %2813 = vrcp.f32 %v1698_v4  ;;  %v4092_v34 = vadd.f32 %v3705_v42, %v1376_v37  ;;  %v1317_v12 = vpop.f32.mrf.mxu3  ;;  %v733_v8 = vmul.f32 1.442695, %v650_v20 }
 0x12a   :  { %v2804_v49 = vpop.eup %2803  ;;  %v4096_v18 = vmul.f32 %v2802_v59, %v3993_v16  ;;  %2815 = vrcp.f32 %v872_v30  ;;  %v4099_v45 = vadd.f32 %v3729_v33, %v550_v38  ;;  %v366_v57 = vpop.f32.mrf.mxu0  ;;  %v4104_v6 = vadd.f32 %v3705_v42, %v1408_v19  ;;  %v4144_v30 = vld [vmem:[%s4598_s6] ss:$0 sm:$0xff] }
 0x12b   :  { %v2806_v35 = vpop.eup %2805  ;;  %v968_v5 = vmul.f32 %v2804_v49, %v3996_v36  ;;  %2817 = vpow2.f32 %v1653_v25  ;;  %v1508_v61 = vsub.f32 0.0, %v4092_v34  ;;  %v1224_v24 = vpop.f32.mrf.mxu1  ;;  %v519_v22 = vmul.f32 %v3713_v43, %v363_v48  ;;  %v4152_v38 = vld [vmem:[%s4595_s2] ss:$0 sm:$0xff] }
 0x12c   :  { %v2808_v26 = vpop.eup %2807  ;;  %v1730_v7 = vadd.f32 1.0, %v2806_v35  ;;  %2819 = vpow2.f32 %v733_v8  ;;  %v682_v16 = vsub.f32 0.0, %v4099_v45  ;;  %v1540_v36 = vsub.f32 0.0, %v4104_v6 }
 0x12d   :  { %v2810_v11 = vpop.eup %2809  ;;  %v2180_v23 = vpack.c.bf16 %v968_v5, %v967_v50  ;;  %v841_v40 = vadd.f32 1.0, %v2808_v26  ;;  %v1591_v39 = vmul.f32 1.442695, %v1508_v61  ;;  %v4110_v15 = vadd.f32 %v3729_v33, %v519_v22 }
 0x12e   :  { %v2812_v17 = vpop.eup %2811  ;;  %2821 = vrcp.f32 %v1730_v7  ;;  %v1699_v46 = vadd.f32 1.0, %v2810_v11  ;;  %v797_v14 = vmul.f32 1.442695, %v682_v16  ;;  %v1655_v62 = vmul.f32 1.442695, %v1540_v36 }
 0x12f   :  { %v2814_v55 = vpop.eup %2813  ;;  %2464 = vst [vmem:[%s4599_s7 + $0x40] sm:$0xff] %v2180_v23   ;;  %2823 = vrcp.f32 %v841_v40  ;;  %v873_v48 = vadd.f32 1.0, %v2812_v17  ;;  %v1377_v56 = vmul.f32 %v3719_v21, %v4065_v0  ;;  %v651_v52 = vsub.f32 0.0, %v4110_v15 }
 0x130   :  { %v2816_v54 = vpop.eup %2815  ;;  %v1826_v2 = vmul.f32 %v2814_v55, %v4017_v47  ;;  %2825 = vrcp.f32 %v1699_v46  ;;  %v551_v33 = vmul.f32 %v3713_v43, %v459_v41  ;;  %v1409_v31 = vmul.f32 %v3719_v21, %v1317_v12  ;;  %v462_v3 = vpop.f32.mrf.mxu2  ;;  %v4136_v21 = vld [vmem:[%s4596_s3] ss:$0 sm:$0xff] }
 0x131   :  { %v2818_v32 = vpop.eup %2817  ;;  %v1000_v10 = vmul.f32 %v2816_v54, %v4027_v9  ;;  %2827 = vrcp.f32 %v873_v48  ;;  %v4122_v50 = vadd.f32 %v3705_v42, %v1377_v56  ;;  %v735_v47 = vmul.f32 1.442695, %v651_v52  ;;  %v1320_v4 = vpop.f32.mrf.mxu3  ;;  %v4162_v12 = vld [vmem:[%s4597_s5] ss:$0 sm:$0xff] }
 0x132   :  { %v2820_v27 = vpop.eup %2819  ;;  %v2340_v0 = vpack.c.bf16 %v1826_v2, %v4073_v51  ;;  %v1731_v53 = vadd.f32 1.0, %v2818_v32  ;;  %2829 = vpow2.f32 %v1591_v39  ;;  %v369_v25 = vpop.f32.mrf.mxu0  ;;  %v4139_v51 = vadd.f32 %v4136_v21, %v551_v33 }
 0x133   :  { %v2260_v43 = vpack.c.bf16 %v1000_v10, %v4089_v63  ;;  %v842_v37 = vadd.f32 1.0, %v2820_v27  ;;  %2831 = vpow2.f32 %v797_v14  ;;  %v1509_v9 = vsub.f32 0.0, %v4122_v50  ;;  %v4128_v13 = vpop.f32.mrf.mxu1 }
 0x134   :  { %v2822_v42 = vpop.eup %2821  ;;  %2495 = vst [vmem:[%s4600_s8 + $0x40] sm:$0xff] %v2340_v0   ;;  %2833 = vrcp.f32 %v1731_v53  ;;  %v4147_v20 = vadd.f32 %v4144_v30, %v1409_v31  ;;  %v520_v41 = vmul.f32 %v4152_v38, %v366_v57  ;;  %v1378_v49 = vmul.f32 %v4162_v12, %v1224_v24 }
 0x135   :  { %v2824_v59 = vpop.eup %2823  ;;  %2480 = vst [vmem:[%s4599_s7 + $0xc0] sm:$0xff] %v2260_v43   ;;  %v1858_v63 = vmul.f32 %v2822_v42, %v4030_v1  ;;  %2835 = vrcp.f32 %v842_v37  ;;  %v1593_v19 = vmul.f32 1.442695, %v1509_v9  ;;  %v683_v57 = vsub.f32 0.0, %v4139_v51 }
 0x136   :  { %v2826_v8 = vpop.eup %2825  ;;  %v969_v35 = vmul.f32 %v2824_v59, %v4041_v58  ;;  %2837 = vpow2.f32 %v1655_v62  ;;  %v1541_v5 = vsub.f32 0.0, %v4147_v20  ;;  %v4173_v7 = vadd.f32 %v4136_v21, %v520_v41 }
 0x137   :  { %v2828_v61 = vpop.eup %2827  ;;  %v2420_v1 = vpack.c.bf16 %v1858_v63, %v4096_v18  ;;  %v4170_v26 = vmul.f32 %v2826_v8, %v4048_v29  ;;  %2839 = vpow2.f32 %v735_v47  ;;  %v799_v58 = vmul.f32 1.442695, %v683_v57 }
 0x138   :  { %v2830_v16 = vpop.eup %2829  ;;  %v4176_v24 = vmul.f32 %v2828_v61, %v4051_v60  ;;  %2841 = vpow2.f32 %v1593_v19  ;;  %v1657_v22 = vmul.f32 1.442695, %v1541_v5  ;;  %v652_v29 = vsub.f32 0.0, %v4173_v7  ;;  %v465_v39 = vpop.f32.mrf.mxu2 }
 0x139   :  { %v2832_v11 = vpop.eup %2831  ;;  %2511 = vst [vmem:[%s4600_s8 + $0xc0] sm:$0xff] %v2420_v1   ;;  %v1700_v18 = vadd.f32 1.0, %v2830_v16  ;;  %v4183_v23 = vadd.f32 %v4144_v30, %v1378_v49  ;;  %v552_v40 = vmul.f32 %v4152_v38, %v462_v3  ;;  %2843 = vpow2.f32 %v799_v58  ;;  %v1323_v14 = vpop.f32.mrf.mxu3 }
 0x13a   :  { %v2834_v36 = vpop.eup %2833  ;;  %v874_v60 = vadd.f32 1.0, %v2832_v11  ;;  %v1410_v17 = vmul.f32 %v4162_v12, %v1320_v4  ;;  %v521_v46 = vmul.f32 %v4152_v38, %v369_v25  ;;  %v372_v55 = vpop.f32.mrf.mxu0  ;;  %v737_v56 = vmul.f32 1.442695, %v652_v29 }
 0x13b   :  { %v2836_v48 = vpop.eup %2835  ;;  %v4189_v62 = vmul.f32 %v2834_v36, %v4062_v44  ;;  %2845 = vrcp.f32 %v1700_v18  ;;  %v1510_v54 = vsub.f32 0.0, %v4183_v23  ;;  %v4192_v2 = vpop.f32.mrf.mxu1  ;;  %v4196_v32 = vadd.f32 %v4136_v21, %v552_v40 }
 0x13c   :  { %v2838_v52 = vpop.eup %2837  ;;  %v970_v33 = vmul.f32 %v2836_v48, %v4076_v28  ;;  %2847 = vrcp.f32 %v874_v60  ;;  %v4199_v10 = vadd.f32 %v4144_v30, %v1410_v17  ;;  %v4202_v27 = vadd.f32 %v4136_v21, %v521_v46 }
 0x13d   :  { %v2840_v31 = vpop.eup %2839  ;;  %v1732_v3 = vadd.f32 1.0, %v2838_v52  ;;  %2849 = vpow2.f32 %v1657_v22  ;;  %v1595_v44 = vmul.f32 1.442695, %v1510_v54  ;;  %v684_v28 = vsub.f32 0.0, %v4196_v32 }
 0x13e   :  { %v2842_v0 = vpop.eup %2841  ;;  %v2185_v53 = vpack.c.bf16 %v970_v33, %v969_v35  ;;  %v843_v47 = vadd.f32 1.0, %v2840_v31  ;;  %2851 = vpow2.f32 %v737_v56  ;;  %v1542_v25 = vsub.f32 0.0, %v4199_v10 }
 0x13f   :  { %2853 = vrcp.f32 %v1732_v3  ;;  %v1701_v4 = vadd.f32 1.0, %v2842_v0  ;;  %v653_v43 = vsub.f32 0.0, %v4202_v27  ;;  %v2844_v37 = vpop.eup %2843  ;;  %v801_v9 = vmul.f32 1.442695, %v684_v28 }
 0x140   :  { %2465 = vst [vmem:[%s4599_s7 + $0x48] sm:$0xff] %v2185_v53   ;;  %2855 = vrcp.f32 %v843_v47  ;;  %v1379_v42 = vmul.f32 %v4162_v12, %v4128_v13  ;;  %v553_v41 = vmul.f32 %v4152_v38, %v465_v39  ;;  %v875_v63 = vadd.f32 1.0, %v2844_v37  ;;  %v468_v8 = vpop.f32.mrf.mxu2 }
 0x141   :  { %v2846_v59 = vpop.eup %2845  ;;  %2857 = vrcp.f32 %v1701_v4  ;;  %v1659_v19 = vmul.f32 1.442695, %v1542_v25  ;;  %v739_v49 = vmul.f32 1.442695, %v653_v43  ;;  %v1326_v1 = vpop.f32.mrf.mxu3  ;;  %v1411_v22 = vmul.f32 %v4162_v12, %v1323_v14 }
 0x142   :  { %v2848_v35 = vpop.eup %2847  ;;  %v1828_v57 = vmul.f32 %v2846_v59, %v4092_v34  ;;  %2859 = vpow2.f32 %v1595_v44  ;;  %v4215_v5 = vadd.f32 %v4144_v30, %v1379_v42  ;;  %v4218_v61 = vadd.f32 %v4136_v21, %v553_v41  ;;  %v375_v13 = vpop.f32.mrf.mxu0 }
 0x143   :  { %v2850_v16 = vpop.eup %2849  ;;  %v1002_v58 = vmul.f32 %v2848_v35, %v4099_v45  ;;  %2861 = vrcp.f32 %v875_v63  ;;  %v522_v11 = vmul.f32 %v4152_v38, %v372_v55  ;;  %v4225_v39 = vpop.f32.mrf.mxu1  ;;  %v4234_v55 = vadd.f32 %v4144_v30, %v1411_v22 }
 0x144   :  { %v2852_v18 = vpop.eup %2851  ;;  %v2345_v34 = vpack.c.bf16 %v1828_v57, %v4170_v26  ;;  %v1733_v29 = vadd.f32 1.0, %v2850_v16  ;;  %2863 = vpow2.f32 %v801_v9  ;;  %v1511_v40 = vsub.f32 0.0, %v4215_v5 }
 0x145   :  { %v2854_v36 = vpop.eup %2853  ;;  %v2265_v60 = vpack.c.bf16 %v1002_v58, %v4176_v24  ;;  %v844_v17 = vadd.f32 1.0, %v2852_v18  ;;  %2865 = vpow2.f32 %v1659_v19  ;;  %v685_v45 = vsub.f32 0.0, %v4218_v61 }
 0x146   :  { %v2856_v46 = vpop.eup %2855  ;;  %2496 = vst [vmem:[%s4600_s8 + $0x48] sm:$0xff] %v2345_v34   ;;  %v1860_v26 = vmul.f32 %v2854_v36, %v4104_v6  ;;  %2867 = vrcp.f32 %v1733_v29  ;;  %v1597_v14 = vmul.f32 1.442695, %v1511_v40  ;;  %v4241_v54 = vadd.f32 %v4136_v21, %v522_v11 }
 0x147   :  { %v2858_v48 = vpop.eup %2857  ;;  %2481 = vst [vmem:[%s4599_s7 + $0xc8] sm:$0xff] %v2265_v60   ;;  %v971_v24 = vmul.f32 %v2856_v46, %v4110_v15  ;;  %2869 = vrcp.f32 %v844_v17  ;;  %v803_v56 = vmul.f32 1.442695, %v685_v45  ;;  %v1543_v31 = vsub.f32 0.0, %v4234_v55 }
 0x148   :  { %v2860_v52 = vpop.eup %2859  ;;  %v2425_v6 = vpack.c.bf16 %v1860_v26, %v4189_v62  ;;  %v4245_v33 = vmul.f32 %v2858_v48, %v4122_v50  ;;  %2871 = vpow2.f32 %v739_v49  ;;  %v654_v0 = vsub.f32 0.0, %v4241_v54  ;;  %v471_v53 = vpop.f32.mrf.mxu2 }
 0x149   :  { %v2862_v3 = vpop.eup %2861  ;;  %v1702_v44 = vadd.f32 1.0, %v2860_v52  ;;  %2873 = vpow2.f32 %v1597_v14  ;;  %v1380_v15 = vmul.f32 %v4162_v12, %v4192_v2  ;;  %v1661_v62 = vmul.f32 1.442695, %v1543_v31  ;;  %v1329_v4 = vpop.f32.mrf.mxu3 }
 0x14a   :  { %v2864_v47 = vpop.eup %2863  ;;  %2512 = vst [vmem:[%s4600_s8 + $0xc8] sm:$0xff] %v2425_v6   ;;  %v4255_v50 = vmul.f32 %v2862_v3, %v4139_v51  ;;  %2875 = vpow2.f32 %v803_v56  ;;  %v554_v28 = vmul.f32 %v4152_v38, %v468_v8  ;;  %v4258_v25 = vpop.f32.mrf.mxu0  ;;  %v741_v2 = vmul.f32 1.442695, %v654_v0 }
 0x14b   :  { %v2866_v43 = vpop.eup %2865  ;;  %2877 = vrcp.f32 %v1702_v44  ;;  %v876_v37 = vadd.f32 1.0, %v2864_v47  ;;  %v4261_v9 = vadd.f32 %v4144_v30, %v1380_v15  ;;  %v1412_v59 = vmul.f32 %v4162_v12, %v1326_v1  ;;  %v1236_v22 = vpop.f32.mrf.mxu1 }
 0x14c   :  { %v2868_v42 = vpop.eup %2867  ;;  %v1734_v41 = vadd.f32 1.0, %v2866_v43  ;;  %2879 = vpow2.f32 %v1661_v62  ;;  %v4264_v51 = vadd.f32 %v4136_v21, %v554_v28  ;;  %v523_v8 = vmul.f32 %v4152_v38, %v375_v13 }
 0x14d   :  { %v2870_v63 = vpop.eup %2869  ;;  %v4268_v19 = vmul.f32 %v2868_v42, %v4147_v20  ;;  %2881 = vrcp.f32 %v876_v37  ;;  %v1512_v49 = vsub.f32 0.0, %v4261_v9  ;;  %v4275_v58 = vadd.f32 %v4144_v30, %v1412_v59 }
 0x14e   :  { %v2872_v35 = vpop.eup %2871  ;;  %v972_v57 = vmul.f32 %v2870_v63, %v4173_v7  ;;  %2883 = vrcp.f32 %v1734_v41  ;;  %v686_v16 = vsub.f32 0.0, %v4264_v51  ;;  %v4278_v18 = vadd.f32 %v4136_v21, %v523_v8 }
 0x14f   :  { %v2874_v1 = vpop.eup %2873  ;;  %v845_v11 = vadd.f32 1.0, %v2872_v35  ;;  %2885 = vpow2.f32 %v741_v2  ;;  %v1599_v20 = vmul.f32 1.442695, %v1512_v49  ;;  %v1544_v7 = vsub.f32 0.0, %v4275_v58 }
 0x150   :  { %v2876_v34 = vpop.eup %2875  ;;  %v2190_v29 = vpack.c.bf16 %v972_v57, %v971_v24  ;;  %v1703_v13 = vadd.f32 1.0, %v2874_v1  ;;  %v805_v40 = vmul.f32 1.442695, %v686_v16  ;;  %v655_v17 = vsub.f32 0.0, %v4278_v18  ;;  %v474_v46 = vpop.f32.mrf.mxu2 }
 0x151   :  { %v2878_v36 = vpop.eup %2877  ;;  %2887 = vrcp.f32 %v845_v11  ;;  %v877_v60 = vadd.f32 1.0, %v2876_v34  ;;  %v1381_v45 = vmul.f32 %v4162_v12, %v4225_v39  ;;  %v1663_v48 = vmul.f32 1.442695, %v1544_v7  ;;  %v1332_v56 = vpop.f32.mrf.mxu3 }
 0x152   :  { %v2880_v26 = vpop.eup %2879  ;;  %2466 = vst [vmem:[%s4599_s7 + $0x50] sm:$0xff] %v2190_v29   ;;  %v1830_v14 = vmul.f32 %v2878_v36, %v4183_v23  ;;  %2889 = vrcp.f32 %v1703_v13  ;;  %v555_v24 = vmul.f32 %v4152_v38, %v471_v53  ;;  %v381_v52 = vpop.f32.mrf.mxu0  ;;  %v743_v3 = vmul.f32 1.442695, %v655_v17 }
 0x153   :  { %v2882_v6 = vpop.eup %2881  ;;  %2891 = vrcp.f32 %v877_v60  ;;  %v1735_v31 = vadd.f32 1.0, %v2880_v26  ;;  %v4290_v39 = vadd.f32 %v4144_v30, %v1381_v45  ;;  %v1413_v28 = vmul.f32 %v4162_v12, %v1329_v4  ;;  %v1239_v63 = vpop.f32.mrf.mxu1 }
 0x154   :  { %v2884_v44 = vpop.eup %2883  ;;  %v2350_v0 = vpack.c.bf16 %v1830_v14, %v4245_v33  ;;  %v1004_v15 = vmul.f32 %v2882_v6, %v4196_v32  ;;  %2893 = vpow2.f32 %v1599_v20  ;;  %v4295_v23 = vadd.f32 %v4136_v21, %v555_v24 }
 0x155   :  { %v2886_v47 = vpop.eup %2885  ;;  %v1862_v53 = vmul.f32 %v2884_v44, %v4199_v10  ;;  %2895 = vrcp.f32 %v1735_v31  ;;  %v1513_v62 = vsub.f32 0.0, %v4290_v39  ;;  %v4307_v42 = vadd.f32 %v4144_v30, %v1413_v28 }
 0x156   :  { %2497 = vst [vmem:[%s4600_s8 + $0x50] sm:$0xff] %v2350_v0   ;;  %v2270_v33 = vpack.c.bf16 %v1004_v15, %v4255_v50  ;;  %v846_v43 = vadd.f32 1.0, %v2886_v47  ;;  %2897 = vpow2.f32 %v805_v40  ;;  %v687_v32 = vsub.f32 0.0, %v4295_v23 }
 0x157   :  { %v2888_v37 = vpop.eup %2887  ;;  %v2430_v2 = vpack.c.bf16 %v1862_v53, %v4268_v19  ;;  %2899 = vpow2.f32 %v1663_v48  ;;  %v1601_v10 = vmul.f32 1.442695, %v1513_v62  ;;  %v524_v59 = vmul.f32 %v4152_v38, %v4258_v25 }
 0x158   :  { %v2890_v41 = vpop.eup %2889  ;;  %2482 = vst [vmem:[%s4599_s7 + $0xd0] sm:$0xff] %v2270_v33   ;;  %v973_v4 = vmul.f32 %v2888_v37, %v4202_v27  ;;  %2901 = vrcp.f32 %v846_v43  ;;  %v807_v50 = vmul.f32 1.442695, %v687_v32  ;;  %v1545_v8 = vsub.f32 0.0, %v4307_v42  ;;  %v477_v27 = vpop.f32.mrf.mxu2 }
 0x159   :  { %v2892_v49 = vpop.eup %2891  ;;  %2513 = vst [vmem:[%s4600_s8 + $0xd0] sm:$0xff] %v2430_v2   ;;  %v4319_v19 = vmul.f32 %v2890_v41, %v4215_v5  ;;  %2903 = vpow2.f32 %v743_v3  ;;  %v1382_v35 = vmul.f32 %v4162_v12, %v1236_v22  ;;  %v4327_v25 = vadd.f32 %v4136_v21, %v524_v59  ;;  %v1335_v11 = vpop.f32.mrf.mxu3 }
 0x15a   :  { %v2894_v57 = vpop.eup %2893  ;;  %v4324_v16 = vmul.f32 %v2892_v49, %v4218_v61  ;;  %2905 = vpow2.f32 %v1601_v10  ;;  %v556_v1 = vmul.f32 %v4152_v38, %v474_v46  ;;  %v1665_v34 = vmul.f32 1.442695, %v1545_v8  ;;  %v4341_v36 = vpop.f32.mrf.mxu0 }
 0x15b   :  { %v2896_v20 = vpop.eup %2895  ;;  %v1704_v5 = vadd.f32 1.0, %v2894_v57  ;;  %2907 = vpow2.f32 %v807_v50  ;;  %v4331_v29 = vadd.f32 %v4144_v30, %v1382_v35  ;;  %v656_v61 = vsub.f32 0.0, %v4327_v25  ;;  %v1242_v43 = vpop.f32.mrf.mxu1 }
 0x15c   :  { %v2898_v22 = vpop.eup %2897  ;;  %v4334_v13 = vmul.f32 %v2896_v20, %v4234_v55  ;;  %v4338_v40 = vadd.f32 %v4136_v21, %v556_v1  ;;  %v1414_v7 = vmul.f32 %v4162_v12, %v1332_v56  ;;  %v525_v46 = vmul.f32 %v4152_v38, %v381_v52 }
 0x15d   :  { %v2900_v60 = vpop.eup %2899  ;;  %2909 = vrcp.f32 %v1704_v5  ;;  %v878_v17 = vadd.f32 1.0, %v2898_v22  ;;  %v1514_v45 = vsub.f32 0.0, %v4331_v29  ;;  %v745_v55 = vmul.f32 1.442695, %v656_v61 }
 0x15e   :  { %v2902_v26 = vpop.eup %2901  ;;  %v1736_v14 = vadd.f32 1.0, %v2900_v60  ;;  %2911 = vpow2.f32 %v1665_v34  ;;  %v688_v48 = vsub.f32 0.0, %v4338_v40  ;;  %v4348_v31 = vadd.f32 %v4144_v30, %v1414_v7 }
 0x15f   :  { %v2904_v24 = vpop.eup %2903  ;;  %v974_v6 = vmul.f32 %v2902_v26, %v4241_v54  ;;  %2913 = vrcp.f32 %v878_v17  ;;  %v1603_v56 = vmul.f32 1.442695, %v1514_v45  ;;  %v4351_v52 = vadd.f32 %v4136_v21, %v525_v46 }
 0x160   :  { %v2906_v3 = vpop.eup %2905  ;;  %2915 = vrcp.f32 %v1736_v14  ;;  %v847_v44 = vadd.f32 1.0, %v2904_v24  ;;  %v809_v0 = vmul.f32 1.442695, %v688_v48  ;;  %v1546_v62 = vsub.f32 0.0, %v4348_v31  ;;  %v480_v32 = vpop.f32.mrf.mxu2 }
 0x161   :  { %v2908_v15 = vpop.eup %2907  ;;  %v2195_v47 = vpack.c.bf16 %v974_v6, %v973_v4  ;;  %v1705_v53 = vadd.f32 1.0, %v2906_v3  ;;  %2917 = vpow2.f32 %v745_v55  ;;  %v657_v28 = vsub.f32 0.0, %v4351_v52  ;;  %v1338_v49 = vpop.f32.mrf.mxu3 }
 0x162   :  { %2919 = vrcp.f32 %v847_v44  ;;  %v879_v54 = vadd.f32 1.0, %v2908_v15  ;;  %v1383_v33 = vmul.f32 %v4162_v12, %v1239_v63  ;;  %v1667_v2 = vmul.f32 1.442695, %v1546_v62  ;;  %v387_v5 = vpop.f32.mrf.mxu0 }
 0x163   :  { %v2910_v37 = vpop.eup %2909  ;;  %2467 = vst [vmem:[%s4599_s7 + $0x58] sm:$0xff] %v2195_v47   ;;  %2921 = vrcp.f32 %v1705_v53  ;;  %v557_v10 = vmul.f32 %v4152_v38, %v477_v27  ;;  %v1415_v41 = vmul.f32 %v4162_v12, %v1335_v11  ;;  %v747_v59 = vmul.f32 1.442695, %v657_v28  ;;  %v1245_v44 = vpop.f32.mrf.mxu1 }
 0x164   :  { %v2912_v4 = vpop.eup %2911  ;;  %v1832_v50 = vmul.f32 %v2910_v37, %v4261_v9  ;;  %2923 = vrcp.f32 %v879_v54  ;;  %v4363_v63 = vadd.f32 %v4144_v30, %v1383_v33  ;;  %v526_v48 = vmul.f32 %v4152_v38, %v4341_v36 }
 0x165   :  { %v2914_v8 = vpop.eup %2913  ;;  %v1737_v35 = vadd.f32 1.0, %v2912_v4  ;;  %2925 = vpow2.f32 %v1603_v56  ;;  %v4366_v57 = vadd.f32 %v4136_v21, %v557_v10  ;;  %v4369_v1 = vadd.f32 %v4144_v30, %v1415_v41 }
 0x166   :  { %v2916_v27 = vpop.eup %2915  ;;  %v2355_v11 = vpack.c.bf16 %v1832_v50, %v4319_v19  ;;  %v1006_v9 = vmul.f32 %v2914_v8, %v4264_v51  ;;  %2927 = vpow2.f32 %v809_v0  ;;  %v1515_v20 = vsub.f32 0.0, %v4363_v63 }
 0x167   :  { %v2918_v34 = vpop.eup %2917  ;;  %v1864_v22 = vmul.f32 %v2916_v27, %v4275_v58  ;;  %2929 = vrcp.f32 %v1737_v35  ;;  %v689_v61 = vsub.f32 0.0, %v4366_v57  ;;  %v1547_v7 = vsub.f32 0.0, %v4369_v1 }
 0x168   :  { %v2920_v60 = vpop.eup %2919  ;;  %2498 = vst [vmem:[%s4600_s8 + $0x58] sm:$0xff] %v2355_v11   ;;  %v2275_v19 = vpack.c.bf16 %v1006_v9, %v4324_v16  ;;  %v848_v51 = vadd.f32 1.0, %v2918_v34  ;;  %2931 = vpow2.f32 %v1667_v2  ;;  %v1605_v17 = vmul.f32 1.442695, %v1515_v20  ;;  %v483_v0 = vpop.f32.mrf.mxu2 }
 0x169   :  { %v2922_v45 = vpop.eup %2921  ;;  %v2435_v46 = vpack.c.bf16 %v1864_v22, %v4334_v13  ;;  %v4383_v58 = vmul.f32 %v2920_v60, %v4278_v18  ;;  %2933 = vpow2.f32 %v747_v59  ;;  %v811_v26 = vmul.f32 1.442695, %v689_v61 }
 0x16a   :  { %v2924_v14 = vpop.eup %2923  ;;  %2483 = vst [vmem:[%s4599_s7 + $0xd8] sm:$0xff] %v2275_v19   ;;  %v4389_v55 = vmul.f32 %v2922_v45, %v4290_v39  ;;  %2935 = vrcp.f32 %v848_v51  ;;  %v1669_v16 = vmul.f32 1.442695, %v1547_v7  ;;  %v1384_v13 = vmul.f32 %v4162_v12, %v1242_v43  ;;  %v1341_v43 = vpop.f32.mrf.mxu3 }
 0x16b   :  { %v2926_v24 = vpop.eup %2925  ;;  %2514 = vst [vmem:[%s4600_s8 + $0xd8] sm:$0xff] %v2435_v46   ;;  %v4397_v18 = vmul.f32 %v2924_v14, %v4295_v23  ;;  %2937 = vpow2.f32 %v1605_v17  ;;  %v558_v6 = vmul.f32 %v4152_v38, %v480_v32  ;;  %v4402_v3 = vadd.f32 %v4136_v21, %v526_v48 }
 0x16c   :  { %v2928_v39 = vpop.eup %2927  ;;  %v1706_v56 = vadd.f32 1.0, %v2926_v24  ;;  %2939 = vpow2.f32 %v811_v26  ;;  %v1416_v36 = vmul.f32 %v4162_v12, %v1338_v49  ;;  %v4406_v23 = vadd.f32 %v4144_v30, %v1384_v13  ;;  %v390_v49 = vpop.f32.mrf.mxu0 }
 0x16d   :  { %v2930_v15 = vpop.eup %2929  ;;  %v880_v47 = vadd.f32 1.0, %v2928_v39  ;;  %2941 = vpow2.f32 %v1669_v16  ;;  %v4409_v53 = vadd.f32 %v4136_v21, %v558_v6  ;;  %v658_v28 = vsub.f32 0.0, %v4402_v3  ;;  %v1248_v24 = vpop.f32.mrf.mxu1 }
 0x16e   :  { %v2932_v62 = vpop.eup %2931  ;;  %v4412_v54 = vmul.f32 %v2930_v15, %v4307_v42  ;;  %2943 = vrcp.f32 %v1706_v56  ;;  %v4416_v33 = vadd.f32 %v4144_v30, %v1416_v36  ;;  %v1516_v2 = vsub.f32 0.0, %v4406_v23 }
 0x16f   :  { %v2934_v32 = vpop.eup %2933  ;;  %2945 = vrcp.f32 %v880_v47  ;;  %v1738_v37 = vadd.f32 1.0, %v2932_v62  ;;  %v690_v10 = vsub.f32 0.0, %v4409_v53  ;;  %v749_v50 = vmul.f32 1.442695, %v658_v28 }
 0x170   :  { %v2936_v41 = vpop.eup %2935  ;;  %v849_v4 = vadd.f32 1.0, %v2934_v32  ;;  %v1548_v42 = vsub.f32 0.0, %v4416_v33  ;;  %v527_v59 = vmul.f32 %v4152_v38, %v387_v5  ;;  %v1607_v27 = vmul.f32 1.442695, %v1516_v2  ;;  %v486_v13 = vpop.f32.mrf.mxu2 }
 0x171   :  { %v2938_v8 = vpop.eup %2937  ;;  %v976_v35 = vmul.f32 %v2936_v41, %v4327_v25  ;;  %2947 = vrcp.f32 %v1738_v37  ;;  %v813_v11 = vmul.f32 1.442695, %v690_v10  ;;  %v1385_v5 = vmul.f32 %v4162_v12, %v1245_v44 }
 0x172   :  { %v2940_v9 = vpop.eup %2939  ;;  %2949 = vrcp.f32 %v849_v4  ;;  %v1707_v20 = vadd.f32 1.0, %v2938_v8  ;;  %v1671_v34 = vmul.f32 1.442695, %v1548_v42  ;;  %v4424_v22 = vadd.f32 %v4136_v21, %v527_v59  ;;  %v1344_v15 = vpop.f32.mrf.mxu3 }
 0x173   :  { %v2942_v61 = vpop.eup %2941  ;;  %v2200_v7 = vpack.c.bf16 %v976_v35, %v4383_v58  ;;  %v881_v60 = vadd.f32 1.0, %v2940_v9  ;;  %2951 = vpow2.f32 %v749_v50  ;;  %v559_v17 = vmul.f32 %v4152_v38, %v483_v0 }
 0x174   :  { %v2944_v19 = vpop.eup %2943  ;;  %2953 = vrcp.f32 %v1707_v20  ;;  %v1739_v25 = vadd.f32 1.0, %v2942_v61  ;;  %v659_v51 = vsub.f32 0.0, %v4424_v22  ;;  %v4435_v58 = vadd.f32 %v4144_v30, %v1385_v5  ;;  %v393_v32 = vpop.f32.mrf.mxu0 }
 0x175   :  { %v2946_v45 = vpop.eup %2945  ;;  %2468 = vst [vmem:[%s4599_s7 + $0x60] sm:$0xff] %v2200_v7   ;;  %v1834_v46 = vmul.f32 %v2944_v19, %v4331_v29  ;;  %2955 = vrcp.f32 %v881_v60  ;;  %v1417_v26 = vmul.f32 %v4162_v12, %v1341_v43  ;;  %v4440_v48 = vadd.f32 %v4136_v21, %v559_v17 }
 0x176   :  { %v1008_v14 = vmul.f32 %v2946_v45, %v4338_v40  ;;  %2957 = vrcp.f32 %v1739_v25  ;;  %v751_v16 = vmul.f32 1.442695, %v659_v51  ;;  %v1517_v29 = vsub.f32 0.0, %v4435_v58  ;;  %v1251_v25 = vpop.f32.mrf.mxu1 }
 0x177   :  { %v2948_v6 = vpop.eup %2947  ;;  %v2360_v39 = vpack.c.bf16 %v1834_v46, %v4389_v55  ;;  %2959 = vpow2.f32 %v1607_v27  ;;  %v4445_v56 = vadd.f32 %v4144_v30, %v1417_v26  ;;  %v691_v0 = vsub.f32 0.0, %v4440_v48 }
 0x178   :  { %v2950_v36 = vpop.eup %2949  ;;  %v2280_v44 = vpack.c.bf16 %v1008_v14, %v4397_v18  ;;  %v1866_v40 = vmul.f32 %v2948_v6, %v4348_v31  ;;  %2961 = vpow2.f32 %v813_v11  ;;  %v1609_v55 = vmul.f32 1.442695, %v1517_v29  ;;  %v489_v51 = vpop.f32.mrf.mxu2 }
 0x179   :  { %v2952_v47 = vpop.eup %2951  ;;  %2499 = vst [vmem:[%s4600_s8 + $0x60] sm:$0xff] %v2360_v39   ;;  %2963 = vpow2.f32 %v1671_v34  ;;  %v1549_v62 = vsub.f32 0.0, %v4445_v56  ;;  %v815_v43 = vmul.f32 1.442695, %v691_v0  ;;  %v4459_v2 = vmul.f32 %v2950_v36, %v4351_v52 }
 0x17a   :  { %v2954_v28 = vpop.eup %2953  ;;  %2484 = vst [vmem:[%s4599_s7 + $0xe0] sm:$0xff] %v2280_v44   ;;  %v2440_v31 = vpack.c.bf16 %v1866_v40, %v4412_v54  ;;  %v850_v18 = vadd.f32 1.0, %v2952_v47  ;;  %2965 = vpow2.f32 %v751_v16  ;;  %v528_v41 = vmul.f32 %v4152_v38, %v390_v49  ;;  %v1347_v6 = vpop.f32.mrf.mxu3 }
 0x17b   :  { %v2956_v37 = vpop.eup %2955  ;;  %2967 = vpow2.f32 %v1609_v55  ;;  %v1673_v10 = vmul.f32 1.442695, %v1549_v62  ;;  %v4466_v50 = vmul.f32 %v2954_v28, %v4363_v63  ;;  %v1386_v54 = vmul.f32 %v4162_v12, %v1248_v24 }
 0x17c   :  { %v2958_v4 = vpop.eup %2957  ;;  %2515 = vst [vmem:[%s4600_s8 + $0xe0] sm:$0xff] %v2440_v31   ;;  %2969 = vrcp.f32 %v850_v18  ;;  %v560_v42 = vmul.f32 %v4152_v38, %v486_v13  ;;  %v4471_v52 = vmul.f32 %v2956_v37, %v4366_v57  ;;  %v4474_v49 = vadd.f32 %v4136_v21, %v528_v41 }
 0x17d   :  { %v2960_v59 = vpop.eup %2959  ;;  %2971 = vpow2.f32 %v815_v43  ;;  %v1418_v8 = vmul.f32 %v4162_v12, %v1344_v15  ;;  %v4478_v63 = vadd.f32 %v4144_v30, %v1386_v54  ;;  %v529_v61 = vmul.f32 %v4152_v38, %v393_v32 }
 0x17e   :  { %v2962_v35 = vpop.eup %2961  ;;  %v1708_v27 = vadd.f32 1.0, %v2960_v59  ;;  %2973 = vpow2.f32 %v1673_v10  ;;  %v4481_v11 = vadd.f32 %v4136_v21, %v560_v42  ;;  %v660_v57 = vsub.f32 0.0, %v4474_v49 }
 0x17f   :  { %v2964_v9 = vpop.eup %2963  ;;  %v882_v20 = vadd.f32 1.0, %v2962_v35  ;;  %v4485_v34 = vadd.f32 %v4144_v30, %v1418_v8  ;;  %v1518_v5 = vsub.f32 0.0, %v4478_v63  ;;  %v1867_v16 = vmul.f32 %v2958_v4, %v4369_v1  ;;  %v396_v1 = vpop.f32.mrf.mxu0 }
 0x180   :  { %v2966_v7 = vpop.eup %2965  ;;  %2975 = vrcp.f32 %v1708_v27  ;;  %v1740_v60 = vadd.f32 1.0, %v2964_v9  ;;  %v692_v19 = vsub.f32 0.0, %v4481_v11  ;;  %v753_v46 = vmul.f32 1.442695, %v660_v57 }
 0x181   :  { %v2968_v17 = vpop.eup %2967  ;;  %2977 = vrcp.f32 %v882_v20  ;;  %v851_v45 = vadd.f32 1.0, %v2966_v7  ;;  %v1550_v26 = vsub.f32 0.0, %v4485_v34  ;;  %v1611_v13 = vmul.f32 1.442695, %v1518_v5 }
 0x182   :  { %v2970_v14 = vpop.eup %2969  ;;  %2979 = vrcp.f32 %v1740_v60  ;;  %v1709_v24 = vadd.f32 1.0, %v2968_v17  ;;  %v817_v36 = vmul.f32 1.442695, %v692_v19  ;;  %v4494_v44 = vadd.f32 %v4136_v21, %v529_v61  ;;  %v492_v61 = vpop.f32.mrf.mxu2 }
 0x183   :  { %v2972_v39 = vpop.eup %2971  ;;  %v978_v29 = vmul.f32 %v2970_v14, %v4402_v3  ;;  %2981 = vrcp.f32 %v851_v45  ;;  %v1387_v15 = vmul.f32 %v4162_v12, %v1251_v25  ;;  %v561_v47 = vmul.f32 %v4152_v38, %v489_v51  ;;  %v1350_v5 = vpop.f32.mrf.mxu3 }
 0x184   :  { %v2974_v40 = vpop.eup %2973  ;;  %2983 = vrcp.f32 %v1709_v24  ;;  %v883_v0 = vadd.f32 1.0, %v2972_v39  ;;  %v1675_v62 = vmul.f32 1.442695, %v1550_v26  ;;  %v661_v28 = vsub.f32 0.0, %v4494_v44 }
 0x185   :  { %v2205_v55 = vpack.c.bf16 %v978_v29, %v4459_v2  ;;  %2985 = vpow2.f32 %v753_v46  ;;  %v1741_v31 = vadd.f32 1.0, %v2974_v40  ;;  %v4501_v18 = vadd.f32 %v4144_v30, %v1387_v15 }
 0x186   :  { %v2976_v3 = vpop.eup %2975  ;;  %v4504_v43 = vadd.f32 %v4136_v21, %v561_v47  ;;  %v1419_v32 = vmul.f32 %v4162_v12, %v1347_v6  ;;  %2987 = vrcp.f32 %v883_v0  ;;  %v755_v10 = vmul.f32 1.442695, %v661_v28 }
 0x187   :  { %v2978_v37 = vpop.eup %2977  ;;  %2469 = vst [vmem:[%s4599_s7 + $0x68] sm:$0xff] %v2205_v55   ;;  %v1836_v2 = vmul.f32 %v2976_v3, %v4406_v23  ;;  %v530_v41 = vmul.f32 %v4152_v38, %v396_v1  ;;  %2989 = vpow2.f32 %v1611_v13  ;;  %v1519_v42 = vsub.f32 0.0, %v4501_v18 }
 0x188   :  { %v2980_v4 = vpop.eup %2979  ;;  %v1010_v54 = vmul.f32 %v2978_v37, %v4409_v53  ;;  %v693_v59 = vsub.f32 0.0, %v4504_v43  ;;  %2991 = vpow2.f32 %v817_v36  ;;  %v4518_v23 = vadd.f32 %v4144_v30, %v1419_v32  ;;  %v1254_v53 = vpop.f32.mrf.mxu1 }
 0x189   :  { %v2982_v8 = vpop.eup %2981  ;;  %v2365_v35 = vpack.c.bf16 %v1836_v2, %v4466_v50  ;;  %v1868_v27 = vmul.f32 %v2980_v4, %v4416_v33  ;;  %2993 = vpow2.f32 %v1675_v62  ;;  %v1613_v57 = vmul.f32 1.442695, %v1519_v42 }
 0x18a   :  { %v2984_v9 = vpop.eup %2983  ;;  %v2285_v20 = vpack.c.bf16 %v1010_v54, %v4471_v52  ;;  %2995 = vrcp.f32 %v1741_v31  ;;  %v819_v50 = vmul.f32 1.442695, %v693_v59  ;;  %v4528_v52 = vadd.f32 %v4136_v21, %v530_v41 }
 0x18b   :  { %v2986_v7 = vpop.eup %2985  ;;  %2500 = vst [vmem:[%s4600_s8 + $0x68] sm:$0xff] %v2365_v35   ;;  %v2445_v60 = vpack.c.bf16 %v1868_v27, %v1867_v16  ;;  %2997 = vpow2.f32 %v755_v10  ;;  %v1551_v25 = vsub.f32 0.0, %v4518_v23  ;;  %v1388_v51 = vmul.f32 %v4162_v12, %v1254_v53 }
 0x18c   :  { %2485 = vst [vmem:[%s4599_s7 + $0xe8] sm:$0xff] %v2285_v20   ;;  %v852_v33 = vadd.f32 1.0, %v2986_v7  ;;  %v2988_v19 = vpop.eup %2987  ;;  %2999 = vpow2.f32 %v1613_v57  ;;  %v562_v17 = vmul.f32 %v4152_v38, %v492_v61  ;;  %v662_v46 = vsub.f32 0.0, %v4528_v52 }
 0x18d   :  { %2516 = vst [vmem:[%s4600_s8 + $0xe8] sm:$0xff] %v2445_v60   ;;  %v2990_v45 = vpop.eup %2989  ;;  %v4538_v16 = vadd.f32 %v4144_v30, %v1388_v51  ;;  %v1420_v13 = vmul.f32 %v4162_v12, %v1350_v5  ;;  %v1677_v36 = vmul.f32 1.442695, %v1551_v25  ;;  %v979_v28 = vmul.f32 %v2982_v8, %v4424_v22 }
 0x18e   :  { %3001 = vrcp.f32 %v852_v33  ;;  %v2992_v26 = vpop.eup %2991  ;;  %v1710_v14 = vadd.f32 1.0, %v2990_v45  ;;  %v4541_v24 = vadd.f32 %v4136_v21, %v562_v17  ;;  %v3045_v21 = vld [vmem:[%s4598_s6] ss:$0 sm:$0xff]  ;;  %v757_v47 = vmul.f32 1.442695, %v662_v46 }
 0x18f   :  { %v2994_v6 = vpop.eup %2993  ;;  %v884_v39 = vadd.f32 1.0, %v2992_v26  ;;  %3003 = vpow2.f32 %v819_v50  ;;  %v1520_v40 = vsub.f32 0.0, %v4538_v16  ;;  %v4549_v30 = vadd.f32 %v3045_v21, %v1420_v13 }
 0x190   :  { %v2996_v29 = vpop.eup %2995  ;;  %3005 = vrcp.f32 %v1710_v14  ;;  %v1742_v38 = vadd.f32 1.0, %v2994_v6  ;;  %v694_v15 = vsub.f32 0.0, %v4541_v24  ;;  %v1837_v4 = vmul.f32 %v2984_v9, %v4435_v58 }
 0x191   :  { %v2998_v0 = vpop.eup %2997  ;;  %3007 = vrcp.f32 %v884_v39  ;;  %v1615_v55 = vmul.f32 1.442695, %v1520_v40  ;;  %v1552_v62 = vsub.f32 0.0, %v4549_v30  ;;  %v1011_v59 = vmul.f32 %v2988_v19, %v4440_v48 }
 0x192   :  { %v3000_v12 = vpop.eup %2999  ;;  %3009 = vrcp.f32 %v1742_v38  ;;  %v821_v32 = vmul.f32 1.442695, %v694_v15  ;;  %v1869_v22 = vmul.f32 %v2996_v29, %v4445_v56  ;;  %v853_v8 = vadd.f32 1.0, %v2998_v0 }
 0x193   :  { %3011 = vpow2.f32 %v1677_v36  ;;  %v1679_v10 = vmul.f32 1.442695, %v1552_v62  ;;  %v1711_v20 = vadd.f32 1.0, %v3000_v12 }
 0x194   :  { %v3002_v1 = vpop.eup %3001  ;;  %3013 = vpow2.f32 %v757_v47 }
 0x195   :  { %v980_v3 = vmul.f32 %v3002_v1, %v4474_v49  ;;  %v3004_v31 = vpop.eup %3003  ;;  %3015 = vpow2.f32 %v1615_v55 }
 0x196   :  { %v3006_v37 = vpop.eup %3005  ;;  %3017 = vpow2.f32 %v821_v32  ;;  %v885_v9 = vadd.f32 1.0, %v3004_v31 }
 0x197   :  { %v2210_v2 = vpack.c.bf16 %v980_v3, %v979_v28  ;;  %v3008_v41 = vpop.eup %3007  ;;  %v1838_v54 = vmul.f32 %v3006_v37, %v4478_v63  ;;  %3019 = vpow2.f32 %v1679_v10 }
 0x198   :  { %v3010_v42 = vpop.eup %3009  ;;  %v1012_v49 = vmul.f32 %v3008_v41, %v4481_v11  ;;  %3021 = vrcp.f32 %v853_v8 }
 0x199   :  { %2470 = vst [vmem:[%s4599_s7 + $0x70] sm:$0xff] %v2210_v2   ;;  %v2370_v35 = vpack.c.bf16 %v1838_v54, %v1837_v4  ;;  %v1870_v27 = vmul.f32 %v3010_v42, %v4485_v34  ;;  %v3012_v58 = vpop.eup %3011  ;;  %3023 = vrcp.f32 %v1711_v20 }
 0x19a   :  { %v2290_v63 = vpack.c.bf16 %v1012_v49, %v1011_v59  ;;  %v3014_v56 = vpop.eup %3013  ;;  %v1743_v34 = vadd.f32 1.0, %v3012_v58  ;;  %3025 = vrcp.f32 %v885_v9 }
 0x19b   :  { %2501 = vst [vmem:[%s4600_s8 + $0x70] sm:$0xff] %v2370_v35   ;;  %v2450_v48 = vpack.c.bf16 %v1870_v27, %v1869_v22  ;;  %v3016_v11 = vpop.eup %3015  ;;  %v854_v57 = vadd.f32 1.0, %v3014_v56 }
 0x19c   :  { %2486 = vst [vmem:[%s4599_s7 + $0xf0] sm:$0xff] %v2290_v63   ;;  %v1712_v53 = vadd.f32 1.0, %v3016_v11  ;;  %v3018_v61 = vpop.eup %3017 }
 0x19d   :  { %2517 = vst [vmem:[%s4600_s8 + $0xf0] sm:$0xff] %v2450_v48   ;;  %3027 = vrcp.f32 %v854_v57  ;;  %v3020_v7 = vpop.eup %3019  ;;  %v886_v60 = vadd.f32 1.0, %v3018_v61 }
 0x19e   :  { %3029 = vrcp.f32 %v1712_v53  ;;  %v1744_v33 = vadd.f32 1.0, %v3020_v7  ;;  %v3022_v50 = vpop.eup %3021 }
 0x19f   :  { %3031 = vrcp.f32 %v1743_v34  ;;  %v3024_v5 = vpop.eup %3023  ;;  %v981_v17 = vmul.f32 %v3022_v50, %v4494_v44 }
 0x1a0   :  { %3033 = vrcp.f32 %v886_v60  ;;  %v3026_v19 = vpop.eup %3025  ;;  %v1839_v26 = vmul.f32 %v3024_v5, %v4501_v18 }
 0x1a1   :  { %3035 = vrcp.f32 %v1744_v33  ;;  %v1013_v29 = vmul.f32 %v3026_v19, %v4504_v43 }
 0x1a3   :  { %v3028_v25 = vpop.eup %3027 }
 0x1a4   :  { %v3030_v51 = vpop.eup %3029  ;;  %v982_v45 = vmul.f32 %v3028_v25, %v4528_v52 }
 0x1a5   :  { %v3032_v46 = vpop.eup %3031  ;;  %v1840_v14 = vmul.f32 %v3030_v51, %v4538_v16 }
 0x1a6   :  { %v3034_v13 = vpop.eup %3033  ;;  %v2215_v6 = vpack.c.bf16 %v982_v45, %v981_v17  ;;  %v1871_v40 = vmul.f32 %v3032_v46, %v4518_v23 }
 0x1a7   :  { %v3036_v39 = vpop.eup %3035  ;;  %v2375_v38 = vpack.c.bf16 %v1840_v14, %v1839_v26  ;;  %v1014_v36 = vmul.f32 %v3034_v13, %v4541_v24 }
 0x1a8   :  { %2471 = vst [vmem:[%s4599_s7 + $0x78] sm:$0xff] %v2215_v6   ;;  %v1872_v44 = vmul.f32 %v3036_v39, %v4549_v30 }
 0x1a9   :  { %2502 = vst [vmem:[%s4600_s8 + $0x78] sm:$0xff] %v2375_v38   ;;  %v2295_v18 = vpack.c.bf16 %v1014_v36, %v1013_v29 }
 0x1aa   :  { %v2455_v52 = vpack.c.bf16 %v1872_v44, %v1871_v40 }
 0x1ab   :  { %2487 = vst [vmem:[%s4599_s7 + $0xf8] sm:$0xff] %v2295_v18  }
 0x1ac   :  { %2518 = vst [vmem:[%s4600_s8 + $0xf8] sm:$0xff] %v2455_v52  }

// kernel: c3_forward.4
= control target key start
LH: loop header
LB: loop body
LE: loop exit
PB: predicated region body
PF: predicated region fallthrough
CT: control target
= control target key end

     0   :  { %s4440_s24 = smov 0   ;;  %s4442_s25 = smov 0   ;;  %s6504_s0 = inlined_call_operand.vmem [shape: bf16[2,16,16,128], index: 0, kind: input, shape index: {}]   ;;  %s6505_s1 = inlined_call_operand.vmem [shape: f32[128,128], index: 1, kind: input, shape index: {}]   ;;  %s6506_s2 = inlined_call_operand.vmem [shape: f32[1,128], index: 2, kind: input, shape index: {}]   ;;  %s6507_s3 = inlined_call_operand.vmem [shape: f32[1,128], index: 3, kind: input, shape index: {}]   ;;  %s6508_s4 = inlined_call_operand.vmem [shape: f32[1152,128], index: 4, kind: input, shape index: {}]   ;;  %s6509_s5 = inlined_call_operand.vmem [shape: f32[1,128], index: 5, kind: input, shape index: {}]   ;;  %s6510_s6 = inlined_call_operand.vmem [shape: f32[1,128], index: 6, kind: input, shape index: {}]   ;;  %s6511_s7 = inlined_call_operand.vmem [shape: bf16[2,16,16,128], index: 7, kind: output, shape index: {}]  }
   0x1   :  { %s4444_s26 = smov 0  }
   0x2 LB: > { %s29_s27 = sadd.s32 1, %s4393_s25  ;;  %p3868_p0 = scmp.ge.s32.totalorder %s4397_s26, 1  ;;  %s4397_s26 = sphi %s4444_s26, %s17_s26   ;;  %s4393_s25 = sphi %s4442_s25, %s6832_s25   ;;  %s4389_s24 = sphi %s4440_s24, %s6831_s24  }
   0x3   : > { %p31_p1 = scmp.ge.s32.totalorder %s29_s27, 2  ;;  %p251_p2 = scmp.lt.s32.totalorder %s4397_s26, 3 }
   0x5   : > { %s6834_s27 = smov (%p31_p1, %s29_s27), 0  ;;  %p252_p3 = pnand %p3868_p0, %p251_p2 }
   0x7   : > { %255 = sbr.rel (%p252_p3) target bundleno = 1118 (0x45e), region = 48 }
   0xc   : > { %v320_v0 = vld [vmem:[%s6505_s1 + $0x78] sm:$0xff]  ;;  %v319_v1 = vld [vmem:[%s6505_s1 + $0x70] sm:$0xff]  ;;  %v318_v2 = vld [vmem:[%s6505_s1 + $0x68] sm:$0xff]  ;;  %p288_p4 = scmp.lt.s32.totalorder %s4389_s24, 1 }
   0xd   : > { %480 = vmatpush.msra.mxu0 %v320_v0  ;;  %4055 = vmatpush.msra.mxu2 %v320_v0  ;;  %v317_v3 = vld [vmem:[%s6505_s1 + $0x60] sm:$0xff]  ;;  %v316_v4 = vld [vmem:[%s6505_s1 + $0x58] sm:$0xff]  ;;  %v315_v5 = vld [vmem:[%s6505_s1 + $0x50] sm:$0xff] }
   0xe   : > { %v314_v6 = vld [vmem:[%s6505_s1 + $0x48] sm:$0xff]  ;;  %v313_v7 = vld [vmem:[%s6505_s1 + $0x40] sm:$0xff]  ;;  %v312_v8 = vld [vmem:[%s6505_s1 + $0x38] sm:$0xff]  ;;  %s6836_s24 = smov (!%p288_p4, %s4389_s24), 1 }
   0xf   : > { %481 = vmatpush.msra.mxu0 %v319_v1  ;;  %4056 = vmatpush.msra.mxu2 %v319_v1  ;;  %v311_v9 = vld [vmem:[%s6505_s1 + $0x30] sm:$0xff]  ;;  %v310_v10 = vld [vmem:[%s6505_s1 + $0x28] sm:$0xff]  ;;  %s3879_s8 = sshll.u32 %s6836_s24, 7  ;;  %v309_v11 = vld [vmem:[%s6505_s1 + $0x20] sm:$0xff] }
  0x10   : > { %v308_v12 = vld [vmem:[%s6505_s1 + $0x18] sm:$0xff]  ;;  %s4509_s15 = scalar_lea.vmem %s6504_s0, %s3879_s8  ;;  %v307_v13 = vld [vmem:[%s6505_s1 + $0x10] sm:$0xff]  ;;  %v306_v16 = vld [vmem:[%s6505_s1 + $0x8] sm:$0xff]  ;;  %s6122_s18 = scalar_lea.vmem %s6511_s7, %s3879_s8 }
  0x11   : > { %482 = vmatpush.msra.mxu0 %v318_v2  ;;  %4057 = vmatpush.msra.mxu2 %v318_v2  ;;  %v4515_v14 = vld [vmem:[%s4509_s15] sm:$0xff]   ;;  %v4539_v22 = vld [vmem:[%s4509_s15 + $0x8] sm:$0xff]   ;;  %v4557_v28 = vld [vmem:[%s4509_s15 + $0x10] sm:$0xff]  }
  0x12   : > { %6585 = vst [vmem:[#allocation4_spill] sm:$0xff] %v4515_v14  ;;  %v4518_v15 = vld [vmem:[%s4509_s15 + $0x40] sm:$0xff]   ;;  %v6543_v18 = vunpack.c.l.bf16 %v4515_v14  ;;  %v6542_v20 = vunpack.c.h.bf16 %v4515_v14  ;;  %v4542_v23 = vld [vmem:[%s4509_s15 + $0x48] sm:$0xff]   ;;  %v6541_v24 = vunpack.c.l.bf16 %v4539_v22  ;;  %v6540_v26 = vunpack.c.h.bf16 %v4539_v22  ;;  %v4560_v29 = vld [vmem:[%s4509_s15 + $0x50] sm:$0xff]  }
  0x13   : > { %483 = vmatpush.msra.mxu0 %v317_v3  ;;  %4058 = vmatpush.msra.mxu2 %v317_v3  ;;  %6586 = vst [vmem:[#allocation5_spill] sm:$0xff] %v4518_v15  ;;  %v305_v17 = vld [vmem:[%s6505_s1] sm:$0xff]  ;;  %v6527_v19 = vunpack.c.l.bf16 %v4518_v15  ;;  %v6526_v21 = vunpack.c.h.bf16 %v4518_v15  ;;  %v6525_v25 = vunpack.c.l.bf16 %v4542_v23  ;;  %v6524_v27 = vunpack.c.h.bf16 %v4542_v23  ;;  %v4575_v34 = vld [vmem:[%s4509_s15 + $0x18] sm:$0xff]   ;;  %v4614_v47 = vld [vmem:[%s4509_s15 + $0x28] sm:$0xff]  }
  0x14   : > { %6587 = vst [vmem:[#allocation6_spill] sm:$0xff] %v4539_v22  ;;  %v6539_v30 = vunpack.c.l.bf16 %v4557_v28  ;;  %v6523_v31 = vunpack.c.l.bf16 %v4560_v29  ;;  %v6538_v32 = vunpack.c.h.bf16 %v4557_v28  ;;  %v6522_v33 = vunpack.c.h.bf16 %v4560_v29  ;;  %v4578_v35 = vld [vmem:[%s4509_s15 + $0x58] sm:$0xff]   ;;  %v4593_v40 = vld [vmem:[%s4509_s15 + $0x20] sm:$0xff]   ;;  %v4617_v48 = vld [vmem:[%s4509_s15 + $0x68] sm:$0xff]  }
  0x15   : > { %484 = vmatpush.msra.mxu0 %v316_v4  ;;  %4059 = vmatpush.msra.mxu2 %v316_v4  ;;  %6588 = vst [vmem:[#allocation7_spill] sm:$0xff] %v4542_v23  ;;  %v6537_v36 = vunpack.c.l.bf16 %v4575_v34  ;;  %v6521_v37 = vunpack.c.l.bf16 %v4578_v35  ;;  %v6536_v38 = vunpack.c.h.bf16 %v4575_v34  ;;  %v6520_v39 = vunpack.c.h.bf16 %v4578_v35  ;;  %v4596_v41 = vld [vmem:[%s4509_s15 + $0x60] sm:$0xff]   ;;  %v1399_v46 = vld [vmem:[%s6508_s4 + $0xf8] sm:$0xff]  ;;  %v1398_v49 = vld [vmem:[%s6508_s4 + $0xf0] sm:$0xff] }
  0x16   : > { %6589 = vst [vmem:[#allocation8_spill] sm:$0xff] %v4557_v28  ;;  %v6535_v42 = vunpack.c.l.bf16 %v4593_v40  ;;  %v6519_v43 = vunpack.c.l.bf16 %v4596_v41  ;;  %v6534_v44 = vunpack.c.h.bf16 %v4593_v40  ;;  %v6518_v45 = vunpack.c.h.bf16 %v4596_v41  ;;  %v1397_v52 = vld [vmem:[%s6508_s4 + $0xe8] sm:$0xff]  ;;  %v1396_v53 = vld [vmem:[%s6508_s4 + $0xe0] sm:$0xff]  ;;  %v1142_v54 = vld [vmem:[%s6508_s4 + $0x78] sm:$0xff] }
  0x17   : > { %485 = vmatpush.msra.mxu0 %v315_v5  ;;  %4060 = vmatpush.msra.mxu2 %v315_v5  ;;  %6590 = vst [vmem:[#allocation9_spill] sm:$0xff] %v4560_v29  ;;  %v6533_v50 = vunpack.c.l.bf16 %v4614_v47  ;;  %v6517_v51 = vunpack.c.l.bf16 %v4617_v48  ;;  %v1141_v55 = vld [vmem:[%s6508_s4 + $0x70] sm:$0xff]  ;;  %v1395_v56 = vld [vmem:[%s6508_s4 + $0xd8] sm:$0xff]  ;;  %v1140_v57 = vld [vmem:[%s6508_s4 + $0x68] sm:$0xff]  ;;  %v6532_v59 = vunpack.c.h.bf16 %v4614_v47  ;;  %v6516_v60 = vunpack.c.h.bf16 %v4617_v48 }
  0x18   : > { %6591 = vst [vmem:[#allocation10_spill] sm:$0xff] %v4575_v34  ;;  %1143 = vmatpush.msra.mxu1 %v1142_v54  ;;  %4071 = vmatpush.msra.mxu3 %v1142_v54  ;;  %v1394_v58 = vld [vmem:[%s6508_s4 + $0xd0] sm:$0xff]  ;;  %v1139_v61 = vld [vmem:[%s6508_s4 + $0x60] sm:$0xff]  ;;  %v1393_v62 = vld [vmem:[%s6508_s4 + $0xc8] sm:$0xff]  ;;  %v4399_v4 = vmov 0.0  }
  0x19   : > { %486 = vmatpush.msra.mxu0 %v314_v6  ;;  %4061 = vmatpush.msra.mxu2 %v314_v6  ;;  %6592 = vst [vmem:[#allocation11_spill] sm:$0xff] %v4578_v35  ;;  %v1392_v63 = vld [vmem:[%s6508_s4 + $0xc0] sm:$0xff]  ;;  %v1138_v0 = vld [vmem:[%s6508_s4 + $0x58] sm:$0xff]  ;;  %v1137_v1 = vld [vmem:[%s6508_s4 + $0x50] sm:$0xff] }
  0x1a   : > { %6593 = vst [vmem:[#allocation12_spill] sm:$0xff] %v4593_v40  ;;  %1144 = vmatpush.msra.mxu1 %v1141_v55  ;;  %4072 = vmatpush.msra.mxu3 %v1141_v55  ;;  %v4671_v2 = vld [vmem:[%s4509_s15 + $0x30] sm:$0xff]   ;;  %v1391_v5 = vld [vmem:[%s6508_s4 + $0xb8] sm:$0xff]  ;;  %v1132_v55 = vld [vmem:[%s6508_s4 + $0x28] sm:$0xff] }
  0x1b   : > { %487 = vmatpush.msra.mxu0 %v313_v7  ;;  %4062 = vmatpush.msra.mxu2 %v313_v7  ;;  %6594 = vst [vmem:[#allocation13_spill] sm:$0xff] %v4596_v41  ;;  %v4674_v3 = vld [vmem:[%s4509_s15 + $0x70] sm:$0xff]   ;;  %v6531_v7 = vunpack.c.l.bf16 %v4671_v2 }
  0x1c   : > { %6595 = vst [vmem:[#allocation14_spill] sm:$0xff] %v4614_v47  ;;  %1145 = vmatpush.msra.mxu1 %v1140_v57  ;;  %4073 = vmatpush.msra.mxu3 %v1140_v57  ;;  %v1390_v6 = vld [vmem:[%s6508_s4 + $0xb0] sm:$0xff]  ;;  %v6514_v54 = vunpack.c.h.bf16 %v4674_v3  ;;  %v1385_v57 = vld [vmem:[%s6508_s4 + $0x88] sm:$0xff] }
  0x1d   : > { %488 = vmatpush.msra.mxu0 %v312_v8  ;;  %4063 = vmatpush.msra.mxu2 %v312_v8  ;;  %6596 = vst [vmem:[#allocation15_spill] sm:$0xff] %v4617_v48  ;;  %v6515_v8 = vunpack.c.l.bf16 %v4674_v3 }
  0x1e   : > { %1146 = vmatpush.msra.mxu1 %v1139_v61  ;;  %4074 = vmatpush.msra.mxu3 %v1139_v61  ;;  %6597 = vst [vmem:[#allocation16_spill] sm:$0xff] %v4671_v2  ;;  %v1910_v61 = vld [vmem:[%s6508_s4 + $0x1e0] sm:$0xff] }
  0x1f   : > { %489 = vmatpush.msra.mxu0 %v311_v9  ;;  %4064 = vmatpush.msra.mxu2 %v311_v9  ;;  %6598 = vst [vmem:[#allocation17_spill] sm:$0xff] %v4674_v3  ;;  %v1136_v9 = vld [vmem:[%s6508_s4 + $0x48] sm:$0xff]  ;;  %v2939_v3 = vld [vmem:[%s6508_s4 + $0x3e0] sm:$0xff] }
  0x20   : > { %1147 = vmatpush.msra.mxu1 %v1138_v0  ;;  %323 = vst [vmem:[#allocation2] sm:$0xff] %v4399_v4  ;;  %4075 = vmatpush.msra.mxu3 %v1138_v0  ;;  %v4763_v0 = vld [vmem:[%s4509_s15 + $0x78] sm:$0xff]  }
  0x21   : > { %490 = vmatpush.msra.mxu0 %v310_v10  ;;  %4065 = vmatpush.msra.mxu2 %v310_v10  ;;  %324 = vst [vmem:[#allocation2 + $0x8] sm:$0xff] %v4399_v4  ;;  %v1389_v10 = vld [vmem:[%s6508_s4 + $0xa8] sm:$0xff] }
  0x22   : > { %1148 = vmatpush.msra.mxu1 %v1137_v1  ;;  %325 = vst [vmem:[#allocation2 + $0x10] sm:$0xff] %v4399_v4  ;;  %4076 = vmatpush.msra.mxu3 %v1137_v1  ;;  %v1130_v1 = vld [vmem:[%s6508_s4 + $0x18] sm:$0xff] }
  0x23   : > { %491 = vmatpush.msra.mxu0 %v309_v11  ;;  %4066 = vmatpush.msra.mxu2 %v309_v11  ;;  %326 = vst [vmem:[#allocation2 + $0x18] sm:$0xff] %v4399_v4  ;;  %v1135_v11 = vld [vmem:[%s6508_s4 + $0x40] sm:$0xff] }
  0x24   : > { %327 = vst [vmem:[#allocation2 + $0x20] sm:$0xff] %v4399_v4  ;;  %1149 = vmatpush.msra.mxu1 %v1136_v9  ;;  %4077 = vmatpush.msra.mxu3 %v1136_v9  ;;  %v1908_v9 = vld [vmem:[%s6508_s4 + $0x1d0] sm:$0xff] }
  0x25   : > { %492 = vmatpush.msra.mxu0 %v308_v12  ;;  %4067 = vmatpush.msra.mxu2 %v308_v12  ;;  %330 = vst [vmem:[#allocation2 + $0x38] sm:$0xff] %v4399_v4  ;;  %v1388_v12 = vld [vmem:[%s6508_s4 + $0xa0] sm:$0xff] }
  0x26   : > { %335 = vst [vmem:[#allocation2 + $0x60] sm:$0xff] %v4399_v4  ;;  %1150 = vmatpush.msra.mxu1 %v1135_v11  ;;  %4078 = vmatpush.msra.mxu3 %v1135_v11  ;;  %v6513_v11 = vunpack.c.l.bf16 %v4763_v0 }
  0x27   : > { %493 = vmatpush.msra.mxu0 %v307_v13  ;;  %4068 = vmatpush.msra.mxu2 %v307_v13  ;;  %340 = vst [vmem:[#allocation2 + $0x88] sm:$0xff] %v4399_v4  ;;  %v1134_v13 = vld [vmem:[%s6508_s4 + $0x38] sm:$0xff] }
  0x28   : > { %345 = vst [vmem:[#allocation2 + $0xb0] sm:$0xff] %v4399_v4  ;;  %1151 = vmatpush.msra.mxu1 %v1134_v13  ;;  %4079 = vmatpush.msra.mxu3 %v1134_v13  ;;  %v1907_v13 = vld [vmem:[%s6508_s4 + $0x1c8] sm:$0xff] }
  0x29   : > { %494 = vmatpush.msra.mxu0 %v306_v16  ;;  %4069 = vmatpush.msra.mxu2 %v306_v16  ;;  %v1913_v16 = vld [vmem:[%s6508_s4 + $0x1f8] sm:$0xff]  ;;  %350 = vst [vmem:[#allocation2 + $0xd8] sm:$0xff] %v4399_v4  ;;  %v1577_v29 = vld [vmem:[#allocation2 + $0x1] sm:$0xff]  ;;  %v1578_v47 = vld [vmem:[#allocation2 + $0x9] sm:$0xff] }
  0x2a   : > { %355 = vst [vmem:[#allocation2 + $0x100] sm:$0xff] %v4399_v4 }
  0x2b   : > { %495 = vmatpush.msra.mxu0 %v305_v17  ;;  %4070 = vmatpush.msra.mxu2 %v305_v17  ;;  %v1387_v17 = vld [vmem:[%s6508_s4 + $0x98] sm:$0xff]  ;;  %360 = vst [vmem:[#allocation2 + $0x128] sm:$0xff] %v4399_v4 }
  0x2c   : > { %496 = vmatmul.f32.vlgmr.msra.gmra.mxu0 %v6543_v18  ;;  %544 = vmatmul.f32.vlgmr.msra.gmra.mxu2 %v6527_v19  ;;  %365 = vst [vmem:[#allocation2 + $0x150] sm:$0xff] %v4399_v4 }
  0x2d   : > { %1400 = vmatpush.msrb.mxu2 %v1399_v46  ;;  %1914 = vmatpush.msrb.mxu0 %v1913_v16  ;;  %v1133_v46 = vld [vmem:[%s6508_s4 + $0x30] sm:$0xff]  ;;  %370 = vst [vmem:[#allocation2 + $0x178] sm:$0xff] %v4399_v4  ;;  %v1127_v16 = vld [vmem:[%s6508_s4] sm:$0xff] }
  0x2e   : > { %1152 = vmatpush.msra.mxu1 %v1133_v46  ;;  %4080 = vmatpush.msra.mxu3 %v1133_v46  ;;  %375 = vst [vmem:[#allocation2 + $0x1a0] sm:$0xff] %v4399_v4  ;;  %v1063_v46 = vld [vmem:[#allocation2 + $0x17] sm:$0xff] }
  0x2f   : > { %1401 = vmatpush.msrb.mxu2 %v1398_v49  ;;  %v1912_v49 = vld [vmem:[%s6508_s4 + $0x1f0] sm:$0xff]  ;;  %380 = vst [vmem:[#allocation2 + $0x1c8] sm:$0xff] %v4399_v4 }
  0x30   : > { %1915 = vmatpush.msrb.mxu0 %v1912_v49  ;;  %1153 = vmatpush.msra.mxu1 %v1132_v55  ;;  %385 = vst [vmem:[#allocation2 + $0x1f0] sm:$0xff] %v4399_v4  ;;  %v1905_v49 = vld [vmem:[%s6508_s4 + $0x1b8] sm:$0xff] }
  0x31   : > { %1402 = vmatpush.msrb.mxu2 %v1397_v52  ;;  %v1386_v52 = vld [vmem:[%s6508_s4 + $0x90] sm:$0xff]  ;;  %6600 = vst [vmem:[#allocation19_spill] sm:$0xff] %v4763_v0  ;;  %4081 = vmatpush.msra.mxu3 %v1132_v55 }
  0x32   : > { %390 = vst [vmem:[#allocation2 + $0x218] sm:$0xff] %v4399_v4 }
  0x33   : > { %1403 = vmatpush.msrb.mxu2 %v1396_v53  ;;  %v6530_v53 = vunpack.c.h.bf16 %v4671_v2  ;;  %395 = vst [vmem:[#allocation2 + $0x240] sm:$0xff] %v4399_v4 }
  0x34   : > { %499 = vmatmul.f32.gmra.mxu0 %v6542_v20  ;;  %547 = vmatmul.f32.gmra.mxu2 %v6526_v21  ;;  %400 = vst [vmem:[#allocation2 + $0x268] sm:$0xff] %v4399_v4 }
  0x35   : > { %1404 = vmatpush.msrb.mxu2 %v1395_v56  ;;  %v1911_v56 = vld [vmem:[%s6508_s4 + $0x1e8] sm:$0xff]  ;;  %405 = vst [vmem:[#allocation2 + $0x290] sm:$0xff] %v4399_v4 }
  0x36   : > { %1916 = vmatpush.msrb.mxu0 %v1911_v56  ;;  %408 = vst [vmem:[#allocation2 + $0x2a8] sm:$0xff] %v4399_v4  ;;  %v6512_v56 = vunpack.c.h.bf16 %v4763_v0  ;;  %v2940_v0 = vld [vmem:[%s6508_s4 + $0x3e8] sm:$0xff] }
  0x37   : > { %1405 = vmatpush.msrb.mxu2 %v1394_v58  ;;  %v1131_v58 = vld [vmem:[%s6508_s4 + $0x20] sm:$0xff]  ;;  %409 = vst [vmem:[#allocation2 + $0x2b0] sm:$0xff] %v4399_v4 }
  0x38   : > { %1154 = vmatpush.msra.mxu1 %v1131_v58  ;;  %1917 = vmatpush.msrb.mxu0 %v1910_v61  ;;  %410 = vst [vmem:[#allocation2 + $0x2b8] sm:$0xff] %v4399_v4  ;;  %v1064_v61 = vld [vmem:[#allocation2 + $0x1f] sm:$0xff] }
  0x39   : > { %1406 = vmatpush.msrb.mxu2 %v1393_v62  ;;  %v1384_v62 = vld [vmem:[%s6508_s4 + $0x80] sm:$0xff]  ;;  %4082 = vmatpush.msra.mxu3 %v1131_v58  ;;  %411 = vst [vmem:[#allocation2 + $0x2c0] sm:$0xff] %v4399_v4 }
  0x3a   : > { %1155 = vmatpush.msra.mxu1 %v1130_v1  ;;  %412 = vst [vmem:[#allocation2 + $0x2c8] sm:$0xff] %v4399_v4  ;;  %v1902_v58 = vld [vmem:[%s6508_s4 + $0x1a0] sm:$0xff] }
  0x3b   : > { %1407 = vmatpush.msrb.mxu2 %v1392_v63  ;;  %v4756_v63 = vld [vmem:[%s4509_s15 + $0x38] sm:$0xff]   ;;  %4083 = vmatpush.msra.mxu3 %v1130_v1  ;;  %v4828_v1 = vld [vmem:[%s6506_s2] ss:$0 sm:$0xff] }
  0x3c   : > { %502 = vmatmul.f32.gmra.mxu0 %v6541_v24  ;;  %550 = vmatmul.f32.gmra.mxu2 %v6525_v25  ;;  %6599 = vst [vmem:[#allocation18_spill] sm:$0xff] %v4756_v63  ;;  %v6528_v55 = vunpack.c.h.bf16 %v4756_v63 }
  0x3d   : > { %1408 = vmatpush.msrb.mxu2 %v1391_v5  ;;  %v1909_v5 = vld [vmem:[%s6508_s4 + $0x1d8] sm:$0xff] }
  0x3e   : > { %1918 = vmatpush.msrb.mxu0 %v1909_v5  ;;  %v1900_v5 = vld [vmem:[%s6508_s4 + $0x190] sm:$0xff] }
  0x3f   : > { %1409 = vmatpush.msrb.mxu2 %v1390_v6  ;;  %v1129_v6 = vld [vmem:[%s6508_s4 + $0x10] sm:$0xff] }
  0x40   : > { %1156 = vmatpush.msra.mxu1 %v1129_v6  ;;  %1919 = vmatpush.msrb.mxu0 %v1908_v9 }
  0x41   : > { %1410 = vmatpush.msrb.mxu2 %v1389_v10  ;;  %v6529_v10 = vunpack.c.l.bf16 %v4756_v63  ;;  %4084 = vmatpush.msra.mxu3 %v1129_v6  ;;  %v4836_v6 = vld [vmem:[%s6507_s3] ss:$0 sm:$0xff] }
  0x42   : > { %1920 = vmatpush.msrb.mxu0 %v1907_v13 }
  0x43   : > { %1411 = vmatpush.msrb.mxu2 %v1388_v12  ;;  %v1128_v12 = vld [vmem:[%s6508_s4 + $0x8] sm:$0xff] }
  0x44   : > { %505 = vmatmul.f32.gmra.mxu0 %v6540_v26  ;;  %553 = vmatmul.f32.gmra.mxu2 %v6524_v27 }
  0x45   : > { %1412 = vmatpush.msrb.mxu2 %v1387_v17  ;;  %1157 = vmatpush.msra.mxu1 %v1128_v12  ;;  %v1906_v17 = vld [vmem:[%s6508_s4 + $0x1c0] sm:$0xff] }
  0x46   : > { %1921 = vmatpush.msrb.mxu0 %v1906_v17  ;;  %4085 = vmatpush.msra.mxu3 %v1128_v12  ;;  %v1899_v12 = vld [vmem:[%s6508_s4 + $0x188] sm:$0xff] }
  0x47   : > { %1413 = vmatpush.msrb.mxu2 %v1386_v52  ;;  %1158 = vmatpush.msra.mxu1 %v1127_v16  ;;  %v1904_v52 = vld [vmem:[%s6508_s4 + $0x1b0] sm:$0xff] }
  0x48   : > { %1159 = vmatmul.f32.vlgmr.msra.gmra.mxu1 %v1063_v46  ;;  %1922 = vmatpush.msrb.mxu0 %v1905_v49 }
  0x49   : > { %1414 = vmatpush.msrb.mxu2 %v1385_v57  ;;  %v1903_v57 = vld [vmem:[%s6508_s4 + $0x1a8] sm:$0xff]  ;;  %4086 = vmatpush.msra.mxu3 %v1127_v16  ;;  %v1898_v16 = vld [vmem:[%s6508_s4 + $0x180] sm:$0xff] }
  0x4a   : > { %1923 = vmatpush.msrb.mxu0 %v1904_v52 }
  0x4b   : > { %1415 = vmatpush.msrb.mxu2 %v1384_v62  ;;  %v1901_v62 = vld [vmem:[%s6508_s4 + $0x198] sm:$0xff] }
  0x4c   : > { %508 = vmatmul.f32.gmra.mxu0 %v6539_v30  ;;  %556 = vmatmul.f32.gmra.mxu2 %v6523_v31 }
  0x4d   : > { %1924 = vmatpush.msrb.mxu0 %v1903_v57 }
  0x4f   : > { %1925 = vmatpush.msrb.mxu0 %v1902_v58 }
  0x50   : > { %1162 = vmatmul.f32.gmra.mxu1 %v1064_v61 }
  0x51   : > { %1926 = vmatpush.msrb.mxu0 %v1901_v62 }
  0x53   : > { %1927 = vmatpush.msrb.mxu0 %v1900_v5 }
  0x54   : > { %511 = vmatmul.f32.gmra.mxu0 %v6538_v32  ;;  %559 = vmatmul.f32.gmra.mxu2 %v6522_v33 }
  0x55   : > { %1928 = vmatpush.msrb.mxu0 %v1899_v12 }
  0x57   : > { %1929 = vmatpush.msrb.mxu0 %v1898_v16 }
  0x5c   : > { %514 = vmatmul.f32.gmra.mxu0 %v6537_v36  ;;  %562 = vmatmul.f32.gmra.mxu2 %v6521_v37 }
  0x64   : > { %517 = vmatmul.f32.gmra.mxu0 %v6536_v38  ;;  %565 = vmatmul.f32.gmra.mxu2 %v6520_v39 }
  0x6c   : > { %520 = vmatmul.f32.gmra.mxu0 %v6535_v42  ;;  %568 = vmatmul.f32.gmra.mxu2 %v6519_v43 }
  0x74   : > { %523 = vmatmul.f32.gmra.mxu0 %v6534_v44  ;;  %571 = vmatmul.f32.gmra.mxu2 %v6518_v45 }
  0x7c   : > { %526 = vmatmul.f32.gmra.mxu0 %v6533_v50  ;;  %574 = vmatmul.f32.gmra.mxu2 %v6517_v51 }
  0x84   : > { %529 = vmatmul.f32.gmra.mxu0 %v6532_v59  ;;  %577 = vmatmul.f32.gmra.mxu2 %v6516_v60 }
  0x8c   : > { %532 = vmatmul.f32.gmra.mxu0 %v6531_v7  ;;  %580 = vmatmul.f32.gmra.mxu2 %v6515_v8 }
  0x94   : > { %535 = vmatmul.f32.gmra.mxu0 %v6530_v53  ;;  %583 = vmatmul.f32.gmra.mxu2 %v6514_v54 }
  0x9c   : > { %538 = vmatmul.f32.gmra.mxu0 %v6529_v10  ;;  %586 = vmatmul.f32.gmra.mxu2 %v6513_v11 }
  0xa4   : > { %541 = vmatmul.f32.gmra.mxu0 %v6528_v55  ;;  %589 = vmatmul.f32.gmra.mxu2 %v6512_v56 }
  0xa9   : > { %v497_v9 = vpop.f32.mrf.mxu0 }
  0xaa   : > { %v596_v13 = vmul.f32 %v4828_v1, %v497_v9 }
  0xac   : > { %v631_v17 = vadd.f32 %v4836_v6, %v596_v13  ;;  %1416 = vmatmul.f32.vlgmr.msrb.gmra.mxu2 %v4399_v4 }
  0xae   : > { %v663_v46 = vsub.f32 0.0, %v631_v17 }
  0xaf   : > { %v545_v49 = vpop.f32.mrf.mxu2 }
  0xb0   : > { %v695_v52 = vmul.f32 1.442695, %v663_v46  ;;  %v612_v62 = vmul.f32 %v4828_v1, %v545_v49 }
  0xb1   : > { %v500_v57 = vpop.f32.mrf.mxu0 }
  0xb2   : > { %4116 = vpow2.f32 %v695_v52  ;;  %v597_v58 = vmul.f32 %v4828_v1, %v500_v57  ;;  %v647_v9 = vadd.f32 %v4836_v6, %v612_v62 }
  0xb4   : > { %v632_v61 = vadd.f32 %v4836_v6, %v597_v58  ;;  %1419 = vmatmul.f32.gmra.mxu2 %v4399_v4  ;;  %v679_v54 = vsub.f32 0.0, %v647_v9 }
  0xb6   : > { %v664_v5 = vsub.f32 0.0, %v632_v61  ;;  %v727_v52 = vmul.f32 1.442695, %v679_v54 }
  0xb7   : > { %v548_v12 = vpop.f32.mrf.mxu2 }
  0xb8   : > { %v4117_v13 = vpop.eup %4116  ;;  %v697_v56 = vmul.f32 1.442695, %v664_v5  ;;  %v613_v4 = vmul.f32 %v4828_v1, %v548_v12 }
  0xb9   : > { %v759_v16 = vadd.f32 1.0, %v4117_v13  ;;  %v503_v11 = vpop.f32.mrf.mxu0 }
  0xba   : > { %4118 = vpow2.f32 %v697_v56  ;;  %v598_v46 = vmul.f32 %v4828_v1, %v503_v11  ;;  %v4859_v58 = vadd.f32 %v4836_v6, %v613_v4 }
  0xbb   : > { %4120 = vrcp.f32 %v759_v16 }
  0xbc   : > { %v4854_v57 = vadd.f32 %v4836_v6, %v598_v46  ;;  %4122 = vpow2.f32 %v727_v52  ;;  %v680_v11 = vsub.f32 0.0, %v4859_v58 }
  0xbe   : > { %v665_v49 = vsub.f32 0.0, %v4854_v57  ;;  %v729_v12 = vmul.f32 1.442695, %v680_v11 }
  0xbf   : > { %v551_v62 = vpop.f32.mrf.mxu2 }
  0xc0   : > { %v4119_v5 = vpop.eup %4118  ;;  %v699_v13 = vmul.f32 1.442695, %v665_v49  ;;  %v614_v49 = vmul.f32 %v4828_v1, %v551_v62 }
  0xc1   : > { %v4121_v8 = vpop.eup %4120  ;;  %v760_v56 = vadd.f32 1.0, %v4119_v5  ;;  %v506_v60 = vpop.f32.mrf.mxu0 }
  0xc2   : > { %v823_v54 = vmul.f32 %v4121_v8, %v631_v17  ;;  %4124 = vpow2.f32 %v699_v13  ;;  %v599_v16 = vmul.f32 %v4828_v1, %v506_v60  ;;  %v4123_v46 = vpop.eup %4122  ;;  %v4869_v8 = vadd.f32 %v4836_v6, %v614_v49 }
  0xc3   : > { %4126 = vrcp.f32 %v760_v56  ;;  %v775_v52 = vadd.f32 1.0, %v4123_v46 }
  0xc4   : > { %856 = vst [vmem:[#allocation2 + $0x28] sm:$0xff] %v823_v54  ;;  %v4864_v4 = vadd.f32 %v4836_v6, %v599_v16  ;;  %1422 = vmatmul.f32.gmra.mxu2 %v823_v54  ;;  %4128 = vpow2.f32 %v729_v12  ;;  %v681_v16 = vsub.f32 0.0, %v4869_v8 }
  0xc5   : > { %888 = vst [vmem:[#allocation2 + $0x40] sm:$0xff] %v823_v54  ;;  %4130 = vrcp.f32 %v775_v52 }
  0xc6   : > { %v666_v5 = vsub.f32 0.0, %v4864_v4  ;;  %v731_v62 = vmul.f32 1.442695, %v681_v16 }
  0xc7   : > { %v554_v60 = vpop.f32.mrf.mxu2 }
  0xc8   : > { %v4125_v17 = vpop.eup %4124  ;;  %v701_v13 = vmul.f32 1.442695, %v666_v5 }
  0xc9   : > { %v4127_v56 = vpop.eup %4126  ;;  %v761_v11 = vadd.f32 1.0, %v4125_v17  ;;  %v509_v46 = vpop.f32.mrf.mxu0 }
  0xca   : > { %v824_v51 = vmul.f32 %v4127_v56, %v632_v61  ;;  %4132 = vpow2.f32 %v701_v13  ;;  %v600_v54 = vmul.f32 %v4828_v1, %v509_v46  ;;  %v4129_v12 = vpop.eup %4128  ;;  %v615_v61 = vmul.f32 %v4828_v1, %v554_v60 }
  0xcb   : > { %4134 = vrcp.f32 %v761_v11  ;;  %v4131_v52 = vpop.eup %4130  ;;  %v776_v45 = vadd.f32 1.0, %v4129_v12 }
  0xcc   : > { %857 = vst [vmem:[#allocation2 + $0x30] sm:$0xff] %v824_v51  ;;  %v4874_v49 = vadd.f32 %v4836_v6, %v600_v54  ;;  %v1065_v43 = vld [vmem:[#allocation2 + $0x3f] sm:$0xff]  ;;  %1425 = vmatmul.f32.gmra.mxu2 %v824_v51  ;;  %v4876_v5 = vmul.f32 %v4131_v52, %v647_v9  ;;  %4136 = vpow2.f32 %v731_v62  ;;  %v4882_v13 = vadd.f32 %v4836_v6, %v615_v61 }
  0xcd   : > { %889 = vst [vmem:[#allocation2 + $0x48] sm:$0xff] %v824_v51  ;;  %1165 = vmatmul.f32.gmra.mxu1 %v1065_v43  ;;  %1930 = vmatmul.f32.vlgmr.msrb.gmra.mxu0 %v1065_v43  ;;  %4138 = vrcp.f32 %v776_v45 }
  0xce   : > { %v667_v17 = vsub.f32 0.0, %v4874_v49  ;;  %872 = vst [vmem:[#allocation2 + $0x168] sm:$0xff] %v4876_v5  ;;  %v682_v43 = vsub.f32 0.0, %v4882_v13 }
  0xcf   : > { %v557_v56 = vpop.f32.mrf.mxu2  ;;  %904 = vst [vmem:[#allocation2 + $0x180] sm:$0xff] %v4876_v5 }
  0xd0   : > { %v4133_v11 = vpop.eup %4132  ;;  %v703_v51 = vmul.f32 1.442695, %v667_v17  ;;  %v733_v12 = vmul.f32 1.442695, %v682_v43 }
  0xd1   : > { %v4135_v9 = vpop.eup %4134  ;;  %v762_v46 = vadd.f32 1.0, %v4133_v11  ;;  %v512_v16 = vpop.f32.mrf.mxu0 }
  0xd2   : > { %v825_v60 = vmul.f32 %v4135_v9, %v4854_v57  ;;  %4140 = vpow2.f32 %v703_v51  ;;  %v601_v45 = vmul.f32 %v4828_v1, %v512_v16  ;;  %v4137_v54 = vpop.eup %4136  ;;  %v616_v57 = vmul.f32 %v4828_v1, %v557_v56 }
  0xd3   : > { %4142 = vrcp.f32 %v762_v46  ;;  %v4139_v62 = vpop.eup %4138  ;;  %v777_v52 = vadd.f32 1.0, %v4137_v54  ;;  %v2349_v23 = vld [vmem:[#allocation2 + $0x31] sm:$0xff] }
  0xd4   : > { %858 = vst [vmem:[#allocation2 + $0x50] sm:$0xff] %v825_v60  ;;  %v4889_v61 = vadd.f32 %v4836_v6, %v601_v45  ;;  %v1066_v17 = vld [vmem:[#allocation2 + $0x47] sm:$0xff]  ;;  %1428 = vmatmul.f32.gmra.mxu2 %v825_v60  ;;  %v4892_v11 = vmul.f32 %v4139_v62, %v4859_v58  ;;  %4144 = vpow2.f32 %v733_v12  ;;  %v4898_v9 = vadd.f32 %v4836_v6, %v616_v57 }
  0xd5   : > { %890 = vst [vmem:[#allocation2 + $0x68] sm:$0xff] %v825_v60  ;;  %1168 = vmatmul.f32.gmra.mxu1 %v1066_v17  ;;  %1933 = vmatmul.f32.gmra.mxu0 %v1066_v17  ;;  %4146 = vrcp.f32 %v777_v52  ;;  %v5473_v15 = vld [vmem:[#allocation2 + $0x168] sm:$0xff] }
  0xd6   : > { %v668_v51 = vsub.f32 0.0, %v4889_v61  ;;  %873 = vst [vmem:[#allocation2 + $0x170] sm:$0xff] %v4892_v11  ;;  %v683_v54 = vsub.f32 0.0, %v4898_v9 }
  0xd7   : > { %v560_v46 = vpop.f32.mrf.mxu2  ;;  %905 = vst [vmem:[#allocation2 + $0x188] sm:$0xff] %v4892_v11 }
  0xd8   : > { %v4141_v16 = vpop.eup %4140  ;;  %v705_v43 = vmul.f32 1.442695, %v668_v51  ;;  %v735_v52 = vmul.f32 1.442695, %v683_v54 }
  0xd9   : > { %v4143_v58 = vpop.eup %4142  ;;  %v763_v60 = vadd.f32 1.0, %v4141_v16  ;;  %v515_v45 = vpop.f32.mrf.mxu0 }
  0xda   : > { %v4903_v56 = vmul.f32 %v4143_v58, %v4864_v4  ;;  %4148 = vpow2.f32 %v705_v43  ;;  %v602_v12 = vmul.f32 %v4828_v1, %v515_v45  ;;  %v4145_v62 = vpop.eup %4144  ;;  %v617_v43 = vmul.f32 %v4828_v1, %v560_v46 }
  0xdb   : > { %4150 = vrcp.f32 %v763_v60  ;;  %v4147_v17 = vpop.eup %4146  ;;  %v778_v57 = vadd.f32 1.0, %v4145_v62 }
  0xdc   : > { %859 = vst [vmem:[#allocation2 + $0x58] sm:$0xff] %v4903_v56  ;;  %v4908_v51 = vadd.f32 %v4836_v6, %v602_v12  ;;  %v1067_v16 = vld [vmem:[#allocation2 + $0x67] sm:$0xff]  ;;  %1431 = vmatmul.f32.gmra.mxu2 %v4903_v56  ;;  %v4913_v4 = vmul.f32 %v4147_v17, %v4869_v8  ;;  %4152 = vpow2.f32 %v735_v52  ;;  %v4919_v60 = vadd.f32 %v4836_v6, %v617_v43 }
  0xdd   : > { %891 = vst [vmem:[#allocation2 + $0x70] sm:$0xff] %v4903_v56  ;;  %1171 = vmatmul.f32.gmra.mxu1 %v1067_v16  ;;  %1936 = vmatmul.f32.gmra.mxu0 %v1067_v16  ;;  %4154 = vrcp.f32 %v778_v57 }
  0xde   : > { %v669_v58 = vsub.f32 0.0, %v4908_v51  ;;  %874 = vst [vmem:[#allocation2 + $0x190] sm:$0xff] %v4913_v4  ;;  %v684_v52 = vsub.f32 0.0, %v4919_v60 }
  0xdf   : > { %v563_v45 = vpop.f32.mrf.mxu2  ;;  %906 = vst [vmem:[#allocation2 + $0x1a8] sm:$0xff] %v4913_v4 }
  0xe0   : > { %v4149_v54 = vpop.eup %4148  ;;  %v707_v12 = vmul.f32 1.442695, %v669_v58  ;;  %v737_v43 = vmul.f32 1.442695, %v684_v52 }
  0xe1   : > { %v4151_v8 = vpop.eup %4150  ;;  %v764_v62 = vadd.f32 1.0, %v4149_v54  ;;  %v518_v17 = vpop.f32.mrf.mxu0 }
  0xe2   : > { %v4924_v46 = vmul.f32 %v4151_v8, %v4874_v49  ;;  %4156 = vpow2.f32 %v707_v12  ;;  %v603_v57 = vmul.f32 %v4828_v1, %v518_v17  ;;  %v4153_v16 = vpop.eup %4152  ;;  %v618_v12 = vmul.f32 %v4828_v1, %v563_v45 }
  0xe3   : > { %4158 = vrcp.f32 %v764_v62  ;;  %v4155_v39 = vpop.eup %4154  ;;  %v779_v37 = vadd.f32 1.0, %v4153_v16  ;;  %v5500_v28 = vld [vmem:[#allocation2 + $0x59] sm:$0xff] }
  0xe4   : > { %860 = vst [vmem:[#allocation2 + $0x78] sm:$0xff] %v4924_v46  ;;  %v4929_v58 = vadd.f32 %v4836_v6, %v603_v57  ;;  %v1068_v54 = vld [vmem:[#allocation2 + $0x6f] sm:$0xff]  ;;  %1434 = vmatmul.f32.gmra.mxu2 %v4924_v46  ;;  %v4934_v49 = vmul.f32 %v4155_v39, %v4882_v13  ;;  %4160 = vpow2.f32 %v737_v43  ;;  %v4940_v62 = vadd.f32 %v4836_v6, %v618_v12 }
  0xe5   : > { %892 = vst [vmem:[#allocation2 + $0x90] sm:$0xff] %v4924_v46  ;;  %1174 = vmatmul.f32.gmra.mxu1 %v1068_v54  ;;  %1939 = vmatmul.f32.gmra.mxu0 %v1068_v54  ;;  %4162 = vrcp.f32 %v779_v37 }
  0xe6   : > { %v670_v8 = vsub.f32 0.0, %v4929_v58  ;;  %875 = vst [vmem:[#allocation2 + $0x198] sm:$0xff] %v4934_v49  ;;  %v685_v43 = vsub.f32 0.0, %v4940_v62 }
  0xe7   : > { %v566_v17 = vpop.f32.mrf.mxu2  ;;  %907 = vst [vmem:[#allocation2 + $0x1b0] sm:$0xff] %v4934_v49 }
  0xe8   : > { %v4157_v52 = vpop.eup %4156  ;;  %v709_v57 = vmul.f32 1.442695, %v670_v8  ;;  %v739_v12 = vmul.f32 1.442695, %v685_v43 }
  0xe9   : > { %v4159_v39 = vpop.eup %4158  ;;  %v765_v13 = vadd.f32 1.0, %v4157_v52  ;;  %v521_v16 = vpop.f32.mrf.mxu0 }
  0xea   : > { %v4945_v45 = vmul.f32 %v4159_v39, %v4889_v61  ;;  %4164 = vpow2.f32 %v709_v57  ;;  %v604_v37 = vmul.f32 %v4828_v1, %v521_v16  ;;  %v4161_v54 = vpop.eup %4160  ;;  %v619_v57 = vmul.f32 %v4828_v1, %v566_v17 }
  0xeb   : > { %4166 = vrcp.f32 %v765_v13  ;;  %v4163_v33 = vpop.eup %4162  ;;  %v780_v31 = vadd.f32 1.0, %v4161_v54 }
  0xec   : > { %861 = vst [vmem:[#allocation2 + $0x80] sm:$0xff] %v4945_v45  ;;  %v4950_v8 = vadd.f32 %v4836_v6, %v604_v37  ;;  %v1069_v52 = vld [vmem:[#allocation2 + $0x8f] sm:$0xff]  ;;  %1437 = vmatmul.f32.gmra.mxu2 %v4945_v45  ;;  %v4955_v61 = vmul.f32 %v4163_v33, %v4898_v9  ;;  %4168 = vpow2.f32 %v739_v12  ;;  %v4961_v13 = vadd.f32 %v4836_v6, %v619_v57 }
  0xed   : > { %893 = vst [vmem:[#allocation2 + $0x98] sm:$0xff] %v4945_v45  ;;  %1177 = vmatmul.f32.gmra.mxu1 %v1069_v52  ;;  %1942 = vmatmul.f32.gmra.mxu0 %v1069_v52  ;;  %4170 = vrcp.f32 %v780_v31 }
  0xee   : > { %v671_v39 = vsub.f32 0.0, %v4950_v8  ;;  %876 = vst [vmem:[#allocation2 + $0x1b8] sm:$0xff] %v4955_v61  ;;  %v686_v12 = vsub.f32 0.0, %v4961_v13 }
  0xef   : > { %v569_v16 = vpop.f32.mrf.mxu2  ;;  %908 = vst [vmem:[#allocation2 + $0x1d0] sm:$0xff] %v4955_v61 }
  0xf0   : > { %v4165_v43 = vpop.eup %4164  ;;  %v711_v37 = vmul.f32 1.442695, %v671_v39  ;;  %v741_v57 = vmul.f32 1.442695, %v686_v12 }
  0xf1   : > { %v4167_v33 = vpop.eup %4166  ;;  %v766_v9 = vadd.f32 1.0, %v4165_v43  ;;  %v524_v54 = vpop.f32.mrf.mxu0 }
  0xf2   : > { %v4966_v17 = vmul.f32 %v4167_v33, %v4908_v51  ;;  %4172 = vpow2.f32 %v711_v37  ;;  %v605_v31 = vmul.f32 %v4828_v1, %v524_v54  ;;  %v4169_v52 = vpop.eup %4168  ;;  %v620_v37 = vmul.f32 %v4828_v1, %v569_v16 }
  0xf3   : > { %4174 = vrcp.f32 %v766_v9  ;;  %v4171_v27 = vpop.eup %4170  ;;  %v781_v25 = vadd.f32 1.0, %v4169_v52 }
  0xf4   : > { %862 = vst [vmem:[#allocation2 + $0xa0] sm:$0xff] %v4966_v17  ;;  %v4971_v39 = vadd.f32 %v4836_v6, %v605_v31  ;;  %v1070_v43 = vld [vmem:[#allocation2 + $0x97] sm:$0xff]  ;;  %1440 = vmatmul.f32.gmra.mxu2 %v4966_v17  ;;  %v4976_v51 = vmul.f32 %v4171_v27, %v4919_v60  ;;  %4176 = vpow2.f32 %v741_v57  ;;  %v4982_v9 = vadd.f32 %v4836_v6, %v620_v37 }
  0xf5   : > { %894 = vst [vmem:[#allocation2 + $0xb8] sm:$0xff] %v4966_v17  ;;  %1180 = vmatmul.f32.gmra.mxu1 %v1070_v43  ;;  %1945 = vmatmul.f32.gmra.mxu0 %v1070_v43  ;;  %4178 = vrcp.f32 %v781_v25 }
  0xf6   : > { %v672_v33 = vsub.f32 0.0, %v4971_v39  ;;  %877 = vst [vmem:[#allocation2 + $0x1c0] sm:$0xff] %v4976_v51  ;;  %v687_v57 = vsub.f32 0.0, %v4982_v9 }
  0xf7   : > { %v572_v54 = vpop.f32.mrf.mxu2  ;;  %909 = vst [vmem:[#allocation2 + $0x1d8] sm:$0xff] %v4976_v51 }
  0xf8   : > { %v4173_v12 = vpop.eup %4172  ;;  %v713_v31 = vmul.f32 1.442695, %v672_v33  ;;  %v743_v37 = vmul.f32 1.442695, %v687_v57 }
  0xf9   : > { %v4175_v27 = vpop.eup %4174  ;;  %v767_v60 = vadd.f32 1.0, %v4173_v12  ;;  %v527_v52 = vpop.f32.mrf.mxu0 }
  0xfa   : > { %v4987_v16 = vmul.f32 %v4175_v27, %v4929_v58  ;;  %4180 = vpow2.f32 %v713_v31  ;;  %v606_v25 = vmul.f32 %v4828_v1, %v527_v52  ;;  %v4177_v43 = vpop.eup %4176  ;;  %v621_v31 = vmul.f32 %v4828_v1, %v572_v54  ;;  %v2170_v27 = vld [vmem:[%s6508_s4 + $0x278] sm:$0xff] }
  0xfb   : > { %4182 = vrcp.f32 %v767_v60  ;;  %v4179_v21 = vpop.eup %4178  ;;  %v782_v19 = vadd.f32 1.0, %v4177_v43  ;;  %2171 = vmatpush.msrb.mxu1 %v2170_v27 }
  0xfc   : > { %863 = vst [vmem:[#allocation2 + $0xa8] sm:$0xff] %v4987_v16  ;;  %v4992_v33 = vadd.f32 %v4836_v6, %v606_v25  ;;  %v1071_v12 = vld [vmem:[#allocation2 + $0xb7] sm:$0xff]  ;;  %1443 = vmatmul.f32.gmra.mxu2 %v4987_v16  ;;  %v4997_v58 = vmul.f32 %v4179_v21, %v4940_v62  ;;  %4184 = vpow2.f32 %v743_v37  ;;  %v5006_v52 = vadd.f32 %v4836_v6, %v621_v31 }
  0xfd   : > { %895 = vst [vmem:[#allocation2 + $0xc0] sm:$0xff] %v4987_v16  ;;  %1183 = vmatmul.f32.gmra.mxu1 %v1071_v12  ;;  %1948 = vmatmul.f32.gmra.mxu0 %v1071_v12  ;;  %4186 = vrcp.f32 %v782_v19  ;;  %v2169_v62 = vld [vmem:[%s6508_s4 + $0x270] sm:$0xff]  ;;  %v2168_v12 = vld [vmem:[%s6508_s4 + $0x268] sm:$0xff] }
  0xfe   : > { %v673_v60 = vsub.f32 0.0, %v4992_v33  ;;  %878 = vst [vmem:[#allocation2 + $0x1e0] sm:$0xff] %v4997_v58  ;;  %2172 = vmatpush.msrb.mxu1 %v2169_v62  ;;  %v688_v37 = vsub.f32 0.0, %v5006_v52  ;;  %v2167_v62 = vld [vmem:[%s6508_s4 + $0x260] sm:$0xff]  ;;  %v1086_v26 = vld [vmem:[#allocation2 + $0x1d7] sm:$0xff] }
  0xff   : > { %v575_v21 = vpop.f32.mrf.mxu2  ;;  %910 = vst [vmem:[#allocation2 + $0x1f8] sm:$0xff] %v4997_v58 }
 0x100   : > { %v4181_v57 = vpop.eup %4180  ;;  %v715_v54 = vmul.f32 1.442695, %v673_v60  ;;  %2173 = vmatpush.msrb.mxu1 %v2168_v12  ;;  %v745_v60 = vmul.f32 1.442695, %v688_v37  ;;  %v2165_v37 = vld [vmem:[%s6508_s4 + $0x250] sm:$0xff] }
 0x101   : > { %v4183_v25 = vpop.eup %4182  ;;  %v768_v19 = vadd.f32 1.0, %v4181_v57  ;;  %v530_v43 = vpop.f32.mrf.mxu0 }
 0x102   : > { %v5017_v31 = vmul.f32 %v4183_v25, %v4950_v8  ;;  %4188 = vpow2.f32 %v715_v54  ;;  %v607_v27 = vmul.f32 %v4828_v1, %v530_v43  ;;  %v4185_v55 = vpop.eup %4184  ;;  %2174 = vmatpush.msrb.mxu1 %v2167_v62  ;;  %v622_v25 = vmul.f32 %v4828_v1, %v575_v21 }
 0x103   : > { %4190 = vrcp.f32 %v768_v19  ;;  %v4187_v57 = vpop.eup %4186  ;;  %v783_v10 = vadd.f32 1.0, %v4185_v55  ;;  %v2166_v55 = vld [vmem:[%s6508_s4 + $0x258] sm:$0xff] }
 0x104   : > { %864 = vst [vmem:[#allocation2 + $0xc8] sm:$0xff] %v5017_v31  ;;  %v5025_v53 = vadd.f32 %v4836_v6, %v607_v27  ;;  %v1072_v8 = vld [vmem:[#allocation2 + $0xbf] sm:$0xff]  ;;  %1446 = vmatmul.f32.gmra.mxu2 %v5017_v31  ;;  %v5030_v54 = vmul.f32 %v4187_v57, %v4961_v13  ;;  %4192 = vpow2.f32 %v745_v60  ;;  %2175 = vmatpush.msrb.mxu1 %v2166_v55  ;;  %v2164_v57 = vld [vmem:[%s6508_s4 + $0x248] sm:$0xff] }
 0x105   : > { %896 = vst [vmem:[#allocation2 + $0xe0] sm:$0xff] %v5017_v31  ;;  %1186 = vmatmul.f32.gmra.mxu1 %v1072_v8  ;;  %1951 = vmatmul.f32.gmra.mxu0 %v1072_v8  ;;  %4194 = vrcp.f32 %v783_v10  ;;  %v5039_v43 = vadd.f32 %v4836_v6, %v622_v25 }
 0x106   : > { %v674_v19 = vsub.f32 0.0, %v5025_v53  ;;  %879 = vst [vmem:[#allocation2 + $0x1e8] sm:$0xff] %v5030_v54  ;;  %2176 = vmatpush.msrb.mxu1 %v2165_v37  ;;  %v2163_v37 = vld [vmem:[%s6508_s4 + $0x240] sm:$0xff] }
 0x107   : > { %v578_v13 = vpop.f32.mrf.mxu2  ;;  %911 = vst [vmem:[#allocation2 + $0x200] sm:$0xff] %v5030_v54  ;;  %v689_v62 = vsub.f32 0.0, %v5039_v43 }
 0x108   : > { %v4189_v12 = vpop.eup %4188  ;;  %v717_v21 = vmul.f32 1.442695, %v674_v19  ;;  %2177 = vmatpush.msrb.mxu1 %v2164_v57  ;;  %v2161_v57 = vld [vmem:[%s6508_s4 + $0x230] sm:$0xff] }
 0x109   : > { %v4191_v27 = vpop.eup %4190  ;;  %v769_v10 = vadd.f32 1.0, %v4189_v12  ;;  %v533_v60 = vpop.f32.mrf.mxu0  ;;  %v747_v19 = vmul.f32 1.442695, %v689_v62 }
 0x10a   : > { %v5050_v8 = vmul.f32 %v4191_v27, %v4971_v39  ;;  %4196 = vpow2.f32 %v717_v21  ;;  %v608_v25 = vmul.f32 %v4828_v1, %v533_v60  ;;  %v4193_v55 = vpop.eup %4192  ;;  %2178 = vmatpush.msrb.mxu1 %v2163_v37  ;;  %v623_v27 = vmul.f32 %v4828_v1, %v578_v13 }
 0x10b   : > { %4198 = vrcp.f32 %v769_v10  ;;  %v4195_v12 = vpop.eup %4194  ;;  %v784_v7 = vadd.f32 1.0, %v4193_v55  ;;  %v2162_v10 = vld [vmem:[%s6508_s4 + $0x238] sm:$0xff] }
 0x10c   : > { %865 = vst [vmem:[#allocation2 + $0xd0] sm:$0xff] %v5050_v8  ;;  %v5058_v59 = vadd.f32 %v4836_v6, %v608_v25  ;;  %v1073_v39 = vld [vmem:[#allocation2 + $0xdf] sm:$0xff]  ;;  %1449 = vmatmul.f32.gmra.mxu2 %v5050_v8  ;;  %v5063_v21 = vmul.f32 %v4195_v12, %v4982_v9  ;;  %4200 = vpow2.f32 %v747_v19  ;;  %2179 = vmatpush.msrb.mxu1 %v2162_v10  ;;  %v2160_v12 = vld [vmem:[%s6508_s4 + $0x228] sm:$0xff] }
 0x10d   : > { %897 = vst [vmem:[#allocation2 + $0xe8] sm:$0xff] %v5050_v8  ;;  %1189 = vmatmul.f32.gmra.mxu1 %v1073_v39  ;;  %1954 = vmatmul.f32.gmra.mxu0 %v1073_v39  ;;  %4202 = vrcp.f32 %v784_v7  ;;  %v5072_v62 = vadd.f32 %v4836_v6, %v623_v27 }
 0x10e   : > { %v675_v60 = vsub.f32 0.0, %v5058_v59  ;;  %880 = vst [vmem:[#allocation2 + $0x208] sm:$0xff] %v5063_v21  ;;  %2180 = vmatpush.msrb.mxu1 %v2161_v57  ;;  %v2159_v57 = vld [vmem:[%s6508_s4 + $0x220] sm:$0xff] }
 0x10f   : > { %v581_v9 = vpop.f32.mrf.mxu2  ;;  %912 = vst [vmem:[#allocation2 + $0x220] sm:$0xff] %v5063_v21  ;;  %v690_v37 = vsub.f32 0.0, %v5072_v62  ;;  %v1088_v20 = vld [vmem:[#allocation2 + $0x1ff] sm:$0xff] }
 0x110   : > { %v4197_v25 = vpop.eup %4196  ;;  %v719_v13 = vmul.f32 1.442695, %v675_v60  ;;  %2181 = vmatpush.msrb.mxu1 %v2160_v12  ;;  %v2157_v12 = vld [vmem:[%s6508_s4 + $0x210] sm:$0xff] }
 0x111   : > { %v4199_v55 = vpop.eup %4198  ;;  %v770_v7 = vadd.f32 1.0, %v4197_v25  ;;  %v536_v19 = vpop.f32.mrf.mxu0  ;;  %v749_v60 = vmul.f32 1.442695, %v690_v37 }
 0x112   : > { %v5083_v39 = vmul.f32 %v4199_v55, %v4992_v33  ;;  %4204 = vpow2.f32 %v719_v13  ;;  %v609_v27 = vmul.f32 %v4828_v1, %v536_v19  ;;  %v4201_v10 = vpop.eup %4200  ;;  %2182 = vmatpush.msrb.mxu1 %v2159_v57  ;;  %v624_v55 = vmul.f32 %v4828_v1, %v581_v9 }
 0x113   : > { %4206 = vrcp.f32 %v770_v7  ;;  %v4203_v25 = vpop.eup %4202  ;;  %v785_v50 = vadd.f32 1.0, %v4201_v10  ;;  %v2158_v7 = vld [vmem:[%s6508_s4 + $0x218] sm:$0xff] }
 0x114   : > { %866 = vst [vmem:[#allocation2 + $0xf0] sm:$0xff] %v5083_v39  ;;  %v5091_v44 = vadd.f32 %v4836_v6, %v609_v27  ;;  %v1074_v33 = vld [vmem:[#allocation2 + $0xe7] sm:$0xff]  ;;  %1452 = vmatmul.f32.gmra.mxu2 %v5083_v39  ;;  %v5096_v13 = vmul.f32 %v4203_v25, %v5006_v52  ;;  %4208 = vpow2.f32 %v749_v60  ;;  %2183 = vmatpush.msrb.mxu1 %v2158_v7 }
 0x115   : > { %898 = vst [vmem:[#allocation2 + $0x108] sm:$0xff] %v5083_v39  ;;  %1192 = vmatmul.f32.gmra.mxu1 %v1074_v33  ;;  %1957 = vmatmul.f32.gmra.mxu0 %v1074_v33  ;;  %4210 = vrcp.f32 %v785_v50  ;;  %v5105_v37 = vadd.f32 %v4836_v6, %v624_v55  ;;  %v2156_v25 = vld [vmem:[%s6508_s4 + $0x208] sm:$0xff] }
 0x116   : > { %v676_v19 = vsub.f32 0.0, %v5091_v44  ;;  %881 = vst [vmem:[#allocation2 + $0x210] sm:$0xff] %v5096_v13  ;;  %2184 = vmatpush.msrb.mxu1 %v2157_v12  ;;  %v2155_v12 = vld [vmem:[%s6508_s4 + $0x200] sm:$0xff] }
 0x117   : > { %v584_v52 = vpop.f32.mrf.mxu2  ;;  %913 = vst [vmem:[#allocation2 + $0x228] sm:$0xff] %v5096_v13  ;;  %v691_v57 = vsub.f32 0.0, %v5105_v37  ;;  %v1089_v18 = vld [vmem:[#allocation2 + $0x21f] sm:$0xff] }
 0x118   : > { %v4205_v27 = vpop.eup %4204  ;;  %v721_v9 = vmul.f32 1.442695, %v676_v19  ;;  %2185 = vmatpush.msrb.mxu1 %v2156_v25 }
 0x119   : > { %v4207_v10 = vpop.eup %4206  ;;  %v771_v50 = vadd.f32 1.0, %v4205_v27  ;;  %v539_v60 = vpop.f32.mrf.mxu0  ;;  %v751_v19 = vmul.f32 1.442695, %v691_v57 }
 0x11a   : > { %v5116_v33 = vmul.f32 %v4207_v10, %v5025_v53  ;;  %4212 = vpow2.f32 %v721_v9  ;;  %v610_v55 = vmul.f32 %v4828_v1, %v539_v60  ;;  %v4209_v7 = vpop.eup %4208  ;;  %2186 = vmatpush.msrb.mxu1 %v2155_v12  ;;  %v625_v10 = vmul.f32 %v4828_v1, %v584_v52 }
 0x11b   : > { %4214 = vrcp.f32 %v771_v50  ;;  %v4211_v27 = vpop.eup %4210  ;;  %v786_v42 = vadd.f32 1.0, %v4209_v7 }
 0x11c   : > { %867 = vst [vmem:[#allocation2 + $0xf8] sm:$0xff] %v5116_v33  ;;  %v5124_v38 = vadd.f32 %v4836_v6, %v610_v55  ;;  %v1075_v53 = vld [vmem:[#allocation2 + $0x107] sm:$0xff]  ;;  %1455 = vmatmul.f32.gmra.mxu2 %v5116_v33  ;;  %v5129_v9 = vmul.f32 %v4211_v27, %v5039_v43  ;;  %4216 = vpow2.f32 %v751_v19  ;;  %v5135_v60 = vadd.f32 %v4836_v6, %v625_v10 }
 0x11d   : > { %899 = vst [vmem:[#allocation2 + $0x110] sm:$0xff] %v5116_v33  ;;  %1195 = vmatmul.f32.gmra.mxu1 %v1075_v53  ;;  %1960 = vmatmul.f32.gmra.mxu0 %v1075_v53  ;;  %4218 = vrcp.f32 %v786_v42 }
 0x11e   : > { %v677_v50 = vsub.f32 0.0, %v5124_v38  ;;  %882 = vst [vmem:[#allocation2 + $0x230] sm:$0xff] %v5129_v9  ;;  %v692_v52 = vsub.f32 0.0, %v5135_v60 }
 0x11f   : > { %v587_v57 = vpop.f32.mrf.mxu2  ;;  %914 = vst [vmem:[#allocation2 + $0x248] sm:$0xff] %v5129_v9 }
 0x120   : > { %v4213_v25 = vpop.eup %4212  ;;  %v723_v55 = vmul.f32 1.442695, %v677_v50  ;;  %v626_v43 = vmul.f32 %v4828_v1, %v587_v57  ;;  %v753_v36 = vmul.f32 1.442695, %v692_v52  ;;  %v1656_v50 = vld [vmem:[%s6508_s4 + $0x178] sm:$0xff] }
 0x121   : > { %v4215_v7 = vpop.eup %4214  ;;  %v772_v12 = vadd.f32 1.0, %v4213_v25  ;;  %v542_v19 = vpop.f32.mrf.mxu0  ;;  %1657 = vmatpush.msrb.mxu3 %v1656_v50 }
 0x122   : > { %v5141_v42 = vmul.f32 %v4215_v7, %v5058_v59  ;;  %4220 = vpow2.f32 %v723_v55  ;;  %v611_v27 = vmul.f32 %v4828_v1, %v542_v19  ;;  %v5145_v53 = vadd.f32 %v4836_v6, %v626_v43  ;;  %v4217_v10 = vpop.eup %4216 }
 0x123   : > { %4222 = vrcp.f32 %v772_v12  ;;  %v4219_v57 = vpop.eup %4218  ;;  %v787_v25 = vadd.f32 1.0, %v4217_v10  ;;  %v1655_v12 = vld [vmem:[%s6508_s4 + $0x170] sm:$0xff] }
 0x124   : > { %868 = vst [vmem:[#allocation2 + $0x118] sm:$0xff] %v5141_v42  ;;  %v5152_v59 = vadd.f32 %v4836_v6, %v611_v27  ;;  %v1076_v55 = vld [vmem:[#allocation2 + $0x10f] sm:$0xff]  ;;  %1458 = vmatmul.f32.gmra.mxu2 %v5141_v42  ;;  %v693_v43 = vsub.f32 0.0, %v5145_v53  ;;  %v5158_v7 = vmul.f32 %v4219_v57, %v5072_v62  ;;  %4224 = vpow2.f32 %v753_v36  ;;  %1658 = vmatpush.msrb.mxu3 %v1655_v12 }
 0x125   : > { %900 = vst [vmem:[#allocation2 + $0x130] sm:$0xff] %v5141_v42  ;;  %1198 = vmatmul.f32.gmra.mxu1 %v1076_v55  ;;  %1963 = vmatmul.f32.gmra.mxu0 %v1076_v55  ;;  %4226 = vrcp.f32 %v787_v25 }
 0x126   : > { %v678_v19 = vsub.f32 0.0, %v5152_v59  ;;  %v755_v52 = vmul.f32 1.442695, %v693_v43  ;;  %883 = vst [vmem:[#allocation2 + $0x238] sm:$0xff] %v5158_v7 }
 0x127   : > { %v590_v27 = vpop.f32.mrf.mxu2  ;;  %915 = vst [vmem:[#allocation2 + $0x250] sm:$0xff] %v5158_v7 }
 0x128   : > { %v4221_v10 = vpop.eup %4220  ;;  %v725_v62 = vmul.f32 1.442695, %v678_v19  ;;  %4228 = vpow2.f32 %v755_v52  ;;  %v627_v50 = vmul.f32 %v4828_v1, %v590_v27 }
 0x129   : > { %v4223_v36 = vpop.eup %4222  ;;  %v773_v57 = vadd.f32 1.0, %v4221_v10 }
 0x12a   : > { %v5168_v55 = vmul.f32 %v4223_v36, %v5091_v44  ;;  %4230 = vpow2.f32 %v725_v62  ;;  %v5171_v25 = vadd.f32 %v4836_v6, %v627_v50  ;;  %v4225_v43 = vpop.eup %4224  ;;  %v1654_v6 = vld [vmem:[%s6508_s4 + $0x168] sm:$0xff] }
 0x12b   : > { %4232 = vrcp.f32 %v773_v57  ;;  %v4227_v12 = vpop.eup %4226  ;;  %v788_v32 = vadd.f32 1.0, %v4225_v43  ;;  %1659 = vmatpush.msrb.mxu3 %v1654_v6 }
 0x12c   : > { %869 = vst [vmem:[#allocation2 + $0x120] sm:$0xff] %v5168_v55  ;;  %v1077_v30 = vld [vmem:[#allocation2 + $0x12f] sm:$0xff]  ;;  %1461 = vmatmul.f32.gmra.mxu2 %v5168_v55  ;;  %v694_v1 = vsub.f32 0.0, %v5171_v25  ;;  %v5178_v44 = vmul.f32 %v4227_v12, %v5105_v37  ;;  %v5199_v12 = vpop.f32.mrf.mxu1 }
 0x12d   : > { %901 = vst [vmem:[#allocation2 + $0x138] sm:$0xff] %v5168_v55  ;;  %1201 = vmatmul.f32.gmra.mxu1 %v1077_v30  ;;  %1966 = vmatmul.f32.gmra.mxu0 %v1077_v30  ;;  %4234 = vrcp.f32 %v788_v32 }
 0x12e   : > { %v4229_v19 = vpop.eup %4228  ;;  %v757_v52 = vmul.f32 1.442695, %v694_v1  ;;  %884 = vst [vmem:[#allocation2 + $0x258] sm:$0xff] %v5178_v44 }
 0x12f   : > { %v789_v27 = vadd.f32 1.0, %v4229_v19  ;;  %916 = vst [vmem:[#allocation2 + $0x270] sm:$0xff] %v5178_v44  ;;  %v5188_v50 = vpop.f32.mrf.mxu2 }
 0x130   : > { %v4231_v10 = vpop.eup %4230  ;;  %4236 = vpow2.f32 %v757_v52 }
 0x131   : > { %v4233_v62 = vpop.eup %4232  ;;  %v774_v37 = vadd.f32 1.0, %v4231_v10  ;;  %4238 = vrcp.f32 %v789_v27  ;;  %v2091_v10 = vld [vmem:[#allocation2 + $0x28] sm:$0xff] }
 0x132   : > { %v5186_v30 = vmul.f32 %v4233_v62, %v5124_v38  ;;  %v1653_v38 = vld [vmem:[%s6508_s4 + $0x160] sm:$0xff] }
 0x133   : > { %4240 = vrcp.f32 %v774_v37  ;;  %v4235_v36 = vpop.eup %4234  ;;  %1660 = vmatpush.msrb.mxu3 %v1653_v38  ;;  %v2092_v38 = vld [vmem:[#allocation2 + $0x30] sm:$0xff] }
 0x134   : > { %870 = vst [vmem:[#allocation2 + $0x140] sm:$0xff] %v5186_v30  ;;  %v1078_v32 = vld [vmem:[#allocation2 + $0x137] sm:$0xff]  ;;  %1464 = vmatmul.f32.gmra.mxu2 %v5186_v30  ;;  %v5194_v57 = vmul.f32 %v4235_v36, %v5135_v60  ;;  %v5216_v36 = vpop.f32.mrf.mxu1 }
 0x135   : > { %902 = vst [vmem:[#allocation2 + $0x158] sm:$0xff] %v5186_v30  ;;  %1204 = vmatmul.f32.gmra.mxu1 %v1078_v32  ;;  %1969 = vmatmul.f32.gmra.mxu0 %v1078_v32 }
 0x136   : > { %v4237_v43 = vpop.eup %4236  ;;  %885 = vst [vmem:[#allocation2 + $0x260] sm:$0xff] %v5194_v57 }
 0x137   : > { %v4239_v1 = vpop.eup %4238  ;;  %v790_v6 = vadd.f32 1.0, %v4237_v43  ;;  %917 = vst [vmem:[#allocation2 + $0x278] sm:$0xff] %v5194_v57  ;;  %v5210_v62 = vpop.f32.mrf.mxu2  ;;  %v1651_v43 = vld [vmem:[%s6508_s4 + $0x150] sm:$0xff] }
 0x138   : > { %v853_v19 = vmul.f32 %v4239_v1, %v5145_v53  ;;  %v1652_v53 = vld [vmem:[%s6508_s4 + $0x158] sm:$0xff] }
 0x139   : > { %v4241_v60 = vpop.eup %4240  ;;  %4242 = vrcp.f32 %v790_v6  ;;  %1661 = vmatpush.msrb.mxu3 %v1652_v53 }
 0x13a   : > { %v5205_v52 = vmul.f32 %v4241_v60, %v5152_v59  ;;  %886 = vst [vmem:[#allocation2 + $0x280] sm:$0xff] %v853_v19  ;;  %v1650_v60 = vld [vmem:[%s6508_s4 + $0x148] sm:$0xff] }
 0x13b   : > { %918 = vst [vmem:[#allocation2 + $0x298] sm:$0xff] %v853_v19  ;;  %1662 = vmatpush.msrb.mxu3 %v1651_v43  ;;  %v1081_v19 = vld [vmem:[#allocation2 + $0x17f] sm:$0xff]  ;;  %v1083_v43 = vld [vmem:[#allocation2 + $0x1a7] sm:$0xff] }
 0x13c   : > { %871 = vst [vmem:[#allocation2 + $0x148] sm:$0xff] %v5205_v52  ;;  %v1079_v27 = vld [vmem:[#allocation2 + $0x157] sm:$0xff]  ;;  %1467 = vmatmul.f32.gmra.mxu2 %v5205_v52 }
 0x13d   : > { %903 = vst [vmem:[#allocation2 + $0x160] sm:$0xff] %v5205_v52  ;;  %1207 = vmatmul.f32.vlgmr.msra.gmra.mxu3 %v1079_v27  ;;  %1972 = vmatmul.f32.gmra.mxu0 %v1079_v27 }
 0x13e   : > { %2187 = vmatmul.f32.vlgmr.msrb.gmra.mxu1 %v2091_v10  ;;  %1663 = vmatpush.msrb.mxu3 %v1650_v60  ;;  %v1094_v35 = vld [vmem:[#allocation2 + $0x277] sm:$0xff] }
 0x13f   : > { %v4243_v59 = vpop.eup %4242 }
 0x140   : > { %v854_v37 = vmul.f32 %v4243_v59, %v5171_v25  ;;  %v1082_v59 = vld [vmem:[#allocation2 + $0x187] sm:$0xff] }
 0x142   : > { %887 = vst [vmem:[#allocation2 + $0x288] sm:$0xff] %v854_v37 }
 0x143   : > { %919 = vst [vmem:[#allocation2 + $0x2a0] sm:$0xff] %v854_v37 }
 0x144   : > { %v1080_v32 = vld [vmem:[#allocation2 + $0x15f] sm:$0xff]  ;;  %1470 = vmatmul.f32.gmra.mxu2 %v4876_v5  ;;  %v5229_v5 = vld [vmem:[#allocation2 + $0x50] sm:$0xff] }
 0x145   : > { %1210 = vmatmul.f32.gmra.mxu3 %v1080_v32  ;;  %1975 = vmatmul.f32.gmra.mxu0 %v1080_v32 }
 0x146   : > { %2190 = vmatmul.f32.gmra.mxu1 %v2092_v38 }
 0x147   : > { %v5222_v1 = vpop.f32.mrf.mxu2 }
 0x14a   : > { %v5224_v6 = vpop.f32.mrf.mxu1  ;;  %v5226_v25 = vpop.f32.mrf.mxu0  ;;  %v1865_v40 = vld [vmem:[#allocation2 + $0x29f] sm:$0xff] }
 0x14c   : > { %1473 = vmatmul.f32.gmra.mxu2 %v4892_v11  ;;  %v1649_v11 = vld [vmem:[%s6508_s4 + $0x140] sm:$0xff] }
 0x14d   : > { %1213 = vmatmul.f32.gmra.mxu3 %v1081_v19  ;;  %1978 = vmatmul.f32.gmra.mxu0 %v1081_v19 }
 0x14e   : > { %2193 = vmatmul.f32.gmra.mxu1 %v5229_v5  ;;  %1664 = vmatpush.msrb.mxu3 %v1649_v11 }
 0x14f   : > { %v5235_v27 = vpop.f32.mrf.mxu2 }
 0x152   : > { %v5237_v10 = vpop.f32.mrf.mxu1  ;;  %v5239_v53 = vpop.f32.mrf.mxu0 }
 0x154   : > { %1476 = vmatmul.f32.gmra.mxu2 %v4913_v4  ;;  %v1648_v4 = vld [vmem:[%s6508_s4 + $0x138] sm:$0xff] }
 0x155   : > { %1216 = vmatmul.f32.gmra.mxu3 %v1082_v59  ;;  %1981 = vmatmul.f32.gmra.mxu0 %v1082_v59  ;;  %v1084_v59 = vld [vmem:[#allocation2 + $0x1af] sm:$0xff] }
 0x156   : > { %2196 = vmatmul.f32.gmra.mxu1 %v4903_v56  ;;  %1665 = vmatpush.msrb.mxu3 %v1648_v4  ;;  %v1085_v4 = vld [vmem:[#allocation2 + $0x1cf] sm:$0xff] }
 0x157   : > { %v5246_v37 = vpop.f32.mrf.mxu2 }
 0x15a   : > { %v5248_v32 = vpop.f32.mrf.mxu1  ;;  %v5250_v38 = vpop.f32.mrf.mxu0 }
 0x15c   : > { %1479 = vmatmul.f32.gmra.mxu2 %v4934_v49  ;;  %v1647_v49 = vld [vmem:[%s6508_s4 + $0x130] sm:$0xff] }
 0x15d   : > { %1219 = vmatmul.f32.gmra.mxu3 %v1083_v43  ;;  %1984 = vmatmul.f32.gmra.mxu0 %v1083_v43 }
 0x15e   : > { %2199 = vmatmul.f32.gmra.mxu1 %v4924_v46  ;;  %1666 = vmatpush.msrb.mxu3 %v1647_v49 }
 0x15f   : > { %v5257_v56 = vpop.f32.mrf.mxu2 }
 0x162   : > { %v5259_v19 = vpop.f32.mrf.mxu1  ;;  %v5261_v60 = vpop.f32.mrf.mxu0 }
 0x164   : > { %1482 = vmatmul.f32.gmra.mxu2 %v4955_v61  ;;  %v1646_v61 = vld [vmem:[%s6508_s4 + $0x128] sm:$0xff] }
 0x165   : > { %1222 = vmatmul.f32.gmra.mxu3 %v1084_v59  ;;  %1987 = vmatmul.f32.gmra.mxu0 %v1084_v59 }
 0x166   : > { %2202 = vmatmul.f32.gmra.mxu1 %v4945_v45  ;;  %1667 = vmatpush.msrb.mxu3 %v1646_v61  ;;  %v2425_v61 = vld [vmem:[%s6508_s4 + $0x2e8] sm:$0xff] }
 0x167   : > { %v5268_v46 = vpop.f32.mrf.mxu2 }
 0x16a   : > { %v5270_v11 = vpop.f32.mrf.mxu1  ;;  %v5272_v43 = vpop.f32.mrf.mxu0 }
 0x16c   : > { %1485 = vmatmul.f32.gmra.mxu2 %v4976_v51  ;;  %v1645_v51 = vld [vmem:[%s6508_s4 + $0x120] sm:$0xff] }
 0x16d   : > { %1225 = vmatmul.f32.gmra.mxu3 %v1085_v4  ;;  %1990 = vmatmul.f32.gmra.mxu0 %v1085_v4 }
 0x16e   : > { %2205 = vmatmul.f32.gmra.mxu1 %v4966_v17  ;;  %1668 = vmatpush.msrb.mxu3 %v1645_v51  ;;  %v2427_v17 = vld [vmem:[%s6508_s4 + $0x2f8] sm:$0xff] }
 0x16f   : > { %v5279_v45 = vpop.f32.mrf.mxu2  ;;  %2428 = vmatpush.msra.mxu2 %v2427_v17  ;;  %v1087_v51 = vld [vmem:[#allocation2 + $0x1f7] sm:$0xff]  ;;  %v2424_v17 = vld [vmem:[%s6508_s4 + $0x2e0] sm:$0xff] }
 0x172   : > { %v5281_v59 = vpop.f32.mrf.mxu1  ;;  %v5283_v49 = vpop.f32.mrf.mxu0 }
 0x174   : > { %1488 = vmatmul.f32.gmra.mxu2 %v4997_v58  ;;  %v2426_v58 = vld [vmem:[%s6508_s4 + $0x2f0] sm:$0xff] }
 0x175   : > { %1228 = vmatmul.f32.gmra.mxu3 %v1086_v26  ;;  %1993 = vmatmul.f32.gmra.mxu0 %v1086_v26 }
 0x176   : > { %2208 = vmatmul.f32.gmra.mxu1 %v4987_v16  ;;  %2429 = vmatpush.msra.mxu2 %v2426_v58  ;;  %v1644_v58 = vld [vmem:[%s6508_s4 + $0x118] sm:$0xff] }
 0x177   : > { %v5293_v4 = vpop.f32.mrf.mxu2  ;;  %1669 = vmatpush.msrb.mxu3 %v1644_v58 }
 0x178   : > { %6601 = vst [vmem:[#allocation20_spill] sm:$0xff] %v5293_v4  ;;  %2430 = vmatpush.msra.mxu2 %v2425_v61  ;;  %v2423_v61 = vld [vmem:[%s6508_s4 + $0x2d8] sm:$0xff] }
 0x17a   : > { %v5298_v26 = vpop.f32.mrf.mxu1  ;;  %v5303_v16 = vpop.f32.mrf.mxu0  ;;  %2431 = vmatpush.msra.mxu2 %v2424_v17  ;;  %v1643_v17 = vld [vmem:[%s6508_s4 + $0x110] sm:$0xff] }
 0x17b   : > { %6602 = vst [vmem:[#allocation21_spill] sm:$0xff] %v5298_v26  ;;  %1670 = vmatpush.msrb.mxu3 %v1643_v17  ;;  %v2942_v17 = vld [vmem:[%s6508_s4 + $0x3f8] sm:$0xff]  ;;  %v2874_v26 = vld [vmem:[#allocation2 + $0x120] sm:$0xff] }
 0x17c   : > { %1491 = vmatmul.f32.gmra.mxu2 %v5030_v54  ;;  %v2422_v54 = vld [vmem:[%s6508_s4 + $0x2d0] sm:$0xff]  ;;  %2943 = vmatpush.msra.mxu0 %v2942_v17  ;;  %v1090_v17 = vld [vmem:[#allocation2 + $0x227] sm:$0xff] }
 0x17d   : > { %1231 = vmatmul.f32.gmra.mxu3 %v1087_v51  ;;  %1996 = vmatmul.f32.gmra.mxu0 %v1087_v51 }
 0x17e   : > { %2211 = vmatmul.f32.gmra.mxu1 %v5017_v31  ;;  %2432 = vmatpush.msra.mxu2 %v2423_v61  ;;  %v2421_v31 = vld [vmem:[%s6508_s4 + $0x2c8] sm:$0xff]  ;;  %v2420_v61 = vld [vmem:[%s6508_s4 + $0x2c0] sm:$0xff] }
 0x17f   : > { %v5316_v24 = vpop.f32.mrf.mxu2 }
 0x180   : > { %6603 = vst [vmem:[#allocation22_spill] sm:$0xff] %v5316_v24  ;;  %2433 = vmatpush.msra.mxu2 %v2422_v54  ;;  %v2419_v54 = vld [vmem:[%s6508_s4 + $0x2b8] sm:$0xff]  ;;  %v5626_v24 = vld [vmem:[#allocation2 + $0x230] sm:$0xff] }
 0x181   : > { %6644 = vst [vmem:[#allocation63_spill] sm:$0xff] %v5626_v24 }
 0x182   : > { %v5321_v51 = vpop.f32.mrf.mxu1  ;;  %v5327_v58 = vpop.f32.mrf.mxu0  ;;  %2434 = vmatpush.msra.mxu2 %v2421_v31  ;;  %v1642_v31 = vld [vmem:[%s6508_s4 + $0x108] sm:$0xff] }
 0x183   : > { %6604 = vst [vmem:[#allocation23_spill] sm:$0xff] %v5321_v51  ;;  %1671 = vmatpush.msrb.mxu3 %v1642_v31  ;;  %v5647_v51 = vld [vmem:[#allocation2 + $0x119] sm:$0xff] }
 0x184   : > { %1494 = vmatmul.f32.gmra.mxu2 %v5063_v21  ;;  %6648 = vst [vmem:[#allocation67_spill] sm:$0xff] %v5647_v51 }
 0x185   : > { %1234 = vmatmul.f32.gmra.mxu3 %v1088_v20  ;;  %1999 = vmatmul.f32.gmra.mxu0 %v1088_v20 }
 0x186   : > { %2214 = vmatmul.f32.gmra.mxu1 %v5050_v8  ;;  %2435 = vmatpush.msra.mxu2 %v2420_v61  ;;  %v2418_v8 = vld [vmem:[%s6508_s4 + $0x2b0] sm:$0xff]  ;;  %v2417_v61 = vld [vmem:[%s6508_s4 + $0x2a8] sm:$0xff] }
 0x187   : > { %v5336_v21 = vpop.f32.mrf.mxu2 }
 0x188   : > { %6605 = vst [vmem:[#allocation24_spill] sm:$0xff] %v5336_v21  ;;  %2436 = vmatpush.msra.mxu2 %v2419_v54  ;;  %v5619_v21 = vld [vmem:[#allocation2 + $0xf9] sm:$0xff] }
 0x189   : > { %6643 = vst [vmem:[#allocation62_spill] sm:$0xff] %v5619_v21 }
 0x18a   : > { %v5341_v20 = vpop.f32.mrf.mxu1  ;;  %2437 = vmatpush.msra.mxu2 %v2418_v8  ;;  %v2415_v8 = vld [vmem:[%s6508_s4 + $0x298] sm:$0xff] }
 0x18b   : > { %6606 = vst [vmem:[#allocation25_spill] sm:$0xff] %v5341_v20  ;;  %v3192_v20 = vld [vmem:[%s6508_s4 + $0x440] sm:$0xff] }
 0x18c   : > { %1497 = vmatmul.f32.gmra.mxu2 %v5096_v13  ;;  %v2941_v13 = vld [vmem:[%s6508_s4 + $0x3f0] sm:$0xff] }
 0x18d   : > { %1237 = vmatmul.f32.gmra.mxu3 %v1089_v18  ;;  %2002 = vmatmul.f32.gmra.mxu0 %v1089_v18  ;;  %v5360_v18 = vpop.f32.mrf.mxu0 }
 0x18e   : > { %2217 = vmatmul.f32.gmra.mxu1 %v5083_v39  ;;  %6607 = vst [vmem:[#allocation26_spill] sm:$0xff] %v5360_v18  ;;  %v2416_v39 = vld [vmem:[%s6508_s4 + $0x2a0] sm:$0xff]  ;;  %2944 = vmatpush.msra.mxu0 %v2941_v13 }
 0x18f   : > { %v5362_v54 = vpop.f32.mrf.mxu2  ;;  %2438 = vmatpush.msra.mxu2 %v2417_v61  ;;  %v1641_v13 = vld [vmem:[%s6508_s4 + $0x100] sm:$0xff] }
 0x190   : > { %6608 = vst [vmem:[#allocation27_spill] sm:$0xff] %v5362_v54  ;;  %2945 = vmatpush.msra.mxu0 %v2940_v0  ;;  %v2938_v0 = vld [vmem:[%s6508_s4 + $0x3d8] sm:$0xff]  ;;  %1672 = vmatpush.msrb.mxu3 %v1641_v13  ;;  %v2936_v13 = vld [vmem:[%s6508_s4 + $0x3c8] sm:$0xff] }
 0x191   : > { %2439 = vmatpush.msra.mxu2 %v2416_v39  ;;  %v2937_v39 = vld [vmem:[%s6508_s4 + $0x3d0] sm:$0xff]  ;;  %v5527_v18 = vld [vmem:[#allocation2 + $0x81] sm:$0xff] }
 0x192   : > { %v5367_v31 = vpop.f32.mrf.mxu1  ;;  %2946 = vmatpush.msra.mxu0 %v2939_v3  ;;  %v2413_v3 = vld [vmem:[%s6508_s4 + $0x288] sm:$0xff]  ;;  %v5603_v54 = vld [vmem:[#allocation2 + $0xf1] sm:$0xff] }
 0x193   : > { %6609 = vst [vmem:[#allocation28_spill] sm:$0xff] %v5367_v31  ;;  %2440 = vmatpush.msra.mxu2 %v2415_v8  ;;  %v2412_v8 = vld [vmem:[%s6508_s4 + $0x280] sm:$0xff] }
 0x194   : > { %1500 = vmatmul.f32.gmra.mxu2 %v5129_v9  ;;  %v2414_v9 = vld [vmem:[%s6508_s4 + $0x290] sm:$0xff]  ;;  %2947 = vmatpush.msra.mxu0 %v2938_v0  ;;  %v1091_v0 = vld [vmem:[#allocation2 + $0x247] sm:$0xff]  ;;  %6638 = vst [vmem:[#allocation57_spill] sm:$0xff] %v5603_v54 }
 0x195   : > { %1240 = vmatmul.f32.gmra.mxu3 %v1090_v17  ;;  %2005 = vmatmul.f32.gmra.mxu0 %v1090_v17 }
 0x196   : > { %2220 = vmatmul.f32.gmra.mxu1 %v5116_v33  ;;  %v5397_v33 = vpop.f32.mrf.mxu0  ;;  %2441 = vmatpush.msra.mxu2 %v2414_v9  ;;  %v2935_v9 = vld [vmem:[%s6508_s4 + $0x3c0] sm:$0xff] }
 0x197   : > { %v5389_v61 = vpop.f32.mrf.mxu2  ;;  %6611 = vst [vmem:[#allocation30_spill] sm:$0xff] %v5397_v33  ;;  %2948 = vmatpush.msra.mxu0 %v2937_v39  ;;  %v2685_v39 = vld [vmem:[%s6508_s4 + $0x378] sm:$0xff] }
 0x198   : > { %6610 = vst [vmem:[#allocation29_spill] sm:$0xff] %v5389_v61  ;;  %2442 = vmatpush.msra.mxu2 %v2413_v3  ;;  %v2934_v3 = vld [vmem:[%s6508_s4 + $0x3b8] sm:$0xff]  ;;  %2686 = vmatpush.msra.mxu3 %v2685_v39  ;;  %v2869_v61 = vld [vmem:[#allocation2 + $0xc8] sm:$0xff] }
 0x199   : > { %2949 = vmatpush.msra.mxu0 %v2936_v13  ;;  %v3199_v39 = vld [vmem:[%s6508_s4 + $0x478] sm:$0xff] }
 0x19a   : > { %v5399_v17 = vpop.f32.mrf.mxu1  ;;  %2443 = vmatpush.msra.mxu2 %v2412_v8  ;;  %v2932_v8 = vld [vmem:[%s6508_s4 + $0x3a8] sm:$0xff]  ;;  %3200 = vmatpush.msra.mxu1 %v3199_v39  ;;  %v2684_v39 = vld [vmem:[%s6508_s4 + $0x370] sm:$0xff] }
 0x19b   : > { %6612 = vst [vmem:[#allocation31_spill] sm:$0xff] %v5399_v17  ;;  %2950 = vmatpush.msra.mxu0 %v2935_v9  ;;  %v2931_v9 = vld [vmem:[%s6508_s4 + $0x3a0] sm:$0xff]  ;;  %2687 = vmatpush.msra.mxu3 %v2684_v39  ;;  %v1864_v39 = vld [vmem:[#allocation2 + $0x297] sm:$0xff] }
 0x19c   : > { %1503 = vmatmul.f32.gmra.mxu2 %v5158_v7  ;;  %v2933_v7 = vld [vmem:[%s6508_s4 + $0x3b0] sm:$0xff] }
 0x19d   : > { %1243 = vmatmul.f32.gmra.mxu3 %v1091_v0  ;;  %2008 = vmatmul.f32.gmra.mxu0 %v1091_v0  ;;  %v1092_v0 = vld [vmem:[#allocation2 + $0x24f] sm:$0xff] }
 0x19e   : > { %2223 = vmatmul.f32.gmra.mxu1 %v5141_v42  ;;  %2951 = vmatpush.msra.mxu0 %v2934_v3  ;;  %v5425_v42 = vpop.f32.mrf.mxu0 }
 0x19f   : > { %v5418_v48 = vpop.f32.mrf.mxu2  ;;  %6615 = vst [vmem:[#allocation34_spill] sm:$0xff] %v5425_v42  ;;  %v5514_v42 = vld [vmem:[#allocation2 + $0x79] sm:$0xff] }
 0x1a0   : > { %6613 = vst [vmem:[#allocation32_spill] sm:$0xff] %v5418_v48  ;;  %2952 = vmatpush.msra.mxu0 %v2933_v7  ;;  %v2930_v7 = vld [vmem:[%s6508_s4 + $0x398] sm:$0xff]  ;;  %v2868_v48 = vld [vmem:[#allocation2 + $0xa8] sm:$0xff] }
 0x1a2   : > { %v5423_v13 = vpop.f32.mrf.mxu1  ;;  %2953 = vmatpush.msra.mxu0 %v2932_v8  ;;  %v1093_v8 = vld [vmem:[#allocation2 + $0x26f] sm:$0xff] }
 0x1a3   : > { %6614 = vst [vmem:[#allocation33_spill] sm:$0xff] %v5423_v13  ;;  %v5589_v13 = vld [vmem:[#allocation2 + $0xd1] sm:$0xff] }
 0x1a4   : > { %1506 = vmatmul.f32.gmra.mxu2 %v5178_v44  ;;  %2954 = vmatpush.msra.mxu0 %v2931_v9  ;;  %v2929_v44 = vld [vmem:[%s6508_s4 + $0x390] sm:$0xff]  ;;  %v2927_v9 = vld [vmem:[%s6508_s4 + $0x380] sm:$0xff] }
 0x1a5   : > { %1246 = vmatmul.f32.gmra.mxu3 %v1092_v0  ;;  %2011 = vmatmul.f32.gmra.mxu0 %v1092_v0 }
 0x1a6   : > { %2226 = vmatmul.f32.gmra.mxu1 %v5168_v55  ;;  %2955 = vmatpush.msra.mxu0 %v2930_v7  ;;  %v2928_v55 = vld [vmem:[%s6508_s4 + $0x388] sm:$0xff]  ;;  %v5452_v41 = vpop.f32.mrf.mxu0 }
 0x1a7   : > { %v5438_v3 = vpop.f32.mrf.mxu2  ;;  %6618 = vst [vmem:[#allocation37_spill] sm:$0xff] %v5452_v41 }
 0x1a8   : > { %6616 = vst [vmem:[#allocation35_spill] sm:$0xff] %v5438_v3  ;;  %2956 = vmatpush.msra.mxu0 %v2929_v44  ;;  %v2348_v44 = vld [vmem:[#allocation2 + $0x29] sm:$0xff] }
 0x1aa   : > { %v5446_v0 = vpop.f32.mrf.mxu1  ;;  %2957 = vmatpush.msra.mxu0 %v2928_v55 }
 0x1ab   : > { %6617 = vst [vmem:[#allocation36_spill] sm:$0xff] %v5446_v0  ;;  %v5575_v0 = vld [vmem:[#allocation2 + $0xc9] sm:$0xff] }
 0x1ac   : > { %1509 = vmatmul.f32.gmra.mxu2 %v5194_v57  ;;  %2958 = vmatpush.msra.mxu0 %v2927_v9 }
 0x1ad   : > { %1249 = vmatmul.f32.gmra.mxu3 %v1093_v8  ;;  %2014 = vmatmul.f32.gmra.mxu0 %v1093_v8 }
 0x1ae   : > { %2229 = vmatmul.f32.gmra.mxu1 %v5186_v30  ;;  %v3198_v30 = vld [vmem:[%s6508_s4 + $0x470] sm:$0xff]  ;;  %v5469_v55 = vpop.f32.mrf.mxu0 }
 0x1af   : > { %v5461_v7 = vpop.f32.mrf.mxu2  ;;  %6621 = vst [vmem:[#allocation40_spill] sm:$0xff] %v5469_v55  ;;  %3201 = vmatpush.msra.mxu1 %v3198_v30 }
 0x1b0   : > { %6619 = vst [vmem:[#allocation38_spill] sm:$0xff] %v5461_v7  ;;  %v5559_v7 = vld [vmem:[#allocation2 + $0xa9] sm:$0xff] }
 0x1b2   : > { %v5463_v57 = vpop.f32.mrf.mxu1 }
 0x1b3   : > { %6620 = vst [vmem:[#allocation39_spill] sm:$0xff] %v5463_v57  ;;  %v2867_v57 = vld [vmem:[#allocation2 + $0xa0] sm:$0xff] }
 0x1b4   : > { %2444 = vmatmul.f32.vlgmr.msra.gmra.mxu2 %v2348_v44 }
 0x1b5   : > { %1252 = vmatmul.f32.gmra.mxu3 %v1094_v35  ;;  %2017 = vmatmul.f32.gmra.mxu0 %v1094_v35  ;;  %v2683_v35 = vld [vmem:[%s6508_s4 + $0x368] sm:$0xff] }
 0x1b6   : > { %2232 = vmatmul.f32.gmra.mxu1 %v5205_v52  ;;  %2688 = vmatpush.msra.mxu3 %v2683_v35  ;;  %v5479_v30 = vpop.f32.mrf.mxu0  ;;  %v3197_v35 = vld [vmem:[%s6508_s4 + $0x468] sm:$0xff] }
 0x1b7   : > { %v1465_v8 = vpop.f32.mrf.mxu2  ;;  %6622 = vst [vmem:[#allocation41_spill] sm:$0xff] %v5479_v30  ;;  %3202 = vmatpush.msra.mxu1 %v3197_v35 }
 0x1bb   : > { %v5471_v9 = vpop.f32.mrf.mxu1 }
 0x1bc   : > { %2447 = vmatmul.f32.gmra.mxu2 %v2349_v23 }
 0x1bd   : > { %1673 = vmatmul.f32.vlgmr.msrb.gmra.mxu3 %v1577_v29  ;;  %2020 = vmatmul.f32.gmra.mxu0 %v1864_v39  ;;  %v5485_v29 = vld [vmem:[#allocation2 + $0x51] sm:$0xff] }
 0x1be   : > { %2235 = vmatmul.f32.gmra.mxu1 %v5473_v15  ;;  %v5488_v39 = vld [vmem:[#allocation2 + $0x170] sm:$0xff]  ;;  %v5496_v55 = vpop.f32.mrf.mxu0 }
 0x1bf   : > { %v1468_v52 = vpop.f32.mrf.mxu2  ;;  %6625 = vst [vmem:[#allocation44_spill] sm:$0xff] %v5496_v55 }
 0x1c0   : > { %v1208_v63 = vpop.f32.mrf.mxu3 }
 0x1c1   : > { %v5481_v2 = vadd.f32 %v1465_v8, %v1208_v63 }
 0x1c3   : > { %6623 = vst [vmem:[#allocation42_spill] sm:$0xff] %v5481_v2  ;;  %v5483_v34 = vpop.f32.mrf.mxu1 }
 0x1c4   : > { %2450 = vmatmul.f32.gmra.mxu2 %v5485_v29 }
 0x1c5   : > { %1676 = vmatmul.f32.gmra.mxu3 %v1578_v47  ;;  %2023 = vmatmul.f32.gmra.mxu0 %v1865_v40  ;;  %v5503_v40 = vld [vmem:[#allocation2 + $0x190] sm:$0xff]  ;;  %v2682_v47 = vld [vmem:[%s6508_s4 + $0x360] sm:$0xff] }
 0x1c6   : > { %2238 = vmatmul.f32.gmra.mxu1 %v5488_v39  ;;  %2689 = vmatpush.msra.mxu3 %v2682_v47  ;;  %v5517_v33 = vpop.f32.mrf.mxu0 }
 0x1c7   : > { %v1471_v63 = vpop.f32.mrf.mxu2  ;;  %6627 = vst [vmem:[#allocation46_spill] sm:$0xff] %v5517_v33  ;;  %v2865_v33 = vld [vmem:[#allocation2 + $0x78] sm:$0xff] }
 0x1c8   : > { %v1211_v8 = vpop.f32.mrf.mxu3 }
 0x1c9   : > { %v5494_v30 = vadd.f32 %v1468_v52, %v1211_v8 }
 0x1cb   : > { %6624 = vst [vmem:[#allocation43_spill] sm:$0xff] %v5494_v30  ;;  %v5498_v41 = vpop.f32.mrf.mxu1  ;;  %v2866_v30 = vld [vmem:[#allocation2 + $0x80] sm:$0xff] }
 0x1cc   : > { %2453 = vmatmul.f32.gmra.mxu2 %v5500_v28 }
 0x1cd   : > { %1679 = vmatmul.f32.gmra.mxu3 %v2348_v44  ;;  %2959 = vmatmul.f32.vlgmr.msra.gmra.mxu0 %v5229_v5  ;;  %v2864_v44 = vld [vmem:[#allocation2 + $0x58] sm:$0xff] }
 0x1ce   : > { %2241 = vmatmul.f32.gmra.mxu1 %v5503_v40  ;;  %v5519_v5 = vld [vmem:[#allocation2 + $0x198] sm:$0xff] }
 0x1cf   : > { %v1474_v52 = vpop.f32.mrf.mxu2 }
 0x1d0   : > { %v1214_v35 = vpop.f32.mrf.mxu3 }
 0x1d1   : > { %v5510_v8 = vadd.f32 %v1471_v63, %v1214_v35  ;;  %v3196_v63 = vld [vmem:[%s6508_s4 + $0x460] sm:$0xff] }
 0x1d2   : > { %3203 = vmatpush.msra.mxu1 %v3196_v63 }
 0x1d3   : > { %6626 = vst [vmem:[#allocation45_spill] sm:$0xff] %v5510_v8  ;;  %v5512_v55 = vpop.f32.mrf.mxu1  ;;  %v5543_v8 = vld [vmem:[#allocation2 + $0xa1] sm:$0xff] }
 0x1d4   : > { %2456 = vmatmul.f32.gmra.mxu2 %v5514_v42 }
 0x1d5   : > { %1682 = vmatmul.f32.gmra.mxu3 %v2349_v23  ;;  %2962 = vmatmul.f32.gmra.mxu0 %v2864_v44  ;;  %v5533_v23 = vld [vmem:[#allocation2 + $0x1b8] sm:$0xff] }
 0x1d6   : > { %2244 = vmatmul.f32.gmra.mxu1 %v5519_v5  ;;  %v2681_v44 = vld [vmem:[%s6508_s4 + $0x358] sm:$0xff] }
 0x1d7   : > { %v1477_v47 = vpop.f32.mrf.mxu2  ;;  %2690 = vmatpush.msra.mxu3 %v2681_v44  ;;  %v3195_v44 = vld [vmem:[%s6508_s4 + $0x458] sm:$0xff] }
 0x1d8   : > { %v1217_v35 = vpop.f32.mrf.mxu3  ;;  %3204 = vmatpush.msra.mxu1 %v3195_v44  ;;  %v2680_v44 = vld [vmem:[%s6508_s4 + $0x350] sm:$0xff] }
 0x1d9   : > { %v5525_v22 = vadd.f32 %v1474_v52, %v1217_v35  ;;  %v5539_v52 = vpop.f32.mrf.mxu0  ;;  %2691 = vmatpush.msra.mxu3 %v2680_v44  ;;  %v3194_v44 = vld [vmem:[%s6508_s4 + $0x450] sm:$0xff] }
 0x1da   : > { %6629 = vst [vmem:[#allocation48_spill] sm:$0xff] %v5539_v52  ;;  %3205 = vmatpush.msra.mxu1 %v3194_v44 }
 0x1db   : > { %6628 = vst [vmem:[#allocation47_spill] sm:$0xff] %v5525_v22  ;;  %v5529_v14 = vpop.f32.mrf.mxu1 }
 0x1dc   : > { %2459 = vmatmul.f32.gmra.mxu2 %v5527_v18 }
 0x1dd   : > { %1685 = vmatmul.f32.gmra.mxu3 %v5485_v29  ;;  %2965 = vmatmul.f32.gmra.mxu0 %v2865_v33  ;;  %v5547_v33 = vld [vmem:[#allocation2 + $0x1c0] sm:$0xff] }
 0x1de   : > { %2247 = vmatmul.f32.gmra.mxu1 %v5533_v23 }
 0x1df   : > { %v1480_v63 = vpop.f32.mrf.mxu2 }
 0x1e0   : > { %v1220_v35 = vpop.f32.mrf.mxu3 }
 0x1e1   : > { %v5541_v22 = vadd.f32 %v1477_v47, %v1220_v35  ;;  %v5555_v52 = vpop.f32.mrf.mxu0 }
 0x1e2   : > { %6631 = vst [vmem:[#allocation50_spill] sm:$0xff] %v5555_v52 }
 0x1e3   : > { %6630 = vst [vmem:[#allocation49_spill] sm:$0xff] %v5541_v22  ;;  %v5549_v2 = vpop.f32.mrf.mxu1 }
 0x1e4   : > { %2462 = vmatmul.f32.gmra.mxu2 %v5543_v8 }
 0x1e5   : > { %1688 = vmatmul.f32.gmra.mxu3 %v5500_v28  ;;  %2968 = vmatmul.f32.gmra.mxu0 %v2866_v30  ;;  %v5563_v30 = vld [vmem:[#allocation2 + $0x1e0] sm:$0xff] }
 0x1e6   : > { %2250 = vmatmul.f32.gmra.mxu1 %v5547_v33 }
 0x1e7   : > { %v1483_v47 = vpop.f32.mrf.mxu2 }
 0x1e8   : > { %v1223_v35 = vpop.f32.mrf.mxu3 }
 0x1e9   : > { %v5557_v22 = vadd.f32 %v1480_v63, %v1223_v35 }
 0x1eb   : > { %6632 = vst [vmem:[#allocation51_spill] sm:$0xff] %v5557_v22  ;;  %v5569_v63 = vpop.f32.mrf.mxu1  ;;  %v5573_v22 = vpop.f32.mrf.mxu0 }
 0x1ec   : > { %2465 = vmatmul.f32.gmra.mxu2 %v5559_v7  ;;  %6634 = vst [vmem:[#allocation53_spill] sm:$0xff] %v5573_v22 }
 0x1ed   : > { %1691 = vmatmul.f32.gmra.mxu3 %v5514_v42  ;;  %2971 = vmatmul.f32.gmra.mxu0 %v2867_v57  ;;  %v5579_v57 = vld [vmem:[#allocation2 + $0x1e8] sm:$0xff] }
 0x1ee   : > { %2253 = vmatmul.f32.gmra.mxu1 %v5563_v30 }
 0x1ef   : > { %v1486_v3 = vpop.f32.mrf.mxu2 }
 0x1f0   : > { %v1226_v35 = vpop.f32.mrf.mxu3 }
 0x1f1   : > { %v5571_v52 = vadd.f32 %v1483_v47, %v1226_v35 }
 0x1f3   : > { %6633 = vst [vmem:[#allocation52_spill] sm:$0xff] %v5571_v52  ;;  %v5587_v52 = vpop.f32.mrf.mxu1  ;;  %v5592_v17 = vpop.f32.mrf.mxu0 }
 0x1f4   : > { %2468 = vmatmul.f32.gmra.mxu2 %v5575_v0  ;;  %6636 = vst [vmem:[#allocation55_spill] sm:$0xff] %v5592_v17  ;;  %v2870_v17 = vld [vmem:[#allocation2 + $0xd0] sm:$0xff] }
 0x1f5   : > { %1694 = vmatmul.f32.gmra.mxu3 %v5527_v18  ;;  %2974 = vmatmul.f32.gmra.mxu0 %v2868_v48  ;;  %v5595_v48 = vld [vmem:[#allocation2 + $0x208] sm:$0xff] }
 0x1f6   : > { %2256 = vmatmul.f32.gmra.mxu1 %v5579_v57 }
 0x1f7   : > { %v1489_v47 = vpop.f32.mrf.mxu2 }
 0x1f8   : > { %v1229_v35 = vpop.f32.mrf.mxu3 }
 0x1f9   : > { %v5585_v22 = vadd.f32 %v1486_v3, %v1229_v35  ;;  %v2679_v3 = vld [vmem:[%s6508_s4 + $0x348] sm:$0xff] }
 0x1fa   : > { %2692 = vmatpush.msra.mxu3 %v2679_v3  ;;  %v3193_v3 = vld [vmem:[%s6508_s4 + $0x448] sm:$0xff] }
 0x1fb   : > { %6635 = vst [vmem:[#allocation54_spill] sm:$0xff] %v5585_v22  ;;  %v5605_v31 = vpop.f32.mrf.mxu1  ;;  %3206 = vmatpush.msra.mxu1 %v3193_v3 }
 0x1fc   : > { %2471 = vmatmul.f32.gmra.mxu2 %v5589_v13  ;;  %6639 = vst [vmem:[#allocation58_spill] sm:$0xff] %v5605_v31 }
 0x1fd   : > { %1697 = vmatmul.f32.gmra.mxu3 %v5543_v8  ;;  %2977 = vmatmul.f32.gmra.mxu0 %v2869_v61  ;;  %v5609_v61 = vld [vmem:[#allocation2 + $0x210] sm:$0xff] }
 0x1fe   : > { %2259 = vmatmul.f32.gmra.mxu1 %v5595_v48  ;;  %6640 = vst [vmem:[#allocation59_spill] sm:$0xff] %v5609_v61 }
 0x1ff   : > { %v1492_v44 = vpop.f32.mrf.mxu2  ;;  %3207 = vmatpush.msra.mxu1 %v3192_v20 }
 0x200   : > { %v1232_v35 = vpop.f32.mrf.mxu3 }
 0x201   : > { %v5601_v22 = vadd.f32 %v1489_v47, %v1232_v35  ;;  %v5615_v47 = vpop.f32.mrf.mxu0 }
 0x202   : > { %6641 = vst [vmem:[#allocation60_spill] sm:$0xff] %v5615_v47 }
 0x203   : > { %6637 = vst [vmem:[#allocation56_spill] sm:$0xff] %v5601_v22  ;;  %v5628_v47 = vpop.f32.mrf.mxu1 }
 0x204   : > { %2474 = vmatmul.f32.gmra.mxu2 %v5603_v54  ;;  %6645 = vst [vmem:[#allocation64_spill] sm:$0xff] %v5628_v47 }
 0x205   : > { %1700 = vmatmul.f32.gmra.mxu3 %v5559_v7  ;;  %2980 = vmatmul.f32.gmra.mxu0 %v2870_v17  ;;  %v2871_v17 = vld [vmem:[#allocation2 + $0xf0] sm:$0xff] }
 0x206   : > { %2262 = vmatmul.f32.gmra.mxu1 %v5609_v61  ;;  %v2872_v61 = vld [vmem:[#allocation2 + $0xf8] sm:$0xff] }
 0x207   : > { %v1495_v35 = vpop.f32.mrf.mxu2 }
 0x208   : > { %v1235_v22 = vpop.f32.mrf.mxu3 }
 0x209   : > { %v5617_v31 = vadd.f32 %v1492_v44, %v1235_v22  ;;  %v2678_v22 = vld [vmem:[%s6508_s4 + $0x340] sm:$0xff]  ;;  %v3191_v44 = vld [vmem:[%s6508_s4 + $0x438] sm:$0xff] }
 0x20a   : > { %2693 = vmatpush.msra.mxu3 %v2678_v22  ;;  %3208 = vmatpush.msra.mxu1 %v3191_v44  ;;  %v3188_v22 = vld [vmem:[%s6508_s4 + $0x420] sm:$0xff]  ;;  %v5654_v44 = vld [vmem:[#allocation2 + $0x238] sm:$0xff] }
 0x20b   : > { %6642 = vst [vmem:[#allocation61_spill] sm:$0xff] %v5617_v31  ;;  %v5640_v31 = vpop.f32.mrf.mxu0 }
 0x20c   : > { %2477 = vmatmul.f32.gmra.mxu2 %v5619_v21  ;;  %6646 = vst [vmem:[#allocation65_spill] sm:$0xff] %v5640_v31  ;;  %v3186_v31 = vld [vmem:[%s6508_s4 + $0x410] sm:$0xff] }
 0x20d   : > { %1703 = vmatmul.f32.gmra.mxu3 %v5575_v0  ;;  %2983 = vmatmul.f32.gmra.mxu0 %v2871_v17  ;;  %v3190_v17 = vld [vmem:[%s6508_s4 + $0x430] sm:$0xff]  ;;  %6649 = vst [vmem:[#allocation68_spill] sm:$0xff] %v5654_v44 }
 0x20e   : > { %2265 = vmatmul.f32.gmra.mxu1 %v5626_v24  ;;  %v3189_v24 = vld [vmem:[%s6508_s4 + $0x428] sm:$0xff] }
 0x20f   : > { %v1498_v3 = vpop.f32.mrf.mxu2  ;;  %3209 = vmatpush.msra.mxu1 %v3190_v17 }
 0x210   : > { %v1238_v20 = vpop.f32.mrf.mxu3 }
 0x211   : > { %v5642_v47 = vadd.f32 %v1495_v35, %v1238_v20  ;;  %3210 = vmatpush.msra.mxu1 %v3189_v24  ;;  %v3187_v35 = vld [vmem:[%s6508_s4 + $0x418] sm:$0xff]  ;;  %v5660_v24 = vpop.f32.mrf.mxu1 }
 0x212   : > { %6650 = vst [vmem:[#allocation69_spill] sm:$0xff] %v5660_v24  ;;  %v5676_v24 = vld [vmem:[#allocation2 + $0x258] sm:$0xff] }
 0x213   : > { %6647 = vst [vmem:[#allocation66_spill] sm:$0xff] %v5642_v47  ;;  %3211 = vmatpush.msra.mxu1 %v3188_v22  ;;  %v5667_v4 = vpop.f32.mrf.mxu0  ;;  %v3185_v22 = vld [vmem:[%s6508_s4 + $0x408] sm:$0xff] }
 0x214   : > { %2480 = vmatmul.f32.gmra.mxu2 %v5647_v51  ;;  %6652 = vst [vmem:[#allocation71_spill] sm:$0xff] %v5667_v4 }
 0x215   : > { %1706 = vmatmul.f32.gmra.mxu3 %v5589_v13  ;;  %2986 = vmatmul.f32.gmra.mxu0 %v2872_v61  ;;  %v5669_v61 = vld [vmem:[#allocation2 + $0x121] sm:$0xff]  ;;  %6653 = vst [vmem:[#allocation72_spill] sm:$0xff] %v5676_v24 }
 0x216   : > { %2268 = vmatmul.f32.gmra.mxu1 %v5654_v44  ;;  %v2873_v44 = vld [vmem:[#allocation2 + $0x118] sm:$0xff] }
 0x217   : > { %v1501_v20 = vpop.f32.mrf.mxu2  ;;  %3212 = vmatpush.msra.mxu1 %v3187_v35 }
 0x218   : > { %v1241_v17 = vpop.f32.mrf.mxu3 }
 0x219   : > { %v5665_v47 = vadd.f32 %v1498_v3, %v1241_v17  ;;  %3213 = vmatpush.msra.mxu1 %v3186_v31  ;;  %v2677_v3 = vld [vmem:[%s6508_s4 + $0x338] sm:$0xff]  ;;  %v3184_v31 = vld [vmem:[%s6508_s4 + $0x400] sm:$0xff] }
 0x21a   : > { %2694 = vmatpush.msra.mxu3 %v2677_v3 }
 0x21b   : > { %6651 = vst [vmem:[#allocation70_spill] sm:$0xff] %v5665_v47  ;;  %3214 = vmatpush.msra.mxu1 %v3185_v22  ;;  %v5687_v47 = vpop.f32.mrf.mxu1 }
 0x21c   : > { %2483 = vmatmul.f32.gmra.mxu2 %v5669_v61  ;;  %6655 = vst [vmem:[#allocation74_spill] sm:$0xff] %v5687_v47 }
 0x21d   : > { %1709 = vmatmul.f32.gmra.mxu3 %v5603_v54  ;;  %2989 = vmatmul.f32.gmra.mxu0 %v2873_v44  ;;  %v5689_v44 = vld [vmem:[#allocation2 + $0x141] sm:$0xff]  ;;  %v5692_v54 = vpop.f32.mrf.mxu0 }
 0x21e   : > { %2271 = vmatmul.f32.gmra.mxu1 %v5676_v24  ;;  %6656 = vst [vmem:[#allocation75_spill] sm:$0xff] %v5692_v54  ;;  %v5695_v24 = vld [vmem:[#allocation2 + $0x260] sm:$0xff] }
 0x21f   : > { %v1504_v35 = vpop.f32.mrf.mxu2  ;;  %3215 = vmatpush.msra.mxu1 %v3184_v31  ;;  %6657 = vst [vmem:[#allocation76_spill] sm:$0xff] %v5695_v24  ;;  %v5700_v31 = vld [vmem:[#allocation2 + $0x280] sm:$0xff] }
 0x220   : > { %v1244_v17 = vpop.f32.mrf.mxu3  ;;  %6659 = vst [vmem:[#allocation78_spill] sm:$0xff] %v5700_v31 }
 0x221   : > { %v5685_v4 = vadd.f32 %v1501_v20, %v1244_v17  ;;  %v5702_v17 = vld [vmem:[#allocation2 + $0x149] sm:$0xff] }
 0x223   : > { %6654 = vst [vmem:[#allocation73_spill] sm:$0xff] %v5685_v4  ;;  %v5704_v47 = vpop.f32.mrf.mxu1  ;;  %v2875_v4 = vld [vmem:[#allocation2 + $0x140] sm:$0xff] }
 0x224   : > { %2486 = vmatmul.f32.gmra.mxu2 %v5689_v44  ;;  %6660 = vst [vmem:[#allocation79_spill] sm:$0xff] %v5704_v47  ;;  %v5716_v47 = vld [vmem:[#allocation2 + $0x288] sm:$0xff] }
 0x225   : > { %1712 = vmatmul.f32.gmra.mxu3 %v5619_v21  ;;  %2992 = vmatmul.f32.gmra.mxu0 %v2874_v26  ;;  %v5709_v26 = vpop.f32.mrf.mxu0  ;;  %v2876_v21 = vld [vmem:[#allocation2 + $0x148] sm:$0xff] }
 0x226   : > { %2274 = vmatmul.f32.gmra.mxu1 %v5695_v24  ;;  %6661 = vst [vmem:[#allocation80_spill] sm:$0xff] %v5709_v26  ;;  %v5718_v24 = vld [vmem:[#allocation2 + $0x169] sm:$0xff] }
 0x227   : > { %v1507_v22 = vpop.f32.mrf.mxu2 }
 0x228   : > { %v1247_v20 = vpop.f32.mrf.mxu3 }
 0x229   : > { %v5698_v3 = vadd.f32 %v1504_v35, %v1247_v20  ;;  %v2676_v35 = vld [vmem:[%s6508_s4 + $0x330] sm:$0xff] }
 0x22a   : > { %2695 = vmatpush.msra.mxu3 %v2676_v35  ;;  %v5729_v35 = vld [vmem:[#allocation2 + $0x171] sm:$0xff] }
 0x22b   : > { %6658 = vst [vmem:[#allocation77_spill] sm:$0xff] %v5698_v3 }
 0x22c   : > { %2489 = vmatmul.f32.gmra.mxu2 %v5702_v17 }
 0x22d   : > { %1715 = vmatmul.f32.gmra.mxu3 %v5647_v51  ;;  %2995 = vmatmul.f32.gmra.mxu0 %v2875_v4  ;;  %v5722_v4 = vpop.f32.mrf.mxu1  ;;  %v5725_v51 = vpop.f32.mrf.mxu0 }
 0x22e   : > { %2277 = vmatmul.f32.gmra.mxu1 %v5700_v31  ;;  %6663 = vst [vmem:[#allocation82_spill] sm:$0xff] %v5722_v4 }
 0x22f   : > { %v1510_v54 = vpop.f32.mrf.mxu2  ;;  %6664 = vst [vmem:[#allocation83_spill] sm:$0xff] %v5725_v51 }
 0x230   : > { %v1250_v20 = vpop.f32.mrf.mxu3 }
 0x231   : > { %v5714_v3 = vadd.f32 %v1507_v22, %v1250_v20  ;;  %v2675_v20 = vld [vmem:[%s6508_s4 + $0x328] sm:$0xff] }
 0x232   : > { %2696 = vmatpush.msra.mxu3 %v2675_v20 }
 0x233   : > { %6662 = vst [vmem:[#allocation81_spill] sm:$0xff] %v5714_v3 }
 0x234   : > { %2492 = vmatmul.f32.gmra.mxu2 %v5718_v24 }
 0x235   : > { %1718 = vmatmul.f32.gmra.mxu3 %v5669_v61  ;;  %2998 = vmatmul.f32.gmra.mxu0 %v2876_v21  ;;  %v1513_v21 = vadd.f32 %v5188_v50, %v5199_v12  ;;  %v5740_v51 = vpop.f32.mrf.mxu1  ;;  %v1514_v12 = vadd.f32 %v5210_v62, %v5216_v36  ;;  %v1515_v62 = vadd.f32 %v5222_v1, %v5224_v6 }
 0x236   : > { %2280 = vmatmul.f32.gmra.mxu1 %v5716_v47  ;;  %v1516_v6 = vadd.f32 %v5235_v27, %v5237_v10  ;;  %v1517_v27 = vadd.f32 %v5246_v37, %v5248_v32  ;;  %v1518_v32 = vadd.f32 %v5257_v56, %v5259_v19  ;;  %v1519_v56 = vadd.f32 %v5268_v46, %v5270_v11 }
 0x237   : > { %v2445_v31 = vpop.f32.mrf.mxu2  ;;  %v1520_v11 = vadd.f32 %v5279_v45, %v5281_v59  ;;  %v6672_v45 = vld [vmem:[#allocation57_spill] sm:$0xff] }
 0x238   : > { %v1253_v26 = vpop.f32.mrf.mxu3  ;;  %v6673_v59 = vld [vmem:[#allocation21_spill] sm:$0xff] }
 0x239   : > { %v5727_v22 = vadd.f32 %v1510_v54, %v1253_v26 }
 0x23b   : > { %6665 = vst [vmem:[#allocation84_spill] sm:$0xff] %v5727_v22  ;;  %v5742_v22 = vpop.f32.mrf.mxu0 }
 0x23c   : > { %2495 = vmatmul.f32.gmra.mxu2 %v5729_v35  ;;  %6666 = vst [vmem:[#allocation85_spill] sm:$0xff] %v5742_v22 }
 0x23d   : > { %1721 = vmatmul.f32.gmra.mxu3 %v5689_v44  ;;  %3001 = vmatmul.f32.gmra.mxu0 %v5473_v15  ;;  %v5745_v15 = vld [vmem:[#allocation2 + $0x191] sm:$0xff] }
 0x23e   : > { %3216 = vmatmul.f32.vlgmr.msra.gmra.mxu1 %v5485_v29 }
 0x23f   : > { %v2448_v4 = vpop.f32.mrf.mxu2 }
 0x240   : > { %v1674_v54 = vpop.f32.mrf.mxu3 }
 0x241   : > { %v1770_v26 = vadd.f32 %v1674_v54, %v1513_v21 }
 0x243   : > { %v2027_v3 = vadd.f32 %v5226_v25, %v1770_v26  ;;  %v5756_v25 = vpop.f32.mrf.mxu1  ;;  %v5759_v26 = vld [vmem:[#allocation2 + $0x199] sm:$0xff] }
 0x244   : > { %2498 = vmatmul.f32.gmra.mxu2 %v5745_v15 }
 0x245   : > { %v2284_v50 = vadd.f32 %v5471_v9, %v2027_v3  ;;  %1724 = vmatmul.f32.gmra.mxu3 %v5702_v17  ;;  %3004 = vmatmul.f32.gmra.mxu0 %v5488_v39  ;;  %v5762_v3 = vpop.f32.mrf.mxu0 }
 0x246   : > { %3219 = vmatmul.f32.gmra.mxu1 %v5500_v28  ;;  %6667 = vst [vmem:[#allocation86_spill] sm:$0xff] %v5762_v3 }
 0x247   : > { %v5754_v29 = vadd.f32 %v2445_v31, %v2284_v50  ;;  %v2451_v9 = vpop.f32.mrf.mxu2  ;;  %v5776_v50 = vld [vmem:[#allocation2 + $0x1b9] sm:$0xff] }
 0x248   : > { %v1677_v21 = vpop.f32.mrf.mxu3 }
 0x249   : > { %v1771_v20 = vadd.f32 %v1677_v21, %v1514_v12 }
 0x24b   : > { %v2028_v54 = vadd.f32 %v5239_v53, %v1771_v20  ;;  %v2674_v53 = vld [vmem:[%s6508_s4 + $0x320] sm:$0xff]  ;;  %v5778_v12 = vpop.f32.mrf.mxu1 }
 0x24c   : > { %2501 = vmatmul.f32.gmra.mxu2 %v5759_v26  ;;  %2697 = vmatpush.msra.mxu3 %v2674_v53 }
 0x24d   : > { %v2285_v28 = vadd.f32 %v5483_v34, %v2028_v54  ;;  %1727 = vmatmul.f32.gmra.mxu3 %v5718_v24  ;;  %3007 = vmatmul.f32.gmra.mxu0 %v5503_v40  ;;  %v5787_v40 = vpop.f32.mrf.mxu0  ;;  %v5792_v54 = vld [vmem:[#allocation2 + $0x1c1] sm:$0xff] }
 0x24e   : > { %3222 = vmatmul.f32.gmra.mxu1 %v5514_v42  ;;  %6668 = vst [vmem:[#allocation87_spill] sm:$0xff] %v5787_v40 }
 0x24f   : > { %v5770_v36 = vadd.f32 %v2448_v4, %v2285_v28  ;;  %v2454_v1 = vpop.f32.mrf.mxu2 }
 0x250   : > { %v1680_v39 = vpop.f32.mrf.mxu3 }
 0x251   : > { %v1772_v31 = vadd.f32 %v1680_v39, %v1515_v62  ;;  %v5811_v62 = vld [vmem:[#allocation2 + $0x1e1] sm:$0xff] }
 0x253   : > { %v2029_v34 = vadd.f32 %v5250_v38, %v1772_v31 }
 0x254   : > { %2504 = vmatmul.f32.gmra.mxu2 %v5776_v50 }
 0x255   : > { %v2286_v42 = vadd.f32 %v5498_v41, %v2029_v34  ;;  %1730 = vmatmul.f32.gmra.mxu3 %v5729_v35  ;;  %3010 = vmatmul.f32.gmra.mxu0 %v5519_v5 }
 0x256   : > { %3225 = vmatmul.f32.gmra.mxu1 %v5527_v18  ;;  %v5798_v18 = vpop.f32.mrf.mxu1 }
 0x257   : > { %v5789_v38 = vadd.f32 %v2451_v9, %v2286_v42  ;;  %v2457_v9 = vpop.f32.mrf.mxu2  ;;  %v5827_v42 = vld [vmem:[#allocation2 + $0x1e9] sm:$0xff] }
 0x258   : > { %v1683_v4 = vpop.f32.mrf.mxu3 }
 0x259   : > { %v1773_v21 = vadd.f32 %v1683_v4, %v1516_v6  ;;  %v5844_v4 = vld [vmem:[#allocation2 + $0x209] sm:$0xff] }
 0x25b   : > { %v2030_v20 = vadd.f32 %v5261_v60, %v1773_v21  ;;  %v2673_v60 = vld [vmem:[%s6508_s4 + $0x318] sm:$0xff] }
 0x25c   : > { %2507 = vmatmul.f32.gmra.mxu2 %v5792_v54  ;;  %2698 = vmatpush.msra.mxu3 %v2673_v60 }
 0x25d   : > { %v2287_v41 = vadd.f32 %v5512_v55, %v2030_v20  ;;  %1733 = vmatmul.f32.gmra.mxu3 %v5745_v15  ;;  %3013 = vmatmul.f32.gmra.mxu0 %v5533_v23  ;;  %v5808_v55 = vpop.f32.mrf.mxu0 }
 0x25e   : > { %3228 = vmatmul.f32.gmra.mxu1 %v5543_v8  ;;  %6669 = vst [vmem:[#allocation88_spill] sm:$0xff] %v5808_v55  ;;  %v5822_v53 = vpop.f32.mrf.mxu1 }
 0x25f   : > { %v5803_v10 = vadd.f32 %v2454_v1, %v2287_v41  ;;  %v2460_v31 = vpop.f32.mrf.mxu2 }
 0x260   : > { %v1686_v5 = vpop.f32.mrf.mxu3 }
 0x261   : > { %v1774_v28 = vadd.f32 %v1686_v5, %v1517_v27  ;;  %v5858_v27 = vld [vmem:[#allocation2 + $0x211] sm:$0xff] }
 0x263   : > { %v2031_v23 = vadd.f32 %v5272_v43, %v1774_v28  ;;  %v2671_v28 = vld [vmem:[%s6508_s4 + $0x308] sm:$0xff] }
 0x264   : > { %2510 = vmatmul.f32.gmra.mxu2 %v5811_v62 }
 0x265   : > { %v2288_v37 = vadd.f32 %v5529_v14, %v2031_v23  ;;  %1736 = vmatmul.f32.gmra.mxu3 %v5759_v26  ;;  %3016 = vmatmul.f32.gmra.mxu0 %v5547_v33  ;;  %v5824_v34 = vpop.f32.mrf.mxu0 }
 0x266   : > { %3231 = vmatmul.f32.gmra.mxu1 %v5559_v7  ;;  %6670 = vst [vmem:[#allocation89_spill] sm:$0xff] %v5824_v34  ;;  %v5841_v6 = vpop.f32.mrf.mxu1 }
 0x267   : > { %v5820_v8 = vadd.f32 %v2457_v9, %v2288_v37  ;;  %v5878_v37 = vld [vmem:[#allocation2 + $0x231] sm:$0xff] }
 0x268   : > { %v1689_v43 = vpop.f32.mrf.mxu3 }
 0x269   : > { %v1775_v39 = vadd.f32 %v1689_v43, %v1518_v32  ;;  %v6676_v43 = vld [vmem:[#allocation62_spill] sm:$0xff] }
 0x26b   : > { %v2032_v14 = vadd.f32 %v5283_v49, %v1775_v39  ;;  %v2672_v49 = vld [vmem:[%s6508_s4 + $0x310] sm:$0xff]  ;;  %v6677_v39 = vld [vmem:[#allocation23_spill] sm:$0xff] }
 0x26c   : > { %2513 = vmatmul.f32.gmra.mxu2 %v5827_v42  ;;  %2699 = vmatpush.msra.mxu3 %v2672_v49 }
 0x26d   : > { %v2289_v7 = vadd.f32 %v5549_v2, %v2032_v14  ;;  %1739 = vmatmul.f32.gmra.mxu3 %v5776_v50  ;;  %3019 = vmatmul.f32.gmra.mxu0 %v5563_v30  ;;  %v2463_v30 = vpop.f32.mrf.mxu2 }
 0x26e   : > { %3234 = vmatmul.f32.gmra.mxu1 %v5575_v0  ;;  %v5847_v0 = vpop.f32.mrf.mxu0  ;;  %v5860_v60 = vpop.f32.mrf.mxu1  ;;  %2700 = vmatpush.msra.mxu3 %v2671_v28 }
 0x26f   : > { %v5836_v19 = vadd.f32 %v2460_v31, %v2289_v7  ;;  %6671 = vst [vmem:[#allocation90_spill] sm:$0xff] %v5847_v0  ;;  %v6678_v31 = vld [vmem:[#allocation22_spill] sm:$0xff] }
 0x270   : > { %v1692_v33 = vpop.f32.mrf.mxu3  ;;  %v1522_v14 = vadd.f32 %v6678_v31, %v6677_v39  ;;  %v5921_v39 = vld [vmem:[#allocation2 + $0x261] sm:$0xff] }
 0x271   : > { %v1776_v1 = vadd.f32 %v1692_v33, %v1519_v56  ;;  %v5892_v33 = vld [vmem:[#allocation2 + $0x239] sm:$0xff] }
 0x273   : > { %v2033_v2 = vadd.f32 %v5303_v16, %v1776_v1  ;;  %v6679_v1 = vld [vmem:[#allocation63_spill] sm:$0xff] }
 0x274   : > { %2516 = vmatmul.f32.gmra.mxu2 %v5844_v4 }
 0x275   : > { %v2290_v46 = vadd.f32 %v5569_v63, %v2033_v2  ;;  %1742 = vmatmul.f32.gmra.mxu3 %v5792_v54  ;;  %3022 = vmatmul.f32.gmra.mxu0 %v5579_v57  ;;  %v6674_v57 = vld [vmem:[#allocation20_spill] sm:$0xff]  ;;  %v6680_v2 = vld [vmem:[#allocation67_spill] sm:$0xff] }
 0x276   : > { %3237 = vmatmul.f32.gmra.mxu1 %v5589_v13  ;;  %v2466_v13 = vpop.f32.mrf.mxu2  ;;  %v1521_v5 = vadd.f32 %v6674_v57, %v6673_v59  ;;  %v5869_v9 = vpop.f32.mrf.mxu0  ;;  %v6684_v59 = vld [vmem:[#allocation68_spill] sm:$0xff] }
 0x277   : > { %v5855_v21 = vadd.f32 %v2463_v30, %v2290_v46  ;;  %v5883_v32 = vpop.f32.mrf.mxu1  ;;  %v6681_v30 = vld [vmem:[#allocation25_spill] sm:$0xff]  ;;  %v6682_v46 = vld [vmem:[#allocation24_spill] sm:$0xff] }
 0x278   : > { %v1695_v16 = vpop.f32.mrf.mxu3  ;;  %v6685_v57 = vld [vmem:[#allocation28_spill] sm:$0xff] }
 0x279   : > { %v1777_v20 = vadd.f32 %v1695_v16, %v1520_v11  ;;  %v1523_v11 = vadd.f32 %v6682_v46, %v6681_v30  ;;  %v2670_v16 = vld [vmem:[%s6508_s4 + $0x300] sm:$0xff] }
 0x27a   : > { %2701 = vmatpush.msra.mxu3 %v2670_v16  ;;  %v5933_v46 = vld [vmem:[#allocation2 + $0x281] sm:$0xff]  ;;  %v6692_v16 = vld [vmem:[#allocation76_spill] sm:$0xff] }
 0x27b   : > { %v2034_v41 = vadd.f32 %v5327_v58, %v1777_v20 }
 0x27c   : > { %2519 = vmatmul.f32.gmra.mxu2 %v5858_v27 }
 0x27d   : > { %v2291_v63 = vadd.f32 %v5587_v52, %v2034_v41  ;;  %1745 = vmatmul.f32.gmra.mxu3 %v5811_v62  ;;  %3025 = vmatmul.f32.gmra.mxu0 %v5595_v48  ;;  %v6675_v48 = vld [vmem:[#allocation59_spill] sm:$0xff] }
 0x27e   : > { %3240 = vmatmul.f32.gmra.mxu1 %v6672_v45  ;;  %v5888_v56 = vpop.f32.mrf.mxu0  ;;  %v5909_v45 = vld [vmem:[#allocation2 + $0x259] sm:$0xff] }
 0x27f   : > { %v5871_v58 = vadd.f32 %v2466_v13, %v2291_v63  ;;  %v5903_v20 = vpop.f32.mrf.mxu1 }
 0x280   : > { %v1698_v23 = vpop.f32.mrf.mxu3  ;;  %6683 = vst [vmem:[#allocation57_spill] sm:$0xff] %v5903_v20 }
 0x281   : > { %v5876_v52 = vadd.f32 %v1698_v23, %v1521_v5  ;;  %v6686_v5 = vld [vmem:[#allocation27_spill] sm:$0xff] }
 0x282   : > { %v1524_v28 = vadd.f32 %v6686_v5, %v6685_v57 }
 0x284   : > { %2522 = vmatmul.f32.gmra.mxu2 %v5878_v37 }
 0x285   : > { %1748 = vmatmul.f32.gmra.mxu3 %v5827_v42  ;;  %3028 = vmatmul.f32.gmra.mxu0 %v6675_v48 }
 0x286   : > { %3243 = vmatmul.f32.gmra.mxu1 %v6676_v43  ;;  %v5907_v13 = vpop.f32.mrf.mxu0 }
 0x287   : > { %v5919_v43 = vpop.f32.mrf.mxu1 }
 0x288   : > { %v1701_v7 = vpop.f32.mrf.mxu3  ;;  %6687 = vst [vmem:[#allocation21_spill] sm:$0xff] %v5919_v43 }
 0x289   : > { %v5890_v49 = vadd.f32 %v1701_v7, %v1522_v14  ;;  %v6688_v14 = vld [vmem:[#allocation72_spill] sm:$0xff]  ;;  %v6690_v7 = vld [vmem:[#allocation29_spill] sm:$0xff] }
 0x28c   : > { %2525 = vmatmul.f32.gmra.mxu2 %v5892_v33 }
 0x28d   : > { %1751 = vmatmul.f32.gmra.mxu3 %v5844_v4  ;;  %3031 = vmatmul.f32.gmra.mxu0 %v6679_v1 }
 0x28e   : > { %3246 = vmatmul.f32.gmra.mxu1 %v6680_v2  ;;  %v5924_v31 = vpop.f32.mrf.mxu0 }
 0x290   : > { %v1704_v41 = vpop.f32.mrf.mxu3 }
 0x291   : > { %v5905_v63 = vadd.f32 %v1704_v41, %v1523_v11  ;;  %v5935_v11 = vpop.f32.mrf.mxu1  ;;  %v6693_v41 = vld [vmem:[#allocation33_spill] sm:$0xff] }
 0x292   : > { %6691 = vst [vmem:[#allocation20_spill] sm:$0xff] %v5935_v11 }
 0x294   : > { %2528 = vmatmul.f32.gmra.mxu2 %v5909_v45 }
 0x295   : > { %1754 = vmatmul.f32.gmra.mxu3 %v5858_v27  ;;  %3034 = vmatmul.f32.gmra.mxu0 %v6684_v59 }
 0x296   : > { %3249 = vmatmul.f32.gmra.mxu1 %v5669_v61  ;;  %v6689_v61 = vld [vmem:[#allocation31_spill] sm:$0xff]  ;;  %v5943_v57 = vpop.f32.mrf.mxu0 }
 0x297   : > { %v1525_v1 = vadd.f32 %v6690_v7, %v6689_v61  ;;  %v6698_v7 = vld [vmem:[#allocation35_spill] sm:$0xff] }
 0x298   : > { %v1707_v23 = vpop.f32.mrf.mxu3 }
 0x299   : > { %v5917_v48 = vadd.f32 %v1707_v23, %v1524_v28  ;;  %v5947_v23 = vld [vmem:[#allocation2 + $0x289] sm:$0xff]  ;;  %v5952_v61 = vpop.f32.mrf.mxu1 }
 0x29a   : > { %6696 = vst [vmem:[#allocation59_spill] sm:$0xff] %v5952_v61 }
 0x29c   : > { %2531 = vmatmul.f32.gmra.mxu2 %v5921_v39 }
 0x29d   : > { %1757 = vmatmul.f32.gmra.mxu3 %v5878_v37  ;;  %3037 = vmatmul.f32.gmra.mxu0 %v6688_v14  ;;  %v6695_v14 = vld [vmem:[#allocation78_spill] sm:$0xff] }
 0x29e   : > { %3252 = vmatmul.f32.gmra.mxu1 %v5689_v44  ;;  %v6694_v44 = vld [vmem:[#allocation32_spill] sm:$0xff] }
 0x29f   : > { %v1526_v59 = vadd.f32 %v6694_v44, %v6693_v41  ;;  %v6699_v44 = vld [vmem:[#allocation39_spill] sm:$0xff] }
 0x2a0   : > { %v1710_v2 = vpop.f32.mrf.mxu3 }
 0x2a1   : > { %v5931_v30 = vadd.f32 %v1710_v2, %v1525_v1 }
 0x2a4   : > { %2534 = vmatmul.f32.gmra.mxu2 %v5933_v46 }
 0x2a5   : > { %1760 = vmatmul.f32.gmra.mxu3 %v5892_v33  ;;  %3040 = vmatmul.f32.gmra.mxu0 %v6692_v16  ;;  %v5957_v16 = vpop.f32.mrf.mxu0 }
 0x2a6   : > { %3255 = vmatmul.f32.gmra.mxu1 %v5702_v17  ;;  %v6697_v17 = vld [vmem:[#allocation36_spill] sm:$0xff] }
 0x2a7   : > { %v1527_v1 = vadd.f32 %v6698_v7, %v6697_v17  ;;  %v2606_v7 = vld [vmem:[#allocation2 + $0x67] sm:$0xff] }
 0x2a8   : > { %v1713_v5 = vpop.f32.mrf.mxu3 }
 0x2a9   : > { %v5945_v28 = vadd.f32 %v1713_v5, %v1526_v59  ;;  %v6700_v59 = vld [vmem:[#allocation38_spill] sm:$0xff] }
 0x2aa   : > { %v1528_v5 = vadd.f32 %v6700_v59, %v6699_v44  ;;  %v2607_v44 = vld [vmem:[#allocation2 + $0x6f] sm:$0xff] }
 0x2ac   : > { %2537 = vmatmul.f32.gmra.mxu2 %v5947_v23 }
 0x2ad   : > { %1763 = vmatmul.f32.gmra.mxu3 %v5909_v45  ;;  %3043 = vmatmul.f32.gmra.mxu0 %v6695_v14  ;;  %v5966_v14 = vpop.f32.mrf.mxu1  ;;  %v5970_v17 = vpop.f32.mrf.mxu0 }
 0x2ae   : > { %3258 = vmatmul.f32.gmra.mxu1 %v5718_v24  ;;  %6701 = vst [vmem:[#allocation62_spill] sm:$0xff] %v5966_v14 }
 0x2b0   : > { %v1716_v2 = vpop.f32.mrf.mxu3 }
 0x2b1   : > { %v5959_v41 = vadd.f32 %v1716_v2, %v1527_v1  ;;  %v4372_v1 = vld [vmem:[#allocation2] sm:$0xff] }
 0x2b5   : > { %1766 = vmatmul.f32.gmra.mxu3 %v5921_v39  ;;  %3046 = vmatmul.f32.gmra.mxu0 %v5716_v47  ;;  %v6702_v47 = vld [vmem:[#allocation42_spill] sm:$0xff]  ;;  %v5978_v59 = vpop.f32.mrf.mxu0 }
 0x2b6   : > { %3261 = vmatmul.f32.gmra.mxu1 %v5729_v35  ;;  %v5976_v35 = vpop.f32.mrf.mxu1 }
 0x2b7   : > { %6703 = vst [vmem:[#allocation23_spill] sm:$0xff] %v5976_v35  ;;  %v2609_v35 = vld [vmem:[#allocation2 + $0x97] sm:$0xff] }
 0x2b8   : > { %v1719_v24 = vpop.f32.mrf.mxu3 }
 0x2b9   : > { %v5968_v0 = vadd.f32 %v1719_v24, %v1528_v5  ;;  %v6704_v24 = vld [vmem:[#allocation43_spill] sm:$0xff] }
 0x2bd   : > { %2702 = vmatmul.f32.vlgmr.msra.gmra.mxu3 %v2606_v7  ;;  %3049 = vmatmul.f32.gmra.mxu0 %v4372_v1 }
 0x2be   : > { %3264 = vmatmul.f32.gmra.mxu1 %v5745_v15  ;;  %v5984_v55 = vpop.f32.mrf.mxu1  ;;  %v2608_v15 = vld [vmem:[#allocation2 + $0x8f] sm:$0xff] }
 0x2bf   : > { %6705 = vst [vmem:[#allocation22_spill] sm:$0xff] %v5984_v55  ;;  %v6710_v55 = vld [vmem:[#allocation49_spill] sm:$0xff] }
 0x2c0   : > { %v1722_v2 = vpop.f32.mrf.mxu3 }
 0x2c1   : > { %v5974_v34 = vadd.f32 %v1722_v2, %v6702_v47  ;;  %v6706_v47 = vld [vmem:[#allocation45_spill] sm:$0xff] }
 0x2c5   : > { %2705 = vmatmul.f32.gmra.mxu3 %v2607_v44  ;;  %3052 = vmatmul.f32.gmra.mxu0 %v4372_v1  ;;  %v6708_v1 = vld [vmem:[#allocation47_spill] sm:$0xff] }
 0x2c6   : > { %3267 = vmatmul.f32.gmra.mxu1 %v5759_v26  ;;  %v5990_v44 = vpop.f32.mrf.mxu1 }
 0x2c7   : > { %6707 = vst [vmem:[#allocation63_spill] sm:$0xff] %v5990_v44 }
 0x2c8   : > { %v1725_v5 = vpop.f32.mrf.mxu3 }
 0x2c9   : > { %v5982_v7 = vadd.f32 %v1725_v5, %v6704_v24  ;;  %v2610_v24 = vld [vmem:[#allocation2 + $0xb7] sm:$0xff] }
 0x2cd   : > { %2708 = vmatmul.f32.gmra.mxu3 %v2608_v15 }
 0x2ce   : > { %3270 = vmatmul.f32.gmra.mxu1 %v5776_v50  ;;  %v5997_v15 = vpop.f32.mrf.mxu1 }
 0x2cf   : > { %6709 = vst [vmem:[#allocation67_spill] sm:$0xff] %v5997_v15 }
 0x2d0   : > { %v1728_v2 = vpop.f32.mrf.mxu3 }
 0x2d1   : > { %v5988_v40 = vadd.f32 %v1728_v2, %v6706_v47  ;;  %v2611_v47 = vld [vmem:[#allocation2 + $0xbf] sm:$0xff] }
 0x2d5   : > { %2711 = vmatmul.f32.gmra.mxu3 %v2609_v35 }
 0x2d6   : > { %3273 = vmatmul.f32.gmra.mxu1 %v5792_v54  ;;  %v6711_v54 = vld [vmem:[#allocation51_spill] sm:$0xff] }
 0x2d8   : > { %v1731_v26 = vpop.f32.mrf.mxu3 }
 0x2d9   : > { %v5994_v5 = vadd.f32 %v1731_v26, %v6708_v1  ;;  %v6006_v26 = vpop.f32.mrf.mxu1  ;;  %v2612_v1 = vld [vmem:[#allocation2 + $0xdf] sm:$0xff] }
 0x2da   : > { %6712 = vst [vmem:[#allocation25_spill] sm:$0xff] %v6006_v26 }
 0x2dd   : > { %2714 = vmatmul.f32.gmra.mxu3 %v2610_v24  ;;  %v6713_v24 = vld [vmem:[#allocation52_spill] sm:$0xff] }
 0x2de   : > { %3276 = vmatmul.f32.gmra.mxu1 %v5811_v62 }
 0x2e0   : > { %v1734_v50 = vpop.f32.mrf.mxu3 }
 0x2e1   : > { %v6000_v2 = vadd.f32 %v1734_v50, %v6710_v55  ;;  %v3217_v55 = vpop.f32.mrf.mxu1  ;;  %v2613_v50 = vld [vmem:[#allocation2 + $0xe7] sm:$0xff] }
 0x2e5   : > { %2717 = vmatmul.f32.gmra.mxu3 %v2611_v47  ;;  %v6715_v47 = vld [vmem:[#allocation54_spill] sm:$0xff] }
 0x2e6   : > { %3279 = vmatmul.f32.gmra.mxu1 %v5827_v42 }
 0x2e8   : > { %v1737_v35 = vpop.f32.mrf.mxu3 }
 0x2e9   : > { %v6004_v44 = vadd.f32 %v1737_v35, %v6711_v54  ;;  %v2614_v35 = vld [vmem:[#allocation2 + $0x107] sm:$0xff]  ;;  %v3220_v54 = vpop.f32.mrf.mxu1 }
 0x2ed   : > { %2720 = vmatmul.f32.gmra.mxu3 %v2612_v1 }
 0x2ee   : > { %3282 = vmatmul.f32.gmra.mxu1 %v5844_v4  ;;  %v6717_v4 = vld [vmem:[#allocation56_spill] sm:$0xff] }
 0x2f0   : > { %v1740_v62 = vpop.f32.mrf.mxu3 }
 0x2f1   : > { %v6010_v15 = vadd.f32 %v1740_v62, %v6713_v24  ;;  %v2615_v62 = vld [vmem:[#allocation2 + $0x10f] sm:$0xff]  ;;  %v6021_v24 = vpop.f32.mrf.mxu1 }
 0x2f3   : > { %6714 = vst [vmem:[#allocation24_spill] sm:$0xff] %v6010_v15 }
 0x2f5   : > { %2723 = vmatmul.f32.gmra.mxu3 %v2613_v50  ;;  %v6719_v50 = vld [vmem:[#allocation61_spill] sm:$0xff] }
 0x2f6   : > { %3285 = vmatmul.f32.gmra.mxu1 %v5858_v27 }
 0x2f8   : > { %v1743_v42 = vpop.f32.mrf.mxu3 }
 0x2f9   : > { %v6014_v3 = vadd.f32 %v1743_v42, %v6715_v47  ;;  %v2616_v42 = vld [vmem:[#allocation2 + $0x12f] sm:$0xff] }
 0x2fb   : > { %6716 = vst [vmem:[#allocation68_spill] sm:$0xff] %v6014_v3 }
 0x2fd   : > { %2726 = vmatmul.f32.gmra.mxu3 %v2614_v35 }
 0x2fe   : > { %3288 = vmatmul.f32.gmra.mxu1 %v5878_v37  ;;  %v6721_v37 = vld [vmem:[#allocation66_spill] sm:$0xff] }
 0x300   : > { %v1746_v1 = vpop.f32.mrf.mxu3 }
 0x301   : > { %v6018_v26 = vadd.f32 %v1746_v1, %v6717_v4  ;;  %v6030_v1 = vpop.f32.mrf.mxu1  ;;  %v2617_v4 = vld [vmem:[#allocation2 + $0x137] sm:$0xff] }
 0x303   : > { %6718 = vst [vmem:[#allocation28_spill] sm:$0xff] %v6018_v26 }
 0x305   : > { %2729 = vmatmul.f32.gmra.mxu3 %v2615_v62  ;;  %v6723_v62 = vld [vmem:[#allocation70_spill] sm:$0xff] }
 0x306   : > { %3291 = vmatmul.f32.gmra.mxu1 %v5892_v33 }
 0x308   : > { %v1749_v27 = vpop.f32.mrf.mxu3 }
 0x309   : > { %v6024_v14 = vadd.f32 %v1749_v27, %v6719_v50  ;;  %v6036_v27 = vpop.f32.mrf.mxu1  ;;  %v2618_v50 = vld [vmem:[#allocation2 + $0x157] sm:$0xff] }
 0x30b   : > { %6720 = vst [vmem:[#allocation27_spill] sm:$0xff] %v6024_v14 }
 0x30d   : > { %2732 = vmatmul.f32.gmra.mxu3 %v2616_v42  ;;  %v6725_v42 = vld [vmem:[#allocation73_spill] sm:$0xff] }
 0x30e   : > { %3294 = vmatmul.f32.gmra.mxu1 %v5909_v45 }
 0x310   : > { %v1752_v47 = vpop.f32.mrf.mxu3 }
 0x311   : > { %v6028_v35 = vadd.f32 %v1752_v47, %v6721_v37  ;;  %v2619_v37 = vld [vmem:[#allocation2 + $0x15f] sm:$0xff] }
 0x313   : > { %6722 = vst [vmem:[#allocation72_spill] sm:$0xff] %v6028_v35  ;;  %v6042_v35 = vpop.f32.mrf.mxu1 }
 0x315   : > { %2735 = vmatmul.f32.gmra.mxu3 %v2617_v4  ;;  %v6727_v4 = vld [vmem:[#allocation77_spill] sm:$0xff] }
 0x316   : > { %3297 = vmatmul.f32.gmra.mxu1 %v5921_v39 }
 0x318   : > { %v1755_v33 = vpop.f32.mrf.mxu3 }
 0x319   : > { %v6034_v22 = vadd.f32 %v1755_v33, %v6723_v62  ;;  %v2620_v62 = vld [vmem:[#allocation2 + $0x17f] sm:$0xff] }
 0x31b   : > { %6724 = vst [vmem:[#allocation31_spill] sm:$0xff] %v6034_v22  ;;  %v6055_v11 = vpop.f32.mrf.mxu1 }
 0x31d   : > { %2738 = vmatmul.f32.gmra.mxu3 %v2618_v50  ;;  %v6729_v50 = vld [vmem:[#allocation81_spill] sm:$0xff] }
 0x31e   : > { %3300 = vmatmul.f32.gmra.mxu1 %v5933_v46  ;;  %v2621_v46 = vld [vmem:[#allocation2 + $0x187] sm:$0xff] }
 0x320   : > { %v1758_v45 = vpop.f32.mrf.mxu3 }
 0x321   : > { %v6040_v47 = vadd.f32 %v1758_v45, %v6725_v42  ;;  %v6731_v42 = vld [vmem:[#allocation84_spill] sm:$0xff] }
 0x323   : > { %6726 = vst [vmem:[#allocation29_spill] sm:$0xff] %v6040_v47 }
 0x325   : > { %2741 = vmatmul.f32.gmra.mxu3 %v2619_v37  ;;  %v2622_v37 = vld [vmem:[#allocation2 + $0x1a7] sm:$0xff] }
 0x326   : > { %3303 = vmatmul.f32.gmra.mxu1 %v5947_v23 }
 0x328   : > { %v1761_v39 = vpop.f32.mrf.mxu3 }
 0x329   : > { %v6046_v33 = vadd.f32 %v1761_v39, %v6727_v4  ;;  %v2623_v4 = vld [vmem:[#allocation2 + $0x1af] sm:$0xff] }
 0x32b   : > { %6728 = vst [vmem:[#allocation76_spill] sm:$0xff] %v6046_v33 }
 0x32d   : > { %2744 = vmatmul.f32.gmra.mxu3 %v2620_v62 }
 0x330   : > { %v1764_v22 = vpop.f32.mrf.mxu3 }
 0x331   : > { %v6049_v61 = vadd.f32 %v1764_v22, %v6729_v50  ;;  %v6061_v22 = vld [vmem:[%s6509_s5] ss:$0 sm:$0xff] }
 0x332   : > { %v6066_v50 = vld [vmem:[%s6510_s6] ss:$0 sm:$0xff] }
 0x333   : > { %6730 = vst [vmem:[#allocation33_spill] sm:$0xff] %v6049_v61 }
 0x335   : > { %2747 = vmatmul.f32.gmra.mxu3 %v2621_v46 }
 0x338   : > { %v1767_v45 = vpop.f32.mrf.mxu3 }
 0x339   : > { %v6052_v47 = vadd.f32 %v1767_v45, %v6731_v42 }
 0x33b   : > { %6732 = vst [vmem:[#allocation32_spill] sm:$0xff] %v6052_v47 }
 0x33d   : > { %2750 = vmatmul.f32.gmra.mxu3 %v2622_v37  ;;  %v6072_v37 = vpop.f32.mrf.mxu1 }
 0x340   : > { %v2703_v14 = vpop.f32.mrf.mxu3 }
 0x341   : > { %v2799_v23 = vadd.f32 %v2703_v14, %v5754_v29 }
 0x343   : > { %v3056_v39 = vadd.f32 %v5869_v9, %v2799_v23  ;;  %v2624_v23 = vld [vmem:[#allocation2 + $0x1cf] sm:$0xff] }
 0x345   : > { %v3313_v62 = vadd.f32 %v3217_v55, %v3056_v39  ;;  %2753 = vmatmul.f32.gmra.mxu3 %v2623_v4  ;;  %v6075_v4 = vpop.f32.mrf.mxu2 }
 0x347   : > { %v3413_v46 = vmul.f32 %v6061_v22, %v3313_v62 }
 0x348   : > { %v2706_v29 = vpop.f32.mrf.mxu3 }
 0x349   : > { %v3449_v14 = vadd.f32 %v6066_v50, %v3413_v46  ;;  %v2800_v9 = vadd.f32 %v2706_v29, %v5770_v36 }
 0x34b   : > { %v3481_v45 = vsub.f32 0.0, %v3449_v14  ;;  %v3057_v42 = vadd.f32 %v5888_v56, %v2800_v9  ;;  %v6080_v56 = vpop.f32.mrf.mxu0  ;;  %v2625_v9 = vld [vmem:[#allocation2 + $0x1d7] sm:$0xff] }
 0x34d   : > { %v3513_v55 = vmul.f32 1.442695, %v3481_v45  ;;  %v3314_v39 = vadd.f32 %v3220_v54, %v3057_v42  ;;  %2756 = vmatmul.f32.gmra.mxu3 %v2624_v23  ;;  %v6083_v42 = vpop.f32.mrf.mxu1 }
 0x34f   : > { %4244 = vpow2.f32 %v3513_v55  ;;  %v3414_v47 = vmul.f32 %v6061_v22, %v3314_v39  ;;  %v6090_v39 = vpop.f32.mrf.mxu2 }
 0x350   : > { %v2709_v62 = vpop.f32.mrf.mxu3 }
 0x351   : > { %v3450_v61 = vadd.f32 %v6066_v50, %v3414_v47  ;;  %v2801_v46 = vadd.f32 %v2709_v62, %v5789_v38 }
 0x353   : > { %v3482_v36 = vsub.f32 0.0, %v3450_v61  ;;  %v3058_v29 = vadd.f32 %v5907_v13, %v2801_v46 }
 0x355   : > { %v4245_v33 = vpop.eup %4244  ;;  %v3515_v45 = vmul.f32 1.442695, %v3482_v36  ;;  %v3315_v54 = vadd.f32 %v6021_v24, %v3058_v29  ;;  %2759 = vmatmul.f32.gmra.mxu3 %v2625_v9  ;;  %v2626_v24 = vld [vmem:[#allocation2 + $0x1f7] sm:$0xff] }
 0x356   : > { %v3577_v55 = vadd.f32 1.0, %v4245_v33  ;;  %v6095_v33 = vpop.f32.mrf.mxu0 }
 0x357   : > { %4246 = vpow2.f32 %v3515_v45  ;;  %v3415_v23 = vmul.f32 %v6061_v22, %v3315_v54 }
 0x358   : > { %v2712_v47 = vpop.f32.mrf.mxu3  ;;  %4248 = vrcp.f32 %v3577_v55 }
 0x359   : > { %v6087_v38 = vadd.f32 %v6066_v50, %v3415_v23  ;;  %v2802_v13 = vadd.f32 %v2712_v47, %v5803_v10  ;;  %v6098_v10 = vpop.f32.mrf.mxu1 }
 0x35b   : > { %v3483_v62 = vsub.f32 0.0, %v6087_v38  ;;  %v3059_v46 = vadd.f32 %v5924_v31, %v2802_v13 }
 0x35d   : > { %v4247_v36 = vpop.eup %4246  ;;  %v3517_v29 = vmul.f32 1.442695, %v3483_v62  ;;  %v3316_v9 = vadd.f32 %v6030_v1, %v3059_v46  ;;  %2762 = vmatmul.f32.gmra.mxu3 %v2626_v24  ;;  %v6103_v1 = vpop.f32.mrf.mxu2  ;;  %v2627_v46 = vld [vmem:[#allocation2 + $0x1ff] sm:$0xff] }
 0x35e   : > { %v3578_v45 = vadd.f32 1.0, %v4247_v36  ;;  %v4249_v55 = vpop.eup %4248 }
 0x35f   : > { %4250 = vpow2.f32 %v3517_v29  ;;  %v3416_v54 = vmul.f32 %v6061_v22, %v3316_v9  ;;  %v3641_v36 = vmul.f32 %v4249_v55, %v3449_v14 }
 0x360   : > { %4252 = vrcp.f32 %v3578_v45  ;;  %v2715_v23 = vpop.f32.mrf.mxu3 }
 0x361   : > { %v3452_v47 = vadd.f32 %v6066_v50, %v3416_v54  ;;  %v2803_v31 = vadd.f32 %v2715_v23, %v5820_v8  ;;  %v6107_v8 = vpop.f32.mrf.mxu0 }
 0x363   : > { %v3484_v13 = vsub.f32 0.0, %v3452_v47  ;;  %v3060_v62 = vadd.f32 %v5943_v57, %v2803_v31  ;;  %v6733_v57 = vld [vmem:[#allocation4_spill] sm:$0xff] }
 0x364   : > { %v6734_v31 = vunpack.c.l.bf16 %v6733_v57  ;;  %v6735_v20 = vunpack.c.h.bf16 %v6733_v57 }
 0x365   : > { %v4251_v24 = vpop.eup %4250  ;;  %v3519_v29 = vmul.f32 1.442695, %v3484_v13  ;;  %v3317_v9 = vadd.f32 %v6036_v27, %v3060_v62  ;;  %2765 = vmatmul.f32.gmra.mxu3 %v2627_v46 }
 0x366   : > { %v4253_v45 = vpop.eup %4252  ;;  %v3579_v23 = vadd.f32 1.0, %v4251_v24  ;;  %v3673_v3 = vadd.f32 %v6734_v31, %v3641_v36 }
 0x367   : > { %v3642_v26 = vmul.f32 %v4253_v45, %v3450_v61  ;;  %4254 = vpow2.f32 %v3519_v29  ;;  %v3417_v54 = vmul.f32 %v6061_v22, %v3317_v9  ;;  %v6124_v61 = vpop.f32.mrf.mxu1 }
 0x368   : > { %v2718_v43 = vpop.f32.mrf.mxu3  ;;  %4256 = vrcp.f32 %v3579_v23  ;;  %v2629_v23 = vld [vmem:[#allocation2 + $0x227] sm:$0xff] }
 0x369   : > { %v3674_v15 = vadd.f32 %v6735_v20, %v3642_v26  ;;  %v6114_v14 = vadd.f32 %v6066_v50, %v3417_v54  ;;  %v2804_v27 = vadd.f32 %v2718_v43, %v5836_v19  ;;  %v2628_v20 = vld [vmem:[#allocation2 + $0x21f] sm:$0xff]  ;;  %v6130_v43 = vpop.f32.mrf.mxu2  ;;  %v6135_v9 = vpop.f32.mrf.mxu0 }
 0x36b   : > { %v3948_v55 = vpack.c.bf16 %v3674_v15, %v3673_v3  ;;  %v3485_v13 = vsub.f32 0.0, %v6114_v14  ;;  %v3061_v62 = vadd.f32 %v5957_v16, %v2804_v27 }
 0x36d   : > { %v4255_v26 = vpop.eup %4254  ;;  %3949 = vst [vmem:[%s6122_s18] sm:$0xff] %v3948_v55   ;;  %v3521_v46 = vmul.f32 1.442695, %v3485_v13  ;;  %v3318_v19 = vadd.f32 %v6042_v35, %v3061_v62  ;;  %2768 = vmatmul.f32.gmra.mxu3 %v2628_v20  ;;  %v6736_v62 = vld [vmem:[#allocation26_spill] sm:$0xff] }
 0x36e   : > { %v3580_v24 = vadd.f32 1.0, %v4255_v26  ;;  %v4257_v29 = vpop.eup %4256 }
 0x36f   : > { %4258 = vpow2.f32 %v3521_v46  ;;  %v3418_v36 = vmul.f32 %v6061_v22, %v3318_v19  ;;  %v6138_v35 = vpop.f32.mrf.mxu1  ;;  %v3643_v31 = vmul.f32 %v4257_v29, %v6087_v38 }
 0x370   : > { %4260 = vrcp.f32 %v3580_v24  ;;  %v2721_v3 = vpop.f32.mrf.mxu3  ;;  %v6737_v24 = vld [vmem:[#allocation6_spill] sm:$0xff] }
 0x371   : > { %v3454_v15 = vadd.f32 %v6066_v50, %v3418_v36  ;;  %v2805_v16 = vadd.f32 %v2721_v3, %v5855_v21  ;;  %v2035_v21 = vadd.f32 %v6736_v62, %v5876_v52  ;;  %v6738_v36 = vunpack.c.l.bf16 %v6737_v24  ;;  %v6741_v62 = vld [vmem:[#allocation30_spill] sm:$0xff] }
 0x372   : > { %v6739_v3 = vunpack.c.h.bf16 %v6737_v24 }
 0x373   : > { %v3486_v45 = vsub.f32 0.0, %v3454_v15  ;;  %v3062_v54 = vadd.f32 %v5970_v17, %v2805_v16  ;;  %v6145_v17 = vpop.f32.mrf.mxu2  ;;  %v3675_v38 = vadd.f32 %v6738_v36, %v3643_v31 }
 0x375   : > { %v4259_v57 = vpop.eup %4258  ;;  %v3523_v27 = vmul.f32 1.442695, %v3486_v45  ;;  %v3319_v55 = vadd.f32 %v6055_v11, %v3062_v54  ;;  %2771 = vmatmul.f32.gmra.mxu3 %v2629_v23 }
 0x376   : > { %v4261_v13 = vpop.eup %4260  ;;  %v3581_v46 = vadd.f32 1.0, %v4259_v57  ;;  %v6158_v57 = vpop.f32.mrf.mxu0 }
 0x377   : > { %v3644_v20 = vmul.f32 %v4261_v13, %v3452_v47  ;;  %4262 = vpow2.f32 %v3523_v27  ;;  %v3419_v26 = vmul.f32 %v6061_v22, %v3319_v55  ;;  %v6740_v47 = vld [vmem:[#allocation58_spill] sm:$0xff] }
 0x378   : > { %v2724_v19 = vpop.f32.mrf.mxu3  ;;  %v2292_v29 = vadd.f32 %v6740_v47, %v2035_v21  ;;  %4264 = vrcp.f32 %v3581_v46  ;;  %v2630_v27 = vld [vmem:[#allocation2 + $0x247] sm:$0xff] }
 0x379   : > { %v3676_v11 = vadd.f32 %v6739_v3, %v3644_v20  ;;  %v6152_v16 = vadd.f32 %v6066_v50, %v3419_v26  ;;  %v2806_v52 = vadd.f32 %v2724_v19, %v5871_v58  ;;  %v2036_v58 = vadd.f32 %v6741_v62, %v5890_v49  ;;  %v6164_v20 = vpop.f32.mrf.mxu1 }
 0x37a   : > { %v2549_v26 = vadd.f32 %v6075_v4, %v2292_v29 }
 0x37b   : > { %v3953_v45 = vpack.c.bf16 %v3676_v11, %v3675_v38  ;;  %v3487_v54 = vsub.f32 0.0, %v6152_v16  ;;  %v3063_v23 = vadd.f32 %v5978_v59, %v2806_v52  ;;  %v6172_v3 = vpop.f32.mrf.mxu2  ;;  %v2631_v52 = vld [vmem:[#allocation2 + $0x24f] sm:$0xff] }
 0x37d   : > { %v4263_v31 = vpop.eup %4262  ;;  %4040 = vst [vmem:[%s6122_s18 + $0x8] sm:$0xff] %v3953_v45   ;;  %v3525_v55 = vmul.f32 1.442695, %v3487_v54  ;;  %v3320_v13 = vadd.f32 %v6072_v37, %v3063_v23  ;;  %2774 = vmatmul.f32.gmra.mxu3 %v2630_v27  ;;  %v6742_v37 = vld [vmem:[#allocation64_spill] sm:$0xff] }
 0x37e   : > { %v3582_v21 = vadd.f32 1.0, %v4263_v31  ;;  %v4265_v36 = vpop.eup %4264  ;;  %v2293_v38 = vadd.f32 %v6742_v37, %v2036_v58  ;;  %v6179_v27 = vpop.f32.mrf.mxu0  ;;  %v6743_v31 = vld [vmem:[#allocation34_spill] sm:$0xff] }
 0x37f   : > { %4266 = vpow2.f32 %v3525_v55  ;;  %v3420_v59 = vmul.f32 %v6061_v22, %v3320_v13  ;;  %v3645_v47 = vmul.f32 %v4265_v36, %v6114_v14  ;;  %v2037_v55 = vadd.f32 %v6743_v31, %v5905_v63  ;;  %v6747_v63 = vld [vmem:[#allocation69_spill] sm:$0xff] }
 0x380   : > { %4268 = vrcp.f32 %v3582_v21  ;;  %v2727_v46 = vpop.f32.mrf.mxu3  ;;  %v2550_v23 = vadd.f32 %v6090_v39, %v2293_v38  ;;  %v6744_v21 = vld [vmem:[#allocation8_spill] sm:$0xff] }
 0x381   : > { %v6169_v19 = vadd.f32 %v6066_v50, %v3420_v59  ;;  %v2807_v24 = vadd.f32 %v2727_v46, %v2549_v26  ;;  %v6184_v62 = vpop.f32.mrf.mxu1  ;;  %v6746_v59 = vunpack.c.h.bf16 %v6744_v21 }
 0x383   : > { %v3488_v49 = vsub.f32 0.0, %v6169_v19  ;;  %v3064_v11 = vadd.f32 %v6080_v56, %v2807_v24 }
 0x385   : > { %v4267_v4 = vpop.eup %4266  ;;  %v3527_v29 = vmul.f32 1.442695, %v3488_v49  ;;  %v3321_v45 = vadd.f32 %v6083_v42, %v3064_v11  ;;  %2777 = vmatmul.f32.gmra.mxu3 %v2631_v52  ;;  %v6745_v42 = vunpack.c.l.bf16 %v6744_v21  ;;  %v6196_v49 = vpop.f32.mrf.mxu2  ;;  %v2632_v11 = vld [vmem:[#allocation2 + $0x26f] sm:$0xff] }
 0x386   : > { %v4269_v54 = vpop.eup %4268  ;;  %v3583_v14 = vadd.f32 1.0, %v4267_v4 }
 0x387   : > { %v3646_v13 = vmul.f32 %v4269_v54, %v3454_v15  ;;  %4270 = vpow2.f32 %v3527_v29  ;;  %v3421_v56 = vmul.f32 %v6061_v22, %v3321_v45  ;;  %v3677_v26 = vadd.f32 %v6745_v42, %v3645_v47  ;;  %v6748_v29 = vld [vmem:[#allocation37_spill] sm:$0xff] }
 0x388   : > { %v2730_v58 = vpop.f32.mrf.mxu3  ;;  %v2294_v15 = vadd.f32 %v6747_v63, %v2037_v55  ;;  %4272 = vrcp.f32 %v3583_v14  ;;  %v2038_v45 = vadd.f32 %v6748_v29, %v5917_v48  ;;  %v2633_v42 = vld [vmem:[#allocation2 + $0x277] sm:$0xff] }
 0x389   : > { %v3678_v39 = vadd.f32 %v6746_v59, %v3646_v13  ;;  %v6191_v46 = vadd.f32 %v6066_v50, %v3421_v56  ;;  %v2808_v24 = vadd.f32 %v2730_v58, %v2550_v23  ;;  %v6210_v21 = vpop.f32.mrf.mxu1 }
 0x38a   : > { %v2551_v23 = vadd.f32 %v6103_v1, %v2294_v15 }
 0x38b   : > { %v3958_v36 = vpack.c.bf16 %v3678_v39, %v3677_v26  ;;  %v3489_v37 = vsub.f32 0.0, %v6191_v46  ;;  %v3065_v38 = vadd.f32 %v6095_v33, %v2808_v24  ;;  %v6204_v33 = vpop.f32.mrf.mxu0 }
 0x38d   : > { %v4271_v52 = vpop.eup %4270  ;;  %4041 = vst [vmem:[%s6122_s18 + $0x10] sm:$0xff] %v3958_v36   ;;  %v3529_v4 = vmul.f32 1.442695, %v3489_v37  ;;  %v3322_v47 = vadd.f32 %v6098_v10, %v3065_v38  ;;  %2780 = vmatmul.f32.gmra.mxu3 %v2632_v11  ;;  %v6749_v10 = vld [vmem:[#allocation74_spill] sm:$0xff]  ;;  %v6217_v36 = vpop.f32.mrf.mxu2  ;;  %v6750_v37 = vld [vmem:[#allocation40_spill] sm:$0xff] }
 0x38e   : > { %v3584_v54 = vadd.f32 1.0, %v4271_v52  ;;  %v4273_v14 = vpop.eup %4272  ;;  %v2295_v58 = vadd.f32 %v6749_v10, %v2038_v45  ;;  %v2039_v38 = vadd.f32 %v6750_v37, %v5931_v30  ;;  %v3150_v52 = vld [vmem:[#allocation2 + $0x2a9] sm:$0xff] }
 0x38f   : > { %4274 = vpow2.f32 %v3529_v4  ;;  %v3422_v31 = vmul.f32 %v6061_v22, %v3322_v47  ;;  %v3647_v59 = vmul.f32 %v4273_v14, %v6152_v16  ;;  %3306 = vmatmul.f32.gmra.mxu1 %v3150_v52 }
 0x390   : > { %4276 = vrcp.f32 %v3584_v54  ;;  %v2733_v55 = vpop.f32.mrf.mxu3  ;;  %v2552_v15 = vadd.f32 %v6130_v43, %v2295_v58  ;;  %v2634_v58 = vld [vmem:[#allocation2 + $0x297] sm:$0xff] }
 0x391   : > { %v6207_v13 = vadd.f32 %v6066_v50, %v3422_v31  ;;  %v2809_v56 = vadd.f32 %v2733_v55, %v2551_v23  ;;  %v6235_v10 = vpop.f32.mrf.mxu1 }
 0x393   : > { %v3490_v48 = vsub.f32 0.0, %v6207_v13  ;;  %v3066_v1 = vadd.f32 %v6107_v8, %v2809_v56  ;;  %v6230_v23 = vpop.f32.mrf.mxu0 }
 0x395   : > { %v4275_v26 = vpop.eup %4274  ;;  %v3531_v39 = vmul.f32 1.442695, %v3490_v48  ;;  %v3323_v24 = vadd.f32 %v6124_v61, %v3066_v1  ;;  %2783 = vmatmul.f32.gmra.mxu3 %v2633_v42  ;;  %v6751_v61 = vld [vmem:[#allocation10_spill] sm:$0xff] }
 0x396   : > { %v4277_v63 = vpop.eup %4276  ;;  %v3585_v4 = vadd.f32 1.0, %v4275_v26  ;;  %v6752_v47 = vunpack.c.l.bf16 %v6751_v61  ;;  %v6753_v43 = vunpack.c.h.bf16 %v6751_v61  ;;  %v6755_v26 = vld [vmem:[#allocation41_spill] sm:$0xff] }
 0x397   : > { %v3648_v11 = vmul.f32 %v4277_v63, %v6169_v19  ;;  %4278 = vpow2.f32 %v3531_v39  ;;  %v3423_v8 = vmul.f32 %v6061_v22, %v3323_v24  ;;  %v6754_v19 = vld [vmem:[#allocation79_spill] sm:$0xff] }
 0x398   : > { %v2736_v16 = vpop.f32.mrf.mxu3  ;;  %v3679_v29 = vadd.f32 %v6752_v47, %v3647_v59  ;;  %v2296_v31 = vadd.f32 %v6754_v19, %v2039_v38  ;;  %4280 = vrcp.f32 %v3585_v4  ;;  %v2040_v59 = vadd.f32 %v6755_v26, %v5945_v28 }
 0x399   : > { %v3680_v45 = vadd.f32 %v6753_v43, %v3648_v11  ;;  %v6228_v54 = vadd.f32 %v6066_v50, %v3423_v8  ;;  %v2810_v30 = vadd.f32 %v2736_v16, %v2552_v15  ;;  %v6243_v15 = vpop.f32.mrf.mxu2  ;;  %v6756_v8 = vld [vmem:[#allocation82_spill] sm:$0xff]  ;;  %v6256_v19 = vpop.f32.mrf.mxu1 }
 0x39a   : > { %v2553_v24 = vadd.f32 %v6145_v17, %v2296_v31  ;;  %v2297_v52 = vadd.f32 %v6756_v8, %v2040_v59  ;;  %v2635_v16 = vld [vmem:[#allocation2 + $0x29f] sm:$0xff]  ;;  %v6757_v31 = vld [vmem:[#allocation44_spill] sm:$0xff] }
 0x39b   : > { %v3963_v55 = vpack.c.bf16 %v3680_v45, %v3679_v29  ;;  %v3491_v56 = vsub.f32 0.0, %v6228_v54  ;;  %v3067_v14 = vadd.f32 %v6135_v9, %v2810_v30  ;;  %v3151_v9 = vld [vmem:[#allocation2 + $0x2b1] sm:$0xff]  ;;  %v6251_v4 = vpop.f32.mrf.mxu0 }
 0x39c   : > { %3309 = vmatmul.f32.gmra.mxu1 %v3151_v9  ;;  %v2554_v30 = vadd.f32 %v6172_v3, %v2297_v52 }
 0x39d   : > { %v4279_v48 = vpop.eup %4278  ;;  %4042 = vst [vmem:[%s6122_s18 + $0x18] sm:$0xff] %v3963_v55   ;;  %v3533_v1 = vmul.f32 1.442695, %v3491_v56  ;;  %v3324_v42 = vadd.f32 %v6138_v35, %v3067_v14  ;;  %2786 = vmatmul.f32.gmra.mxu3 %v2634_v58  ;;  %v2041_v55 = vadd.f32 %v6757_v31, %v5959_v41  ;;  %v6758_v58 = vld [vmem:[#allocation12_spill] sm:$0xff]  ;;  %v2636_v41 = vld [vmem:[#allocation2 + $0x2bf] sm:$0xff] }
 0x39e   : > { %v3586_v39 = vadd.f32 1.0, %v4279_v48  ;;  %v4281_v11 = vpop.eup %4280  ;;  %v6759_v48 = vunpack.c.l.bf16 %v6758_v58 }
 0x39f   : > { %4282 = vpow2.f32 %v3533_v1  ;;  %v3424_v63 = vmul.f32 %v6061_v22, %v3324_v42  ;;  %v3649_v47 = vmul.f32 %v4281_v11, %v6191_v46  ;;  %v6760_v1 = vunpack.c.h.bf16 %v6758_v58  ;;  %v6761_v11 = vld [vmem:[#allocation46_spill] sm:$0xff] }
 0x3a0   : > { %4284 = vrcp.f32 %v3586_v39  ;;  %v2739_v37 = vpop.f32.mrf.mxu3  ;;  %v2042_v8 = vadd.f32 %v6761_v11, %v5968_v0  ;;  %v6766_v11 = vld [vmem:[#allocation50_spill] sm:$0xff] }
 0x3a1   : > { %v6246_v38 = vadd.f32 %v6066_v50, %v3424_v63  ;;  %v2811_v35 = vadd.f32 %v2739_v37, %v2553_v24  ;;  %v6269_v59 = vpop.f32.mrf.mxu2 }
 0x3a3   : > { %v3492_v28 = vsub.f32 0.0, %v6246_v38  ;;  %v3068_v17 = vadd.f32 %v6158_v57, %v2811_v35  ;;  %v6278_v52 = vpop.f32.mrf.mxu0 }
 0x3a5   : > { %v4283_v61 = vpop.eup %4282  ;;  %v3535_v29 = vmul.f32 1.442695, %v3492_v28  ;;  %v3325_v43 = vadd.f32 %v6164_v20, %v3068_v17  ;;  %2789 = vmatmul.f32.gmra.mxu3 %v2635_v16  ;;  %v3681_v20 = vadd.f32 %v6759_v48, %v3649_v47  ;;  %v6282_v16 = vpop.f32.mrf.mxu1 }
 0x3a6   : > { %v4285_v45 = vpop.eup %4284  ;;  %v3587_v14 = vadd.f32 1.0, %v4283_v61 }
 0x3a7   : > { %v3650_v57 = vmul.f32 %v4285_v45, %v6207_v13  ;;  %4286 = vpow2.f32 %v3535_v29  ;;  %v3425_v56 = vmul.f32 %v6061_v22, %v3325_v43  ;;  %v2298_v13 = vadd.f32 %v5740_v51, %v2041_v55  ;;  %v2637_v43 = vld [vmem:[#allocation2 + $0x2c7] sm:$0xff] }
 0x3a8   : > { %v2742_v46 = vpop.f32.mrf.mxu3  ;;  %4288 = vrcp.f32 %v3587_v14  ;;  %v2299_v29 = vadd.f32 %v5756_v25, %v2042_v8  ;;  %v2044_v8 = vadd.f32 %v6766_v11, %v5982_v7 }
 0x3a9   : > { %v3682_v42 = vadd.f32 %v6760_v1, %v3650_v57  ;;  %v6267_v3 = vadd.f32 %v6066_v50, %v3425_v56  ;;  %v2812_v26 = vadd.f32 %v2742_v46, %v2554_v30  ;;  %v2555_v51 = vadd.f32 %v6196_v49, %v2298_v13  ;;  %v6287_v30 = vpop.f32.mrf.mxu2  ;;  %v6762_v46 = vld [vmem:[#allocation48_spill] sm:$0xff]  ;;  %v6763_v1 = vld [vmem:[#allocation14_spill] sm:$0xff] }
 0x3aa   : > { %v2556_v14 = vadd.f32 %v6217_v36, %v2299_v29  ;;  %v2043_v58 = vadd.f32 %v6762_v46, %v5974_v34  ;;  %v2301_v29 = vadd.f32 %v5798_v18, %v2044_v8 }
 0x3ab   : > { %v3968_v39 = vpack.c.bf16 %v3682_v42, %v3681_v20  ;;  %v3493_v24 = vsub.f32 0.0, %v6267_v3  ;;  %v3069_v63 = vadd.f32 %v6179_v27, %v2812_v26  ;;  %v6296_v48 = vpop.f32.mrf.mxu0  ;;  %v6764_v42 = vunpack.c.l.bf16 %v6763_v1 }
 0x3ac   : > { %v6765_v26 = vunpack.c.h.bf16 %v6763_v1 }
 0x3ad   : > { %v4287_v9 = vpop.eup %4286  ;;  %4043 = vst [vmem:[%s6122_s18 + $0x20] sm:$0xff] %v3968_v39   ;;  %v3537_v37 = vmul.f32 1.442695, %v3493_v24  ;;  %v3326_v35 = vadd.f32 %v6184_v62, %v3069_v63  ;;  %2792 = vmatmul.f32.gmra.mxu3 %v2636_v41  ;;  %v6305_v13 = vpop.f32.mrf.mxu1 }
 0x3ae   : > { %v3588_v28 = vadd.f32 1.0, %v4287_v9  ;;  %v4289_v62 = vpop.eup %4288 }
 0x3af   : > { %4290 = vpow2.f32 %v3537_v37  ;;  %v3426_v17 = vmul.f32 %v6061_v22, %v3326_v35  ;;  %v3651_v31 = vmul.f32 %v4289_v62, %v6228_v54 }
 0x3b0   : > { %4292 = vrcp.f32 %v3588_v28  ;;  %v2745_v27 = vpop.f32.mrf.mxu3 }
 0x3b1   : > { %v3462_v61 = vadd.f32 %v6066_v50, %v3426_v17  ;;  %v2813_v47 = vadd.f32 %v2745_v27, %v2555_v51  ;;  %v2502_v28 = vpop.f32.mrf.mxu2 }
 0x3b3   : > { %v3494_v0 = vsub.f32 0.0, %v3462_v61  ;;  %v3070_v45 = vadd.f32 %v6204_v33, %v2813_v47 }
 0x3b5   : > { %v4291_v49 = vpop.eup %4290  ;;  %v3539_v55 = vmul.f32 1.442695, %v3494_v0  ;;  %v3327_v57 = vadd.f32 %v6210_v21, %v3070_v45  ;;  %2795 = vmatmul.f32.gmra.mxu3 %v2637_v43  ;;  %v3683_v21 = vadd.f32 %v6764_v42, %v3651_v31  ;;  %v6318_v43 = vpop.f32.mrf.mxu0 }
 0x3b6   : > { %v4293_v56 = vpop.eup %4292  ;;  %v3589_v20 = vadd.f32 1.0, %v4291_v49  ;;  %v6321_v0 = vpop.f32.mrf.mxu1 }
 0x3b7   : > { %v3652_v25 = vmul.f32 %v4293_v56, %v6246_v38  ;;  %4294 = vpow2.f32 %v3539_v55  ;;  %v3427_v33 = vmul.f32 %v6061_v22, %v3327_v57  ;;  %v2300_v38 = vadd.f32 %v5778_v12, %v2043_v58  ;;  %v6767_v56 = vld [vmem:[#allocation53_spill] sm:$0xff] }
 0x3b8   : > { %v2748_v54 = vpop.f32.mrf.mxu3  ;;  %4296 = vrcp.f32 %v3589_v20  ;;  %v2558_v57 = vadd.f32 %v6269_v59, %v2301_v29 }
 0x3b9   : > { %v3684_v41 = vadd.f32 %v6765_v26, %v3652_v25  ;;  %v6303_v36 = vadd.f32 %v6066_v50, %v3427_v33  ;;  %v2814_v34 = vadd.f32 %v2748_v54, %v2556_v14  ;;  %v2557_v17 = vadd.f32 %v6243_v15, %v2300_v38  ;;  %v6768_v33 = vld [vmem:[#allocation16_spill] sm:$0xff] }
 0x3ba   : > { %v2045_v14 = vadd.f32 %v6767_v56, %v5988_v40  ;;  %v6769_v20 = vunpack.c.l.bf16 %v6768_v33  ;;  %v6770_v54 = vunpack.c.h.bf16 %v6768_v33 }
 0x3bb   : > { %v3973_v39 = vpack.c.bf16 %v3684_v41, %v3683_v21  ;;  %v3495_v24 = vsub.f32 0.0, %v6303_v36  ;;  %v3071_v63 = vadd.f32 %v6230_v23, %v2814_v34 }
 0x3bc   : > { %v2302_v40 = vadd.f32 %v5822_v53, %v2045_v14 }
 0x3bd   : > { %v4295_v9 = vpop.eup %4294  ;;  %4044 = vst [vmem:[%s6122_s18 + $0x28] sm:$0xff] %v3973_v39   ;;  %v3541_v37 = vmul.f32 1.442695, %v3495_v24  ;;  %v3328_v35 = vadd.f32 %v6235_v10, %v3071_v63  ;;  %v6339_v26 = vpop.f32.mrf.mxu0  ;;  %v6771_v39 = vld [vmem:[#allocation55_spill] sm:$0xff] }
 0x3be   : > { %v3590_v51 = vadd.f32 1.0, %v4295_v9  ;;  %v4297_v62 = vpop.eup %4296  ;;  %v2046_v24 = vadd.f32 %v6771_v39, %v5994_v5  ;;  %v3277_v63 = vpop.f32.mrf.mxu1  ;;  %v2559_v53 = vadd.f32 %v6287_v30, %v2302_v40 }
 0x3bf   : > { %4298 = vpow2.f32 %v3541_v37  ;;  %v3428_v12 = vmul.f32 %v6061_v22, %v3328_v35  ;;  %v3653_v15 = vmul.f32 %v4297_v62, %v6267_v3 }
 0x3c0   : > { %4300 = vrcp.f32 %v3590_v51  ;;  %v2751_v27 = vpop.f32.mrf.mxu3  ;;  %v2303_v51 = vadd.f32 %v5841_v6, %v2046_v24 }
 0x3c1   : > { %v3464_v23 = vadd.f32 %v6066_v50, %v3428_v12  ;;  %v2815_v47 = vadd.f32 %v2751_v27, %v2557_v17  ;;  %v3685_v3 = vadd.f32 %v6769_v20, %v3653_v15 }
 0x3c2   : > { %v2560_v29 = vadd.f32 %v2502_v28, %v2303_v51 }
 0x3c3   : > { %v3496_v10 = vsub.f32 0.0, %v3464_v23  ;;  %v3072_v7 = vadd.f32 %v6251_v4, %v2815_v47  ;;  %v2505_v4 = vpop.f32.mrf.mxu2 }
 0x3c5   : > { %v4299_v45 = vpop.eup %4298  ;;  %v3543_v49 = vmul.f32 1.442695, %v3496_v10  ;;  %v3329_v31 = vadd.f32 %v6256_v19, %v3072_v7  ;;  %v3023_v10 = vpop.f32.mrf.mxu0  ;;  %v6772_v7 = vld [vmem:[#allocation60_spill] sm:$0xff] }
 0x3c6   : > { %v4301_v55 = vpop.eup %4300  ;;  %v3591_v58 = vadd.f32 1.0, %v4299_v45  ;;  %v2047_v45 = vadd.f32 %v6772_v7, %v6000_v2 }
 0x3c7   : > { %v3654_v18 = vmul.f32 %v4301_v55, %v3462_v61  ;;  %4302 = vpow2.f32 %v3543_v49  ;;  %v3429_v46 = vmul.f32 %v6061_v22, %v3329_v31  ;;  %v3280_v49 = vpop.f32.mrf.mxu1  ;;  %v6773_v55 = vld [vmem:[#allocation18_spill] sm:$0xff] }
 0x3c8   : > { %v2754_v25 = vpop.f32.mrf.mxu3  ;;  %4304 = vrcp.f32 %v3591_v58  ;;  %v6775_v56 = vunpack.c.h.bf16 %v6773_v55  ;;  %v2304_v2 = vadd.f32 %v5860_v60, %v2047_v45 }
 0x3c9   : > { %v3686_v19 = vadd.f32 %v6770_v54, %v3654_v18  ;;  %v6334_v1 = vadd.f32 %v6066_v50, %v3429_v46  ;;  %v2816_v59 = vadd.f32 %v2754_v25, %v2558_v57  ;;  %v6774_v57 = vunpack.c.l.bf16 %v6773_v55  ;;  %v6783_v55 = vld [vmem:[#allocation68_spill] sm:$0xff] }
 0x3cb   : > { %v3978_v61 = vpack.c.bf16 %v3686_v19, %v3685_v3  ;;  %v3497_v42 = vsub.f32 0.0, %v6334_v1  ;;  %v3073_v21 = vadd.f32 %v6278_v52, %v2816_v59  ;;  %v2508_v17 = vpop.f32.mrf.mxu2  ;;  %v6776_v3 = vld [vmem:[#allocation65_spill] sm:$0xff]  ;;  %v2561_v59 = vadd.f32 %v2505_v4, %v2304_v2 }
 0x3cc   : > { %v2048_v54 = vadd.f32 %v6776_v3, %v6004_v44 }
 0x3cd   : > { %v4303_v41 = vpop.eup %4302  ;;  %4045 = vst [vmem:[%s6122_s18 + $0x30] sm:$0xff] %v3978_v61   ;;  %v3545_v34 = vmul.f32 1.442695, %v3497_v42  ;;  %v3330_v38 = vadd.f32 %v6282_v16, %v3073_v21  ;;  %v3026_v40 = vpop.f32.mrf.mxu0 }
 0x3ce   : > { %v3592_v9 = vadd.f32 1.0, %v4303_v41  ;;  %v4305_v8 = vpop.eup %4304  ;;  %v2305_v41 = vadd.f32 %v5883_v32, %v2048_v54 }
 0x3cf   : > { %4306 = vpow2.f32 %v3545_v34  ;;  %v3430_v37 = vmul.f32 %v6061_v22, %v3330_v38  ;;  %v3655_v27 = vmul.f32 %v4305_v8, %v6303_v36  ;;  %v3283_v34 = vpop.f32.mrf.mxu1 }
 0x3d0   : > { %4308 = vrcp.f32 %v3592_v9  ;;  %v2757_v52 = vpop.f32.mrf.mxu3 }
 0x3d1   : > { %v3466_v35 = vadd.f32 %v6066_v50, %v3430_v37  ;;  %v2817_v11 = vadd.f32 %v2757_v52, %v2559_v53  ;;  %v3687_v36 = vadd.f32 %v6774_v57, %v3655_v27  ;;  %v2562_v53 = vadd.f32 %v2508_v17, %v2305_v41  ;;  %v6777_v52 = vld [vmem:[#allocation24_spill] sm:$0xff]  ;;  %v6784_v57 = vld [vmem:[#allocation75_spill] sm:$0xff] }
 0x3d2   : > { %v6787_v41 = vld [vmem:[#allocation80_spill] sm:$0xff] }
 0x3d3   : > { %v3498_v16 = vsub.f32 0.0, %v3466_v35  ;;  %v3074_v12 = vadd.f32 %v6296_v48, %v2817_v11  ;;  %v2511_v58 = vpop.f32.mrf.mxu2  ;;  %v6778_v11 = vld [vmem:[#allocation71_spill] sm:$0xff] }
 0x3d4   : > { %v2049_v8 = vadd.f32 %v6778_v11, %v6777_v52  ;;  %v6791_v11 = vld [vmem:[#allocation20_spill] sm:$0xff] }
 0x3d5   : > { %v4307_v5 = vpop.eup %4306  ;;  %v3547_v47 = vmul.f32 1.442695, %v3498_v16  ;;  %v3331_v30 = vadd.f32 %v6305_v13, %v3074_v12 }
 0x3d6   : > { %v4309_v62 = vpop.eup %4308  ;;  %v3593_v31 = vadd.f32 1.0, %v4307_v5  ;;  %v6779_v5 = vld [vmem:[#allocation5_spill] sm:$0xff] }
 0x3d7   : > { %v3656_v15 = vmul.f32 %v4309_v62, %v3464_v23  ;;  %4310 = vpow2.f32 %v3547_v47  ;;  %v3431_v6 = vmul.f32 %v6061_v22, %v3331_v30  ;;  %v3029_v30 = vpop.f32.mrf.mxu0  ;;  %v6782_v62 = vld [vmem:[#allocation57_spill] sm:$0xff] }
 0x3d8   : > { %v2760_v48 = vpop.f32.mrf.mxu3  ;;  %4312 = vrcp.f32 %v3593_v31 }
 0x3d9   : > { %v3688_v13 = vadd.f32 %v6775_v56, %v3656_v15  ;;  %v6360_v28 = vadd.f32 %v6066_v50, %v3431_v6  ;;  %v2818_v14 = vadd.f32 %v2760_v48, %v2560_v29  ;;  %v2306_v29 = vadd.f32 %v6782_v62, %v2049_v8  ;;  %v3286_v15 = vpop.f32.mrf.mxu1 }
 0x3db   : > { %v3983_v23 = vpack.c.bf16 %v3688_v13, %v3687_v36  ;;  %v3499_v18 = vsub.f32 0.0, %v6360_v28  ;;  %v3075_v46 = vadd.f32 %v6318_v43, %v2818_v14  ;;  %v2514_v37 = vpop.f32.mrf.mxu2  ;;  %v2050_v36 = vadd.f32 %v6784_v57, %v6783_v55 }
 0x3dc   : > { %v2563_v13 = vadd.f32 %v2511_v58, %v2306_v29 }
 0x3dd   : > { %v4311_v25 = vpop.eup %4310  ;;  %4046 = vst [vmem:[%s6122_s18 + $0x38] sm:$0xff] %v3983_v23   ;;  %v3549_v33 = vmul.f32 1.442695, %v3499_v18  ;;  %v3332_v20 = vadd.f32 %v6321_v0, %v3075_v46 }
 0x3de   : > { %v3594_v19 = vadd.f32 1.0, %v4311_v25  ;;  %v4313_v21 = vpop.eup %4312  ;;  %v6785_v25 = vld [vmem:[#allocation21_spill] sm:$0xff] }
 0x3df   : > { %4314 = vpow2.f32 %v3549_v33  ;;  %v3432_v60 = vmul.f32 %v6061_v22, %v3332_v20  ;;  %v3657_v44 = vmul.f32 %v4313_v21, %v6334_v1  ;;  %v6781_v1 = vunpack.c.h.bf16 %v6779_v5  ;;  %v6786_v21 = vld [vmem:[#allocation28_spill] sm:$0xff] }
 0x3e0   : > { %4316 = vrcp.f32 %v3594_v19  ;;  %v2763_v61 = vpop.f32.mrf.mxu3  ;;  %v2307_v33 = vadd.f32 %v6785_v25, %v2050_v36 }
 0x3e1   : > { %v3468_v43 = vadd.f32 %v6066_v50, %v3432_v60  ;;  %v2819_v42 = vadd.f32 %v2763_v61, %v2561_v59 }
 0x3e2   : > { %v2564_v61 = vadd.f32 %v2514_v37, %v2307_v33 }
 0x3e3   : > { %v3500_v38 = vsub.f32 0.0, %v3468_v43  ;;  %v3076_v0 = vadd.f32 %v6339_v26, %v2819_v42  ;;  %v6780_v26 = vunpack.c.l.bf16 %v6779_v5  ;;  %v2517_v2 = vpop.f32.mrf.mxu2  ;;  %v3289_v42 = vpop.f32.mrf.mxu1 }
 0x3e5   : > { %v4315_v39 = vpop.eup %4314  ;;  %v3551_v4 = vmul.f32 1.442695, %v3500_v38  ;;  %v3333_v24 = vadd.f32 %v3277_v63, %v3076_v0  ;;  %v3689_v27 = vadd.f32 %v6780_v26, %v3657_v44  ;;  %v2051_v38 = vadd.f32 %v6787_v41, %v6786_v21  ;;  %v6792_v26 = vld [vmem:[#allocation27_spill] sm:$0xff]  ;;  %v6800_v21 = vld [vmem:[#allocation62_spill] sm:$0xff] }
 0x3e6   : > { %v4317_v9 = vpop.eup %4316  ;;  %v3595_v16 = vadd.f32 1.0, %v4315_v39 }
 0x3e7   : > { %v3658_v51 = vmul.f32 %v4317_v9, %v3466_v35  ;;  %4318 = vpow2.f32 %v3551_v4  ;;  %v3433_v32 = vmul.f32 %v6061_v22, %v3333_v24  ;;  %v2308_v8 = vadd.f32 %v6791_v11, %v2051_v38 }
 0x3e8   : > { %v2766_v12 = vpop.f32.mrf.mxu3  ;;  %4320 = vrcp.f32 %v3595_v16 }
 0x3e9   : > { %v3690_v47 = vadd.f32 %v6781_v1, %v3658_v51  ;;  %v6382_v63 = vadd.f32 %v6066_v50, %v3433_v32  ;;  %v2820_v17 = vadd.f32 %v2766_v12, %v2562_v53  ;;  %v2565_v62 = vadd.f32 %v2517_v2, %v2308_v8 }
 0x3eb   : > { %v3988_v35 = vpack.c.bf16 %v3690_v47, %v3689_v27  ;;  %v3501_v7 = vsub.f32 0.0, %v6382_v63  ;;  %v3077_v45 = vadd.f32 %v3023_v10, %v2820_v17  ;;  %v2520_v52 = vpop.f32.mrf.mxu2  ;;  %v6793_v27 = vld [vmem:[#allocation83_spill] sm:$0xff] }
 0x3ec   : > { %v2052_v1 = vadd.f32 %v6793_v27, %v6792_v26 }
 0x3ed   : > { %v4319_v6 = vpop.eup %4318  ;;  %4047 = vst [vmem:[%s6122_s18 + $0x40] sm:$0xff] %v3988_v35   ;;  %v3553_v31 = vmul.f32 1.442695, %v3501_v7  ;;  %v3334_v48 = vadd.f32 %v3280_v49, %v3077_v45  ;;  %v3032_v49 = vpop.f32.mrf.mxu0 }
 0x3ee   : > { %v3596_v56 = vadd.f32 1.0, %v4319_v6  ;;  %v4321_v46 = vpop.eup %4320  ;;  %v3292_v35 = vpop.f32.mrf.mxu1 }
 0x3ef   : > { %4322 = vpow2.f32 %v3553_v31  ;;  %v3434_v14 = vmul.f32 %v6061_v22, %v3334_v48  ;;  %v3659_v19 = vmul.f32 %v4321_v46, %v6360_v28  ;;  %v6794_v31 = vld [vmem:[#allocation59_spill] sm:$0xff] }
 0x3f0   : > { %4324 = vrcp.f32 %v3596_v56  ;;  %v2769_v23 = vpop.f32.mrf.mxu3  ;;  %v2309_v48 = vadd.f32 %v6794_v31, %v2052_v1 }
 0x3f1   : > { %v3470_v18 = vadd.f32 %v6066_v50, %v3434_v14  ;;  %v2821_v10 = vadd.f32 %v2769_v23, %v2563_v13 }
 0x3f2   : > { %v2566_v23 = vadd.f32 %v2520_v52, %v2309_v48 }
 0x3f3   : > { %v3502_v20 = vsub.f32 0.0, %v3470_v18  ;;  %v3078_v3 = vadd.f32 %v3026_v40, %v2821_v10  ;;  %v6788_v40 = vld [vmem:[#allocation7_spill] sm:$0xff]  ;;  %v2523_v57 = vpop.f32.mrf.mxu2  ;;  %v6796_v10 = vld [vmem:[#allocation85_spill] sm:$0xff] }
 0x3f4   : > { %v6789_v24 = vunpack.c.l.bf16 %v6788_v40  ;;  %v6790_v28 = vunpack.c.h.bf16 %v6788_v40 }
 0x3f5   : > { %v4323_v54 = vpop.eup %4322  ;;  %v3555_v59 = vmul.f32 1.442695, %v3502_v20  ;;  %v3335_v58 = vadd.f32 %v3283_v34, %v3078_v3  ;;  %v3035_v47 = vpop.f32.mrf.mxu0 }
 0x3f6   : > { %v4325_v60 = vpop.eup %4324  ;;  %v3597_v44 = vadd.f32 1.0, %v4323_v54  ;;  %v3691_v9 = vadd.f32 %v6789_v24, %v3659_v19  ;;  %v6801_v24 = vld [vmem:[#allocation31_spill] sm:$0xff] }
 0x3f7   : > { %v3660_v0 = vmul.f32 %v4325_v60, %v3468_v43  ;;  %4326 = vpow2.f32 %v3555_v59  ;;  %v3435_v39 = vmul.f32 %v6061_v22, %v3335_v58 }
 0x3f8   : > { %v2772_v4 = vpop.f32.mrf.mxu3  ;;  %4328 = vrcp.f32 %v3597_v44 }
 0x3f9   : > { %v3692_v53 = vadd.f32 %v6790_v28, %v3660_v0  ;;  %v6401_v34 = vadd.f32 %v6066_v50, %v3435_v39  ;;  %v2822_v37 = vadd.f32 %v2772_v4, %v2564_v61 }
 0x3fb   : > { %v3993_v43 = vpack.c.bf16 %v3692_v53, %v3691_v9  ;;  %v3503_v51 = vsub.f32 0.0, %v6401_v34  ;;  %v3079_v32 = vadd.f32 %v3029_v30, %v2822_v37  ;;  %v6802_v9 = vld [vmem:[#allocation86_spill] sm:$0xff]  ;;  %v2526_v53 = vpop.f32.mrf.mxu2 }
 0x3fc   : > { %v2054_v28 = vadd.f32 %v6802_v9, %v6801_v24 }
 0x3fd   : > { %v4327_v16 = vpop.eup %4326  ;;  %4048 = vst [vmem:[%s6122_s18 + $0x48] sm:$0xff] %v3993_v43   ;;  %v3557_v12 = vmul.f32 1.442695, %v3503_v51  ;;  %v3336_v5 = vadd.f32 %v3286_v15, %v3079_v32  ;;  %v3038_v20 = vpop.f32.mrf.mxu0 }
 0x3fe   : > { %v3598_v17 = vadd.f32 1.0, %v4327_v16  ;;  %v4329_v6 = vpop.eup %4328  ;;  %v6803_v16 = vld [vmem:[#allocation23_spill] sm:$0xff] }
 0x3ff   : > { %4330 = vpow2.f32 %v3557_v12  ;;  %v3436_v29 = vmul.f32 %v6061_v22, %v3336_v5  ;;  %v3661_v56 = vmul.f32 %v4329_v6, %v6382_v63  ;;  %v6795_v22 = vld [vmem:[#allocation72_spill] sm:$0xff]  ;;  %v2311_v12 = vadd.f32 %v6803_v16, %v2054_v28  ;;  %v6805_v6 = vld [vmem:[#allocation87_spill] sm:$0xff]  ;;  %v6814_v16 = vld [vmem:[#allocation89_spill] sm:$0xff] }
 0x400   : > { %4332 = vrcp.f32 %v3598_v17  ;;  %v2775_v7 = vpop.f32.mrf.mxu3  ;;  %v2053_v46 = vadd.f32 %v6796_v10, %v6795_v22  ;;  %v6809_v10 = vld [vmem:[#allocation22_spill] sm:$0xff] }
 0x401   : > { %v3472_v45 = vadd.f32 %v6066_v50, %v3436_v29  ;;  %v2823_v30 = vadd.f32 %v2775_v7, %v2565_v62  ;;  %v6417_v50 = vld [vmem:[%s6509_s5] ss:$0 sm:$0xff]  ;;  %v2568_v7 = vadd.f32 %v2526_v53, %v2311_v12 }
 0x402   : > { %v2310_v41 = vadd.f32 %v6800_v21, %v2053_v46 }
 0x403   : > { %v3504_v55 = vsub.f32 0.0, %v3472_v45  ;;  %v3080_v15 = vadd.f32 %v3032_v49, %v2823_v30  ;;  %v6797_v49 = vld [vmem:[#allocation9_spill] sm:$0xff] }
 0x404   : > { %v6798_v54 = vunpack.c.l.bf16 %v6797_v49  ;;  %v6799_v59 = vunpack.c.h.bf16 %v6797_v49  ;;  %v2567_v52 = vadd.f32 %v2523_v57, %v2310_v41  ;;  %v6804_v30 = vld [vmem:[#allocation29_spill] sm:$0xff] }
 0x405   : > { %v4331_v36 = vpop.eup %4330  ;;  %v3559_v13 = vmul.f32 1.442695, %v3504_v55  ;;  %v3337_v14 = vadd.f32 %v3289_v42, %v3080_v15  ;;  %v3295_v42 = vpop.f32.mrf.mxu1  ;;  %v2055_v31 = vadd.f32 %v6805_v6, %v6804_v30  ;;  %v6818_v6 = vld [vmem:[#allocation67_spill] sm:$0xff] }
 0x406   : > { %v4333_v2 = vpop.eup %4332  ;;  %v3599_v3 = vadd.f32 1.0, %v4331_v36  ;;  %v3693_v19 = vadd.f32 %v6798_v54, %v3661_v56  ;;  %v3041_v5 = vpop.f32.mrf.mxu0  ;;  %v6806_v56 = vld [vmem:[#allocation11_spill] sm:$0xff]  ;;  %v6810_v54 = vld [vmem:[#allocation76_spill] sm:$0xff] }
 0x407   : > { %v3662_v25 = vmul.f32 %v4333_v2, %v3470_v18  ;;  %4334 = vpow2.f32 %v3559_v13  ;;  %v3437_v33 = vmul.f32 %v6417_v50, %v3337_v14  ;;  %v6427_v18 = vld [vmem:[%s6510_s6] ss:$0 sm:$0xff]  ;;  %v2529_v15 = vpop.f32.mrf.mxu2  ;;  %v6807_v13 = vunpack.c.l.bf16 %v6806_v56 }
 0x408   : > { %v2778_v63 = vpop.f32.mrf.mxu3  ;;  %4336 = vrcp.f32 %v3599_v3  ;;  %v2312_v46 = vadd.f32 %v6809_v10, %v2055_v31 }
 0x409   : > { %v3694_v58 = vadd.f32 %v6799_v59, %v3662_v25  ;;  %v6430_v60 = vadd.f32 %v6427_v18, %v3437_v33  ;;  %v2824_v61 = vadd.f32 %v2778_v63, %v2566_v23 }
 0x40b   : > { %v3998_v38 = vpack.c.bf16 %v3694_v58, %v3693_v19  ;;  %v3505_v0 = vsub.f32 0.0, %v6430_v60  ;;  %v3081_v39 = vadd.f32 %v3035_v47, %v2824_v61  ;;  %v6811_v19 = vld [vmem:[#allocation88_spill] sm:$0xff] }
 0x40c   : > { %v2056_v59 = vadd.f32 %v6811_v19, %v6810_v54 }
 0x40d   : > { %v4335_v44 = vpop.eup %4334  ;;  %4049 = vst [vmem:[%s6122_s18 + $0x50] sm:$0xff] %v3998_v38   ;;  %v3561_v4 = vmul.f32 1.442695, %v3505_v0  ;;  %v3338_v40 = vadd.f32 %v3292_v35, %v3081_v39  ;;  %v3298_v1 = vpop.f32.mrf.mxu1 }
 0x40e   : > { %v3600_v37 = vadd.f32 1.0, %v4335_v44  ;;  %v4337_v32 = vpop.eup %4336  ;;  %v6812_v44 = vld [vmem:[#allocation63_spill] sm:$0xff] }
 0x40f   : > { %4338 = vpow2.f32 %v3561_v4  ;;  %v3438_v11 = vmul.f32 %v6417_v50, %v3338_v40  ;;  %v3663_v17 = vmul.f32 %v4337_v32, %v6401_v34  ;;  %v6808_v34 = vunpack.c.h.bf16 %v6806_v56  ;;  %v2532_v40 = vpop.f32.mrf.mxu2  ;;  %v6813_v32 = vld [vmem:[#allocation33_spill] sm:$0xff] }
 0x410   : > { %4340 = vrcp.f32 %v3600_v37  ;;  %v2781_v8 = vpop.f32.mrf.mxu3  ;;  %v2313_v4 = vadd.f32 %v6812_v44, %v2056_v59  ;;  %v2057_v12 = vadd.f32 %v6814_v16, %v6813_v32 }
 0x411   : > { %v3474_v43 = vadd.f32 %v6427_v18, %v3438_v11  ;;  %v2825_v51 = vadd.f32 %v2781_v8, %v2567_v52  ;;  %v3695_v14 = vadd.f32 %v6807_v13, %v3663_v17  ;;  %v6815_v17 = vld [vmem:[#allocation13_spill] sm:$0xff] }
 0x412   : > { %v2570_v8 = vadd.f32 %v2532_v40, %v2313_v4  ;;  %v2314_v31 = vadd.f32 %v6818_v6, %v2057_v12 }
 0x413   : > { %v3506_v26 = vsub.f32 0.0, %v3474_v43  ;;  %v3082_v27 = vadd.f32 %v3038_v20, %v2825_v51  ;;  %v3044_v20 = vpop.f32.mrf.mxu0 }
 0x415   : > { %v4339_v47 = vpop.eup %4338  ;;  %v3563_v62 = vmul.f32 1.442695, %v3506_v26  ;;  %v3339_v29 = vadd.f32 %v3295_v42, %v3082_v27  ;;  %v3301_v58 = vpop.f32.mrf.mxu1  ;;  %v2569_v42 = vadd.f32 %v2529_v15, %v2312_v46 }
 0x416   : > { %v4341_v35 = vpop.eup %4340  ;;  %v3601_v57 = vadd.f32 1.0, %v4339_v47 }
 0x417   : > { %v3664_v48 = vmul.f32 %v4341_v35, %v3472_v45  ;;  %4342 = vpow2.f32 %v3563_v62  ;;  %v3439_v55 = vmul.f32 %v6417_v50, %v3339_v29  ;;  %v6816_v62 = vunpack.c.l.bf16 %v6815_v17  ;;  %v2535_v15 = vpop.f32.mrf.mxu2 }
 0x418   : > { %v2784_v36 = vpop.f32.mrf.mxu3  ;;  %4344 = vrcp.f32 %v3601_v57 }
 0x419   : > { %v3696_v2 = vadd.f32 %v6808_v34, %v3664_v48  ;;  %v6449_v23 = vadd.f32 %v6427_v18, %v3439_v55  ;;  %v2826_v22 = vadd.f32 %v2784_v36, %v2568_v7  ;;  %v2571_v34 = vadd.f32 %v2535_v15, %v2314_v31  ;;  %v6825_v31 = vld [vmem:[#allocation17_spill] sm:$0xff] }
 0x41b   : > { %v4003_v45 = vpack.c.bf16 %v3696_v2, %v3695_v14  ;;  %v3507_v25 = vsub.f32 0.0, %v6449_v23  ;;  %v3083_v33 = vadd.f32 %v3041_v5, %v2826_v22  ;;  %v3047_v51 = vpop.f32.mrf.mxu0  ;;  %v6819_v2 = vld [vmem:[#allocation32_spill] sm:$0xff]  ;;  %v6820_v22 = vld [vmem:[#allocation90_spill] sm:$0xff] }
 0x41c   : > { %v2058_v10 = vadd.f32 %v6820_v22, %v6819_v2 }
 0x41d   : > { %v4343_v3 = vpop.eup %4342  ;;  %4050 = vst [vmem:[%s6122_s18 + $0x58] sm:$0xff] %v4003_v45   ;;  %v3565_v63 = vmul.f32 1.442695, %v3507_v25  ;;  %v3340_v49 = vadd.f32 %v3298_v1, %v3083_v33  ;;  %v3304_v27 = vpop.f32.mrf.mxu1 }
 0x41e   : > { %v3602_v61 = vadd.f32 1.0, %v4343_v3  ;;  %v4345_v39 = vpop.eup %4344 }
 0x41f   : > { %4346 = vpow2.f32 %v3565_v63  ;;  %v3440_v21 = vmul.f32 %v6417_v50, %v3340_v49  ;;  %v3665_v53 = vmul.f32 %v4345_v39, %v6430_v60  ;;  %v6817_v60 = vunpack.c.h.bf16 %v6815_v17  ;;  %v6821_v63 = vld [vmem:[#allocation25_spill] sm:$0xff] }
 0x420   : > { %4348 = vrcp.f32 %v3602_v61  ;;  %v2787_v41 = vpop.f32.mrf.mxu3  ;;  %v2315_v49 = vadd.f32 %v6821_v63, %v2058_v10 }
 0x421   : > { %v3476_v38 = vadd.f32 %v6427_v18, %v3440_v21  ;;  %v2827_v0 = vadd.f32 %v2787_v41, %v2569_v42  ;;  %v3697_v29 = vadd.f32 %v6816_v62, %v3665_v53  ;;  %v2538_v41 = vpop.f32.mrf.mxu2 }
 0x423   : > { %v3508_v24 = vsub.f32 0.0, %v3476_v38  ;;  %v3084_v9 = vadd.f32 %v3044_v20, %v2827_v0  ;;  %v3050_v14 = vpop.f32.mrf.mxu0  ;;  %v2572_v0 = vadd.f32 %v2538_v41, %v2315_v49 }
 0x425   : > { %v4347_v28 = vpop.eup %4346  ;;  %v3567_v37 = vmul.f32 1.442695, %v3508_v24  ;;  %v3341_v52 = vadd.f32 %v3301_v58, %v3084_v9  ;;  %v3307_v25 = vpop.f32.mrf.mxu1  ;;  %v6822_v9 = vld [vmem:[#allocation15_spill] sm:$0xff] }
 0x426   : > { %v4349_v11 = vpop.eup %4348  ;;  %v3603_v1 = vadd.f32 1.0, %v4347_v28  ;;  %v6823_v28 = vunpack.c.l.bf16 %v6822_v9 }
 0x427   : > { %v3666_v5 = vmul.f32 %v4349_v11, %v3474_v43  ;;  %4350 = vpow2.f32 %v3567_v37  ;;  %v3441_v26 = vmul.f32 %v6417_v50, %v3341_v52  ;;  %v6824_v37 = vunpack.c.h.bf16 %v6822_v9 }
 0x428   : > { %v2790_v47 = vpop.f32.mrf.mxu3  ;;  %4352 = vrcp.f32 %v3603_v1 }
 0x429   : > { %v3698_v35 = vadd.f32 %v6817_v60, %v3666_v5  ;;  %v3477_v7 = vadd.f32 %v6427_v18, %v3441_v26  ;;  %v2828_v30 = vadd.f32 %v2790_v47, %v2570_v8 }
 0x42b   : > { %v4008_v48 = vpack.c.bf16 %v3698_v35, %v3697_v29  ;;  %v3509_v43 = vsub.f32 0.0, %v3477_v7  ;;  %v3085_v55 = vadd.f32 %v3047_v51, %v2828_v30  ;;  %v3053_v24 = vpop.f32.mrf.mxu0 }
 0x42d   : > { %v4351_v57 = vpop.eup %4350  ;;  %4051 = vst [vmem:[%s6122_s18 + $0x60] sm:$0xff] %v4008_v48   ;;  %v3569_v36 = vmul.f32 1.442695, %v3509_v43  ;;  %v3342_v56 = vadd.f32 %v3304_v27, %v3085_v55  ;;  %v3310_v8 = vpop.f32.mrf.mxu1  ;;  %v6826_v48 = vunpack.c.l.bf16 %v6825_v31  ;;  %v6827_v55 = vunpack.c.h.bf16 %v6825_v31 }
 0x42e   : > { %v3604_v13 = vadd.f32 1.0, %v4351_v57  ;;  %v4353_v3 = vpop.eup %4352 }
 0x42f   : > { %4354 = vpow2.f32 %v3569_v36  ;;  %v3442_v46 = vmul.f32 %v6417_v50, %v3342_v56  ;;  %v3667_v58 = vmul.f32 %v4353_v3, %v6449_v23 }
 0x430   : > { %4356 = vrcp.f32 %v3604_v13  ;;  %v2793_v45 = vpop.f32.mrf.mxu3 }
 0x431   : > { %v3478_v33 = vadd.f32 %v6427_v18, %v3442_v46  ;;  %v2829_v20 = vadd.f32 %v2793_v45, %v2571_v34  ;;  %v3699_v53 = vadd.f32 %v6823_v28, %v3667_v58 }
 0x433   : > { %v3510_v54 = vsub.f32 0.0, %v3478_v33  ;;  %v3086_v19 = vadd.f32 %v3050_v14, %v2829_v20  ;;  %v6828_v14 = vld [vmem:[#allocation19_spill] sm:$0xff] }
 0x434   : > { %v6829_v34 = vunpack.c.l.bf16 %v6828_v14  ;;  %v6830_v22 = vunpack.c.h.bf16 %v6828_v14 }
 0x435   : > { %v4355_v59 = vpop.eup %4354  ;;  %v3571_v61 = vmul.f32 1.442695, %v3510_v54  ;;  %v3343_v42 = vadd.f32 %v3307_v25, %v3086_v19 }
 0x436   : > { %v4357_v21 = vpop.eup %4356  ;;  %v3605_v4 = vadd.f32 1.0, %v4355_v59 }
 0x437   : > { %v3668_v39 = vmul.f32 %v4357_v21, %v3476_v38  ;;  %4358 = vpow2.f32 %v3571_v61  ;;  %v3443_v44 = vmul.f32 %v6417_v50, %v3343_v42 }
 0x438   : > { %v2796_v40 = vpop.f32.mrf.mxu3  ;;  %4360 = vrcp.f32 %v3605_v4 }
 0x439   : > { %v3700_v52 = vadd.f32 %v6824_v37, %v3668_v39  ;;  %v3479_v23 = vadd.f32 %v6427_v18, %v3443_v44  ;;  %v2830_v11 = vadd.f32 %v2796_v40, %v2572_v0 }
 0x43b   : > { %v4013_v51 = vpack.c.bf16 %v3700_v52, %v3699_v53  ;;  %v3511_v32 = vsub.f32 0.0, %v3479_v23  ;;  %v3087_v38 = vadd.f32 %v3053_v24, %v2830_v11 }
 0x43d   : > { %v4359_v16 = vpop.eup %4358  ;;  %4052 = vst [vmem:[%s6122_s18 + $0x68] sm:$0xff] %v4013_v51   ;;  %v3573_v12 = vmul.f32 1.442695, %v3511_v32  ;;  %v3344_v5 = vadd.f32 %v3310_v8, %v3087_v38 }
 0x43e   : > { %v3606_v26 = vadd.f32 1.0, %v4359_v16  ;;  %v4361_v47 = vpop.eup %4360 }
 0x43f   : > { %4362 = vpow2.f32 %v3573_v12  ;;  %v3444_v27 = vmul.f32 %v6417_v50, %v3344_v5  ;;  %v3669_v29 = vmul.f32 %v4361_v47, %v3477_v7 }
 0x440   : > { %4364 = vrcp.f32 %v3606_v26 }
 0x441   : > { %v3480_v1 = vadd.f32 %v6427_v18, %v3444_v27  ;;  %v3701_v43 = vadd.f32 %v6826_v48, %v3669_v29 }
 0x443   : > { %v3512_v17 = vsub.f32 0.0, %v3480_v1 }
 0x445   : > { %v4363_v62 = vpop.eup %4362  ;;  %v3575_v60 = vmul.f32 1.442695, %v3512_v17 }
 0x446   : > { %v4365_v35 = vpop.eup %4364  ;;  %v3607_v6 = vadd.f32 1.0, %v4363_v62 }
 0x447   : > { %v3670_v30 = vmul.f32 %v4365_v35, %v3478_v33  ;;  %4366 = vpow2.f32 %v3575_v60 }
 0x448   : > { %4368 = vrcp.f32 %v3607_v6 }
 0x449   : > { %v3702_v50 = vadd.f32 %v6827_v55, %v3670_v30 }
 0x44b   : > { %v4018_v15 = vpack.c.bf16 %v3702_v50, %v3701_v43 }
 0x44d   : > { %v4367_v57 = vpop.eup %4366  ;;  %4053 = vst [vmem:[%s6122_s18 + $0x70] sm:$0xff] %v4018_v15  }
 0x44e   : > { %v3608_v18 = vadd.f32 1.0, %v4367_v57  ;;  %v4369_v36 = vpop.eup %4368 }
 0x44f   : > { %v3671_v7 = vmul.f32 %v4369_v36, %v3479_v23 }
 0x450   : > { %4370 = vrcp.f32 %v3608_v18 }
 0x451   : > { %v3703_v2 = vadd.f32 %v6829_v34, %v3671_v7 }
 0x456   : > { %v4371_v56 = vpop.eup %4370 }
 0x457   : > { %v3672_v13 = vmul.f32 %v4371_v56, %v3480_v1 }
 0x459   : > { %v3704_v10 = vadd.f32 %v6830_v22, %v3672_v13 }
 0x45b   : > { %v4023_v46 = vpack.c.bf16 %v3704_v10, %v3703_v2 }
 0x45d   : > { %4054 = vst [vmem:[%s6122_s18 + $0x78] sm:$0xff] %v4023_v46  }
 0x45e PF: > { %s17_s26 = sadd.s32 1, %s4397_s26   ;;  %s6831_s24 = smov %s4393_s25 }
 0x45f   : > { %p14_p5 = scmp.ge.s32.totalorder %s17_s26, 4   ;;  %s6832_s25 = smov %s6834_s27 }
 0x461   :  { %16 = sbr.rel (!%p14_p5) target bundleno = 2 (0x2), region = 92 }

</bundles_post_ra>
